<compile_context>
chip_gen: v7x
topology: tpu7x:2x2x1
jax: 0.10.0
libtpu: 0.0.40
codegen_flags: <defaults>
</compile_context>

<pallas_src>
import jax
import jax.numpy as jnp
import numpy as np
from jax.experimental import pallas as pl
from jax.experimental.pallas import tpu as pltpu

EPS = 1e-5  # torch.nn.BatchNorm2d default


# ----------------------------- kernel helpers ------------------------------

def _compiler_params():
    # ~7 MB actually used per grid step; 48 MiB is > v5e's 16 MiB scoped default and
    # leaves headroom under v7x's 64 MiB physical VMEM.
    return pltpu.CompilerParams(
        dimension_semantics=("parallel",),
        vmem_limit_bytes=48 * 1024 * 1024,
    )


def _banded_conv(src, w_ref, k, out_rows, out_cols):
    """Valid conv as sum_kh  src[kh:kh+out_rows, :] @ w_ref[kh]  (f32 accumulation).

    src:   (rows_in, width_in*cin) bf16 tile already in VMEM/vregs.
    w_ref: (k, width_in*cin, out_cols) banded weights (built in prepare_params).
    """
    acc = jnp.zeros((out_rows, out_cols), jnp.float32)
    for kh in range(k):
        acc = acc + jnp.dot(src[kh:kh + out_rows, :], w_ref[kh],
                            preferred_element_type=jnp.float32)
    return acc


def _row_pool_select(n_out, n_in):
    """0/1 selection matrices picking even / odd rows (exact row max-pool via 2 dots)."""
    r = jax.lax.broadcasted_iota(jnp.int32, (n_out, n_in), 0)
    c = jax.lax.broadcasted_iota(jnp.int32, (n_out, n_in), 1)
    sel0 = jnp.where(c == 2 * r, 1.0, 0.0).astype(jnp.bfloat16)
    sel1 = jnp.where(c == 2 * r + 1, 1.0, 0.0).astype(jnp.bfloat16)
    return sel0, sel1


# ----------------------------- Pallas kernels ------------------------------

def _stage1_stats_kernel(x_ref, wb1_ref, stat_ref):
    # Pass 1 of the two-pass BN32: per-block partial sum / sumsq of conv1's output,
    # lanes in the same (dj*12+jo)*32+c order the main kernel uses.
    B = x_ref.shape[0]
    ssum = jnp.zeros((1, 768), jnp.float32)
    ssq = jnp.zeros((1, 768), jnp.float32)
    for b in range(B):
        y1 = _banded_conv(x_ref[b], wb1_ref, 5, 24, 768)          # (24, 768) f32
        ssum = ssum + jnp.sum(y1, axis=0, keepdims=True)
        ssq = ssq + jnp.sum(y1 * y1, axis=0, keepdims=True)
    stat_ref[0] = jnp.concatenate([ssum, ssq], axis=0)            # (2, 768)


def _stage2_kernel(x_ref, wb1_ref, aff1_ref, wb2_ref, wb3_ref, y2_ref, stat_ref):
    # conv1 (recomputed; cheaper than an HBM round trip of its 36 KB/img output)
    # -> BN32 (folded affine) -> ReLU -> fused 2x2 maxpool -> conv2 + conv3
    # -> write pre-BN y2 + per-block partial BN64 stats.
    B = x_ref.shape[0]
    sc1 = aff1_ref[0:1, :]
    sh1 = aff1_ref[1:2, :]
    sel0, sel1 = _row_pool_select(12, 24)
    ssum = jnp.zeros((1, 512), jnp.float32)
    ssq = jnp.zeros((1, 512), jnp.float32)
    for b in range(B):
        x = x_ref[b]                                              # (28, 28) bf16
        y1 = _banded_conv(x, wb1_ref, 5, 24, 768)                 # (24, 768) f32
        # BN32 folded affine + ReLU (single pass over the block)
        h = jnp.maximum(y1 * sc1 + sh1, 0.0).astype(jnp.bfloat16)  # (24, 768)
        # 2x2 maxpool: rows via selection matmuls (exact), cols via dj-major halves.
        r = jnp.maximum(jnp.dot(sel0, h, preferred_element_type=jnp.float32),
                        jnp.dot(sel1, h, preferred_element_type=jnp.float32))  # (12, 768)
        h1 = jnp.maximum(r[:, 0:384], r[:, 384:768]).astype(jnp.bfloat16)       # (12, 384)
        # conv2(h1) + conv3(x), K-summed in f32.
        y2 = _banded_conv(h1, wb2_ref, 5, 8, 512)
        y2 = y2 + _banded_conv(x, wb3_ref, 21, 8, 512)            # (8, 512) f32
        y2_ref[b] = y2
        ssum = ssum + jnp.sum(y2, axis=0, keepdims=True)
        ssq = ssq + jnp.sum(y2 * y2, axis=0, keepdims=True)
    stat_ref[0] = jnp.concatenate([ssum, ssq], axis=0)            # (2, 512)


def _head_kernel(y2_ref, aff2_ref, wfc_ref, bfc_ref, out_ref):
    # BN64 (folded affine) -> ReLU -> 2x2 maxpool -> fcl, all in VMEM; the pooled
    # features never hit HBM and the logits are stored lane-dense (padded to 128).
    B = y2_ref.shape[0]
    sc2 = aff2_ref[0:1, :]
    sh2 = aff2_ref[1:2, :]
    sel0, sel1 = _row_pool_select(4, 8)
    bias = bfc_ref[...]                                           # (1, 128) f32
    for b in range(B):
        z = jnp.maximum(y2_ref[b] * sc2 + sh2, 0.0)               # (8, 512) f32
        z = jnp.maximum(z[:, 0:256], z[:, 256:512]).astype(jnp.bfloat16)        # (8, 256)
        p = jnp.maximum(jnp.dot(sel0, z, preferred_element_type=jnp.float32),
                        jnp.dot(sel1, z, preferred_element_type=jnp.float32))   # (4, 256)
        pb = p.astype(jnp.bfloat16)
        acc = bias
        for io in range(4):                                       # contraction over io
            acc = acc + jnp.dot(pb[io:io + 1, :], wfc_ref[io],
                                preferred_element_type=jnp.float32)              # (1, 128)
        out_ref[b] = acc


# --------------------------- pallas_call wrappers ---------------------------

def stage1_stats(x, wb1, block_n):
    n = x.shape[0]
    g = n // block_n
    return pl.pallas_call(
        _stage1_stats_kernel,
        out_shape=jax.ShapeDtypeStruct((g, 2, 768), jnp.float32),
        grid=(g,),
        in_specs=[
            pl.BlockSpec((block_n, 28, 28), lambda i: (i, 0, 0)),
            pl.BlockSpec((5, 28, 768), lambda i: (0, 0, 0)),
        ],
        out_specs=pl.BlockSpec((1, 2, 768), lambda i: (i, 0, 0)),
        compiler_params=_compiler_params(),
    )(x, wb1)


def stage2_main(x, wb1, aff1, wb2, wb3, block_n):
    n = x.shape[0]
    g = n // block_n
    return pl.pallas_call(
        _stage2_kernel,
        out_shape=(jax.ShapeDtypeStruct((n, 8, 512), jnp.float32),
                   jax.ShapeDtypeStruct((g, 2, 512), jnp.float32)),
        grid=(g,),
        in_specs=[
            pl.BlockSpec((block_n, 28, 28), lambda i: (i, 0, 0)),
            pl.BlockSpec((5, 28, 768), lambda i: (0, 0, 0)),
            pl.BlockSpec((2, 768), lambda i: (0, 0)),
            pl.BlockSpec((5, 384, 512), lambda i: (0, 0, 0)),
            pl.BlockSpec((21, 28, 512), lambda i: (0, 0, 0)),
        ],
        out_specs=(pl.BlockSpec((block_n, 8, 512), lambda i: (i, 0, 0)),
                   pl.BlockSpec((1, 2, 512), lambda i: (i, 0, 0))),
        compiler_params=_compiler_params(),
    )(x, wb1, aff1, wb2, wb3)


def head(y2, aff2, wfc, bfc, block_n):
    n = y2.shape[0]
    g = n // block_n
    return pl.pallas_call(
        _head_kernel,
        out_shape=jax.ShapeDtypeStruct((n, 1, 128), jnp.float32),
        grid=(g,),
        in_specs=[
            pl.BlockSpec((block_n, 8, 512), lambda i: (i, 0, 0)),
            pl.BlockSpec((2, 512), lambda i: (0, 0)),
            pl.BlockSpec((4, 256, 128), lambda i: (0, 0, 0)),
            pl.BlockSpec((1, 128), lambda i: (0, 0)),
        ],
        out_specs=pl.BlockSpec((block_n, 1, 128), lambda i: (i, 0, 0)),
        compiler_params=_compiler_params(),
    )(y2, aff2, wfc, bfc)


# ---------------------------- weight preparation ----------------------------

def _banded_weight(w, width_in):
    """torch conv weight (Cout, Cin, k, k) -> banded matrices (k, width_in*Cin, Wout*Cout).

    Column order is dj-major: col = (dj*(Wout//2) + jo)*Cout + c with j = 2*jo + dj, so
    the in-kernel 2x2 column pool is a max of two lane-aligned halves.
    wb[kh, (j+kw)*Cin + cin, (dj*half+jo)*Cout + c] = w[c, cin, kh, kw].
    """
    w = np.asarray(w, np.float32)
    cout, cin, k, _ = w.shape
    width_out = width_in - k + 1
    half = width_out // 2
    wb = np.zeros((k, width_in * cin, width_out * cout), np.float32)
    for kh in range(k):
        for kw in range(k):
            for j in range(width_out):
                dj, jo = j % 2, j // 2
                c0 = (dj * half + jo) * cout
                r0 = (j + kw) * cin
                wb[kh, r0:r0 + cin, c0:c0 + cout] = w[:, :, kh, kw].T
    return jnp.asarray(wb, jnp.bfloat16)


def init_params(key):
    # Conv biases omitted: with train-mode BatchNorm (batch statistics) a per-channel
    # constant added before BN is exactly cancelled by the mean subtraction.
    ks = jax.random.split(key, 5)
    s = 0.1
    return dict(
        w1=jax.random.normal(ks[0], (32, 1, 5, 5), jnp.float32) * s,
        w2=jax.random.normal(ks[1], (64, 32, 5, 5), jnp.float32) * s,
        w3=jax.random.normal(ks[2], (64, 1, 21, 21), jnp.float32) * s,
        g32=jnp.ones((32,), jnp.float32), be32=jnp.zeros((32,), jnp.float32),
        g64=jnp.ones((64,), jnp.float32), be64=jnp.zeros((64,), jnp.float32),
        wfc=jax.random.normal(ks[3], (10, 4 * 4 * 64), jnp.float32) * s,
        bfc=jax.random.normal(ks[4], (10,), jnp.float32) * s,
    )


def prepare_params(p):
    # One-time weight prep (banded conv matrices, FC permutation + lane padding),
    # all hoisted out of the jitted forward.
    wb1 = _banded_weight(p['w1'], 28)                         # (5, 28, 768)
    wb2 = _banded_weight(p['w2'], 12)                         # (5, 384, 512)
    wb3 = _banded_weight(p['w3'], 28)                         # (21, 28, 512)
    # fcl weight: torch flatten index c*16+io*4+jo  ->  [io, jo*64+c, k], k padded to 128.
    wfc = np.asarray(p['wfc'], np.float32).reshape(10, 64, 4, 4)
    wfc = np.transpose(wfc, (2, 3, 1, 0)).reshape(4, 256, 10)
    wfc = np.pad(wfc, ((0, 0), (0, 0), (0, 118)))
    bfc = np.pad(np.asarray(p['bfc'], np.float32), (0, 118))[None, :]
    return dict(
        wb1=wb1, wb2=wb2, wb3=wb3,
        wfc=jnp.asarray(wfc, jnp.bfloat16),
        bfc=jnp.asarray(bfc, jnp.float32),
        g32=p['g32'], be32=p['be32'], g64=p['g64'], be64=p['be64'],
    )


# -------------------------------- JAX glue ----------------------------------

def _pick_block(n, target=8):
    b = min(n, target)
    while n % b:
        b -= 1
    return b


def _bn_affine(stats_blocks, groups, count, gamma, beta):
    """Cross-block BN reduction + folded affine (a few hundred floats of XLA glue).

    stats_blocks: (nblk, 2, groups*C) partial [sum; sumsq] in group-major lane order.
    Returns (2, groups*C) f32 [scale; shift] tiled back to that lane order.
    """
    c = gamma.shape[0]
    s = stats_blocks.sum(axis=0).reshape(2, groups, c).sum(axis=1)   # (2, C)
    mean = s[0] / count
    var = s[1] / count - mean * mean          # biased variance (torch train-mode BN)
    scale = gamma * jax.lax.rsqrt(var + EPS)
    shift = beta - mean * scale
    return jnp.stack([jnp.tile(scale, groups),
                      jnp.tile(shift, groups)]).astype(jnp.float32)


@jax.jit
def cnn_forward(x_nchw, prep):
    x = x_nchw[:, 0, :, :].astype(jnp.bfloat16)                 # (N, 28, 28)
    n = x.shape[0]
    blk = _pick_block(n)

    # stage 1, pass 1: conv1 partial BN32 statistics (tiny stats kernel).
    st1 = stage1_stats(x, prep['wb1'], blk)                     # (N/blk, 2, 768)
    aff1 = _bn_affine(st1, 24, n * 24 * 24, prep['g32'], prep['be32'])

    # stage 1 apply + stage 2 convs + partial BN64 statistics, fused.
    y2, st2 = stage2_main(x, prep['wb1'], aff1, prep['wb2'], prep['wb3'], blk)
    aff2 = _bn_affine(st2, 8, n * 8 * 8, prep['g64'], prep['be64'])

    # BN64 + ReLU + pool + fcl, fused; logits stored lane-dense (128) then sliced.
    logits = head(y2, aff2, prep['wfc'], prep['bfc'], blk)      # (N, 1, 128)
    return logits[:, 0, :10]


if __name__ == "__main__":
    key = jax.random.PRNGKey(0)
    pkey, xkey = jax.random.split(key)
    params = init_params(pkey)
    prep = prepare_params(params)
    # Spatial size 28 is forced by the architecture (fcl expects 4*4*64 features).
    x = jax.random.normal(xkey, (2, 1, 28, 28), jnp.float32)    # NCHW, like torch
    out = cnn_forward(x, prep)
    jax.block_until_ready(out)
    assert out.shape == (2, 10) and out.dtype == jnp.float32
    assert bool(jnp.all(jnp.isfinite(out)))
    print("KERNEL_OK")
</pallas_src>

<mosaic_0001>
module attributes {stable_mosaic.version = 11 : i64} {
  func.func @_stage1_stats_kernel(%arg0: i32, %arg1: memref<2x28x28xbf16, #tpu.memory_space<vmem>>, %arg2: memref<5x28x768xbf16, #tpu.memory_space<vmem>>, %arg3: memref<1x2x768xf32, #tpu.memory_space<vmem>>) attributes {dimension_semantics = [#tpu.dimension_semantics<parallel>], iteration_bounds = array<i64: 1>, scalar_prefetch = 0 : i64, scratch_operands = 0 : i64, tpu.core_type = #tpu.core_type<tc>, window_params = [{transform_indices = @transform_0, window_bounds = array<i64: 2, 28, 28>}, {pipeline_mode = #tpu.pipeline_mode<synchronous>, transform_indices = @transform_1, window_bounds = array<i64: 5, 28, 768>}, {transform_indices = @transform_2, window_bounds = array<i64: 1, 2, 768>}]} {
    %cst = arith.constant 0.000000e+00 : f32
    %0 = vector.broadcast %cst : f32 to vector<1x768xf32>
    %cst_0 = arith.constant 0.000000e+00 : f32
    %1 = vector.broadcast %cst_0 : f32 to vector<1x768xf32>
    %c0 = arith.constant 0 : index
    %c0_1 = arith.constant 0 : index
    %c0_2 = arith.constant 0 : index
    %2 = vector.load %arg1[%c0, %c0_1, %c0_2] : memref<2x28x28xbf16, #tpu.memory_space<vmem>>, vector<1x28x28xbf16>
    %3 = vector.shape_cast %2 : vector<1x28x28xbf16> to vector<28x28xbf16>
    %cst_3 = arith.constant 0.000000e+00 : f32
    %4 = vector.broadcast %cst_3 : f32 to vector<24x768xf32>
    %5 = vector.extract_strided_slice %3 {offsets = [0, 0], sizes = [24, 28], strides = [1, 1]} : vector<28x28xbf16> to vector<24x28xbf16>
    %c0_4 = arith.constant 0 : index
    %c0_5 = arith.constant 0 : index
    %c0_6 = arith.constant 0 : index
    %6 = vector.load %arg2[%c0_4, %c0_5, %c0_6] : memref<5x28x768xbf16, #tpu.memory_space<vmem>>, vector<1x28x768xbf16>
    %7 = vector.shape_cast %6 : vector<1x28x768xbf16> to vector<28x768xbf16>
    %cst_7 = arith.constant dense<0.000000e+00> : vector<24x768xf32>
    %8 = tpu.matmul %5, %7, %cst_7 {dimension_numbers = #tpu.dot_dimension_numbers<[1], [0], [0], [1], [0, 0, 1, 1], [], []>} : vector<24x28xbf16>, vector<28x768xbf16>, vector<24x768xf32> -> vector<24x768xf32>
    %9 = arith.addf %4, %8 : vector<24x768xf32>
    %10 = vector.extract_strided_slice %3 {offsets = [1, 0], sizes = [24, 28], strides = [1, 1]} : vector<28x28xbf16> to vector<24x28xbf16>
    %c1 = arith.constant 1 : index
    %c0_8 = arith.constant 0 : index
    %c0_9 = arith.constant 0 : index
    %11 = vector.load %arg2[%c1, %c0_8, %c0_9] : memref<5x28x768xbf16, #tpu.memory_space<vmem>>, vector<1x28x768xbf16>
    %12 = vector.shape_cast %11 : vector<1x28x768xbf16> to vector<28x768xbf16>
    %cst_10 = arith.constant dense<0.000000e+00> : vector<24x768xf32>
    %13 = tpu.matmul %10, %12, %cst_10 {dimension_numbers = #tpu.dot_dimension_numbers<[1], [0], [0], [1], [0, 0, 1, 1], [], []>} : vector<24x28xbf16>, vector<28x768xbf16>, vector<24x768xf32> -> vector<24x768xf32>
    %14 = arith.addf %9, %13 : vector<24x768xf32>
    %15 = vector.extract_strided_slice %3 {offsets = [2, 0], sizes = [24, 28], strides = [1, 1]} : vector<28x28xbf16> to vector<24x28xbf16>
    %c2 = arith.constant 2 : index
    %c0_11 = arith.constant 0 : index
    %c0_12 = arith.constant 0 : index
    %16 = vector.load %arg2[%c2, %c0_11, %c0_12] : memref<5x28x768xbf16, #tpu.memory_space<vmem>>, vector<1x28x768xbf16>
    %17 = vector.shape_cast %16 : vector<1x28x768xbf16> to vector<28x768xbf16>
    %cst_13 = arith.constant dense<0.000000e+00> : vector<24x768xf32>
    %18 = tpu.matmul %15, %17, %cst_13 {dimension_numbers = #tpu.dot_dimension_numbers<[1], [0], [0], [1], [0, 0, 1, 1], [], []>} : vector<24x28xbf16>, vector<28x768xbf16>, vector<24x768xf32> -> vector<24x768xf32>
    %19 = arith.addf %14, %18 : vector<24x768xf32>
    %20 = vector.extract_strided_slice %3 {offsets = [3, 0], sizes = [24, 28], strides = [1, 1]} : vector<28x28xbf16> to vector<24x28xbf16>
    %c3 = arith.constant 3 : index
    %c0_14 = arith.constant 0 : index
    %c0_15 = arith.constant 0 : index
    %21 = vector.load %arg2[%c3, %c0_14, %c0_15] : memref<5x28x768xbf16, #tpu.memory_space<vmem>>, vector<1x28x768xbf16>
    %22 = vector.shape_cast %21 : vector<1x28x768xbf16> to vector<28x768xbf16>
    %cst_16 = arith.constant dense<0.000000e+00> : vector<24x768xf32>
    %23 = tpu.matmul %20, %22, %cst_16 {dimension_numbers = #tpu.dot_dimension_numbers<[1], [0], [0], [1], [0, 0, 1, 1], [], []>} : vector<24x28xbf16>, vector<28x768xbf16>, vector<24x768xf32> -> vector<24x768xf32>
    %24 = arith.addf %19, %23 : vector<24x768xf32>
    %25 = vector.extract_strided_slice %3 {offsets = [4, 0], sizes = [24, 28], strides = [1, 1]} : vector<28x28xbf16> to vector<24x28xbf16>
    %c4 = arith.constant 4 : index
    %c0_17 = arith.constant 0 : index
    %c0_18 = arith.constant 0 : index
    %26 = vector.load %arg2[%c4, %c0_17, %c0_18] : memref<5x28x768xbf16, #tpu.memory_space<vmem>>, vector<1x28x768xbf16>
    %27 = vector.shape_cast %26 : vector<1x28x768xbf16> to vector<28x768xbf16>
    %cst_19 = arith.constant dense<0.000000e+00> : vector<24x768xf32>
    %28 = tpu.matmul %25, %27, %cst_19 {dimension_numbers = #tpu.dot_dimension_numbers<[1], [0], [0], [1], [0, 0, 1, 1], [], []>} : vector<24x28xbf16>, vector<28x768xbf16>, vector<24x768xf32> -> vector<24x768xf32>
    %29 = arith.addf %24, %28 : vector<24x768xf32>
    %cst_20 = arith.constant dense<0.000000e+00> : vector<768xf32>
    %30 = vector.multi_reduction <add>, %29, %cst_20 [0] : vector<24x768xf32> to vector<768xf32>
    %31 = vector.shape_cast %30 : vector<768xf32> to vector<1x768xf32>
    %32 = arith.addf %0, %31 : vector<1x768xf32>
    %33 = arith.mulf %29, %29 : vector<24x768xf32>
    %cst_21 = arith.constant dense<0.000000e+00> : vector<768xf32>
    %34 = vector.multi_reduction <add>, %33, %cst_21 [0] : vector<24x768xf32> to vector<768xf32>
    %35 = vector.shape_cast %34 : vector<768xf32> to vector<1x768xf32>
    %36 = arith.addf %1, %35 : vector<1x768xf32>
    %c1_22 = arith.constant 1 : index
    %c0_23 = arith.constant 0 : index
    %c0_24 = arith.constant 0 : index
    %37 = vector.load %arg1[%c1_22, %c0_23, %c0_24] : memref<2x28x28xbf16, #tpu.memory_space<vmem>>, vector<1x28x28xbf16>
    %38 = vector.shape_cast %37 : vector<1x28x28xbf16> to vector<28x28xbf16>
    %cst_25 = arith.constant 0.000000e+00 : f32
    %39 = vector.broadcast %cst_25 : f32 to vector<24x768xf32>
    %40 = vector.extract_strided_slice %38 {offsets = [0, 0], sizes = [24, 28], strides = [1, 1]} : vector<28x28xbf16> to vector<24x28xbf16>
    %c0_26 = arith.constant 0 : index
    %c0_27 = arith.constant 0 : index
    %c0_28 = arith.constant 0 : index
    %41 = vector.load %arg2[%c0_26, %c0_27, %c0_28] : memref<5x28x768xbf16, #tpu.memory_space<vmem>>, vector<1x28x768xbf16>
    %42 = vector.shape_cast %41 : vector<1x28x768xbf16> to vector<28x768xbf16>
    %cst_29 = arith.constant dense<0.000000e+00> : vector<24x768xf32>
    %43 = tpu.matmul %40, %42, %cst_29 {dimension_numbers = #tpu.dot_dimension_numbers<[1], [0], [0], [1], [0, 0, 1, 1], [], []>} : vector<24x28xbf16>, vector<28x768xbf16>, vector<24x768xf32> -> vector<24x768xf32>
    %44 = arith.addf %39, %43 : vector<24x768xf32>
    %45 = vector.extract_strided_slice %38 {offsets = [1, 0], sizes = [24, 28], strides = [1, 1]} : vector<28x28xbf16> to vector<24x28xbf16>
    %c1_30 = arith.constant 1 : index
    %c0_31 = arith.constant 0 : index
    %c0_32 = arith.constant 0 : index
    %46 = vector.load %arg2[%c1_30, %c0_31, %c0_32] : memref<5x28x768xbf16, #tpu.memory_space<vmem>>, vector<1x28x768xbf16>
    %47 = vector.shape_cast %46 : vector<1x28x768xbf16> to vector<28x768xbf16>
    %cst_33 = arith.constant dense<0.000000e+00> : vector<24x768xf32>
    %48 = tpu.matmul %45, %47, %cst_33 {dimension_numbers = #tpu.dot_dimension_numbers<[1], [0], [0], [1], [0, 0, 1, 1], [], []>} : vector<24x28xbf16>, vector<28x768xbf16>, vector<24x768xf32> -> vector<24x768xf32>
    %49 = arith.addf %44, %48 : vector<24x768xf32>
    %50 = vector.extract_strided_slice %38 {offsets = [2, 0], sizes = [24, 28], strides = [1, 1]} : vector<28x28xbf16> to vector<24x28xbf16>
    %c2_34 = arith.constant 2 : index
    %c0_35 = arith.constant 0 : index
    %c0_36 = arith.constant 0 : index
    %51 = vector.load %arg2[%c2_34, %c0_35, %c0_36] : memref<5x28x768xbf16, #tpu.memory_space<vmem>>, vector<1x28x768xbf16>
    %52 = vector.shape_cast %51 : vector<1x28x768xbf16> to vector<28x768xbf16>
    %cst_37 = arith.constant dense<0.000000e+00> : vector<24x768xf32>
    %53 = tpu.matmul %50, %52, %cst_37 {dimension_numbers = #tpu.dot_dimension_numbers<[1], [0], [0], [1], [0, 0, 1, 1], [], []>} : vector<24x28xbf16>, vector<28x768xbf16>, vector<24x768xf32> -> vector<24x768xf32>
    %54 = arith.addf %49, %53 : vector<24x768xf32>
    %55 = vector.extract_strided_slice %38 {offsets = [3, 0], sizes = [24, 28], strides = [1, 1]} : vector<28x28xbf16> to vector<24x28xbf16>
    %c3_38 = arith.constant 3 : index
    %c0_39 = arith.constant 0 : index
    %c0_40 = arith.constant 0 : index
    %56 = vector.load %arg2[%c3_38, %c0_39, %c0_40] : memref<5x28x768xbf16, #tpu.memory_space<vmem>>, vector<1x28x768xbf16>
    %57 = vector.shape_cast %56 : vector<1x28x768xbf16> to vector<28x768xbf16>
    %cst_41 = arith.constant dense<0.000000e+00> : vector<24x768xf32>
    %58 = tpu.matmul %55, %57, %cst_41 {dimension_numbers = #tpu.dot_dimension_numbers<[1], [0], [0], [1], [0, 0, 1, 1], [], []>} : vector<24x28xbf16>, vector<28x768xbf16>, vector<24x768xf32> -> vector<24x768xf32>
    %59 = arith.addf %54, %58 : vector<24x768xf32>
    %60 = vector.extract_strided_slice %38 {offsets = [4, 0], sizes = [24, 28], strides = [1, 1]} : vector<28x28xbf16> to vector<24x28xbf16>
    %c4_42 = arith.constant 4 : index
    %c0_43 = arith.constant 0 : index
    %c0_44 = arith.constant 0 : index
    %61 = vector.load %arg2[%c4_42, %c0_43, %c0_44] : memref<5x28x768xbf16, #tpu.memory_space<vmem>>, vector<1x28x768xbf16>
    %62 = vector.shape_cast %61 : vector<1x28x768xbf16> to vector<28x768xbf16>
    %cst_45 = arith.constant dense<0.000000e+00> : vector<24x768xf32>
    %63 = tpu.matmul %60, %62, %cst_45 {dimension_numbers = #tpu.dot_dimension_numbers<[1], [0], [0], [1], [0, 0, 1, 1], [], []>} : vector<24x28xbf16>, vector<28x768xbf16>, vector<24x768xf32> -> vector<24x768xf32>
    %64 = arith.addf %59, %63 : vector<24x768xf32>
    %cst_46 = arith.constant dense<0.000000e+00> : vector<768xf32>
    %65 = vector.multi_reduction <add>, %64, %cst_46 [0] : vector<24x768xf32> to vector<768xf32>
    %66 = vector.shape_cast %65 : vector<768xf32> to vector<1x768xf32>
    %67 = arith.addf %32, %66 : vector<1x768xf32>
    %68 = arith.mulf %64, %64 : vector<24x768xf32>
    %cst_47 = arith.constant dense<0.000000e+00> : vector<768xf32>
    %69 = vector.multi_reduction <add>, %68, %cst_47 [0] : vector<24x768xf32> to vector<768xf32>
    %70 = vector.shape_cast %69 : vector<768xf32> to vector<1x768xf32>
    %71 = arith.addf %36, %70 : vector<1x768xf32>
    %72 = tpu.concatenate %67, %71 in 0 : vector<1x768xf32>, vector<1x768xf32> -> vector<2x768xf32>
    %c0_48 = arith.constant 0 : index
    %c0_49 = arith.constant 0 : index
    %c0_50 = arith.constant 0 : index
    %73 = vector.load %arg3[%c0_48, %c0_49, %c0_50] : memref<1x2x768xf32, #tpu.memory_space<vmem>>, vector<1x2x768xf32>
    %74 = vector.shape_cast %73 : vector<1x2x768xf32> to vector<2x768xf32>
    %75 = vector.shape_cast %72 : vector<2x768xf32> to vector<1x2x768xf32>
    tpu.vector_store %arg3[%c0_48, %c0_49, %c0_50], %75 {strides = array<i32>} : memref<1x2x768xf32, #tpu.memory_space<vmem>>, vector<1x2x768xf32>,
    return
  }
  func.func @transform_0(%arg0: i32) -> (i32, i32, i32) {
    %c0_i32 = arith.constant 0 : i32
    %c0_i32_0 = arith.constant 0 : i32
    %c0_i32_1 = arith.constant 0 : i32
    return %arg0, %c0_i32, %c0_i32_0 : i32, i32, i32
  }
  func.func @transform_1(%arg0: i32) -> (i32, i32, i32) {
    %c0_i32 = arith.constant 0 : i32
    %c0_i32_0 = arith.constant 0 : i32
    %c0_i32_1 = arith.constant 0 : i32
    %c0_i32_2 = arith.constant 0 : i32
    return %c0_i32, %c0_i32_0, %c0_i32_1 : i32, i32, i32
  }
  func.func @transform_2(%arg0: i32) -> (i32, i32, i32) {
    %c0_i32 = arith.constant 0 : i32
    %c0_i32_0 = arith.constant 0 : i32
    %c0_i32_1 = arith.constant 0 : i32
    return %arg0, %c0_i32, %c0_i32_0 : i32, i32, i32
  }
}

module attributes {stable_mosaic.version = 11 : i64} {
  func.func @_stage2_kernel(%arg0: i32, %arg1: memref<2x28x28xbf16, #tpu.memory_space<vmem>>, %arg2: memref<5x28x768xbf16, #tpu.memory_space<vmem>>, %arg3: memref<2x768xf32, #tpu.memory_space<vmem>>, %arg4: memref<5x384x512xbf16, #tpu.memory_space<vmem>>, %arg5: memref<21x28x512xbf16, #tpu.memory_space<vmem>>, %arg6: memref<2x8x512xf32, #tpu.memory_space<vmem>>, %arg7: memref<1x2x512xf32, #tpu.memory_space<vmem>>) attributes {dimension_semantics = [#tpu.dimension_semantics<parallel>], iteration_bounds = array<i64: 1>, scalar_prefetch = 0 : i64, scratch_operands = 0 : i64, tpu.core_type = #tpu.core_type<tc>, window_params = [{transform_indices = @transform_0, window_bounds = array<i64: 2, 28, 28>}, {pipeline_mode = #tpu.pipeline_mode<synchronous>, transform_indices = @transform_1, window_bounds = array<i64: 5, 28, 768>}, {pipeline_mode = #tpu.pipeline_mode<synchronous>, transform_indices = @transform_2, window_bounds = array<i64: 2, 768>}, {pipeline_mode = #tpu.pipeline_mode<synchronous>, transform_indices = @transform_3, window_bounds = array<i64: 5, 384, 512>}, {pipeline_mode = #tpu.pipeline_mode<synchronous>, transform_indices = @transform_4, window_bounds = array<i64: 21, 28, 512>}, {transform_indices = @transform_5, window_bounds = array<i64: 2, 8, 512>}, {transform_indices = @transform_6, window_bounds = array<i64: 1, 2, 512>}]} {
    %c0 = arith.constant 0 : index
    %c0_0 = arith.constant 0 : index
    %0 = vector.load %arg3[%c0, %c0_0] : memref<2x768xf32, #tpu.memory_space<vmem>>, vector<1x768xf32>
    %c1 = arith.constant 1 : index
    %c0_1 = arith.constant 0 : index
    %1 = vector.load %arg3[%c1, %c0_1] : memref<2x768xf32, #tpu.memory_space<vmem>>, vector<1x768xf32>
    %2 = tpu.iota {dimensions = array<i32: 0>} : vector<12x24xi32>
    %3 = tpu.iota {dimensions = array<i32: 1>} : vector<12x24xi32>
    %c2_i32 = arith.constant 2 : i32
    %4 = vector.broadcast %c2_i32 : i32 to vector<12x24xi32>
    %5 = arith.muli %4, %2 : vector<12x24xi32>
    %6 = arith.cmpi eq, %3, %5 : vector<12x24xi32>
    %cst = arith.constant 1.000000e+00 : f32
    %cst_2 = arith.constant 0.000000e+00 : f32
    %7 = vector.broadcast %cst : f32 to vector<12x24xf32>
    %8 = vector.broadcast %cst_2 : f32 to vector<12x24xf32>
    %9 = arith.select %6, %7, %8 : vector<12x24xi1>, vector<12x24xf32>
    %10 = arith.truncf %9 : vector<12x24xf32> to vector<12x24xbf16>
    %c2_i32_3 = arith.constant 2 : i32
    %11 = vector.broadcast %c2_i32_3 : i32 to vector<12x24xi32>
    %12 = arith.muli %11, %2 : vector<12x24xi32>
    %c1_i32 = arith.constant 1 : i32
    %13 = vector.broadcast %c1_i32 : i32 to vector<12x24xi32>
    %14 = arith.addi %12, %13 : vector<12x24xi32>
    %15 = arith.cmpi eq, %3, %14 : vector<12x24xi32>
    %cst_4 = arith.constant 1.000000e+00 : f32
    %cst_5 = arith.constant 0.000000e+00 : f32
    %16 = vector.broadcast %cst_4 : f32 to vector<12x24xf32>
    %17 = vector.broadcast %cst_5 : f32 to vector<12x24xf32>
    %18 = arith.select %15, %16, %17 : vector<12x24xi1>, vector<12x24xf32>
    %19 = arith.truncf %18 : vector<12x24xf32> to vector<12x24xbf16>
    %cst_6 = arith.constant 0.000000e+00 : f32
    %20 = vector.broadcast %cst_6 : f32 to vector<1x512xf32>
    %cst_7 = arith.constant 0.000000e+00 : f32
    %21 = vector.broadcast %cst_7 : f32 to vector<1x512xf32>
    %c0_8 = arith.constant 0 : index
    %c0_9 = arith.constant 0 : index
    %c0_10 = arith.constant 0 : index
    %22 = vector.load %arg1[%c0_8, %c0_9, %c0_10] : memref<2x28x28xbf16, #tpu.memory_space<vmem>>, vector<1x28x28xbf16>
    %23 = vector.shape_cast %22 : vector<1x28x28xbf16> to vector<28x28xbf16>
    %cst_11 = arith.constant 0.000000e+00 : f32
    %24 = vector.broadcast %cst_11 : f32 to vector<24x768xf32>
    %25 = vector.extract_strided_slice %23 {offsets = [0, 0], sizes = [24, 28], strides = [1, 1]} : vector<28x28xbf16> to vector<24x28xbf16>
    %c0_12 = arith.constant 0 : index
    %c0_13 = arith.constant 0 : index
    %c0_14 = arith.constant 0 : index
    %26 = vector.load %arg2[%c0_12, %c0_13, %c0_14] : memref<5x28x768xbf16, #tpu.memory_space<vmem>>, vector<1x28x768xbf16>
    %27 = vector.shape_cast %26 : vector<1x28x768xbf16> to vector<28x768xbf16>
    %cst_15 = arith.constant dense<0.000000e+00> : vector<24x768xf32>
    %28 = tpu.matmul %25, %27, %cst_15 {dimension_numbers = #tpu.dot_dimension_numbers<[1], [0], [0], [1], [0, 0, 1, 1], [], []>} : vector<24x28xbf16>, vector<28x768xbf16>, vector<24x768xf32> -> vector<24x768xf32>
    %29 = arith.addf %24, %28 : vector<24x768xf32>
    %30 = vector.extract_strided_slice %23 {offsets = [1, 0], sizes = [24, 28], strides = [1, 1]} : vector<28x28xbf16> to vector<24x28xbf16>
    %c1_16 = arith.constant 1 : index
    %c0_17 = arith.constant 0 : index
    %c0_18 = arith.constant 0 : index
    %31 = vector.load %arg2[%c1_16, %c0_17, %c0_18] : memref<5x28x768xbf16, #tpu.memory_space<vmem>>, vector<1x28x768xbf16>
    %32 = vector.shape_cast %31 : vector<1x28x768xbf16> to vector<28x768xbf16>
    %cst_19 = arith.constant dense<0.000000e+00> : vector<24x768xf32>
    %33 = tpu.matmul %30, %32, %cst_19 {dimension_numbers = #tpu.dot_dimension_numbers<[1], [0], [0], [1], [0, 0, 1, 1], [], []>} : vector<24x28xbf16>, vector<28x768xbf16>, vector<24x768xf32> -> vector<24x768xf32>
    %34 = arith.addf %29, %33 : vector<24x768xf32>
    %35 = vector.extract_strided_slice %23 {offsets = [2, 0], sizes = [24, 28], strides = [1, 1]} : vector<28x28xbf16> to vector<24x28xbf16>
    %c2 = arith.constant 2 : index
    %c0_20 = arith.constant 0 : index
    %c0_21 = arith.constant 0 : index
    %36 = vector.load %arg2[%c2, %c0_20, %c0_21] : memref<5x28x768xbf16, #tpu.memory_space<vmem>>, vector<1x28x768xbf16>
    %37 = vector.shape_cast %36 : vector<1x28x768xbf16> to vector<28x768xbf16>
    %cst_22 = arith.constant dense<0.000000e+00> : vector<24x768xf32>
    %38 = tpu.matmul %35, %37, %cst_22 {dimension_numbers = #tpu.dot_dimension_numbers<[1], [0], [0], [1], [0, 0, 1, 1], [], []>} : vector<24x28xbf16>, vector<28x768xbf16>, vector<24x768xf32> -> vector<24x768xf32>
    %39 = arith.addf %34, %38 : vector<24x768xf32>
    %40 = vector.extract_strided_slice %23 {offsets = [3, 0], sizes = [24, 28], strides = [1, 1]} : vector<28x28xbf16> to vector<24x28xbf16>
    %c3 = arith.constant 3 : index
    %c0_23 = arith.constant 0 : index
    %c0_24 = arith.constant 0 : index
    %41 = vector.load %arg2[%c3, %c0_23, %c0_24] : memref<5x28x768xbf16, #tpu.memory_space<vmem>>, vector<1x28x768xbf16>
    %42 = vector.shape_cast %41 : vector<1x28x768xbf16> to vector<28x768xbf16>
    %cst_25 = arith.constant dense<0.000000e+00> : vector<24x768xf32>
    %43 = tpu.matmul %40, %42, %cst_25 {dimension_numbers = #tpu.dot_dimension_numbers<[1], [0], [0], [1], [0, 0, 1, 1], [], []>} : vector<24x28xbf16>, vector<28x768xbf16>, vector<24x768xf32> -> vector<24x768xf32>
    %44 = arith.addf %39, %43 : vector<24x768xf32>
    %45 = vector.extract_strided_slice %23 {offsets = [4, 0], sizes = [24, 28], strides = [1, 1]} : vector<28x28xbf16> to vector<24x28xbf16>
    %c4 = arith.constant 4 : index
    %c0_26 = arith.constant 0 : index
    %c0_27 = arith.constant 0 : index
    %46 = vector.load %arg2[%c4, %c0_26, %c0_27] : memref<5x28x768xbf16, #tpu.memory_space<vmem>>, vector<1x28x768xbf16>
    %47 = vector.shape_cast %46 : vector<1x28x768xbf16> to vector<28x768xbf16>
    %cst_28 = arith.constant dense<0.000000e+00> : vector<24x768xf32>
    %48 = tpu.matmul %45, %47, %cst_28 {dimension_numbers = #tpu.dot_dimension_numbers<[1], [0], [0], [1], [0, 0, 1, 1], [], []>} : vector<24x28xbf16>, vector<28x768xbf16>, vector<24x768xf32> -> vector<24x768xf32>
    %49 = arith.addf %44, %48 : vector<24x768xf32>
    %50 = vector.broadcast %0 : vector<1x768xf32> to vector<24x768xf32>
    %51 = arith.mulf %49, %50 : vector<24x768xf32>
    %52 = vector.broadcast %1 : vector<1x768xf32> to vector<24x768xf32>
    %53 = arith.addf %51, %52 : vector<24x768xf32>
    %cst_29 = arith.constant 0.000000e+00 : f32
    %54 = vector.broadcast %cst_29 : f32 to vector<24x768xf32>
    %55 = arith.maximumf %53, %54 : vector<24x768xf32>
    %56 = arith.truncf %55 : vector<24x768xf32> to vector<24x768xbf16>
    %cst_30 = arith.constant dense<0.000000e+00> : vector<12x768xf32>
    %57 = tpu.matmul %10, %56, %cst_30 {dimension_numbers = #tpu.dot_dimension_numbers<[1], [0], [0], [1], [0, 0, 1, 1], [], []>} : vector<12x24xbf16>, vector<24x768xbf16>, vector<12x768xf32> -> vector<12x768xf32>
    %cst_31 = arith.constant dense<0.000000e+00> : vector<12x768xf32>
    %58 = tpu.matmul %19, %56, %cst_31 {dimension_numbers = #tpu.dot_dimension_numbers<[1], [0], [0], [1], [0, 0, 1, 1], [], []>} : vector<12x24xbf16>, vector<24x768xbf16>, vector<12x768xf32> -> vector<12x768xf32>
    %59 = arith.maximumf %57, %58 : vector<12x768xf32>
    %60 = vector.extract_strided_slice %59 {offsets = [0, 0], sizes = [12, 384], strides = [1, 1]} : vector<12x768xf32> to vector<12x384xf32>
    %61 = vector.extract_strided_slice %59 {offsets = [0, 384], sizes = [12, 384], strides = [1, 1]} : vector<12x768xf32> to vector<12x384xf32>
    %62 = arith.maximumf %60, %61 : vector<12x384xf32>
    %63 = arith.truncf %62 : vector<12x384xf32> to vector<12x384xbf16>
    %cst_32 = arith.constant 0.000000e+00 : f32
    %64 = vector.broadcast %cst_32 : f32 to vector<8x512xf32>
    %65 = vector.extract_strided_slice %63 {offsets = [0, 0], sizes = [8, 384], strides = [1, 1]} : vector<12x384xbf16> to vector<8x384xbf16>
    %c0_33 = arith.constant 0 : index
    %c0_34 = arith.constant 0 : index
    %c0_35 = arith.constant 0 : index
    %66 = vector.load %arg4[%c0_33, %c0_34, %c0_35] : memref<5x384x512xbf16, #tpu.memory_space<vmem>>, vector<1x384x512xbf16>
    %67 = vector.shape_cast %66 : vector<1x384x512xbf16> to vector<384x512xbf16>
    %cst_36 = arith.constant dense<0.000000e+00> : vector<8x512xf32>
    %68 = tpu.matmul %65, %67, %cst_36 {dimension_numbers = #tpu.dot_dimension_numbers<[1], [0], [0], [1], [0, 0, 1, 1], [], []>} : vector<8x384xbf16>, vector<384x512xbf16>, vector<8x512xf32> -> vector<8x512xf32>
    %69 = arith.addf %64, %68 : vector<8x512xf32>
    %70 = vector.extract_strided_slice %63 {offsets = [1, 0], sizes = [8, 384], strides = [1, 1]} : vector<12x384xbf16> to vector<8x384xbf16>
    %c1_37 = arith.constant 1 : index
    %c0_38 = arith.constant 0 : index
    %c0_39 = arith.constant 0 : index
    %71 = vector.load %arg4[%c1_37, %c0_38, %c0_39] : memref<5x384x512xbf16, #tpu.memory_space<vmem>>, vector<1x384x512xbf16>
    %72 = vector.shape_cast %71 : vector<1x384x512xbf16> to vector<384x512xbf16>
    %cst_40 = arith.constant dense<0.000000e+00> : vector<8x512xf32>
    %73 = tpu.matmul %70, %72, %cst_40 {dimension_numbers = #tpu.dot_dimension_numbers<[1], [0], [0], [1], [0, 0, 1, 1], [], []>} : vector<8x384xbf16>, vector<384x512xbf16>, vector<8x512xf32> -> vector<8x512xf32>
    %74 = arith.addf %69, %73 : vector<8x512xf32>
    %75 = vector.extract_strided_slice %63 {offsets = [2, 0], sizes = [8, 384], strides = [1, 1]} : vector<12x384xbf16> to vector<8x384xbf16>
    %c2_41 = arith.constant 2 : index
    %c0_42 = arith.constant 0 : index
    %c0_43 = arith.constant 0 : index
    %76 = vector.load %arg4[%c2_41, %c0_42, %c0_43] : memref<5x384x512xbf16, #tpu.memory_space<vmem>>, vector<1x384x512xbf16>
    %77 = vector.shape_cast %76 : vector<1x384x512xbf16> to vector<384x512xbf16>
    %cst_44 = arith.constant dense<0.000000e+00> : vector<8x512xf32>
    %78 = tpu.matmul %75, %77, %cst_44 {dimension_numbers = #tpu.dot_dimension_numbers<[1], [0], [0], [1], [0, 0, 1, 1], [], []>} : vector<8x384xbf16>, vector<384x512xbf16>, vector<8x512xf32> -> vector<8x512xf32>
    %79 = arith.addf %74, %78 : vector<8x512xf32>
    %80 = vector.extract_strided_slice %63 {offsets = [3, 0], sizes = [8, 384], strides = [1, 1]} : vector<12x384xbf16> to vector<8x384xbf16>
    %c3_45 = arith.constant 3 : index
    %c0_46 = arith.constant 0 : index
    %c0_47 = arith.constant 0 : index
    %81 = vector.load %arg4[%c3_45, %c0_46, %c0_47] : memref<5x384x512xbf16, #tpu.memory_space<vmem>>, vector<1x384x512xbf16>
    %82 = vector.shape_cast %81 : vector<1x384x512xbf16> to vector<384x512xbf16>
    %cst_48 = arith.constant dense<0.000000e+00> : vector<8x512xf32>
    %83 = tpu.matmul %80, %82, %cst_48 {dimension_numbers = #tpu.dot_dimension_numbers<[1], [0], [0], [1], [0, 0, 1, 1], [], []>} : vector<8x384xbf16>, vector<384x512xbf16>, vector<8x512xf32> -> vector<8x512xf32>
    %84 = arith.addf %79, %83 : vector<8x512xf32>
    %85 = vector.extract_strided_slice %63 {offsets = [4, 0], sizes = [8, 384], strides = [1, 1]} : vector<12x384xbf16> to vector<8x384xbf16>
    %c4_49 = arith.constant 4 : index
    %c0_50 = arith.constant 0 : index
    %c0_51 = arith.constant 0 : index
    %86 = vector.load %arg4[%c4_49, %c0_50, %c0_51] : memref<5x384x512xbf16, #tpu.memory_space<vmem>>, vector<1x384x512xbf16>
    %87 = vector.shape_cast %86 : vector<1x384x512xbf16> to vector<384x512xbf16>
    %cst_52 = arith.constant dense<0.000000e+00> : vector<8x512xf32>
    %88 = tpu.matmul %85, %87, %cst_52 {dimension_numbers = #tpu.dot_dimension_numbers<[1], [0], [0], [1], [0, 0, 1, 1], [], []>} : vector<8x384xbf16>, vector<384x512xbf16>, vector<8x512xf32> -> vector<8x512xf32>
    %89 = arith.addf %84, %88 : vector<8x512xf32>
    %cst_53 = arith.constant 0.000000e+00 : f32
    %90 = vector.broadcast %cst_53 : f32 to vector<8x512xf32>
    %91 = vector.extract_strided_slice %23 {offsets = [0, 0], sizes = [8, 28], strides = [1, 1]} : vector<28x28xbf16> to vector<8x28xbf16>
    %c0_54 = arith.constant 0 : index
    %c0_55 = arith.constant 0 : index
    %c0_56 = arith.constant 0 : index
    %92 = vector.load %arg5[%c0_54, %c0_55, %c0_56] : memref<21x28x512xbf16, #tpu.memory_space<vmem>>, vector<1x28x512xbf16>
    %93 = vector.shape_cast %92 : vector<1x28x512xbf16> to vector<28x512xbf16>
    %cst_57 = arith.constant dense<0.000000e+00> : vector<8x512xf32>
    %94 = tpu.matmul %91, %93, %cst_57 {dimension_numbers = #tpu.dot_dimension_numbers<[1], [0], [0], [1], [0, 0, 1, 1], [], []>} : vector<8x28xbf16>, vector<28x512xbf16>, vector<8x512xf32> -> vector<8x512xf32>
    %95 = arith.addf %90, %94 : vector<8x512xf32>
    %96 = vector.extract_strided_slice %23 {offsets = [1, 0], sizes = [8, 28], strides = [1, 1]} : vector<28x28xbf16> to vector<8x28xbf16>
    %c1_58 = arith.constant 1 : index
    %c0_59 = arith.constant 0 : index
    %c0_60 = arith.constant 0 : index
    %97 = vector.load %arg5[%c1_58, %c0_59, %c0_60] : memref<21x28x512xbf16, #tpu.memory_space<vmem>>, vector<1x28x512xbf16>
    %98 = vector.shape_cast %97 : vector<1x28x512xbf16> to vector<28x512xbf16>
    %cst_61 = arith.constant dense<0.000000e+00> : vector<8x512xf32>
    %99 = tpu.matmul %96, %98, %cst_61 {dimension_numbers = #tpu.dot_dimension_numbers<[1], [0], [0], [1], [0, 0, 1, 1], [], []>} : vector<8x28xbf16>, vector<28x512xbf16>, vector<8x512xf32> -> vector<8x512xf32>
    %100 = arith.addf %95, %99 : vector<8x512xf32>
    %101 = vector.extract_strided_slice %23 {offsets = [2, 0], sizes = [8, 28], strides = [1, 1]} : vector<28x28xbf16> to vector<8x28xbf16>
    %c2_62 = arith.constant 2 : index
    %c0_63 = arith.constant 0 : index
    %c0_64 = arith.constant 0 : index
    %102 = vector.load %arg5[%c2_62, %c0_63, %c0_64] : memref<21x28x512xbf16, #tpu.memory_space<vmem>>, vector<1x28x512xbf16>
    %103 = vector.shape_cast %102 : vector<1x28x512xbf16> to vector<28x512xbf16>
    %cst_65 = arith.constant dense<0.000000e+00> : vector<8x512xf32>
    %104 = tpu.matmul %101, %103, %cst_65 {dimension_numbers = #tpu.dot_dimension_numbers<[1], [0], [0], [1], [0, 0, 1, 1], [], []>} : vector<8x28xbf16>, vector<28x512xbf16>, vector<8x512xf32> -> vector<8x512xf32>
    %105 = arith.addf %100, %104 : vector<8x512xf32>
    %106 = vector.extract_strided_slice %23 {offsets = [3, 0], sizes = [8, 28], strides = [1, 1]} : vector<28x28xbf16> to vector<8x28xbf16>
    %c3_66 = arith.constant 3 : index
    %c0_67 = arith.constant 0 : index
    %c0_68 = arith.constant 0 : index
    %107 = vector.load %arg5[%c3_66, %c0_67, %c0_68] : memref<21x28x512xbf16, #tpu.memory_space<vmem>>, vector<1x28x512xbf16>
    %108 = vector.shape_cast %107 : vector<1x28x512xbf16> to vector<28x512xbf16>
    %cst_69 = arith.constant dense<0.000000e+00> : vector<8x512xf32>
    %109 = tpu.matmul %106, %108, %cst_69 {dimension_numbers = #tpu.dot_dimension_numbers<[1], [0], [0], [1], [0, 0, 1, 1], [], []>} : vector<8x28xbf16>, vector<28x512xbf16>, vector<8x512xf32> -> vector<8x512xf32>
    %110 = arith.addf %105, %109 : vector<8x512xf32>
    %111 = vector.extract_strided_slice %23 {offsets = [4, 0], sizes = [8, 28], strides = [1, 1]} : vector<28x28xbf16> to vector<8x28xbf16>
    %c4_70 = arith.constant 4 : index
    %c0_71 = arith.constant 0 : index
    %c0_72 = arith.constant 0 : index
    %112 = vector.load %arg5[%c4_70, %c0_71, %c0_72] : memref<21x28x512xbf16, #tpu.memory_space<vmem>>, vector<1x28x512xbf16>
    %113 = vector.shape_cast %112 : vector<1x28x512xbf16> to vector<28x512xbf16>
    %cst_73 = arith.constant dense<0.000000e+00> : vector<8x512xf32>
    %114 = tpu.matmul %111, %113, %cst_73 {dimension_numbers = #tpu.dot_dimension_numbers<[1], [0], [0], [1], [0, 0, 1, 1], [], []>} : vector<8x28xbf16>, vector<28x512xbf16>, vector<8x512xf32> -> vector<8x512xf32>
    %115 = arith.addf %110, %114 : vector<8x512xf32>
    %116 = vector.extract_strided_slice %23 {offsets = [5, 0], sizes = [8, 28], strides = [1, 1]} : vector<28x28xbf16> to vector<8x28xbf16>
    %c5 = arith.constant 5 : index
    %c0_74 = arith.constant 0 : index
    %c0_75 = arith.constant 0 : index
    %117 = vector.load %arg5[%c5, %c0_74, %c0_75] : memref<21x28x512xbf16, #tpu.memory_space<vmem>>, vector<1x28x512xbf16>
    %118 = vector.shape_cast %117 : vector<1x28x512xbf16> to vector<28x512xbf16>
    %cst_76 = arith.constant dense<0.000000e+00> : vector<8x512xf32>
    %119 = tpu.matmul %116, %118, %cst_76 {dimension_numbers = #tpu.dot_dimension_numbers<[1], [0], [0], [1], [0, 0, 1, 1], [], []>} : vector<8x28xbf16>, vector<28x512xbf16>, vector<8x512xf32> -> vector<8x512xf32>
    %120 = arith.addf %115, %119 : vector<8x512xf32>
    %121 = vector.extract_strided_slice %23 {offsets = [6, 0], sizes = [8, 28], strides = [1, 1]} : vector<28x28xbf16> to vector<8x28xbf16>
    %c6 = arith.constant 6 : index
    %c0_77 = arith.constant 0 : index
    %c0_78 = arith.constant 0 : index
    %122 = vector.load %arg5[%c6, %c0_77, %c0_78] : memref<21x28x512xbf16, #tpu.memory_space<vmem>>, vector<1x28x512xbf16>
    %123 = vector.shape_cast %122 : vector<1x28x512xbf16> to vector<28x512xbf16>
    %cst_79 = arith.constant dense<0.000000e+00> : vector<8x512xf32>
    %124 = tpu.matmul %121, %123, %cst_79 {dimension_numbers = #tpu.dot_dimension_numbers<[1], [0], [0], [1], [0, 0, 1, 1], [], []>} : vector<8x28xbf16>, vector<28x512xbf16>, vector<8x512xf32> -> vector<8x512xf32>
    %125 = arith.addf %120, %124 : vector<8x512xf32>
    %126 = vector.extract_strided_slice %23 {offsets = [7, 0], sizes = [8, 28], strides = [1, 1]} : vector<28x28xbf16> to vector<8x28xbf16>
    %c7 = arith.constant 7 : index
    %c0_80 = arith.constant 0 : index
    %c0_81 = arith.constant 0 : index
    %127 = vector.load %arg5[%c7, %c0_80, %c0_81] : memref<21x28x512xbf16, #tpu.memory_space<vmem>>, vector<1x28x512xbf16>
    %128 = vector.shape_cast %127 : vector<1x28x512xbf16> to vector<28x512xbf16>
    %cst_82 = arith.constant dense<0.000000e+00> : vector<8x512xf32>
    %129 = tpu.matmul %126, %128, %cst_82 {dimension_numbers = #tpu.dot_dimension_numbers<[1], [0], [0], [1], [0, 0, 1, 1], [], []>} : vector<8x28xbf16>, vector<28x512xbf16>, vector<8x512xf32> -> vector<8x512xf32>
    %130 = arith.addf %125, %129 : vector<8x512xf32>
    %131 = vector.extract_strided_slice %23 {offsets = [8, 0], sizes = [8, 28], strides = [1, 1]} : vector<28x28xbf16> to vector<8x28xbf16>
    %c8 = arith.constant 8 : index
    %c0_83 = arith.constant 0 : index
    %c0_84 = arith.constant 0 : index
    %132 = vector.load %arg5[%c8, %c0_83, %c0_84] : memref<21x28x512xbf16, #tpu.memory_space<vmem>>, vector<1x28x512xbf16>
    %133 = vector.shape_cast %132 : vector<1x28x512xbf16> to vector<28x512xbf16>
    %cst_85 = arith.constant dense<0.000000e+00> : vector<8x512xf32>
    %134 = tpu.matmul %131, %133, %cst_85 {dimension_numbers = #tpu.dot_dimension_numbers<[1], [0], [0], [1], [0, 0, 1, 1], [], []>} : vector<8x28xbf16>, vector<28x512xbf16>, vector<8x512xf32> -> vector<8x512xf32>
    %135 = arith.addf %130, %134 : vector<8x512xf32>
    %136 = vector.extract_strided_slice %23 {offsets = [9, 0], sizes = [8, 28], strides = [1, 1]} : vector<28x28xbf16> to vector<8x28xbf16>
    %c9 = arith.constant 9 : index
    %c0_86 = arith.constant 0 : index
    %c0_87 = arith.constant 0 : index
    %137 = vector.load %arg5[%c9, %c0_86, %c0_87] : memref<21x28x512xbf16, #tpu.memory_space<vmem>>, vector<1x28x512xbf16>
    %138 = vector.shape_cast %137 : vector<1x28x512xbf16> to vector<28x512xbf16>
    %cst_88 = arith.constant dense<0.000000e+00> : vector<8x512xf32>
    %139 = tpu.matmul %136, %138, %cst_88 {dimension_numbers = #tpu.dot_dimension_numbers<[1], [0], [0], [1], [0, 0, 1, 1], [], []>} : vector<8x28xbf16>, vector<28x512xbf16>, vector<8x512xf32> -> vector<8x512xf32>
    %140 = arith.addf %135, %139 : vector<8x512xf32>
    %141 = vector.extract_strided_slice %23 {offsets = [10, 0], sizes = [8, 28], strides = [1, 1]} : vector<28x28xbf16> to vector<8x28xbf16>
    %c10 = arith.constant 10 : index
    %c0_89 = arith.constant 0 : index
    %c0_90 = arith.constant 0 : index
    %142 = vector.load %arg5[%c10, %c0_89, %c0_90] : memref<21x28x512xbf16, #tpu.memory_space<vmem>>, vector<1x28x512xbf16>
    %143 = vector.shape_cast %142 : vector<1x28x512xbf16> to vector<28x512xbf16>
    %cst_91 = arith.constant dense<0.000000e+00> : vector<8x512xf32>
    %144 = tpu.matmul %141, %143, %cst_91 {dimension_numbers = #tpu.dot_dimension_numbers<[1], [0], [0], [1], [0, 0, 1, 1], [], []>} : vector<8x28xbf16>, vector<28x512xbf16>, vector<8x512xf32> -> vector<8x512xf32>
    %145 = arith.addf %140, %144 : vector<8x512xf32>
    %146 = vector.extract_strided_slice %23 {offsets = [11, 0], sizes = [8, 28], strides = [1, 1]} : vector<28x28xbf16> to vector<8x28xbf16>
    %c11 = arith.constant 11 : index
    %c0_92 = arith.constant 0 : index
    %c0_93 = arith.constant 0 : index
    %147 = vector.load %arg5[%c11, %c0_92, %c0_93] : memref<21x28x512xbf16, #tpu.memory_space<vmem>>, vector<1x28x512xbf16>
    %148 = vector.shape_cast %147 : vector<1x28x512xbf16> to vector<28x512xbf16>
    %cst_94 = arith.constant dense<0.000000e+00> : vector<8x512xf32>
    %149 = tpu.matmul %146, %148, %cst_94 {dimension_numbers = #tpu.dot_dimension_numbers<[1], [0], [0], [1], [0, 0, 1, 1], [], []>} : vector<8x28xbf16>, vector<28x512xbf16>, vector<8x512xf32> -> vector<8x512xf32>
    %150 = arith.addf %145, %149 : vector<8x512xf32>
    %151 = vector.extract_strided_slice %23 {offsets = [12, 0], sizes = [8, 28], strides = [1, 1]} : vector<28x28xbf16> to vector<8x28xbf16>
    %c12 = arith.constant 12 : index
    %c0_95 = arith.constant 0 : index
    %c0_96 = arith.constant 0 : index
    %152 = vector.load %arg5[%c12, %c0_95, %c0_96] : memref<21x28x512xbf16, #tpu.memory_space<vmem>>, vector<1x28x512xbf16>
    %153 = vector.shape_cast %152 : vector<1x28x512xbf16> to vector<28x512xbf16>
    %cst_97 = arith.constant dense<0.000000e+00> : vector<8x512xf32>
    %154 = tpu.matmul %151, %153, %cst_97 {dimension_numbers = #tpu.dot_dimension_numbers<[1], [0], [0], [1], [0, 0, 1, 1], [], []>} : vector<8x28xbf16>, vector<28x512xbf16>, vector<8x512xf32> -> vector<8x512xf32>
    %155 = arith.addf %150, %154 : vector<8x512xf32>
    %156 = vector.extract_strided_slice %23 {offsets = [13, 0], sizes = [8, 28], strides = [1, 1]} : vector<28x28xbf16> to vector<8x28xbf16>
    %c13 = arith.constant 13 : index
    %c0_98 = arith.constant 0 : index
    %c0_99 = arith.constant 0 : index
    %157 = vector.load %arg5[%c13, %c0_98, %c0_99] : memref<21x28x512xbf16, #tpu.memory_space<vmem>>, vector<1x28x512xbf16>
    %158 = vector.shape_cast %157 : vector<1x28x512xbf16> to vector<28x512xbf16>
    %cst_100 = arith.constant dense<0.000000e+00> : vector<8x512xf32>
    %159 = tpu.matmul %156, %158, %cst_100 {dimension_numbers = #tpu.dot_dimension_numbers<[1], [0], [0], [1], [0, 0, 1, 1], [], []>} : vector<8x28xbf16>, vector<28x512xbf16>, vector<8x512xf32> -> vector<8x512xf32>
    %160 = arith.addf %155, %159 : vector<8x512xf32>
    %161 = vector.extract_strided_slice %23 {offsets = [14, 0], sizes = [8, 28], strides = [1, 1]} : vector<28x28xbf16> to vector<8x28xbf16>
    %c14 = arith.constant 14 : index
    %c0_101 = arith.constant 0 : index
    %c0_102 = arith.constant 0 : index
    %162 = vector.load %arg5[%c14, %c0_101, %c0_102] : memref<21x28x512xbf16, #tpu.memory_space<vmem>>, vector<1x28x512xbf16>
    %163 = vector.shape_cast %162 : vector<1x28x512xbf16> to vector<28x512xbf16>
    %cst_103 = arith.constant dense<0.000000e+00> : vector<8x512xf32>
    %164 = tpu.matmul %161, %163, %cst_103 {dimension_numbers = #tpu.dot_dimension_numbers<[1], [0], [0], [1], [0, 0, 1, 1], [], []>} : vector<8x28xbf16>, vector<28x512xbf16>, vector<8x512xf32> -> vector<8x512xf32>
    %165 = arith.addf %160, %164 : vector<8x512xf32>
    %166 = vector.extract_strided_slice %23 {offsets = [15, 0], sizes = [8, 28], strides = [1, 1]} : vector<28x28xbf16> to vector<8x28xbf16>
    %c15 = arith.constant 15 : index
    %c0_104 = arith.constant 0 : index
    %c0_105 = arith.constant 0 : index
    %167 = vector.load %arg5[%c15, %c0_104, %c0_105] : memref<21x28x512xbf16, #tpu.memory_space<vmem>>, vector<1x28x512xbf16>
    %168 = vector.shape_cast %167 : vector<1x28x512xbf16> to vector<28x512xbf16>
    %cst_106 = arith.constant dense<0.000000e+00> : vector<8x512xf32>
    %169 = tpu.matmul %166, %168, %cst_106 {dimension_numbers = #tpu.dot_dimension_numbers<[1], [0], [0], [1], [0, 0, 1, 1], [], []>} : vector<8x28xbf16>, vector<28x512xbf16>, vector<8x512xf32> -> vector<8x512xf32>
    %170 = arith.addf %165, %169 : vector<8x512xf32>
    %171 = vector.extract_strided_slice %23 {offsets = [16, 0], sizes = [8, 28], strides = [1, 1]} : vector<28x28xbf16> to vector<8x28xbf16>
    %c16 = arith.constant 16 : index
    %c0_107 = arith.constant 0 : index
    %c0_108 = arith.constant 0 : index
    %172 = vector.load %arg5[%c16, %c0_107, %c0_108] : memref<21x28x512xbf16, #tpu.memory_space<vmem>>, vector<1x28x512xbf16>
    %173 = vector.shape_cast %172 : vector<1x28x512xbf16> to vector<28x512xbf16>
    %cst_109 = arith.constant dense<0.000000e+00> : vector<8x512xf32>
    %174 = tpu.matmul %171, %173, %cst_109 {dimension_numbers = #tpu.dot_dimension_numbers<[1], [0], [0], [1], [0, 0, 1, 1], [], []>} : vector<8x28xbf16>, vector<28x512xbf16>, vector<8x512xf32> -> vector<8x512xf32>
    %175 = arith.addf %170, %174 : vector<8x512xf32>
    %176 = vector.extract_strided_slice %23 {offsets = [17, 0], sizes = [8, 28], strides = [1, 1]} : vector<28x28xbf16> to vector<8x28xbf16>
    %c17 = arith.constant 17 : index
    %c0_110 = arith.constant 0 : index
    %c0_111 = arith.constant 0 : index
    %177 = vector.load %arg5[%c17, %c0_110, %c0_111] : memref<21x28x512xbf16, #tpu.memory_space<vmem>>, vector<1x28x512xbf16>
    %178 = vector.shape_cast %177 : vector<1x28x512xbf16> to vector<28x512xbf16>
    %cst_112 = arith.constant dense<0.000000e+00> : vector<8x512xf32>
    %179 = tpu.matmul %176, %178, %cst_112 {dimension_numbers = #tpu.dot_dimension_numbers<[1], [0], [0], [1], [0, 0, 1, 1], [], []>} : vector<8x28xbf16>, vector<28x512xbf16>, vector<8x512xf32> -> vector<8x512xf32>
    %180 = arith.addf %175, %179 : vector<8x512xf32>
    %181 = vector.extract_strided_slice %23 {offsets = [18, 0], sizes = [8, 28], strides = [1, 1]} : vector<28x28xbf16> to vector<8x28xbf16>
    %c18 = arith.constant 18 : index
    %c0_113 = arith.constant 0 : index
    %c0_114 = arith.constant 0 : index
    %182 = vector.load %arg5[%c18, %c0_113, %c0_114] : memref<21x28x512xbf16, #tpu.memory_space<vmem>>, vector<1x28x512xbf16>
    %183 = vector.shape_cast %182 : vector<1x28x512xbf16> to vector<28x512xbf16>
    %cst_115 = arith.constant dense<0.000000e+00> : vector<8x512xf32>
    %184 = tpu.matmul %181, %183, %cst_115 {dimension_numbers = #tpu.dot_dimension_numbers<[1], [0], [0], [1], [0, 0, 1, 1], [], []>} : vector<8x28xbf16>, vector<28x512xbf16>, vector<8x512xf32> -> vector<8x512xf32>
    %185 = arith.addf %180, %184 : vector<8x512xf32>
    %186 = vector.extract_strided_slice %23 {offsets = [19, 0], sizes = [8, 28], strides = [1, 1]} : vector<28x28xbf16> to vector<8x28xbf16>
    %c19 = arith.constant 19 : index
    %c0_116 = arith.constant 0 : index
    %c0_117 = arith.constant 0 : index
    %187 = vector.load %arg5[%c19, %c0_116, %c0_117] : memref<21x28x512xbf16, #tpu.memory_space<vmem>>, vector<1x28x512xbf16>
    %188 = vector.shape_cast %187 : vector<1x28x512xbf16> to vector<28x512xbf16>
    %cst_118 = arith.constant dense<0.000000e+00> : vector<8x512xf32>
    %189 = tpu.matmul %186, %188, %cst_118 {dimension_numbers = #tpu.dot_dimension_numbers<[1], [0], [0], [1], [0, 0, 1, 1], [], []>} : vector<8x28xbf16>, vector<28x512xbf16>, vector<8x512xf32> -> vector<8x512xf32>
    %190 = arith.addf %185, %189 : vector<8x512xf32>
    %191 = vector.extract_strided_slice %23 {offsets = [20, 0], sizes = [8, 28], strides = [1, 1]} : vector<28x28xbf16> to vector<8x28xbf16>
    %c20 = arith.constant 20 : index
    %c0_119 = arith.constant 0 : index
    %c0_120 = arith.constant 0 : index
    %192 = vector.load %arg5[%c20, %c0_119, %c0_120] : memref<21x28x512xbf16, #tpu.memory_space<vmem>>, vector<1x28x512xbf16>
    %193 = vector.shape_cast %192 : vector<1x28x512xbf16> to vector<28x512xbf16>
    %cst_121 = arith.constant dense<0.000000e+00> : vector<8x512xf32>
    %194 = tpu.matmul %191, %193, %cst_121 {dimension_numbers = #tpu.dot_dimension_numbers<[1], [0], [0], [1], [0, 0, 1, 1], [], []>} : vector<8x28xbf16>, vector<28x512xbf16>, vector<8x512xf32> -> vector<8x512xf32>
    %195 = arith.addf %190, %194 : vector<8x512xf32>
    %196 = arith.addf %89, %195 : vector<8x512xf32>
    %c0_122 = arith.constant 0 : index
    %c0_123 = arith.constant 0 : index
    %c0_124 = arith.constant 0 : index
    %197 = vector.load %arg6[%c0_122, %c0_123, %c0_124] : memref<2x8x512xf32, #tpu.memory_space<vmem>>, vector<1x8x512xf32>
    %198 = vector.shape_cast %197 : vector<1x8x512xf32> to vector<8x512xf32>
    %199 = vector.shape_cast %196 : vector<8x512xf32> to vector<1x8x512xf32>
    tpu.vector_store %arg6[%c0_122, %c0_123, %c0_124], %199 {strides = array<i32>} : memref<2x8x512xf32, #tpu.memory_space<vmem>>, vector<1x8x512xf32>,
    %cst_125 = arith.constant dense<0.000000e+00> : vector<512xf32>
    %200 = vector.multi_reduction <add>, %196, %cst_125 [0] : vector<8x512xf32> to vector<512xf32>
    %201 = vector.shape_cast %200 : vector<512xf32> to vector<1x512xf32>
    %202 = arith.addf %20, %201 : vector<1x512xf32>
    %203 = arith.mulf %196, %196 : vector<8x512xf32>
    %cst_126 = arith.constant dense<0.000000e+00> : vector<512xf32>
    %204 = vector.multi_reduction <add>, %203, %cst_126 [0] : vector<8x512xf32> to vector<512xf32>
    %205 = vector.shape_cast %204 : vector<512xf32> to vector<1x512xf32>
    %206 = arith.addf %21, %205 : vector<1x512xf32>
    %c1_127 = arith.constant 1 : index
    %c0_128 = arith.constant 0 : index
    %c0_129 = arith.constant 0 : index
    %207 = vector.load %arg1[%c1_127, %c0_128, %c0_129] : memref<2x28x28xbf16, #tpu.memory_space<vmem>>, vector<1x28x28xbf16>
    %208 = vector.shape_cast %207 : vector<1x28x28xbf16> to vector<28x28xbf16>
    %cst_130 = arith.constant 0.000000e+00 : f32
    %209 = vector.broadcast %cst_130 : f32 to vector<24x768xf32>
    %210 = vector.extract_strided_slice %208 {offsets = [0, 0], sizes = [24, 28], strides = [1, 1]} : vector<28x28xbf16> to vector<24x28xbf16>
    %c0_131 = arith.constant 0 : index
    %c0_132 = arith.constant 0 : index
    %c0_133 = arith.constant 0 : index
    %211 = vector.load %arg2[%c0_131, %c0_132, %c0_133] : memref<5x28x768xbf16, #tpu.memory_space<vmem>>, vector<1x28x768xbf16>
    %212 = vector.shape_cast %211 : vector<1x28x768xbf16> to vector<28x768xbf16>
    %cst_134 = arith.constant dense<0.000000e+00> : vector<24x768xf32>
    %213 = tpu.matmul %210, %212, %cst_134 {dimension_numbers = #tpu.dot_dimension_numbers<[1], [0], [0], [1], [0, 0, 1, 1], [], []>} : vector<24x28xbf16>, vector<28x768xbf16>, vector<24x768xf32> -> vector<24x768xf32>
    %214 = arith.addf %209, %213 : vector<24x768xf32>
    %215 = vector.extract_strided_slice %208 {offsets = [1, 0], sizes = [24, 28], strides = [1, 1]} : vector<28x28xbf16> to vector<24x28xbf16>
    %c1_135 = arith.constant 1 : index
    %c0_136 = arith.constant 0 : index
    %c0_137 = arith.constant 0 : index
    %216 = vector.load %arg2[%c1_135, %c0_136, %c0_137] : memref<5x28x768xbf16, #tpu.memory_space<vmem>>, vector<1x28x768xbf16>
    %217 = vector.shape_cast %216 : vector<1x28x768xbf16> to vector<28x768xbf16>
    %cst_138 = arith.constant dense<0.000000e+00> : vector<24x768xf32>
    %218 = tpu.matmul %215, %217, %cst_138 {dimension_numbers = #tpu.dot_dimension_numbers<[1], [0], [0], [1], [0, 0, 1, 1], [], []>} : vector<24x28xbf16>, vector<28x768xbf16>, vector<24x768xf32> -> vector<24x768xf32>
    %219 = arith.addf %214, %218 : vector<24x768xf32>
    %220 = vector.extract_strided_slice %208 {offsets = [2, 0], sizes = [24, 28], strides = [1, 1]} : vector<28x28xbf16> to vector<24x28xbf16>
    %c2_139 = arith.constant 2 : index
    %c0_140 = arith.constant 0 : index
    %c0_141 = arith.constant 0 : index
    %221 = vector.load %arg2[%c2_139, %c0_140, %c0_141] : memref<5x28x768xbf16, #tpu.memory_space<vmem>>, vector<1x28x768xbf16>
    %222 = vector.shape_cast %221 : vector<1x28x768xbf16> to vector<28x768xbf16>
    %cst_142 = arith.constant dense<0.000000e+00> : vector<24x768xf32>
    %223 = tpu.matmul %220, %222, %cst_142 {dimension_numbers = #tpu.dot_dimension_numbers<[1], [0], [0], [1], [0, 0, 1, 1], [], []>} : vector<24x28xbf16>, vector<28x768xbf16>, vector<24x768xf32> -> vector<24x768xf32>
    %224 = arith.addf %219, %223 : vector<24x768xf32>
    %225 = vector.extract_strided_slice %208 {offsets = [3, 0], sizes = [24, 28], strides = [1, 1]} : vector<28x28xbf16> to vector<24x28xbf16>
    %c3_143 = arith.constant 3 : index
    %c0_144 = arith.constant 0 : index
    %c0_145 = arith.constant 0 : index
    %226 = vector.load %arg2[%c3_143, %c0_144, %c0_145] : memref<5x28x768xbf16, #tpu.memory_space<vmem>>, vector<1x28x768xbf16>
    %227 = vector.shape_cast %226 : vector<1x28x768xbf16> to vector<28x768xbf16>
    %cst_146 = arith.constant dense<0.000000e+00> : vector<24x768xf32>
    %228 = tpu.matmul %225, %227, %cst_146 {dimension_numbers = #tpu.dot_dimension_numbers<[1], [0], [0], [1], [0, 0, 1, 1], [], []>} : vector<24x28xbf16>, vector<28x768xbf16>, vector<24x768xf32> -> vector<24x768xf32>
    %229 = arith.addf %224, %228 : vector<24x768xf32>
    %230 = vector.extract_strided_slice %208 {offsets = [4, 0], sizes = [24, 28], strides = [1, 1]} : vector<28x28xbf16> to vector<24x28xbf16>
    %c4_147 = arith.constant 4 : index
    %c0_148 = arith.constant 0 : index
    %c0_149 = arith.constant 0 : index
    %231 = vector.load %arg2[%c4_147, %c0_148, %c0_149] : memref<5x28x768xbf16, #tpu.memory_space<vmem>>, vector<1x28x768xbf16>
    %232 = vector.shape_cast %231 : vector<1x28x768xbf16> to vector<28x768xbf16>
    %cst_150 = arith.constant dense<0.000000e+00> : vector<24x768xf32>
    %233 = tpu.matmul %230, %232, %cst_150 {dimension_numbers = #tpu.dot_dimension_numbers<[1], [0], [0], [1], [0, 0, 1, 1], [], []>} : vector<24x28xbf16>, vector<28x768xbf16>, vector<24x768xf32> -> vector<24x768xf32>
    %234 = arith.addf %229, %233 : vector<24x768xf32>
    %235 = vector.broadcast %0 : vector<1x768xf32> to vector<24x768xf32>
    %236 = arith.mulf %234, %235 : vector<24x768xf32>
    %237 = vector.broadcast %1 : vector<1x768xf32> to vector<24x768xf32>
    %238 = arith.addf %236, %237 : vector<24x768xf32>
    %cst_151 = arith.constant 0.000000e+00 : f32
    %239 = vector.broadcast %cst_151 : f32 to vector<24x768xf32>
    %240 = arith.maximumf %238, %239 : vector<24x768xf32>
    %241 = arith.truncf %240 : vector<24x768xf32> to vector<24x768xbf16>
    %cst_152 = arith.constant dense<0.000000e+00> : vector<12x768xf32>
    %242 = tpu.matmul %10, %241, %cst_152 {dimension_numbers = #tpu.dot_dimension_numbers<[1], [0], [0], [1], [0, 0, 1, 1], [], []>} : vector<12x24xbf16>, vector<24x768xbf16>, vector<12x768xf32> -> vector<12x768xf32>
    %cst_153 = arith.constant dense<0.000000e+00> : vector<12x768xf32>
    %243 = tpu.matmul %19, %241, %cst_153 {dimension_numbers = #tpu.dot_dimension_numbers<[1], [0], [0], [1], [0, 0, 1, 1], [], []>} : vector<12x24xbf16>, vector<24x768xbf16>, vector<12x768xf32> -> vector<12x768xf32>
    %244 = arith.maximumf %242, %243 : vector<12x768xf32>
    %245 = vector.extract_strided_slice %244 {offsets = [0, 0], sizes = [12, 384], strides = [1, 1]} : vector<12x768xf32> to vector<12x384xf32>
    %246 = vector.extract_strided_slice %244 {offsets = [0, 384], sizes = [12, 384], strides = [1, 1]} : vector<12x768xf32> to vector<12x384xf32>
    %247 = arith.maximumf %245, %246 : vector<12x384xf32>
    %248 = arith.truncf %247 : vector<12x384xf32> to vector<12x384xbf16>
    %cst_154 = arith.constant 0.000000e+00 : f32
    %249 = vector.broadcast %cst_154 : f32 to vector<8x512xf32>
    %250 = vector.extract_strided_slice %248 {offsets = [0, 0], sizes = [8, 384], strides = [1, 1]} : vector<12x384xbf16> to vector<8x384xbf16>
    %c0_155 = arith.constant 0 : index
    %c0_156 = arith.constant 0 : index
    %c0_157 = arith.constant 0 : index
    %251 = vector.load %arg4[%c0_155, %c0_156, %c0_157] : memref<5x384x512xbf16, #tpu.memory_space<vmem>>, vector<1x384x512xbf16>
    %252 = vector.shape_cast %251 : vector<1x384x512xbf16> to vector<384x512xbf16>
    %cst_158 = arith.constant dense<0.000000e+00> : vector<8x512xf32>
    %253 = tpu.matmul %250, %252, %cst_158 {dimension_numbers = #tpu.dot_dimension_numbers<[1], [0], [0], [1], [0, 0, 1, 1], [], []>} : vector<8x384xbf16>, vector<384x512xbf16>, vector<8x512xf32> -> vector<8x512xf32>
    %254 = arith.addf %249, %253 : vector<8x512xf32>
    %255 = vector.extract_strided_slice %248 {offsets = [1, 0], sizes = [8, 384], strides = [1, 1]} : vector<12x384xbf16> to vector<8x384xbf16>
    %c1_159 = arith.constant 1 : index
    %c0_160 = arith.constant 0 : index
    %c0_161 = arith.constant 0 : index
    %256 = vector.load %arg4[%c1_159, %c0_160, %c0_161] : memref<5x384x512xbf16, #tpu.memory_space<vmem>>, vector<1x384x512xbf16>
    %257 = vector.shape_cast %256 : vector<1x384x512xbf16> to vector<384x512xbf16>
    %cst_162 = arith.constant dense<0.000000e+00> : vector<8x512xf32>
    %258 = tpu.matmul %255, %257, %cst_162 {dimension_numbers = #tpu.dot_dimension_numbers<[1], [0], [0], [1], [0, 0, 1, 1], [], []>} : vector<8x384xbf16>, vector<384x512xbf16>, vector<8x512xf32> -> vector<8x512xf32>
    %259 = arith.addf %254, %258 : vector<8x512xf32>
    %260 = vector.extract_strided_slice %248 {offsets = [2, 0], sizes = [8, 384], strides = [1, 1]} : vector<12x384xbf16> to vector<8x384xbf16>
    %c2_163 = arith.constant 2 : index
    %c0_164 = arith.constant 0 : index
    %c0_165 = arith.constant 0 : index
    %261 = vector.load %arg4[%c2_163, %c0_164, %c0_165] : memref<5x384x512xbf16, #tpu.memory_space<vmem>>, vector<1x384x512xbf16>
    %262 = vector.shape_cast %261 : vector<1x384x512xbf16> to vector<384x512xbf16>
    %cst_166 = arith.constant dense<0.000000e+00> : vector<8x512xf32>
    %263 = tpu.matmul %260, %262, %cst_166 {dimension_numbers = #tpu.dot_dimension_numbers<[1], [0], [0], [1], [0, 0, 1, 1], [], []>} : vector<8x384xbf16>, vector<384x512xbf16>, vector<8x512xf32> -> vector<8x512xf32>
    %264 = arith.addf %259, %263 : vector<8x512xf32>
    %265 = vector.extract_strided_slice %248 {offsets = [3, 0], sizes = [8, 384], strides = [1, 1]} : vector<12x384xbf16> to vector<8x384xbf16>
    %c3_167 = arith.constant 3 : index
    %c0_168 = arith.constant 0 : index
    %c0_169 = arith.constant 0 : index
    %266 = vector.load %arg4[%c3_167, %c0_168, %c0_169] : memref<5x384x512xbf16, #tpu.memory_space<vmem>>, vector<1x384x512xbf16>
    %267 = vector.shape_cast %266 : vector<1x384x512xbf16> to vector<384x512xbf16>
    %cst_170 = arith.constant dense<0.000000e+00> : vector<8x512xf32>
    %268 = tpu.matmul %265, %267, %cst_170 {dimension_numbers = #tpu.dot_dimension_numbers<[1], [0], [0], [1], [0, 0, 1, 1], [], []>} : vector<8x384xbf16>, vector<384x512xbf16>, vector<8x512xf32> -> vector<8x512xf32>
    %269 = arith.addf %264, %268 : vector<8x512xf32>
    %270 = vector.extract_strided_slice %248 {offsets = [4, 0], sizes = [8, 384], strides = [1, 1]} : vector<12x384xbf16> to vector<8x384xbf16>
    %c4_171 = arith.constant 4 : index
    %c0_172 = arith.constant 0 : index
    %c0_173 = arith.constant 0 : index
    %271 = vector.load %arg4[%c4_171, %c0_172, %c0_173] : memref<5x384x512xbf16, #tpu.memory_space<vmem>>, vector<1x384x512xbf16>
    %272 = vector.shape_cast %271 : vector<1x384x512xbf16> to vector<384x512xbf16>
    %cst_174 = arith.constant dense<0.000000e+00> : vector<8x512xf32>
    %273 = tpu.matmul %270, %272, %cst_174 {dimension_numbers = #tpu.dot_dimension_numbers<[1], [0], [0], [1], [0, 0, 1, 1], [], []>} : vector<8x384xbf16>, vector<384x512xbf16>, vector<8x512xf32> -> vector<8x512xf32>
    %274 = arith.addf %269, %273 : vector<8x512xf32>
    %cst_175 = arith.constant 0.000000e+00 : f32
    %275 = vector.broadcast %cst_175 : f32 to vector<8x512xf32>
    %276 = vector.extract_strided_slice %208 {offsets = [0, 0], sizes = [8, 28], strides = [1, 1]} : vector<28x28xbf16> to vector<8x28xbf16>
    %c0_176 = arith.constant 0 : index
    %c0_177 = arith.constant 0 : index
    %c0_178 = arith.constant 0 : index
    %277 = vector.load %arg5[%c0_176, %c0_177, %c0_178] : memref<21x28x512xbf16, #tpu.memory_space<vmem>>, vector<1x28x512xbf16>
    %278 = vector.shape_cast %277 : vector<1x28x512xbf16> to vector<28x512xbf16>
    %cst_179 = arith.constant dense<0.000000e+00> : vector<8x512xf32>
    %279 = tpu.matmul %276, %278, %cst_179 {dimension_numbers = #tpu.dot_dimension_numbers<[1], [0], [0], [1], [0, 0, 1, 1], [], []>} : vector<8x28xbf16>, vector<28x512xbf16>, vector<8x512xf32> -> vector<8x512xf32>
    %280 = arith.addf %275, %279 : vector<8x512xf32>
    %281 = vector.extract_strided_slice %208 {offsets = [1, 0], sizes = [8, 28], strides = [1, 1]} : vector<28x28xbf16> to vector<8x28xbf16>
    %c1_180 = arith.constant 1 : index
    %c0_181 = arith.constant 0 : index
    %c0_182 = arith.constant 0 : index
    %282 = vector.load %arg5[%c1_180, %c0_181, %c0_182] : memref<21x28x512xbf16, #tpu.memory_space<vmem>>, vector<1x28x512xbf16>
    %283 = vector.shape_cast %282 : vector<1x28x512xbf16> to vector<28x512xbf16>
    %cst_183 = arith.constant dense<0.000000e+00> : vector<8x512xf32>
    %284 = tpu.matmul %281, %283, %cst_183 {dimension_numbers = #tpu.dot_dimension_numbers<[1], [0], [0], [1], [0, 0, 1, 1], [], []>} : vector<8x28xbf16>, vector<28x512xbf16>, vector<8x512xf32> -> vector<8x512xf32>
    %285 = arith.addf %280, %284 : vector<8x512xf32>
    %286 = vector.extract_strided_slice %208 {offsets = [2, 0], sizes = [8, 28], strides = [1, 1]} : vector<28x28xbf16> to vector<8x28xbf16>
    %c2_184 = arith.constant 2 : index
    %c0_185 = arith.constant 0 : index
    %c0_186 = arith.constant 0 : index
    %287 = vector.load %arg5[%c2_184, %c0_185, %c0_186] : memref<21x28x512xbf16, #tpu.memory_space<vmem>>, vector<1x28x512xbf16>
    %288 = vector.shape_cast %287 : vector<1x28x512xbf16> to vector<28x512xbf16>
    %cst_187 = arith.constant dense<0.000000e+00> : vector<8x512xf32>
    %289 = tpu.matmul %286, %288, %cst_187 {dimension_numbers = #tpu.dot_dimension_numbers<[1], [0], [0], [1], [0, 0, 1, 1], [], []>} : vector<8x28xbf16>, vector<28x512xbf16>, vector<8x512xf32> -> vector<8x512xf32>
    %290 = arith.addf %285, %289 : vector<8x512xf32>
    %291 = vector.extract_strided_slice %208 {offsets = [3, 0], sizes = [8, 28], strides = [1, 1]} : vector<28x28xbf16> to vector<8x28xbf16>
    %c3_188 = arith.constant 3 : index
    %c0_189 = arith.constant 0 : index
    %c0_190 = arith.constant 0 : index
    %292 = vector.load %arg5[%c3_188, %c0_189, %c0_190] : memref<21x28x512xbf16, #tpu.memory_space<vmem>>, vector<1x28x512xbf16>
    %293 = vector.shape_cast %292 : vector<1x28x512xbf16> to vector<28x512xbf16>
    %cst_191 = arith.constant dense<0.000000e+00> : vector<8x512xf32>
    %294 = tpu.matmul %291, %293, %cst_191 {dimension_numbers = #tpu.dot_dimension_numbers<[1], [0], [0], [1], [0, 0, 1, 1], [], []>} : vector<8x28xbf16>, vector<28x512xbf16>, vector<8x512xf32> -> vector<8x512xf32>
    %295 = arith.addf %290, %294 : vector<8x512xf32>
    %296 = vector.extract_strided_slice %208 {offsets = [4, 0], sizes = [8, 28], strides = [1, 1]} : vector<28x28xbf16> to vector<8x28xbf16>
    %c4_192 = arith.constant 4 : index
    %c0_193 = arith.constant 0 : index
    %c0_194 = arith.constant 0 : index
    %297 = vector.load %arg5[%c4_192, %c0_193, %c0_194] : memref<21x28x512xbf16, #tpu.memory_space<vmem>>, vector<1x28x512xbf16>
    %298 = vector.shape_cast %297 : vector<1x28x512xbf16> to vector<28x512xbf16>
    %cst_195 = arith.constant dense<0.000000e+00> : vector<8x512xf32>
    %299 = tpu.matmul %296, %298, %cst_195 {dimension_numbers = #tpu.dot_dimension_numbers<[1], [0], [0], [1], [0, 0, 1, 1], [], []>} : vector<8x28xbf16>, vector<28x512xbf16>, vector<8x512xf32> -> vector<8x512xf32>
    %300 = arith.addf %295, %299 : vector<8x512xf32>
    %301 = vector.extract_strided_slice %208 {offsets = [5, 0], sizes = [8, 28], strides = [1, 1]} : vector<28x28xbf16> to vector<8x28xbf16>
    %c5_196 = arith.constant 5 : index
    %c0_197 = arith.constant 0 : index
    %c0_198 = arith.constant 0 : index
    %302 = vector.load %arg5[%c5_196, %c0_197, %c0_198] : memref<21x28x512xbf16, #tpu.memory_space<vmem>>, vector<1x28x512xbf16>
    %303 = vector.shape_cast %302 : vector<1x28x512xbf16> to vector<28x512xbf16>
    %cst_199 = arith.constant dense<0.000000e+00> : vector<8x512xf32>
    %304 = tpu.matmul %301, %303, %cst_199 {dimension_numbers = #tpu.dot_dimension_numbers<[1], [0], [0], [1], [0, 0, 1, 1], [], []>} : vector<8x28xbf16>, vector<28x512xbf16>, vector<8x512xf32> -> vector<8x512xf32>
    %305 = arith.addf %300, %304 : vector<8x512xf32>
    %306 = vector.extract_strided_slice %208 {offsets = [6, 0], sizes = [8, 28], strides = [1, 1]} : vector<28x28xbf16> to vector<8x28xbf16>
    %c6_200 = arith.constant 6 : index
    %c0_201 = arith.constant 0 : index
    %c0_202 = arith.constant 0 : index
    %307 = vector.load %arg5[%c6_200, %c0_201, %c0_202] : memref<21x28x512xbf16, #tpu.memory_space<vmem>>, vector<1x28x512xbf16>
    %308 = vector.shape_cast %307 : vector<1x28x512xbf16> to vector<28x512xbf16>
    %cst_203 = arith.constant dense<0.000000e+00> : vector<8x512xf32>
    %309 = tpu.matmul %306, %308, %cst_203 {dimension_numbers = #tpu.dot_dimension_numbers<[1], [0], [0], [1], [0, 0, 1, 1], [], []>} : vector<8x28xbf16>, vector<28x512xbf16>, vector<8x512xf32> -> vector<8x512xf32>
    %310 = arith.addf %305, %309 : vector<8x512xf32>
    %311 = vector.extract_strided_slice %208 {offsets = [7, 0], sizes = [8, 28], strides = [1, 1]} : vector<28x28xbf16> to vector<8x28xbf16>
    %c7_204 = arith.constant 7 : index
    %c0_205 = arith.constant 0 : index
    %c0_206 = arith.constant 0 : index
    %312 = vector.load %arg5[%c7_204, %c0_205, %c0_206] : memref<21x28x512xbf16, #tpu.memory_space<vmem>>, vector<1x28x512xbf16>
    %313 = vector.shape_cast %312 : vector<1x28x512xbf16> to vector<28x512xbf16>
    %cst_207 = arith.constant dense<0.000000e+00> : vector<8x512xf32>
    %314 = tpu.matmul %311, %313, %cst_207 {dimension_numbers = #tpu.dot_dimension_numbers<[1], [0], [0], [1], [0, 0, 1, 1], [], []>} : vector<8x28xbf16>, vector<28x512xbf16>, vector<8x512xf32> -> vector<8x512xf32>
    %315 = arith.addf %310, %314 : vector<8x512xf32>
    %316 = vector.extract_strided_slice %208 {offsets = [8, 0], sizes = [8, 28], strides = [1, 1]} : vector<28x28xbf16> to vector<8x28xbf16>
    %c8_208 = arith.constant 8 : index
    %c0_209 = arith.constant 0 : index
    %c0_210 = arith.constant 0 : index
    %317 = vector.load %arg5[%c8_208, %c0_209, %c0_210] : memref<21x28x512xbf16, #tpu.memory_space<vmem>>, vector<1x28x512xbf16>
    %318 = vector.shape_cast %317 : vector<1x28x512xbf16> to vector<28x512xbf16>
    %cst_211 = arith.constant dense<0.000000e+00> : vector<8x512xf32>
    %319 = tpu.matmul %316, %318, %cst_211 {dimension_numbers = #tpu.dot_dimension_numbers<[1], [0], [0], [1], [0, 0, 1, 1], [], []>} : vector<8x28xbf16>, vector<28x512xbf16>, vector<8x512xf32> -> vector<8x512xf32>
    %320 = arith.addf %315, %319 : vector<8x512xf32>
    %321 = vector.extract_strided_slice %208 {offsets = [9, 0], sizes = [8, 28], strides = [1, 1]} : vector<28x28xbf16> to vector<8x28xbf16>
    %c9_212 = arith.constant 9 : index
    %c0_213 = arith.constant 0 : index
    %c0_214 = arith.constant 0 : index
    %322 = vector.load %arg5[%c9_212, %c0_213, %c0_214] : memref<21x28x512xbf16, #tpu.memory_space<vmem>>, vector<1x28x512xbf16>
    %323 = vector.shape_cast %322 : vector<1x28x512xbf16> to vector<28x512xbf16>
    %cst_215 = arith.constant dense<0.000000e+00> : vector<8x512xf32>
    %324 = tpu.matmul %321, %323, %cst_215 {dimension_numbers = #tpu.dot_dimension_numbers<[1], [0], [0], [1], [0, 0, 1, 1], [], []>} : vector<8x28xbf16>, vector<28x512xbf16>, vector<8x512xf32> -> vector<8x512xf32>
    %325 = arith.addf %320, %324 : vector<8x512xf32>
    %326 = vector.extract_strided_slice %208 {offsets = [10, 0], sizes = [8, 28], strides = [1, 1]} : vector<28x28xbf16> to vector<8x28xbf16>
    %c10_216 = arith.constant 10 : index
    %c0_217 = arith.constant 0 : index
    %c0_218 = arith.constant 0 : index
    %327 = vector.load %arg5[%c10_216, %c0_217, %c0_218] : memref<21x28x512xbf16, #tpu.memory_space<vmem>>, vector<1x28x512xbf16>
    %328 = vector.shape_cast %327 : vector<1x28x512xbf16> to vector<28x512xbf16>
    %cst_219 = arith.constant dense<0.000000e+00> : vector<8x512xf32>
    %329 = tpu.matmul %326, %328, %cst_219 {dimension_numbers = #tpu.dot_dimension_numbers<[1], [0], [0], [1], [0, 0, 1, 1], [], []>} : vector<8x28xbf16>, vector<28x512xbf16>, vector<8x512xf32> -> vector<8x512xf32>
    %330 = arith.addf %325, %329 : vector<8x512xf32>
    %331 = vector.extract_strided_slice %208 {offsets = [11, 0], sizes = [8, 28], strides = [1, 1]} : vector<28x28xbf16> to vector<8x28xbf16>
    %c11_220 = arith.constant 11 : index
    %c0_221 = arith.constant 0 : index
    %c0_222 = arith.constant 0 : index
    %332 = vector.load %arg5[%c11_220, %c0_221, %c0_222] : memref<21x28x512xbf16, #tpu.memory_space<vmem>>, vector<1x28x512xbf16>
    %333 = vector.shape_cast %332 : vector<1x28x512xbf16> to vector<28x512xbf16>
    %cst_223 = arith.constant dense<0.000000e+00> : vector<8x512xf32>
    %334 = tpu.matmul %331, %333, %cst_223 {dimension_numbers = #tpu.dot_dimension_numbers<[1], [0], [0], [1], [0, 0, 1, 1], [], []>} : vector<8x28xbf16>, vector<28x512xbf16>, vector<8x512xf32> -> vector<8x512xf32>
    %335 = arith.addf %330, %334 : vector<8x512xf32>
    %336 = vector.extract_strided_slice %208 {offsets = [12, 0], sizes = [8, 28], strides = [1, 1]} : vector<28x28xbf16> to vector<8x28xbf16>
    %c12_224 = arith.constant 12 : index
    %c0_225 = arith.constant 0 : index
    %c0_226 = arith.constant 0 : index
    %337 = vector.load %arg5[%c12_224, %c0_225, %c0_226] : memref<21x28x512xbf16, #tpu.memory_space<vmem>>, vector<1x28x512xbf16>
    %338 = vector.shape_cast %337 : vector<1x28x512xbf16> to vector<28x512xbf16>
    %cst_227 = arith.constant dense<0.000000e+00> : vector<8x512xf32>
    %339 = tpu.matmul %336, %338, %cst_227 {dimension_numbers = #tpu.dot_dimension_numbers<[1], [0], [0], [1], [0, 0, 1, 1], [], []>} : vector<8x28xbf16>, vector<28x512xbf16>, vector<8x512xf32> -> vector<8x512xf32>
    %340 = arith.addf %335, %339 : vector<8x512xf32>
    %341 = vector.extract_strided_slice %208 {offsets = [13, 0], sizes = [8, 28], strides = [1, 1]} : vector<28x28xbf16> to vector<8x28xbf16>
    %c13_228 = arith.constant 13 : index
    %c0_229 = arith.constant 0 : index
    %c0_230 = arith.constant 0 : index
    %342 = vector.load %arg5[%c13_228, %c0_229, %c0_230] : memref<21x28x512xbf16, #tpu.memory_space<vmem>>, vector<1x28x512xbf16>
    %343 = vector.shape_cast %342 : vector<1x28x512xbf16> to vector<28x512xbf16>
    %cst_231 = arith.constant dense<0.000000e+00> : vector<8x512xf32>
    %344 = tpu.matmul %341, %343, %cst_231 {dimension_numbers = #tpu.dot_dimension_numbers<[1], [0], [0], [1], [0, 0, 1, 1], [], []>} : vector<8x28xbf16>, vector<28x512xbf16>, vector<8x512xf32> -> vector<8x512xf32>
    %345 = arith.addf %340, %344 : vector<8x512xf32>
    %346 = vector.extract_strided_slice %208 {offsets = [14, 0], sizes = [8, 28], strides = [1, 1]} : vector<28x28xbf16> to vector<8x28xbf16>
    %c14_232 = arith.constant 14 : index
    %c0_233 = arith.constant 0 : index
    %c0_234 = arith.constant 0 : index
    %347 = vector.load %arg5[%c14_232, %c0_233, %c0_234] : memref<21x28x512xbf16, #tpu.memory_space<vmem>>, vector<1x28x512xbf16>
    %348 = vector.shape_cast %347 : vector<1x28x512xbf16> to vector<28x512xbf16>
    %cst_235 = arith.constant dense<0.000000e+00> : vector<8x512xf32>
    %349 = tpu.matmul %346, %348, %cst_235 {dimension_numbers = #tpu.dot_dimension_numbers<[1], [0], [0], [1], [0, 0, 1, 1], [], []>} : vector<8x28xbf16>, vector<28x512xbf16>, vector<8x512xf32> -> vector<8x512xf32>
    %350 = arith.addf %345, %349 : vector<8x512xf32>
    %351 = vector.extract_strided_slice %208 {offsets = [15, 0], sizes = [8, 28], strides = [1, 1]} : vector<28x28xbf16> to vector<8x28xbf16>
    %c15_236 = arith.constant 15 : index
    %c0_237 = arith.constant 0 : index
    %c0_238 = arith.constant 0 : index
    %352 = vector.load %arg5[%c15_236, %c0_237, %c0_238] : memref<21x28x512xbf16, #tpu.memory_space<vmem>>, vector<1x28x512xbf16>
    %353 = vector.shape_cast %352 : vector<1x28x512xbf16> to vector<28x512xbf16>
    %cst_239 = arith.constant dense<0.000000e+00> : vector<8x512xf32>
    %354 = tpu.matmul %351, %353, %cst_239 {dimension_numbers = #tpu.dot_dimension_numbers<[1], [0], [0], [1], [0, 0, 1, 1], [], []>} : vector<8x28xbf16>, vector<28x512xbf16>, vector<8x512xf32> -> vector<8x512xf32>
    %355 = arith.addf %350, %354 : vector<8x512xf32>
    %356 = vector.extract_strided_slice %208 {offsets = [16, 0], sizes = [8, 28], strides = [1, 1]} : vector<28x28xbf16> to vector<8x28xbf16>
    %c16_240 = arith.constant 16 : index
    %c0_241 = arith.constant 0 : index
    %c0_242 = arith.constant 0 : index
    %357 = vector.load %arg5[%c16_240, %c0_241, %c0_242] : memref<21x28x512xbf16, #tpu.memory_space<vmem>>, vector<1x28x512xbf16>
    %358 = vector.shape_cast %357 : vector<1x28x512xbf16> to vector<28x512xbf16>
    %cst_243 = arith.constant dense<0.000000e+00> : vector<8x512xf32>
    %359 = tpu.matmul %356, %358, %cst_243 {dimension_numbers = #tpu.dot_dimension_numbers<[1], [0], [0], [1], [0, 0, 1, 1], [], []>} : vector<8x28xbf16>, vector<28x512xbf16>, vector<8x512xf32> -> vector<8x512xf32>
    %360 = arith.addf %355, %359 : vector<8x512xf32>
    %361 = vector.extract_strided_slice %208 {offsets = [17, 0], sizes = [8, 28], strides = [1, 1]} : vector<28x28xbf16> to vector<8x28xbf16>
    %c17_244 = arith.constant 17 : index
    %c0_245 = arith.constant 0 : index
    %c0_246 = arith.constant 0 : index
    %362 = vector.load %arg5[%c17_244, %c0_245, %c0_246] : memref<21x28x512xbf16, #tpu.memory_space<vmem>>, vector<1x28x512xbf16>
    %363 = vector.shape_cast %362 : vector<1x28x512xbf16> to vector<28x512xbf16>
    %cst_247 = arith.constant dense<0.000000e+00> : vector<8x512xf32>
    %364 = tpu.matmul %361, %363, %cst_247 {dimension_numbers = #tpu.dot_dimension_numbers<[1], [0], [0], [1], [0, 0, 1, 1], [], []>} : vector<8x28xbf16>, vector<28x512xbf16>, vector<8x512xf32> -> vector<8x512xf32>
    %365 = arith.addf %360, %364 : vector<8x512xf32>
    %366 = vector.extract_strided_slice %208 {offsets = [18, 0], sizes = [8, 28], strides = [1, 1]} : vector<28x28xbf16> to vector<8x28xbf16>
    %c18_248 = arith.constant 18 : index
    %c0_249 = arith.constant 0 : index
    %c0_250 = arith.constant 0 : index
    %367 = vector.load %arg5[%c18_248, %c0_249, %c0_250] : memref<21x28x512xbf16, #tpu.memory_space<vmem>>, vector<1x28x512xbf16>
    %368 = vector.shape_cast %367 : vector<1x28x512xbf16> to vector<28x512xbf16>
    %cst_251 = arith.constant dense<0.000000e+00> : vector<8x512xf32>
    %369 = tpu.matmul %366, %368, %cst_251 {dimension_numbers = #tpu.dot_dimension_numbers<[1], [0], [0], [1], [0, 0, 1, 1], [], []>} : vector<8x28xbf16>, vector<28x512xbf16>, vector<8x512xf32> -> vector<8x512xf32>
    %370 = arith.addf %365, %369 : vector<8x512xf32>
    %371 = vector.extract_strided_slice %208 {offsets = [19, 0], sizes = [8, 28], strides = [1, 1]} : vector<28x28xbf16> to vector<8x28xbf16>
    %c19_252 = arith.constant 19 : index
    %c0_253 = arith.constant 0 : index
    %c0_254 = arith.constant 0 : index
    %372 = vector.load %arg5[%c19_252, %c0_253, %c0_254] : memref<21x28x512xbf16, #tpu.memory_space<vmem>>, vector<1x28x512xbf16>
    %373 = vector.shape_cast %372 : vector<1x28x512xbf16> to vector<28x512xbf16>
    %cst_255 = arith.constant dense<0.000000e+00> : vector<8x512xf32>
    %374 = tpu.matmul %371, %373, %cst_255 {dimension_numbers = #tpu.dot_dimension_numbers<[1], [0], [0], [1], [0, 0, 1, 1], [], []>} : vector<8x28xbf16>, vector<28x512xbf16>, vector<8x512xf32> -> vector<8x512xf32>
    %375 = arith.addf %370, %374 : vector<8x512xf32>
    %376 = vector.extract_strided_slice %208 {offsets = [20, 0], sizes = [8, 28], strides = [1, 1]} : vector<28x28xbf16> to vector<8x28xbf16>
    %c20_256 = arith.constant 20 : index
    %c0_257 = arith.constant 0 : index
    %c0_258 = arith.constant 0 : index
    %377 = vector.load %arg5[%c20_256, %c0_257, %c0_258] : memref<21x28x512xbf16, #tpu.memory_space<vmem>>, vector<1x28x512xbf16>
    %378 = vector.shape_cast %377 : vector<1x28x512xbf16> to vector<28x512xbf16>
    %cst_259 = arith.constant dense<0.000000e+00> : vector<8x512xf32>
    %379 = tpu.matmul %376, %378, %cst_259 {dimension_numbers = #tpu.dot_dimension_numbers<[1], [0], [0], [1], [0, 0, 1, 1], [], []>} : vector<8x28xbf16>, vector<28x512xbf16>, vector<8x512xf32> -> vector<8x512xf32>
    %380 = arith.addf %375, %379 : vector<8x512xf32>
    %381 = arith.addf %274, %380 : vector<8x512xf32>
    %c1_260 = arith.constant 1 : index
    %c0_261 = arith.constant 0 : index
    %c0_262 = arith.constant 0 : index
    %382 = vector.load %arg6[%c1_260, %c0_261, %c0_262] : memref<2x8x512xf32, #tpu.memory_space<vmem>>, vector<1x8x512xf32>
    %383 = vector.shape_cast %382 : vector<1x8x512xf32> to vector<8x512xf32>
    %384 = vector.shape_cast %381 : vector<8x512xf32> to vector<1x8x512xf32>
    tpu.vector_store %arg6[%c1_260, %c0_261, %c0_262], %384 {strides = array<i32>} : memref<2x8x512xf32, #tpu.memory_space<vmem>>, vector<1x8x512xf32>,
    %cst_263 = arith.constant dense<0.000000e+00> : vector<512xf32>
    %385 = vector.multi_reduction <add>, %381, %cst_263 [0] : vector<8x512xf32> to vector<512xf32>
    %386 = vector.shape_cast %385 : vector<512xf32> to vector<1x512xf32>
    %387 = arith.addf %202, %386 : vector<1x512xf32>
    %388 = arith.mulf %381, %381 : vector<8x512xf32>
    %cst_264 = arith.constant dense<0.000000e+00> : vector<512xf32>
    %389 = vector.multi_reduction <add>, %388, %cst_264 [0] : vector<8x512xf32> to vector<512xf32>
    %390 = vector.shape_cast %389 : vector<512xf32> to vector<1x512xf32>
    %391 = arith.addf %206, %390 : vector<1x512xf32>
    %392 = tpu.concatenate %387, %391 in 0 : vector<1x512xf32>, vector<1x512xf32> -> vector<2x512xf32>
    %c0_265 = arith.constant 0 : index
    %c0_266 = arith.constant 0 : index
    %c0_267 = arith.constant 0 : index
    %393 = vector.load %arg7[%c0_265, %c0_266, %c0_267] : memref<1x2x512xf32, #tpu.memory_space<vmem>>, vector<1x2x512xf32>
    %394 = vector.shape_cast %393 : vector<1x2x512xf32> to vector<2x512xf32>
    %395 = vector.shape_cast %392 : vector<2x512xf32> to vector<1x2x512xf32>
    tpu.vector_store %arg7[%c0_265, %c0_266, %c0_267], %395 {strides = array<i32>} : memref<1x2x512xf32, #tpu.memory_space<vmem>>, vector<1x2x512xf32>,
    return
  }
  func.func @transform_0(%arg0: i32) -> (i32, i32, i32) {
    %c0_i32 = arith.constant 0 : i32
    %c0_i32_0 = arith.constant 0 : i32
    %c0_i32_1 = arith.constant 0 : i32
    return %arg0, %c0_i32, %c0_i32_0 : i32, i32, i32
  }
  func.func @transform_1(%arg0: i32) -> (i32, i32, i32) {
    %c0_i32 = arith.constant 0 : i32
    %c0_i32_0 = arith.constant 0 : i32
    %c0_i32_1 = arith.constant 0 : i32
    %c0_i32_2 = arith.constant 0 : i32
    return %c0_i32, %c0_i32_0, %c0_i32_1 : i32, i32, i32
  }
  func.func @transform_2(%arg0: i32) -> (i32, i32) {
    %c0_i32 = arith.constant 0 : i32
    %c0_i32_0 = arith.constant 0 : i32
    %c0_i32_1 = arith.constant 0 : i32
    return %c0_i32, %c0_i32_0 : i32, i32
  }
  func.func @transform_3(%arg0: i32) -> (i32, i32, i32) {
    %c0_i32 = arith.constant 0 : i32
    %c0_i32_0 = arith.constant 0 : i32
    %c0_i32_1 = arith.constant 0 : i32
    %c0_i32_2 = arith.constant 0 : i32
    return %c0_i32, %c0_i32_0, %c0_i32_1 : i32, i32, i32
  }
  func.func @transform_4(%arg0: i32) -> (i32, i32, i32) {
    %c0_i32 = arith.constant 0 : i32
    %c0_i32_0 = arith.constant 0 : i32
    %c0_i32_1 = arith.constant 0 : i32
    %c0_i32_2 = arith.constant 0 : i32
    return %c0_i32, %c0_i32_0, %c0_i32_1 : i32, i32, i32
  }
  func.func @transform_5(%arg0: i32) -> (i32, i32, i32) {
    %c0_i32 = arith.constant 0 : i32
    %c0_i32_0 = arith.constant 0 : i32
    %c0_i32_1 = arith.constant 0 : i32
    return %arg0, %c0_i32, %c0_i32_0 : i32, i32, i32
  }
  func.func @transform_6(%arg0: i32) -> (i32, i32, i32) {
    %c0_i32 = arith.constant 0 : i32
    %c0_i32_0 = arith.constant 0 : i32
    %c0_i32_1 = arith.constant 0 : i32
    return %arg0, %c0_i32, %c0_i32_0 : i32, i32, i32
  }
}

module attributes {stable_mosaic.version = 11 : i64} {
  func.func @_head_kernel(%arg0: i32, %arg1: memref<2x8x512xf32, #tpu.memory_space<vmem>>, %arg2: memref<2x512xf32, #tpu.memory_space<vmem>>, %arg3: memref<4x256x128xbf16, #tpu.memory_space<vmem>>, %arg4: memref<1x128xf32, #tpu.memory_space<vmem>>, %arg5: memref<2x1x128xf32, #tpu.memory_space<vmem>>) attributes {dimension_semantics = [#tpu.dimension_semantics<parallel>], iteration_bounds = array<i64: 1>, scalar_prefetch = 0 : i64, scratch_operands = 0 : i64, tpu.core_type = #tpu.core_type<tc>, window_params = [{transform_indices = @transform_0, window_bounds = array<i64: 2, 8, 512>}, {pipeline_mode = #tpu.pipeline_mode<synchronous>, transform_indices = @transform_1, window_bounds = array<i64: 2, 512>}, {pipeline_mode = #tpu.pipeline_mode<synchronous>, transform_indices = @transform_2, window_bounds = array<i64: 4, 256, 128>}, {pipeline_mode = #tpu.pipeline_mode<synchronous>, transform_indices = @transform_3, window_bounds = array<i64: 1, 128>}, {transform_indices = @transform_4, window_bounds = array<i64: 2, 1, 128>}]} {
    %c0 = arith.constant 0 : index
    %c0_0 = arith.constant 0 : index
    %0 = vector.load %arg2[%c0, %c0_0] : memref<2x512xf32, #tpu.memory_space<vmem>>, vector<1x512xf32>
    %c1 = arith.constant 1 : index
    %c0_1 = arith.constant 0 : index
    %1 = vector.load %arg2[%c1, %c0_1] : memref<2x512xf32, #tpu.memory_space<vmem>>, vector<1x512xf32>
    %2 = tpu.iota {dimensions = array<i32: 0>} : vector<4x8xi32>
    %3 = tpu.iota {dimensions = array<i32: 1>} : vector<4x8xi32>
    %c2_i32 = arith.constant 2 : i32
    %4 = vector.broadcast %c2_i32 : i32 to vector<4x8xi32>
    %5 = arith.muli %4, %2 : vector<4x8xi32>
    %6 = arith.cmpi eq, %3, %5 : vector<4x8xi32>
    %cst = arith.constant 1.000000e+00 : f32
    %cst_2 = arith.constant 0.000000e+00 : f32
    %7 = vector.broadcast %cst : f32 to vector<4x8xf32>
    %8 = vector.broadcast %cst_2 : f32 to vector<4x8xf32>
    %9 = arith.select %6, %7, %8 : vector<4x8xi1>, vector<4x8xf32>
    %10 = arith.truncf %9 : vector<4x8xf32> to vector<4x8xbf16>
    %c2_i32_3 = arith.constant 2 : i32
    %11 = vector.broadcast %c2_i32_3 : i32 to vector<4x8xi32>
    %12 = arith.muli %11, %2 : vector<4x8xi32>
    %c1_i32 = arith.constant 1 : i32
    %13 = vector.broadcast %c1_i32 : i32 to vector<4x8xi32>
    %14 = arith.addi %12, %13 : vector<4x8xi32>
    %15 = arith.cmpi eq, %3, %14 : vector<4x8xi32>
    %cst_4 = arith.constant 1.000000e+00 : f32
    %cst_5 = arith.constant 0.000000e+00 : f32
    %16 = vector.broadcast %cst_4 : f32 to vector<4x8xf32>
    %17 = vector.broadcast %cst_5 : f32 to vector<4x8xf32>
    %18 = arith.select %15, %16, %17 : vector<4x8xi1>, vector<4x8xf32>
    %19 = arith.truncf %18 : vector<4x8xf32> to vector<4x8xbf16>
    %c0_6 = arith.constant 0 : index
    %c0_7 = arith.constant 0 : index
    %20 = vector.load %arg4[%c0_6, %c0_7] : memref<1x128xf32, #tpu.memory_space<vmem>>, vector<1x128xf32>
    %c0_8 = arith.constant 0 : index
    %c0_9 = arith.constant 0 : index
    %c0_10 = arith.constant 0 : index
    %21 = vector.load %arg1[%c0_8, %c0_9, %c0_10] : memref<2x8x512xf32, #tpu.memory_space<vmem>>, vector<1x8x512xf32>
    %22 = vector.shape_cast %21 : vector<1x8x512xf32> to vector<8x512xf32>
    %23 = vector.broadcast %0 : vector<1x512xf32> to vector<8x512xf32>
    %24 = arith.mulf %22, %23 : vector<8x512xf32>
    %25 = vector.broadcast %1 : vector<1x512xf32> to vector<8x512xf32>
    %26 = arith.addf %24, %25 : vector<8x512xf32>
    %cst_11 = arith.constant 0.000000e+00 : f32
    %27 = vector.broadcast %cst_11 : f32 to vector<8x512xf32>
    %28 = arith.maximumf %26, %27 : vector<8x512xf32>
    %29 = vector.extract_strided_slice %28 {offsets = [0, 0], sizes = [8, 256], strides = [1, 1]} : vector<8x512xf32> to vector<8x256xf32>
    %30 = vector.extract_strided_slice %28 {offsets = [0, 256], sizes = [8, 256], strides = [1, 1]} : vector<8x512xf32> to vector<8x256xf32>
    %31 = arith.maximumf %29, %30 : vector<8x256xf32>
    %32 = arith.truncf %31 : vector<8x256xf32> to vector<8x256xbf16>
    %cst_12 = arith.constant dense<0.000000e+00> : vector<4x256xf32>
    %33 = tpu.matmul %10, %32, %cst_12 {dimension_numbers = #tpu.dot_dimension_numbers<[1], [0], [0], [1], [0, 0, 1, 1], [], []>} : vector<4x8xbf16>, vector<8x256xbf16>, vector<4x256xf32> -> vector<4x256xf32>
    %cst_13 = arith.constant dense<0.000000e+00> : vector<4x256xf32>
    %34 = tpu.matmul %19, %32, %cst_13 {dimension_numbers = #tpu.dot_dimension_numbers<[1], [0], [0], [1], [0, 0, 1, 1], [], []>} : vector<4x8xbf16>, vector<8x256xbf16>, vector<4x256xf32> -> vector<4x256xf32>
    %35 = arith.maximumf %33, %34 : vector<4x256xf32>
    %36 = arith.truncf %35 : vector<4x256xf32> to vector<4x256xbf16>
    %37 = vector.extract_strided_slice %36 {offsets = [0, 0], sizes = [1, 256], strides = [1, 1]} : vector<4x256xbf16> to vector<1x256xbf16>
    %c0_14 = arith.constant 0 : index
    %c0_15 = arith.constant 0 : index
    %c0_16 = arith.constant 0 : index
    %38 = vector.load %arg3[%c0_14, %c0_15, %c0_16] : memref<4x256x128xbf16, #tpu.memory_space<vmem>>, vector<1x256x128xbf16>
    %39 = vector.shape_cast %38 : vector<1x256x128xbf16> to vector<256x128xbf16>
    %cst_17 = arith.constant dense<0.000000e+00> : vector<1x128xf32>
    %40 = tpu.matmul %37, %39, %cst_17 {dimension_numbers = #tpu.dot_dimension_numbers<[1], [0], [0], [1], [0, 0, 1, 1], [], []>} : vector<1x256xbf16>, vector<256x128xbf16>, vector<1x128xf32> -> vector<1x128xf32>
    %41 = arith.addf %20, %40 : vector<1x128xf32>
    %42 = vector.extract_strided_slice %36 {offsets = [1, 0], sizes = [1, 256], strides = [1, 1]} : vector<4x256xbf16> to vector<1x256xbf16>
    %c1_18 = arith.constant 1 : index
    %c0_19 = arith.constant 0 : index
    %c0_20 = arith.constant 0 : index
    %43 = vector.load %arg3[%c1_18, %c0_19, %c0_20] : memref<4x256x128xbf16, #tpu.memory_space<vmem>>, vector<1x256x128xbf16>
    %44 = vector.shape_cast %43 : vector<1x256x128xbf16> to vector<256x128xbf16>
    %cst_21 = arith.constant dense<0.000000e+00> : vector<1x128xf32>
    %45 = tpu.matmul %42, %44, %cst_21 {dimension_numbers = #tpu.dot_dimension_numbers<[1], [0], [0], [1], [0, 0, 1, 1], [], []>} : vector<1x256xbf16>, vector<256x128xbf16>, vector<1x128xf32> -> vector<1x128xf32>
    %46 = arith.addf %41, %45 : vector<1x128xf32>
    %47 = vector.extract_strided_slice %36 {offsets = [2, 0], sizes = [1, 256], strides = [1, 1]} : vector<4x256xbf16> to vector<1x256xbf16>
    %c2 = arith.constant 2 : index
    %c0_22 = arith.constant 0 : index
    %c0_23 = arith.constant 0 : index
    %48 = vector.load %arg3[%c2, %c0_22, %c0_23] : memref<4x256x128xbf16, #tpu.memory_space<vmem>>, vector<1x256x128xbf16>
    %49 = vector.shape_cast %48 : vector<1x256x128xbf16> to vector<256x128xbf16>
    %cst_24 = arith.constant dense<0.000000e+00> : vector<1x128xf32>
    %50 = tpu.matmul %47, %49, %cst_24 {dimension_numbers = #tpu.dot_dimension_numbers<[1], [0], [0], [1], [0, 0, 1, 1], [], []>} : vector<1x256xbf16>, vector<256x128xbf16>, vector<1x128xf32> -> vector<1x128xf32>
    %51 = arith.addf %46, %50 : vector<1x128xf32>
    %52 = vector.extract_strided_slice %36 {offsets = [3, 0], sizes = [1, 256], strides = [1, 1]} : vector<4x256xbf16> to vector<1x256xbf16>
    %c3 = arith.constant 3 : index
    %c0_25 = arith.constant 0 : index
    %c0_26 = arith.constant 0 : index
    %53 = vector.load %arg3[%c3, %c0_25, %c0_26] : memref<4x256x128xbf16, #tpu.memory_space<vmem>>, vector<1x256x128xbf16>
    %54 = vector.shape_cast %53 : vector<1x256x128xbf16> to vector<256x128xbf16>
    %cst_27 = arith.constant dense<0.000000e+00> : vector<1x128xf32>
    %55 = tpu.matmul %52, %54, %cst_27 {dimension_numbers = #tpu.dot_dimension_numbers<[1], [0], [0], [1], [0, 0, 1, 1], [], []>} : vector<1x256xbf16>, vector<256x128xbf16>, vector<1x128xf32> -> vector<1x128xf32>
    %56 = arith.addf %51, %55 : vector<1x128xf32>
    %c0_28 = arith.constant 0 : index
    %c0_29 = arith.constant 0 : index
    %c0_30 = arith.constant 0 : index
    %57 = vector.load %arg5[%c0_28, %c0_29, %c0_30] : memref<2x1x128xf32, #tpu.memory_space<vmem>>, vector<1x1x128xf32>
    %58 = vector.shape_cast %57 : vector<1x1x128xf32> to vector<1x128xf32>
    %59 = vector.shape_cast %56 : vector<1x128xf32> to vector<1x1x128xf32>
    tpu.vector_store %arg5[%c0_28, %c0_29, %c0_30], %59 {strides = array<i32>} : memref<2x1x128xf32, #tpu.memory_space<vmem>>, vector<1x1x128xf32>,
    %c1_31 = arith.constant 1 : index
    %c0_32 = arith.constant 0 : index
    %c0_33 = arith.constant 0 : index
    %60 = vector.load %arg1[%c1_31, %c0_32, %c0_33] : memref<2x8x512xf32, #tpu.memory_space<vmem>>, vector<1x8x512xf32>
    %61 = vector.shape_cast %60 : vector<1x8x512xf32> to vector<8x512xf32>
    %62 = vector.broadcast %0 : vector<1x512xf32> to vector<8x512xf32>
    %63 = arith.mulf %61, %62 : vector<8x512xf32>
    %64 = vector.broadcast %1 : vector<1x512xf32> to vector<8x512xf32>
    %65 = arith.addf %63, %64 : vector<8x512xf32>
    %cst_34 = arith.constant 0.000000e+00 : f32
    %66 = vector.broadcast %cst_34 : f32 to vector<8x512xf32>
    %67 = arith.maximumf %65, %66 : vector<8x512xf32>
    %68 = vector.extract_strided_slice %67 {offsets = [0, 0], sizes = [8, 256], strides = [1, 1]} : vector<8x512xf32> to vector<8x256xf32>
    %69 = vector.extract_strided_slice %67 {offsets = [0, 256], sizes = [8, 256], strides = [1, 1]} : vector<8x512xf32> to vector<8x256xf32>
    %70 = arith.maximumf %68, %69 : vector<8x256xf32>
    %71 = arith.truncf %70 : vector<8x256xf32> to vector<8x256xbf16>
    %cst_35 = arith.constant dense<0.000000e+00> : vector<4x256xf32>
    %72 = tpu.matmul %10, %71, %cst_35 {dimension_numbers = #tpu.dot_dimension_numbers<[1], [0], [0], [1], [0, 0, 1, 1], [], []>} : vector<4x8xbf16>, vector<8x256xbf16>, vector<4x256xf32> -> vector<4x256xf32>
    %cst_36 = arith.constant dense<0.000000e+00> : vector<4x256xf32>
    %73 = tpu.matmul %19, %71, %cst_36 {dimension_numbers = #tpu.dot_dimension_numbers<[1], [0], [0], [1], [0, 0, 1, 1], [], []>} : vector<4x8xbf16>, vector<8x256xbf16>, vector<4x256xf32> -> vector<4x256xf32>
    %74 = arith.maximumf %72, %73 : vector<4x256xf32>
    %75 = arith.truncf %74 : vector<4x256xf32> to vector<4x256xbf16>
    %76 = vector.extract_strided_slice %75 {offsets = [0, 0], sizes = [1, 256], strides = [1, 1]} : vector<4x256xbf16> to vector<1x256xbf16>
    %c0_37 = arith.constant 0 : index
    %c0_38 = arith.constant 0 : index
    %c0_39 = arith.constant 0 : index
    %77 = vector.load %arg3[%c0_37, %c0_38, %c0_39] : memref<4x256x128xbf16, #tpu.memory_space<vmem>>, vector<1x256x128xbf16>
    %78 = vector.shape_cast %77 : vector<1x256x128xbf16> to vector<256x128xbf16>
    %cst_40 = arith.constant dense<0.000000e+00> : vector<1x128xf32>
    %79 = tpu.matmul %76, %78, %cst_40 {dimension_numbers = #tpu.dot_dimension_numbers<[1], [0], [0], [1], [0, 0, 1, 1], [], []>} : vector<1x256xbf16>, vector<256x128xbf16>, vector<1x128xf32> -> vector<1x128xf32>
    %80 = arith.addf %20, %79 : vector<1x128xf32>
    %81 = vector.extract_strided_slice %75 {offsets = [1, 0], sizes = [1, 256], strides = [1, 1]} : vector<4x256xbf16> to vector<1x256xbf16>
    %c1_41 = arith.constant 1 : index
    %c0_42 = arith.constant 0 : index
    %c0_43 = arith.constant 0 : index
    %82 = vector.load %arg3[%c1_41, %c0_42, %c0_43] : memref<4x256x128xbf16, #tpu.memory_space<vmem>>, vector<1x256x128xbf16>
    %83 = vector.shape_cast %82 : vector<1x256x128xbf16> to vector<256x128xbf16>
    %cst_44 = arith.constant dense<0.000000e+00> : vector<1x128xf32>
    %84 = tpu.matmul %81, %83, %cst_44 {dimension_numbers = #tpu.dot_dimension_numbers<[1], [0], [0], [1], [0, 0, 1, 1], [], []>} : vector<1x256xbf16>, vector<256x128xbf16>, vector<1x128xf32> -> vector<1x128xf32>
    %85 = arith.addf %80, %84 : vector<1x128xf32>
    %86 = vector.extract_strided_slice %75 {offsets = [2, 0], sizes = [1, 256], strides = [1, 1]} : vector<4x256xbf16> to vector<1x256xbf16>
    %c2_45 = arith.constant 2 : index
    %c0_46 = arith.constant 0 : index
    %c0_47 = arith.constant 0 : index
    %87 = vector.load %arg3[%c2_45, %c0_46, %c0_47] : memref<4x256x128xbf16, #tpu.memory_space<vmem>>, vector<1x256x128xbf16>
    %88 = vector.shape_cast %87 : vector<1x256x128xbf16> to vector<256x128xbf16>
    %cst_48 = arith.constant dense<0.000000e+00> : vector<1x128xf32>
    %89 = tpu.matmul %86, %88, %cst_48 {dimension_numbers = #tpu.dot_dimension_numbers<[1], [0], [0], [1], [0, 0, 1, 1], [], []>} : vector<1x256xbf16>, vector<256x128xbf16>, vector<1x128xf32> -> vector<1x128xf32>
    %90 = arith.addf %85, %89 : vector<1x128xf32>
    %91 = vector.extract_strided_slice %75 {offsets = [3, 0], sizes = [1, 256], strides = [1, 1]} : vector<4x256xbf16> to vector<1x256xbf16>
    %c3_49 = arith.constant 3 : index
    %c0_50 = arith.constant 0 : index
    %c0_51 = arith.constant 0 : index
    %92 = vector.load %arg3[%c3_49, %c0_50, %c0_51] : memref<4x256x128xbf16, #tpu.memory_space<vmem>>, vector<1x256x128xbf16>
    %93 = vector.shape_cast %92 : vector<1x256x128xbf16> to vector<256x128xbf16>
    %cst_52 = arith.constant dense<0.000000e+00> : vector<1x128xf32>
    %94 = tpu.matmul %91, %93, %cst_52 {dimension_numbers = #tpu.dot_dimension_numbers<[1], [0], [0], [1], [0, 0, 1, 1], [], []>} : vector<1x256xbf16>, vector<256x128xbf16>, vector<1x128xf32> -> vector<1x128xf32>
    %95 = arith.addf %90, %94 : vector<1x128xf32>
    %c1_53 = arith.constant 1 : index
    %c0_54 = arith.constant 0 : index
    %c0_55 = arith.constant 0 : index
    %96 = vector.load %arg5[%c1_53, %c0_54, %c0_55] : memref<2x1x128xf32, #tpu.memory_space<vmem>>, vector<1x1x128xf32>
    %97 = vector.shape_cast %96 : vector<1x1x128xf32> to vector<1x128xf32>
    %98 = vector.shape_cast %95 : vector<1x128xf32> to vector<1x1x128xf32>
    tpu.vector_store %arg5[%c1_53, %c0_54, %c0_55], %98 {strides = array<i32>} : memref<2x1x128xf32, #tpu.memory_space<vmem>>, vector<1x1x128xf32>,
    return
  }
  func.func @transform_0(%arg0: i32) -> (i32, i32, i32) {
    %c0_i32 = arith.constant 0 : i32
    %c0_i32_0 = arith.constant 0 : i32
    %c0_i32_1 = arith.constant 0 : i32
    return %arg0, %c0_i32, %c0_i32_0 : i32, i32, i32
  }
  func.func @transform_1(%arg0: i32) -> (i32, i32) {
    %c0_i32 = arith.constant 0 : i32
    %c0_i32_0 = arith.constant 0 : i32
    %c0_i32_1 = arith.constant 0 : i32
    return %c0_i32, %c0_i32_0 : i32, i32
  }
  func.func @transform_2(%arg0: i32) -> (i32, i32, i32) {
    %c0_i32 = arith.constant 0 : i32
    %c0_i32_0 = arith.constant 0 : i32
    %c0_i32_1 = arith.constant 0 : i32
    %c0_i32_2 = arith.constant 0 : i32
    return %c0_i32, %c0_i32_0, %c0_i32_1 : i32, i32, i32
  }
  func.func @transform_3(%arg0: i32) -> (i32, i32) {
    %c0_i32 = arith.constant 0 : i32
    %c0_i32_0 = arith.constant 0 : i32
    %c0_i32_1 = arith.constant 0 : i32
    return %c0_i32, %c0_i32_0 : i32, i32
  }
  func.func @transform_4(%arg0: i32) -> (i32, i32, i32) {
    %c0_i32 = arith.constant 0 : i32
    %c0_i32_0 = arith.constant 0 : i32
    %c0_i32_1 = arith.constant 0 : i32
    return %arg0, %c0_i32, %c0_i32_0 : i32, i32, i32
  }
}

</mosaic_0001>

<bundles_post_ra>
// kernel: tile.29
= control target key start
LH: loop header
LB: loop body
LE: loop exit
PB: predicated region body
PF: predicated region fallthrough
CT: control target
= control target key end

     0   :  { %s77_s8 = smov 96   ;;  %vm3_vm0 = vcmask 261120   ;;  %s79_s15 = smov 64   ;;  %vm10_vm1 = vcmask 1048320   ;;  %vm17_vm2 = vcmask 785920   ;;  %vm24_vm3 = vcmask 523520   ;;  %s120_s0 = inlined_call_operand.vmem [shape: f32[24,32], index: 0, kind: input, shape index: {}]   ;;  %s121_s1 = inlined_call_operand.vmem [shape: f32[1,768], index: 1, kind: output, shape index: {}]  }
   0x1   :  { %v66_v0 = vld [vmem:[%s120_s0 + $0x3] ss:$4 sm:$0x3f]   ;;  %v67_v1 = vld [vmem:[%s120_s0 + $0x2] ss:$4 sm:$0x3f]  }
   0x2   :  { %8 = vrot.lane.b32.xlu0 %v66_v0, %s77_s8  ;;  %v68_v2 = vld [vmem:[%s120_s0 + $0x1] ss:$4 sm:$0x3f]   ;;  %v2_v3 = vld [vmem:[%s120_s0] ss:$4 sm:$0x3f]  }
   0x3   :  { %s78_s0 = smov 32   ;;  %4 = vst.msk [vmem:[#allocation0] ss:$8 sm:$0xf] %vm3_vm0, %v2_v3  }
   0x4   :  { %22 = vrot.lane.b32.xlu1 %v68_v2, %s78_s0  ;;  %5 = vst.msk [vmem:[#allocation0] ss:$8 sm:$0x30] %vm3_vm0, %v2_v3  }
   0x6   :  { %15 = vrot.lane.b32.xlu0 %v67_v1, %s79_s15 }
  0x74   :  { %v9_v4 = vpop.permute.xlu0 %8  }
  0x75   :  { %11 = vst.msk [vmem:[#allocation0] ss:$8 sm:$0xf] %vm10_vm1, %v9_v4   ;;  %12 = vst.msk [vmem:[#allocation0] ss:$8 sm:$0x30] %vm10_vm1, %v9_v4  }
  0x76   :  { %v23_v5 = vpop.permute.xlu1 %22  }
  0x78   :  { %v16_v6 = vpop.permute.xlu0 %15  }
  0x79   :  { %18 = vst.msk [vmem:[#allocation0] ss:$8 sm:$0xf] %vm17_vm2, %v16_v6   ;;  %19 = vst.msk [vmem:[#allocation0] ss:$8 sm:$0x30] %vm17_vm2, %v16_v6  }
  0x7a   :  { %25 = vst.msk [vmem:[#allocation0] ss:$8 sm:$0xf] %vm24_vm3, %v23_v5   ;;  %26 = vst.msk [vmem:[#allocation0] ss:$8 sm:$0x30] %vm24_vm3, %v23_v5  }
  0x81   :  { %v30_v7 = vld [vmem:[#allocation0] sm:$0x1]  ;;  %v34_v8 = vld [vmem:[#allocation0 + $0x8] sm:$0x1]  ;;  %v39_v9 = vld [vmem:[#allocation0 + $0x10] sm:$0x1] }
  0x82   :  { %32 = vst [vmem:[%s121_s1] sm:$0x1] %v30_v7  ;;  %69 = vst [vmem:[%s121_s1 + $0x1] sm:$0x1] %v34_v8  ;;  %v45_v10 = vld [vmem:[#allocation0 + $0x18] sm:$0x1] }
  0x83   :  { %70 = vst [vmem:[%s121_s1 + $0x2] sm:$0x1] %v39_v9  ;;  %v51_v11 = vld [vmem:[#allocation0 + $0x20] sm:$0x1]  ;;  %v57_v12 = vld [vmem:[#allocation0 + $0x28] sm:$0x1] }
  0x84   :  { %71 = vst [vmem:[%s121_s1 + $0x3] sm:$0x1] %v45_v10  ;;  %72 = vst [vmem:[%s121_s1 + $0x4] sm:$0x1] %v51_v11 }
  0x85   :  { %73 = vst [vmem:[%s121_s1 + $0x5] sm:$0x1] %v57_v12 }

// kernel: tile.27
= control target key start
LH: loop header
LB: loop body
LE: loop exit
PB: predicated region body
PF: predicated region fallthrough
CT: control target
= control target key end

     0   :  { %s34_s0 = inlined_call_operand.vmem [shape: f32[32], index: 0, kind: input, shape index: {}]   ;;  %s35_s1 = inlined_call_operand.vmem [shape: f32[24,32], index: 1, kind: output, shape index: {}]  }
   0x1   :  { %v4_v0 = vld [vmem:[%s34_s0] ss:$0 sm:$0xff] }
   0x2   :  { %5 = vst [vmem:[%s35_s1] sm:$0xff] %v4_v0  ;;  %10 = vst [vmem:[%s35_s1 + $0x8] sm:$0xff] %v4_v0 }
   0x3   :  { %11 = vst [vmem:[%s35_s1 + $0x10] sm:$0xff] %v4_v0 }

// kernel: tile.37
= control target key start
LH: loop header
LB: loop body
LE: loop exit
PB: predicated region body
PF: predicated region fallthrough
CT: control target
= control target key end

     0   :  { %s22_s0 = inlined_call_operand.vmem [shape: f32[64], index: 0, kind: input, shape index: {}]   ;;  %s23_s1 = inlined_call_operand.vmem [shape: f32[8,64], index: 1, kind: output, shape index: {}]  }
   0x1   :  { %v4_v0 = vld [vmem:[%s22_s0] ss:$0 sm:$0xff] }
   0x2   :  { %5 = vst [vmem:[%s23_s1] sm:$0xff] %v4_v0 }

// kernel: tile.39
= control target key start
LH: loop header
LB: loop body
LE: loop exit
PB: predicated region body
PF: predicated region fallthrough
CT: control target
= control target key end

     0   :  { %vm3_vm0 = vcmask 523264   ;;  %s41_s8 = smov 64   ;;  %vm9_vm1 = vcmask 1048064   ;;  %s70_s0 = inlined_call_operand.vmem [shape: f32[8,64], index: 0, kind: input, shape index: {}]   ;;  %s71_s1 = inlined_call_operand.vmem [shape: f32[1,512], index: 1, kind: output, shape index: {}]  }
   0x1   :  { %v36_v0 = vld [vmem:[%s70_s0 + $0x1] ss:$2 sm:$0xf]   ;;  %v2_v1 = vld [vmem:[%s70_s0] ss:$2 sm:$0xf]  }
   0x2   :  { %7 = vrot.lane.b32.xlu0 %v36_v0, %s41_s8  ;;  %4 = vst.msk [vmem:[#allocation0] ss:$8 sm:$0xf] %vm3_vm0, %v2_v1  }
  0x74   :  { %v8_v2 = vpop.permute.xlu0 %7  }
  0x75   :  { %10 = vst.msk [vmem:[#allocation0] ss:$8 sm:$0xf] %vm9_vm1, %v8_v2  }
  0x7c   :  { %v14_v3 = vld [vmem:[#allocation0] sm:$0x1]  ;;  %v18_v4 = vld [vmem:[#allocation0 + $0x8] sm:$0x1]  ;;  %v23_v5 = vld [vmem:[#allocation0 + $0x10] sm:$0x1] }
  0x7d   :  { %16 = vst [vmem:[%s71_s1] sm:$0x1] %v14_v3  ;;  %37 = vst [vmem:[%s71_s1 + $0x1] sm:$0x1] %v18_v4  ;;  %v29_v6 = vld [vmem:[#allocation0 + $0x18] sm:$0x1] }
  0x7e   :  { %38 = vst [vmem:[%s71_s1 + $0x2] sm:$0x1] %v23_v5  ;;  %39 = vst [vmem:[%s71_s1 + $0x3] sm:$0x1] %v29_v6 }

// kernel: cnn_forward.3
= control target key start
LH: loop header
LB: loop body
LE: loop exit
PB: predicated region body
PF: predicated region fallthrough
CT: control target
= control target key end

     0   :  { %7 = vsyncpa [#allocation3], 0  ;;  %s3016_s9 = smov [#allocation2]   ;;  %s3358_s0 = inlined_call_operand.vmem [shape: bf16[2,28,28], index: 0, kind: input, shape index: {}]   ;;  %s3359_s1 = inlined_call_operand.hbm [shape: bf16[5,28,768], index: 1, kind: input, shape index: {}]   ;;  %s3360_s2 = inlined_call_operand.vmem [shape: f32[1,2,768], index: 2, kind: output, shape index: {}]  }
   0x1   :  { %s15_s10 = sshll.u32 %s3016_s9, 4  ;;  %s2992_s13 = scalar_lea.hbm %s3359_s1, 7680  ;;  %s16_s10 = int_to_ptr.vmem [resolvable:$true] %s15_s10 }
   0x2   :  { %p2993_p0 = scmp.ne.s32.totalorder %s3359_s1, %s2992_s13  ;;  %p2996_p1 = scmp.lt.u32.totalorder %s2992_s13, %s3359_s1 }
   0x4   :  { %p2998_p2 = pnand %p2996_p1, %p2993_p0 }
   0x6   :  { %3001 = shalt.err (!%p2998_p2)
}
   0x7   :  { %s3002_s18 = scalar_lea.vmem %s16_s10, 7680  ;;  %p3007_p4 = scmp.lt.s32.totalorder %s16_s10, %s16_s10 }
   0x8   :  { %p3003_p3 = scmp.ne.s32.totalorder %s16_s10, %s3002_s18  ;;  %p3008_p5 = scmp.lt.s32.totalorder %s3002_s18, %s3002_s18 }
   0xa   :  { %p3009_p6 = por %p3008_p5, %p3007_p4 }
   0xc   :  { %p3010_p7 = pnand %p3009_p6, %p3003_p3 }
   0xe   :  { %3013 = shalt.err (!%p3010_p7)
}
   0xf   :  { %s3017_s19 = smov 384   ;;  %s3018_s20 = smov 24  }
  0x10   :  { %21 = dma.hbm_to_vmem [thread:$0]  %s3359_s1, 7680, %s16_s10, [#allocation3], %s3017_s19, %s3017_s19, %s3018_s20  }
  0x11   :  { %3014 = dma.done.wait [#allocation3], 7680  }
  0x12   :  { %3015 = vsyncadd [#allocation3], 4294959616  ;;  %v3019_v0 = vmov 0   ;;  %v2896_v1 = vld [vmem:[#allocation2 + $0x64] ss:$24 sps:$4 sm:$0xff]   ;;  %vm142_vm0 = vcmask 1045504  }
  0x13   :  { %193 = vmatprep.mubr.bf16.mxu0 %v3019_v0  ;;  %1541 = vmatprep.mubr.bf16.mxu1 %v3019_v0  ;;  %v2898_v2 = vld [vmem:[#allocation2 + $0x60] ss:$24 sps:$4 sm:$0xff]   ;;  %v2899_v3 = vld [vmem:[#allocation2 + $0x94] ss:$24 sps:$4 sm:$0x3f]   ;;  %vm135_vm2 = vcmask 228352  }
  0x14   :  { %161 = vmatprep.subr.bf16.mxu0 %v2896_v1  ;;  %1509 = vmatprep.subr.bf16.mxu1 %v2896_v1  ;;  %v2901_v4 = vld [vmem:[#allocation2 + $0x90] ss:$24 sps:$4 sm:$0x3f]   ;;  %v29_v7 = vld [vmem:[%s3358_s0 + $0xc] sm:$0x3]  ;;  %v3064_v8 = vld [vmem:[%s3358_s0] sm:$0xff]  }
  0x15   :  { %162 = vmatpush1.bf16.msra.mxu0 %v2898_v2  ;;  %1510 = vmatpush1.bf16.msra.mxu1 %v2898_v2  ;;  %v3053_v5 = vld [vmem:[%s3358_s0 + $0x8] sm:$0xf]  ;;  %v144_v6 = vsel %vm142_vm0, %v2901_v4, 0  ;;  %vm65_vm1 = vsmask.f32 7424  ;;  %v67_v11 = vshrl.u32 %v3064_v8, 16 }
  0x16   :  { %2552 = vmatprep.subr.msk.bf16.mxu0 %vm142_vm0, %v2899_v3  ;;  %2652 = vmatprep.subr.msk.bf16.mxu1 %vm142_vm0, %v2899_v3  ;;  %v3067_v9 = vcombine.low %v3053_v5, %v29_v7  ;;  %v2906_v10 = vld [vmem:[#allocation2 + $0x6c] ss:$24 sps:$4 sm:$0xff]   ;;  %v69_v12 = vshll.u32 %v3064_v8, 16  ;;  %v3075_v14 = vld [vmem:[%s3358_s0 + $0x18] sm:$0xf]  ;;  %v3083_v16 = vld [vmem:[%s3358_s0 + $0x10] sm:$0xff]   ;;  %v2561_v4 = vcombine.low %v3053_v5, %v3053_v5 }
  0x17   :  { %v2649_v15 = vld [vmem:[%s3358_s0 + $0x1c] sm:$0x3]  ;;  %v2904_v18 = vld [vmem:[#allocation2 + $0x68] ss:$24 sps:$4 sm:$0xff]   ;;  %v1489_v21 = vshrl.u32 %v3083_v16, 16  ;;  %v1491_v22 = vshll.u32 %v3083_v16, 16 }
  0x18   :  { %v74_v13 = vshll.u32 %v3067_v9, 16  ;;  %v71_v17 = vrot.slane %v69_v12, 1  ;;  %v3086_v19 = vcombine.low %v3075_v14, %v2649_v15  ;;  %v2909_v26 = vld [vmem:[#allocation2 + $0x9c] ss:$24 sps:$4 sm:$0x3f]   ;;  %v78_v28 = vshrl.u32 %v3067_v9, 16 }
  0x19   :  { %164 = vmatpush1.bf16.msra.mxu0 %v144_v6  ;;  %1512 = vmatpush1.bf16.msra.mxu1 %v144_v6  ;;  %v1493_v27 = vrot.slane %v1491_v22, 1  ;;  %v2911_v30 = vld [vmem:[#allocation2 + $0x98] ss:$24 sps:$4 sm:$0x3f]   ;;  %v2914_v41 = vld [vmem:[#allocation2 + $0x74] ss:$24 sps:$4 sm:$0xff]   ;;  %v2661_v6 = vcombine.low %v3075_v14, %v3075_v14 }
  0x1a   :  { %212 = vmatprep.subr.bf16.mxu0 %v2906_v10  ;;  %1560 = vmatprep.subr.bf16.mxu1 %v2906_v10  ;;  %v76_v20 = vrot.slane %v74_v13, 1  ;;  %v72_v23 = vor.u32 %v71_v17, %v67_v11  ;;  %v829_v24 = vrot.slane %v74_v13, 2  ;;  %v1496_v25 = vshll.u32 %v3086_v19, 16  ;;  %v2912_v48 = vld [vmem:[#allocation2 + $0x70] ss:$24 sps:$4 sm:$0xff]  }
  0x1b   :  { %v1500_v29 = vshrl.u32 %v3086_v19, 16  ;;  %v1494_v34 = vor.u32 %v1493_v27, %v1489_v21  ;;  %v828_v35 = vrot.slane %v78_v28, 1  ;;  %v150_v40 = vsel %vm142_vm0, %v2911_v30, 0  ;;  %v2915_v50 = vld [vmem:[#allocation2 + $0xa4] ss:$24 sps:$4 sm:$0x3f]  }
  0x1c   :  { %v77_v31 = vsel %vm65_vm1, %v72_v23, %v76_v20  ;;  %v1498_v32 = vrot.slane %v1496_v25, 1  ;;  %v2005_v33 = vrot.slane %v1496_v25, 2  ;;  %v80_v42 = vor.u32 %v78_v28, %v76_v20  ;;  %v2917_v51 = vld [vmem:[#allocation2 + $0xa0] ss:$24 sps:$4 sm:$0x3f]  }
  0x1d   :  { %2553 = vmatmul.mubr.msk.bf16.vlgmr.msra.gmra.mrb[0].mxu0 %vm135_vm2, %v77_v31  ;;  %v2004_v36 = vrot.slane %v1500_v29, 1  ;;  %v3097_v38 = vor.u32 %v829_v24, %v828_v35  ;;  %v825_v44 = vrot.slane %v67_v11, 1  ;;  %v826_v45 = vrot.slane %v69_v12, 2  ;;  %v2920_v55 = vld [vmem:[#allocation2 + $0x4] ss:$24 sps:$4 sm:$0xff]  }
  0x1e   :  { %213 = vmatpush1.bf16.msra.mxu0 %v2904_v18  ;;  %203 = vmatprep.mubr.bf16.mxu0 %v3019_v0  ;;  %v1499_v37 = vsel %vm65_vm1, %v1494_v34, %v1498_v32  ;;  %v1502_v43 = vor.u32 %v1500_v29, %v1498_v32  ;;  %v2001_v46 = vrot.slane %v1489_v21, 1  ;;  %v2002_v47 = vrot.slane %v1491_v22, 2  ;;  %v2918_v57 = vld [vmem:[#allocation2] ss:$24 sps:$4 sm:$0xff]   ;;  %v2926_v61 = vld [vmem:[#allocation2 + $0xc] ss:$24 sps:$4 sm:$0xff]  }
  0x1f   :  { %2555 = vmatprep.subr.msk.bf16.mxu0 %vm142_vm0, %v2909_v26  ;;  %v3100_v39 = vor.u32 %v2005_v33, %v2004_v36  ;;  %2653 = vmatmul.mubr.msk.bf16.vlgmr.msra.gmra.mrb[0].mxu1 %vm135_vm2, %v1499_v37  ;;  %v827_v49 = vor.u32 %v826_v45, %v825_v44  ;;  %vm824_vm3 = vsmask.f32 6400  ;;  %v156_v54 = vsel %vm142_vm0, %v2917_v51, 0  ;;  %v2921_v58 = vld [vmem:[#allocation2 + $0x34] ss:$24 sps:$4 sm:$0x3f]  }
  0x20   :  { %1561 = vmatpush1.bf16.msra.mxu1 %v2904_v18  ;;  %1551 = vmatprep.mubr.bf16.mxu1 %v3019_v0  ;;  %v2003_v53 = vor.u32 %v2002_v47, %v2001_v46  ;;  %v2923_v59 = vld [vmem:[#allocation2 + $0x30] ss:$24 sps:$4 sm:$0x3f]   ;;  %v2928_v63 = vld [vmem:[#allocation2 + $0x3c] ss:$24 sps:$4 sm:$0x3f]  }
  0x21   :  { %2655 = vmatprep.subr.msk.bf16.mxu1 %vm142_vm0, %v2909_v26  ;;  %v3111_v52 = vsel %vm824_vm3, %v827_v49, %v3097_v38  ;;  %v375_v60 = vsel %vm142_vm0, %v2923_v59, 0  ;;  %v2924_v62 = vld [vmem:[#allocation2 + $0x8] ss:$24 sps:$4 sm:$0xff]   ;;  %v2931_v1 = vld [vmem:[#allocation2 + $0x38] ss:$24 sps:$4 sm:$0x3f]  }
  0x22   :  { %215 = vmatpush1.bf16.msra.mxu0 %v150_v40  ;;  %v3118_v56 = vsel %vm824_vm3, %v2003_v53, %v3100_v39  ;;  %v381_v2 = vsel %vm142_vm0, %v2931_v1, 0  ;;  %v2934_v3 = vld [vmem:[#allocation2 + $0x14] ss:$24 sps:$4 sm:$0xff]   ;;  %v2932_v7 = vld [vmem:[#allocation2 + $0x10] ss:$24 sps:$4 sm:$0xff]   ;;  %v559_v20 = vrot.slane %v3064_v8, 1 }
  0x23   :  { %263 = vmatprep.subr.bf16.mxu0 %v2914_v41  ;;  %v2935_v10 = vld [vmem:[#allocation2 + $0x44] ss:$24 sps:$4 sm:$0x3f]   ;;  %v2937_v5 = vld [vmem:[#allocation2 + $0x40] ss:$24 sps:$4 sm:$0x3f]  }
  0x24   :  { %1563 = vmatpush1.bf16.msra.mxu1 %v150_v40  ;;  %v387_v11 = vsel %vm142_vm0, %v2937_v5, 0  ;;  %v2940_v12 = vld [vmem:[#allocation2 + $0xc4] ss:$24 sps:$4 sm:$0xff]   ;;  %v2938_v13 = vld [vmem:[#allocation2 + $0xc0] ss:$24 sps:$4 sm:$0xff]   ;;  %v3181_v21 = vrot.slane %v3067_v9, 1 }
  0x25   :  { %2554 = vmatmul.mubr.msk.bf16.gmra.mrb[4].mxu0 %vm135_vm2, %v80_v42  ;;  %1611 = vmatprep.subr.bf16.mxu1 %v2914_v41  ;;  %v2941_v14 = vld [vmem:[#allocation2 + $0xf4] ss:$24 sps:$4 sm:$0x3f]   ;;  %v2943_v15 = vld [vmem:[#allocation2 + $0xf0] ss:$24 sps:$4 sm:$0x3f]  }
  0x26   :  { %244 = vmatprep.mubr.bf16.mxu0 %v3019_v0  ;;  %v623_v17 = vsel %vm142_vm0, %v2943_v15, 0  ;;  %v2946_v18 = vld [vmem:[#allocation2 + $0xcc] ss:$24 sps:$4 sm:$0xff]   ;;  %vm558_vm4 = vcmask 1046528   ;;  %v1821_v22 = vrot.slane %v3083_v16, 1  ;;  %v3187_v23 = vrot.slane %v3086_v19, 1 }
  0x27   :  { %2654 = vmatmul.mubr.msk.bf16.gmra.mrb[4].mxu1 %vm135_vm2, %v1502_v43  ;;  %v561_v24 = vsel %vm558_vm4, %v559_v20, %v3181_v21  ;;  %v2944_v25 = vld [vmem:[#allocation2 + $0xc8] ss:$24 sps:$4 sm:$0xff]   ;;  %v2947_v26 = vld [vmem:[#allocation2 + $0xfc] ss:$24 sps:$4 sm:$0x3f]   ;;  %vm2491_vm5 = vcmask 1040384  }
  0x28   :  { %1592 = vmatprep.mubr.bf16.mxu1 %v3019_v0  ;;  %v2949_v27 = vld [vmem:[#allocation2 + $0xf8] ss:$24 sps:$4 sm:$0x3f]   ;;  %v1823_v28 = vsel %vm558_vm4, %v1821_v22, %v3187_v23  ;;  %v2952_v30 = vld [vmem:[#allocation2 + $0xd4] ss:$24 sps:$4 sm:$0xff]  }
  0x29   :  { %v629_v29 = vsel %vm142_vm0, %v2949_v27, 0  ;;  %v2953_v32 = vld [vmem:[#allocation2 + $0x104] ss:$24 sps:$4 sm:$0x3f]   ;;  %v2956_v36 = vld [vmem:[#allocation2 + $0x120] ss:$24 sps:$4 sm:$0xff]  }
  0x2a   :  { %v2955_v33 = vld [vmem:[#allocation2 + $0x100] ss:$24 sps:$4 sm:$0x3f]   ;;  %v2958_v35 = vld [vmem:[#allocation2 + $0x124] ss:$24 sps:$4 sm:$0xff]  }
  0x2b   :  { %v635_v34 = vsel %vm142_vm0, %v2955_v33, 0  ;;  %v2961_v40 = vld [vmem:[#allocation2 + $0x150] ss:$24 sps:$4 sm:$0x3f]   ;;  %v2970_v47 = vld [vmem:[#allocation2 + $0x134] ss:$24 sps:$4 sm:$0xff]  }
  0x2c   :  { %v893_v41 = vsel %vm142_vm0, %v2961_v40, 0  ;;  %v2965_v44 = vld [vmem:[#allocation2 + $0x15c] ss:$24 sps:$4 sm:$0x3f]   ;;  %v2982_v59 = vld [vmem:[#allocation2 + $0x18c] ss:$24 sps:$4 sm:$0xff]  }
  0x2d   :  { %2556 = vmatmul.mubr.msk.bf16.vlgmr.msra.gmra.mrb[8].mxu0 %vm135_vm2, %v77_v31  ;;  %v2967_v45 = vld [vmem:[#allocation2 + $0x158] ss:$24 sps:$4 sm:$0x3f]   ;;  %v2971_v49 = vld [vmem:[#allocation2 + $0x164] ss:$24 sps:$4 sm:$0x3f]  }
  0x2e   :  { %264 = vmatpush1.bf16.msra.mxu0 %v2912_v48  ;;  %254 = vmatprep.mubr.bf16.mxu0 %v3019_v0  ;;  %v899_v46 = vsel %vm142_vm0, %v2967_v45, 0  ;;  %v2976_v53 = vld [vmem:[#allocation2 + $0x184] ss:$24 sps:$4 sm:$0xff]   ;;  %v2985_v1 = vld [vmem:[#allocation2 + $0x1b8] ss:$24 sps:$4 sm:$0x3f]  }
  0x2f   :  { %2558 = vmatprep.subr.msk.bf16.mxu0 %vm142_vm0, %v2915_v50  ;;  %2656 = vmatmul.mubr.msk.bf16.vlgmr.msra.gmra.mrb[8].mxu1 %vm135_vm2, %v1499_v37 }
  0x30   :  { %1612 = vmatpush1.bf16.msra.mxu1 %v2912_v48  ;;  %1602 = vmatprep.mubr.bf16.mxu1 %v3019_v0  ;;  %v2968_v48 = vld [vmem:[#allocation2 + $0x130] ss:$24 sps:$4 sm:$0xff]  }
  0x31   :  { %2658 = vmatprep.subr.msk.bf16.mxu1 %vm142_vm0, %v2915_v50  ;;  %v2973_v50 = vld [vmem:[#allocation2 + $0x160] ss:$24 sps:$4 sm:$0x3f]  }
  0x32   :  { %266 = vmatpush1.bf16.msra.mxu0 %v156_v54  ;;  %v905_v51 = vsel %vm142_vm0, %v2973_v50, 0 }
  0x33   :  { %392 = vmatprep.subr.bf16.mxu0 %v2920_v55 }
  0x34   :  { %1614 = vmatpush1.bf16.msra.mxu1 %v156_v54  ;;  %v2974_v54 = vld [vmem:[#allocation2 + $0x180] ss:$24 sps:$4 sm:$0xff]  }
  0x35   :  { %2557 = vmatmul.mubr.msk.bf16.gmra.mrb[12].mxu0 %vm135_vm2, %v80_v42  ;;  %1668 = vmatprep.subr.bf16.mxu1 %v2920_v55  ;;  %v2977_v55 = vld [vmem:[#allocation2 + $0x1b4] ss:$24 sps:$4 sm:$0x3f]  }
  0x36   :  { %295 = vmatprep.mubr.bf16.mxu0 %v3019_v0 }
  0x37   :  { %2657 = vmatmul.mubr.msk.bf16.gmra.mrb[12].mxu1 %vm135_vm2, %v1502_v43 }
  0x38   :  { %1643 = vmatprep.mubr.bf16.mxu1 %v3019_v0 }
  0x3d   :  { %2559 = vmatmul.mubr.msk.bf16.vlgmr.msra.gmra.mrb[16].mxu0 %vm135_vm2, %v77_v31  ;;  %v2950_v31 = vld [vmem:[#allocation2 + $0xd0] ss:$24 sps:$4 sm:$0xff]  }
  0x3e   :  { %393 = vmatpush1.bf16.msra.mxu0 %v2918_v57  ;;  %305 = vmatprep.mubr.bf16.mxu0 %v3019_v0 }
  0x3f   :  { %2574 = vmatprep.subr.msk.bf16.mxu0 %vm142_vm0, %v2921_v58  ;;  %2659 = vmatmul.mubr.msk.bf16.vlgmr.msra.gmra.mrb[16].mxu1 %vm135_vm2, %v1499_v37  ;;  %v2959_v37 = vld [vmem:[#allocation2 + $0x154] ss:$24 sps:$4 sm:$0x3f]  }
  0x40   :  { %1669 = vmatpush1.bf16.msra.mxu1 %v2918_v57  ;;  %1653 = vmatprep.mubr.bf16.mxu1 %v3019_v0  ;;  %v2979_v57 = vld [vmem:[#allocation2 + $0x1b0] ss:$24 sps:$4 sm:$0x3f]  }
  0x41   :  { %2662 = vmatprep.subr.msk.bf16.mxu1 %vm142_vm0, %v2921_v58  ;;  %v1159_v58 = vsel %vm142_vm0, %v2979_v57, 0 }
  0x42   :  { %395 = vmatpush1.bf16.msra.mxu0 %v375_v60 }
  0x43   :  { %443 = vmatprep.subr.bf16.mxu0 %v2926_v61 }
  0x44   :  { %1671 = vmatpush1.bf16.msra.mxu1 %v375_v60  ;;  %v1096_v60 = vrot.slane %v3067_v9, 2  ;;  %v1165_v9 = vsel %vm142_vm0, %v2985_v1, 0 }
  0x45   :  { %2560 = vmatmul.mubr.msk.bf16.gmra.mrb[20].mxu0 %vm135_vm2, %v80_v42  ;;  %1719 = vmatprep.subr.bf16.mxu1 %v2926_v61  ;;  %v2964_v42 = vld [vmem:[#allocation2 + $0x12c] ss:$24 sps:$4 sm:$0xff]   ;;  %v2186_v61 = vrot.slane %v3086_v19, 2 }
  0x46   :  { %424 = vmatprep.mubr.bf16.mxu0 %v3019_v0  ;;  %v2989_v19 = vld [vmem:[#allocation2 + $0x1c4] ss:$24 sps:$4 sm:$0x3f]  }
  0x47   :  { %2660 = vmatmul.mubr.msk.bf16.gmra.mrb[20].mxu1 %vm135_vm2, %v1502_v43  ;;  %v2962_v43 = vld [vmem:[#allocation2 + $0x128] ss:$24 sps:$4 sm:$0xff]  }
  0x48   :  { %1700 = vmatprep.mubr.bf16.mxu1 %v3019_v0 }
  0x4d   :  { %2575 = vmatmul.mubr.msk.bf16.vlgmr.msra.gmra.mrb[0].mxu0 %vm135_vm2, %v3064_v8 }
  0x4e   :  { %444 = vmatpush1.bf16.msra.mxu0 %v2924_v62  ;;  %434 = vmatprep.mubr.bf16.mxu0 %v3019_v0 }
  0x4f   :  { %2577 = vmatprep.subr.msk.bf16.mxu0 %vm142_vm0, %v2928_v63  ;;  %2663 = vmatmul.mubr.msk.bf16.vlgmr.msra.gmra.mrb[0].mxu1 %vm135_vm2, %v3083_v16 }
  0x50   :  { %1720 = vmatpush1.bf16.msra.mxu1 %v2924_v62  ;;  %1710 = vmatprep.mubr.bf16.mxu1 %v3019_v0 }
  0x51   :  { %2665 = vmatprep.subr.msk.bf16.mxu1 %vm142_vm0, %v2928_v63  ;;  %v2983_v63 = vld [vmem:[#allocation2 + $0x1bc] ss:$24 sps:$4 sm:$0x3f]  }
  0x52   :  { %446 = vmatpush1.bf16.msra.mxu0 %v381_v2 }
  0x53   :  { %494 = vmatprep.subr.bf16.mxu0 %v2934_v3 }
  0x54   :  { %1722 = vmatpush1.bf16.msra.mxu1 %v381_v2  ;;  %v2991_v2 = vld [vmem:[#allocation2 + $0x1c0] ss:$24 sps:$4 sm:$0x3f]  }
  0x55   :  { %2576 = vmatmul.mubr.msk.bf16.gmra.mrb[4].mxu0 %vm135_vm2, %v2561_v4  ;;  %1770 = vmatprep.subr.bf16.mxu1 %v2934_v3  ;;  %v1171_v3 = vsel %vm142_vm0, %v2991_v2, 0 }
  0x56   :  { %475 = vmatprep.mubr.bf16.mxu0 %v3019_v0 }
  0x57   :  { %2664 = vmatmul.mubr.msk.bf16.gmra.mrb[4].mxu1 %vm135_vm2, %v2661_v6 }
  0x58   :  { %1751 = vmatprep.mubr.bf16.mxu1 %v3019_v0 }
  0x5d   :  { %2578 = vmatmul.mubr.msk.bf16.vlgmr.msra.gmra.mrb[8].mxu0 %vm135_vm2, %v3064_v8 }
  0x5e   :  { %495 = vmatpush1.bf16.msra.mxu0 %v2932_v7  ;;  %485 = vmatprep.mubr.bf16.mxu0 %v3019_v0 }
  0x5f   :  { %2580 = vmatprep.subr.msk.bf16.mxu0 %vm142_vm0, %v2935_v10  ;;  %2666 = vmatmul.mubr.msk.bf16.vlgmr.msra.gmra.mrb[8].mxu1 %vm135_vm2, %v3083_v16 }
  0x60   :  { %1771 = vmatpush1.bf16.msra.mxu1 %v2932_v7  ;;  %1761 = vmatprep.mubr.bf16.mxu1 %v3019_v0  ;;  %v3020_v7 = vmov 1983009808  }
  0x61   :  { %2668 = vmatprep.subr.msk.bf16.mxu1 %vm142_vm0, %v2935_v10  ;;  %v2507_v10 = vunpack.c.l.s4 %v3020_v7 }
  0x62   :  { %497 = vmatpush1.bf16.msra.mxu0 %v387_v11 }
  0x63   :  { %640 = vmatprep.subr.bf16.mxu0 %v2940_v12 }
  0x64   :  { %1773 = vmatpush1.bf16.msra.mxu1 %v387_v11 }
  0x65   :  { %2579 = vmatmul.mubr.msk.bf16.gmra.mrb[12].mxu0 %vm135_vm2, %v2561_v4  ;;  %1830 = vmatprep.subr.bf16.mxu1 %v2940_v12 }
  0x66   :  { %526 = vmatprep.mubr.bf16.mxu0 %v3019_v0 }
  0x67   :  { %2667 = vmatmul.mubr.msk.bf16.gmra.mrb[12].mxu1 %vm135_vm2, %v2661_v6 }
  0x68   :  { %1802 = vmatprep.mubr.bf16.mxu1 %v3019_v0 }
  0x6d   :  { %2581 = vmatmul.mubr.msk.bf16.vlgmr.msra.gmra.mrb[16].mxu0 %vm135_vm2, %v3064_v8 }
  0x6e   :  { %641 = vmatpush1.bf16.msra.mxu0 %v2938_v13  ;;  %536 = vmatprep.mubr.bf16.mxu0 %v3019_v0 }
  0x6f   :  { %2595 = vmatprep.subr.msk.bf16.mxu0 %vm142_vm0, %v2941_v14  ;;  %2669 = vmatmul.mubr.msk.bf16.vlgmr.msra.gmra.mrb[16].mxu1 %vm135_vm2, %v3083_v16 }
  0x70   :  { %1831 = vmatpush1.bf16.msra.mxu1 %v2938_v13  ;;  %1812 = vmatprep.mubr.bf16.mxu1 %v3019_v0 }
  0x71   :  { %2671 = vmatprep.subr.msk.bf16.mxu1 %vm142_vm0, %v2941_v14 }
  0x72   :  { %643 = vmatpush1.bf16.msra.mxu0 %v623_v17 }
  0x73   :  { %691 = vmatprep.subr.bf16.mxu0 %v2946_v18 }
  0x74   :  { %1833 = vmatpush1.bf16.msra.mxu1 %v623_v17  ;;  %v2509_v17 = vlaneseq }
  0x75   :  { %2582 = vmatmul.mubr.msk.bf16.gmra.mrb[20].mxu0 %vm135_vm2, %v2561_v4  ;;  %1881 = vmatprep.subr.bf16.mxu1 %v2946_v18 }
  0x76   :  { %672 = vmatprep.mubr.bf16.mxu0 %v3019_v0  ;;  %v2510_v33 = vshrl.u32 %v2509_v17, 7 }
  0x77   :  { %2670 = vmatmul.mubr.msk.bf16.gmra.mrb[20].mxu1 %vm135_vm2, %v2661_v6 }
  0x78   :  { %1862 = vmatprep.mubr.bf16.mxu1 %v3019_v0 }
  0x7d   :  { %2596 = vmatmul.mubr.msk.bf16.vlgmr.msra.gmra.mrb[0].mxu0 %vm135_vm2, %v561_v24 }
  0x7e   :  { %692 = vmatpush1.bf16.msra.mxu0 %v2944_v25  ;;  %682 = vmatprep.mubr.bf16.mxu0 %v3019_v0 }
  0x7f   :  { %2598 = vmatprep.subr.msk.bf16.mxu0 %vm142_vm0, %v2947_v26  ;;  %2672 = vmatmul.mubr.msk.bf16.vlgmr.msra.gmra.mrb[0].mxu1 %vm135_vm2, %v1823_v28 }
  0x80   :  { %1882 = vmatpush1.bf16.msra.mxu1 %v2944_v25  ;;  %1872 = vmatprep.mubr.bf16.mxu1 %v3019_v0 }
  0x81   :  { %2674 = vmatprep.subr.msk.bf16.mxu1 %vm142_vm0, %v2947_v26 }
  0x82   :  { %694 = vmatpush1.bf16.msra.mxu0 %v629_v29 }
  0x83   :  { %742 = vmatprep.subr.bf16.mxu0 %v2952_v30 }
  0x84   :  { %1884 = vmatpush1.bf16.msra.mxu1 %v629_v29 }
  0x85   :  { %2597 = vmatmul.mubr.msk.bf16.gmra.mrb[4].mxu0 %vm135_vm2, %v3181_v21  ;;  %1932 = vmatprep.subr.bf16.mxu1 %v2952_v30 }
  0x86   :  { %723 = vmatprep.mubr.bf16.mxu0 %v3019_v0 }
  0x87   :  { %2673 = vmatmul.mubr.msk.bf16.gmra.mrb[4].mxu1 %vm135_vm2, %v3187_v23 }
  0x88   :  { %1913 = vmatprep.mubr.bf16.mxu1 %v3019_v0 }
  0x8d   :  { %2599 = vmatmul.mubr.msk.bf16.vlgmr.msra.gmra.mrb[8].mxu0 %vm135_vm2, %v561_v24 }
  0x8e   :  { %743 = vmatpush1.bf16.msra.mxu0 %v2950_v31  ;;  %733 = vmatprep.mubr.bf16.mxu0 %v3019_v0 }
  0x8f   :  { %2601 = vmatprep.subr.msk.bf16.mxu0 %vm142_vm0, %v2953_v32  ;;  %2675 = vmatmul.mubr.msk.bf16.vlgmr.msra.gmra.mrb[8].mxu1 %vm135_vm2, %v1823_v28 }
  0x90   :  { %1933 = vmatpush1.bf16.msra.mxu1 %v2950_v31  ;;  %1923 = vmatprep.mubr.bf16.mxu1 %v3019_v0 }
  0x91   :  { %2677 = vmatprep.subr.msk.bf16.mxu1 %vm142_vm0, %v2953_v32 }
  0x92   :  { %745 = vmatpush1.bf16.msra.mxu0 %v635_v34 }
  0x93   :  { %910 = vmatprep.subr.bf16.mxu0 %v2958_v35 }
  0x94   :  { %1935 = vmatpush1.bf16.msra.mxu1 %v635_v34 }
  0x95   :  { %2600 = vmatmul.mubr.msk.bf16.gmra.mrb[12].mxu0 %vm135_vm2, %v3181_v21  ;;  %2014 = vmatprep.subr.bf16.mxu1 %v2958_v35 }
  0x96   :  { %774 = vmatprep.mubr.bf16.mxu0 %v3019_v0 }
  0x97   :  { %2676 = vmatmul.mubr.msk.bf16.gmra.mrb[12].mxu1 %vm135_vm2, %v3187_v23 }
  0x98   :  { %1964 = vmatprep.mubr.bf16.mxu1 %v3019_v0 }
  0x9d   :  { %2602 = vmatmul.mubr.msk.bf16.vlgmr.msra.gmra.mrb[16].mxu0 %vm135_vm2, %v561_v24  ;;  %v2508_v24 = vunpack.c.0.s8 %v2507_v10 }
  0x9e   :  { %911 = vmatpush1.bf16.msra.mxu0 %v2956_v36  ;;  %784 = vmatprep.mubr.bf16.mxu0 %v3019_v0 }
  0x9f   :  { %2616 = vmatprep.subr.msk.bf16.mxu0 %vm142_vm0, %v2959_v37  ;;  %2678 = vmatmul.mubr.msk.bf16.vlgmr.msra.gmra.mrb[16].mxu1 %vm135_vm2, %v1823_v28 }
  0xa0   :  { %2015 = vmatpush1.bf16.msra.mxu1 %v2956_v36  ;;  %1974 = vmatprep.mubr.bf16.mxu1 %v3019_v0 }
  0xa1   :  { %2680 = vmatprep.subr.msk.bf16.mxu1 %vm142_vm0, %v2959_v37 }
  0xa2   :  { %913 = vmatpush1.bf16.msra.mxu0 %v893_v41 }
  0xa3   :  { %961 = vmatprep.subr.bf16.mxu0 %v2964_v42 }
  0xa4   :  { %2017 = vmatpush1.bf16.msra.mxu1 %v893_v41 }
  0xa5   :  { %2603 = vmatmul.mubr.msk.bf16.gmra.mrb[20].mxu0 %vm135_vm2, %v3181_v21  ;;  %2065 = vmatprep.subr.bf16.mxu1 %v2964_v42 }
  0xa6   :  { %942 = vmatprep.mubr.bf16.mxu0 %v3019_v0 }
  0xa7   :  { %2679 = vmatmul.mubr.msk.bf16.gmra.mrb[20].mxu1 %vm135_vm2, %v3187_v23 }
  0xa8   :  { %2046 = vmatprep.mubr.bf16.mxu1 %v3019_v0 }
  0xad   :  { %2617 = vmatmul.mubr.msk.bf16.vlgmr.msra.gmra.mrb[0].mxu0 %vm135_vm2, %v3111_v52 }
  0xae   :  { %962 = vmatpush1.bf16.msra.mxu0 %v2962_v43  ;;  %952 = vmatprep.mubr.bf16.mxu0 %v3019_v0 }
  0xaf   :  { %2619 = vmatprep.subr.msk.bf16.mxu0 %vm142_vm0, %v2965_v44  ;;  %2681 = vmatmul.mubr.msk.bf16.vlgmr.msra.gmra.mrb[0].mxu1 %vm135_vm2, %v3118_v56 }
  0xb0   :  { %2066 = vmatpush1.bf16.msra.mxu1 %v2962_v43  ;;  %2056 = vmatprep.mubr.bf16.mxu1 %v3019_v0 }
  0xb1   :  { %2683 = vmatprep.subr.msk.bf16.mxu1 %vm142_vm0, %v2965_v44 }
  0xb2   :  { %964 = vmatpush1.bf16.msra.mxu0 %v899_v46 }
  0xb3   :  { %1012 = vmatprep.subr.bf16.mxu0 %v2970_v47 }
  0xb4   :  { %2068 = vmatpush1.bf16.msra.mxu1 %v899_v46 }
  0xb5   :  { %2618 = vmatmul.mubr.msk.bf16.gmra.mrb[4].mxu0 %vm135_vm2, %v3097_v38  ;;  %2116 = vmatprep.subr.bf16.mxu1 %v2970_v47 }
  0xb6   :  { %993 = vmatprep.mubr.bf16.mxu0 %v3019_v0 }
  0xb7   :  { %2682 = vmatmul.mubr.msk.bf16.gmra.mrb[4].mxu1 %vm135_vm2, %v3100_v39 }
  0xb8   :  { %2097 = vmatprep.mubr.bf16.mxu1 %v3019_v0 }
  0xbd   :  { %2620 = vmatmul.mubr.msk.bf16.vlgmr.msra.gmra.mrb[8].mxu0 %vm135_vm2, %v3111_v52 }
  0xbe   :  { %1013 = vmatpush1.bf16.msra.mxu0 %v2968_v48  ;;  %1003 = vmatprep.mubr.bf16.mxu0 %v3019_v0 }
  0xbf   :  { %2622 = vmatprep.subr.msk.bf16.mxu0 %vm142_vm0, %v2971_v49  ;;  %2684 = vmatmul.mubr.msk.bf16.vlgmr.msra.gmra.mrb[8].mxu1 %vm135_vm2, %v3118_v56 }
  0xc0   :  { %2117 = vmatpush1.bf16.msra.mxu1 %v2968_v48  ;;  %2107 = vmatprep.mubr.bf16.mxu1 %v3019_v0  ;;  %v3309_v48 = vsub.s32 %v2508_v24, %v2510_v33 }
  0xc1   :  { %2686 = vmatprep.subr.msk.bf16.mxu1 %vm142_vm0, %v2971_v49 }
  0xc2   :  { %1015 = vmatpush1.bf16.msra.mxu0 %v905_v51 }
  0xc3   :  { %1176 = vmatprep.subr.bf16.mxu0 %v2976_v53 }
  0xc4   :  { %2119 = vmatpush1.bf16.msra.mxu1 %v905_v51 }
  0xc5   :  { %2621 = vmatmul.mubr.msk.bf16.gmra.mrb[12].mxu0 %vm135_vm2, %v3097_v38  ;;  %2194 = vmatprep.subr.bf16.mxu1 %v2976_v53 }
  0xc6   :  { %1044 = vmatprep.mubr.bf16.mxu0 %v3019_v0 }
  0xc7   :  { %2685 = vmatmul.mubr.msk.bf16.gmra.mrb[12].mxu1 %vm135_vm2, %v3100_v39 }
  0xc8   :  { %2148 = vmatprep.mubr.bf16.mxu1 %v3019_v0 }
  0xcd   :  { %2623 = vmatmul.mubr.msk.bf16.vlgmr.msra.gmra.mrb[16].mxu0 %vm135_vm2, %v3111_v52  ;;  %v1095_v52 = vrot.slane %v3064_v8, 2 }
  0xce   :  { %1177 = vmatpush1.bf16.msra.mxu0 %v2974_v54  ;;  %1054 = vmatprep.mubr.bf16.mxu0 %v3019_v0 }
  0xcf   :  { %2637 = vmatprep.subr.msk.bf16.mxu0 %vm142_vm0, %v2977_v55  ;;  %2687 = vmatmul.mubr.msk.bf16.vlgmr.msra.gmra.mrb[16].mxu1 %vm135_vm2, %v3118_v56  ;;  %v2185_v56 = vrot.slane %v3083_v16, 2  ;;  %v1097_v62 = vsel %vm142_vm0, %v1095_v52, %v1096_v60  ;;  %v2986_v16 = vld [vmem:[#allocation2 + $0x190] ss:$24 sps:$4 sm:$0xff]  }
  0xd0   :  { %2195 = vmatpush1.bf16.msra.mxu1 %v2974_v54  ;;  %2158 = vmatprep.mubr.bf16.mxu1 %v3019_v0 }
  0xd1   :  { %2689 = vmatprep.subr.msk.bf16.mxu1 %vm142_vm0, %v2977_v55  ;;  %v2187_v8 = vsel %vm142_vm0, %v2185_v56, %v2186_v61 }
  0xd2   :  { %1179 = vmatpush1.bf16.msra.mxu0 %v1159_v58 }
  0xd3   :  { %1227 = vmatprep.subr.bf16.mxu0 %v2982_v59 }
  0xd4   :  { %2197 = vmatpush1.bf16.msra.mxu1 %v1159_v58 }
  0xd5   :  { %2624 = vmatmul.mubr.msk.bf16.gmra.mrb[20].mxu0 %vm135_vm2, %v3097_v38  ;;  %2245 = vmatprep.subr.bf16.mxu1 %v2982_v59  ;;  %v2980_v38 = vld [vmem:[#allocation2 + $0x188] ss:$24 sps:$4 sm:$0xff]  }
  0xd6   :  { %1208 = vmatprep.mubr.bf16.mxu0 %v3019_v0 }
  0xd7   :  { %2688 = vmatmul.mubr.msk.bf16.gmra.mrb[20].mxu1 %vm135_vm2, %v3100_v39  ;;  %v2988_v39 = vld [vmem:[#allocation2 + $0x194] ss:$24 sps:$4 sm:$0xff]  }
  0xd8   :  { %2226 = vmatprep.mubr.bf16.mxu1 %v3019_v0 }
  0xdd   :  { %2638 = vmatmul.mubr.msk.bf16.vlgmr.msra.gmra.mrb[0].mxu0 %vm135_vm2, %v1097_v62 }
  0xde   :  { %1228 = vmatpush1.bf16.msra.mxu0 %v2980_v38  ;;  %1218 = vmatprep.mubr.bf16.mxu0 %v3019_v0 }
  0xdf   :  { %2640 = vmatprep.subr.msk.bf16.mxu0 %vm142_vm0, %v2983_v63  ;;  %2690 = vmatmul.mubr.msk.bf16.vlgmr.msra.gmra.mrb[0].mxu1 %vm135_vm2, %v2187_v8 }
  0xe0   :  { %2246 = vmatpush1.bf16.msra.mxu1 %v2980_v38  ;;  %2236 = vmatprep.mubr.bf16.mxu1 %v3019_v0 }
  0xe1   :  { %2692 = vmatprep.subr.msk.bf16.mxu1 %vm142_vm0, %v2983_v63 }
  0xe2   :  { %1230 = vmatpush1.bf16.msra.mxu0 %v1165_v9 }
  0xe3   :  { %1278 = vmatprep.subr.bf16.mxu0 %v2988_v39 }
  0xe4   :  { %2248 = vmatpush1.bf16.msra.mxu1 %v1165_v9 }
  0xe5   :  { %2639 = vmatmul.mubr.msk.bf16.gmra.mrb[4].mxu0 %vm135_vm2, %v1096_v60  ;;  %2296 = vmatprep.subr.bf16.mxu1 %v2988_v39 }
  0xe6   :  { %1259 = vmatprep.mubr.bf16.mxu0 %v3019_v0 }
  0xe7   :  { %2691 = vmatmul.mubr.msk.bf16.gmra.mrb[4].mxu1 %vm135_vm2, %v2186_v61 }
  0xe8   :  { %2277 = vmatprep.mubr.bf16.mxu1 %v3019_v0 }
  0xed   :  { %2641 = vmatmul.mubr.msk.bf16.vlgmr.msra.gmra.mrb[8].mxu0 %vm135_vm2, %v1097_v62 }
  0xee   :  { %1279 = vmatpush1.bf16.msra.mxu0 %v2986_v16  ;;  %1269 = vmatprep.mubr.bf16.mxu0 %v3019_v0 }
  0xef   :  { %2643 = vmatprep.subr.msk.bf16.mxu0 %vm142_vm0, %v2989_v19  ;;  %2693 = vmatmul.mubr.msk.bf16.vlgmr.msra.gmra.mrb[8].mxu1 %vm135_vm2, %v2187_v8 }
  0xf0   :  { %2297 = vmatpush1.bf16.msra.mxu1 %v2986_v16  ;;  %2287 = vmatprep.mubr.bf16.mxu1 %v3019_v0 }
  0xf1   :  { %2695 = vmatprep.subr.msk.bf16.mxu1 %vm142_vm0, %v2989_v19 }
  0xf2   :  { %1281 = vmatpush1.bf16.msra.mxu0 %v1171_v3 }
  0xf4   :  { %2299 = vmatpush1.bf16.msra.mxu1 %v1171_v3 }
  0xf5   :  { %2642 = vmatmul.mubr.msk.bf16.gmra.mrb[12].mxu0 %vm135_vm2, %v1096_v60 }
  0xf6   :  { %1310 = vmatprep.mubr.bf16.mxu0 %v3019_v0 }
  0xf7   :  { %2694 = vmatmul.mubr.msk.bf16.gmra.mrb[12].mxu1 %vm135_vm2, %v2186_v61 }
  0xf8   :  { %2328 = vmatprep.mubr.bf16.mxu1 %v3019_v0 }
  0xfd   :  { %2644 = vmatmul.mubr.msk.bf16.vlgmr.msra.gmra.mrb[16].mxu0 %vm135_vm2, %v1097_v62 }
  0xfe   :  { %1320 = vmatprep.mubr.bf16.mxu0 %v3019_v0 }
  0xff   :  { %2696 = vmatmul.mubr.msk.bf16.vlgmr.msra.gmra.mrb[16].mxu1 %vm135_vm2, %v2187_v8 }
 0x100   :  { %2338 = vmatprep.mubr.bf16.mxu1 %v3019_v0 }
 0x105   :  { %2645 = vmatmul.mubr.msk.bf16.gmra.mrb[20].mxu0 %vm135_vm2, %v1096_v60 }
 0x107   :  { %2697 = vmatmul.mubr.msk.bf16.gmra.mrb[20].mxu1 %vm135_vm2, %v2186_v61 }
 0x1b0   :  { %v1210_v4 = vpop.f32.mrb[0].mxu0 }
 0x1b1   :  { %v1212_v6 = vpop.f32.mrb[1].mxu0  ;;  %v1401_v11 = vmul.f32 %v1210_v4, %v1210_v4 }
 0x1b2   :  { %v1214_v5 = vpop.f32.mrb[2].mxu0  ;;  %v2228_v12 = vpop.f32.mrb[0].mxu1  ;;  %v1402_v18 = vmul.f32 %v1212_v6, %v1212_v6 }
 0x1b3   :  { %v1347_v13 = vadd.f32 %v1214_v5, %v1210_v4  ;;  %v1407_v14 = vmul.f32 %v1214_v5, %v1214_v5  ;;  %v1216_v15 = vpop.f32.mrb[3].mxu0  ;;  %v2230_v20 = vpop.f32.mrb[1].mxu1  ;;  %v2419_v25 = vmul.f32 %v2228_v12, %v2228_v12 }
 0x1b4   :  { %v1355_v21 = vadd.f32 %v1216_v15, %v1212_v6  ;;  %v1408_v22 = vmul.f32 %v1216_v15, %v1216_v15  ;;  %v2232_v23 = vpop.f32.mrb[2].mxu1  ;;  %v2420_v30 = vmul.f32 %v2230_v20, %v2230_v20 }
 0x1b5   :  { %v1419_v0 = vadd.f32 %v1407_v14, %v1401_v11  ;;  %v2365_v26 = vadd.f32 %v2232_v23, %v2228_v12  ;;  %v2425_v27 = vmul.f32 %v2232_v23, %v2232_v23  ;;  %v2234_v29 = vpop.f32.mrb[3].mxu1 }
 0x1b6   :  { %v1427_v28 = vadd.f32 %v1408_v22, %v1402_v18  ;;  %v2373_v31 = vadd.f32 %v2234_v29, %v2230_v20  ;;  %v2426_v32 = vmul.f32 %v2234_v29, %v2234_v29 }
 0x1b7   :  { %v2437_v34 = vadd.f32 %v2425_v27, %v2419_v25 }
 0x1b8   :  { %v1220_v35 = vpop.f32.mrb[4].mxu0  ;;  %v2445_v36 = vadd.f32 %v2426_v32, %v2420_v30 }
 0x1b9   :  { %v1348_v37 = vadd.f32 %v1347_v13, %v1220_v35  ;;  %v1413_v40 = vmul.f32 %v1220_v35, %v1220_v35  ;;  %v1222_v41 = vpop.f32.mrb[5].mxu0 }
 0x1ba   :  { %v1356_v42 = vadd.f32 %v1355_v21, %v1222_v41  ;;  %v1414_v43 = vmul.f32 %v1222_v41, %v1222_v41  ;;  %v1224_v44 = vpop.f32.mrb[6].mxu0  ;;  %v2238_v47 = vpop.f32.mrb[4].mxu1 }
 0x1bb   :  { %v1349_v45 = vrot.slane %v1348_v37, 4  ;;  %v1420_v46 = vadd.f32 %v1419_v0, %v1413_v40  ;;  %v1225_v49 = vpop.f32.mrb[7].mxu0  ;;  %v2366_v50 = vadd.f32 %v2365_v26, %v2238_v47  ;;  %v2431_v51 = vmul.f32 %v2238_v47, %v2238_v47  ;;  %v2240_v55 = vpop.f32.mrb[5].mxu1 }
 0x1bc   :  { %v1357_v53 = vrot.slane %v1356_v42, 4  ;;  %v1428_v54 = vadd.f32 %v1427_v28, %v1414_v43  ;;  %v2374_v59 = vadd.f32 %v2373_v31, %v2240_v55  ;;  %v2432_v52 = vmul.f32 %v2240_v55, %v2240_v55  ;;  %v2242_v60 = vpop.f32.mrb[6].mxu1 }
 0x1bd   :  { %v1350_v57 = vadd.f32 %v1349_v45, %v1348_v37  ;;  %v1421_v58 = vrot.slane %v1420_v46, 4  ;;  %v2367_v56 = vrot.slane %v2366_v50, 4  ;;  %v2438_v61 = vadd.f32 %v2437_v34, %v2431_v51  ;;  %v2243_v63 = vpop.f32.mrb[7].mxu1 }
 0x1be   :  { %v1358_v62 = vadd.f32 %v1357_v53, %v1356_v42  ;;  %v1429_v38 = vrot.slane %v1428_v54, 4  ;;  %v2375_v9 = vrot.slane %v2374_v59, 4  ;;  %v2446_v39 = vadd.f32 %v2445_v36, %v2432_v52 }
 0x1bf   :  { %v1351_v1 = vrot.slane %v1350_v57, 2  ;;  %v1422_v8 = vadd.f32 %v1421_v58, %v1420_v46  ;;  %v2368_v16 = vadd.f32 %v2367_v56, %v2366_v50  ;;  %v2439_v19 = vrot.slane %v2438_v61, 4 }
 0x1c0   :  { %v1359_v2 = vrot.slane %v1358_v62, 2  ;;  %v1430_v3 = vadd.f32 %v1429_v38, %v1428_v54  ;;  %v1261_v4 = vpop.f32.mrb[8].mxu0  ;;  %v2376_v10 = vadd.f32 %v2375_v9, %v2374_v59  ;;  %v2447_v5 = vrot.slane %v2446_v39, 4 }
 0x1c1   :  { %v1352_v6 = vadd.f32 %v1351_v1, %v1350_v57  ;;  %v1423_v7 = vrot.slane %v1422_v8, 2  ;;  %v1263_v11 = vpop.f32.mrb[9].mxu0  ;;  %v2369_v12 = vrot.slane %v2368_v16, 2  ;;  %v2440_v13 = vadd.f32 %v2439_v19, %v2438_v61 }
 0x1c2   :  { %v1360_v14 = vadd.f32 %v1359_v2, %v1358_v62  ;;  %v1431_v15 = vrot.slane %v1430_v3, 2  ;;  %v1265_v17 = vpop.f32.mrb[10].mxu0  ;;  %v2377_v21 = vrot.slane %v2376_v10, 2  ;;  %v2448_v22 = vadd.f32 %v2447_v5, %v2446_v39  ;;  %v2279_v0 = vpop.f32.mrb[8].mxu1 }
 0x1c3   :  { %v1353_v18 = vrot.slane %v1352_v6, 1  ;;  %v1424_v20 = vadd.f32 %v1423_v7, %v1422_v8  ;;  %v1267_v23 = vpop.f32.mrb[11].mxu0  ;;  %v2370_v24 = vadd.f32 %v2369_v12, %v2368_v16  ;;  %v2441_v25 = vrot.slane %v2440_v13, 2  ;;  %v2281_v28 = vpop.f32.mrb[9].mxu1 }
 0x1c4   :  { %v1361_v26 = vrot.slane %v1360_v14, 1  ;;  %v1432_v27 = vadd.f32 %v1431_v15, %v1430_v3  ;;  %v2378_v31 = vadd.f32 %v2377_v21, %v2376_v10  ;;  %v2449_v32 = vrot.slane %v2448_v22, 2  ;;  %v2283_v33 = vpop.f32.mrb[10].mxu1 }
 0x1c5   :  { %v1354_v29 = vadd.f32 %v1353_v18, %v1352_v6  ;;  %v1425_v30 = vrot.slane %v1424_v20, 1  ;;  %v2371_v34 = vrot.slane %v2370_v24, 1  ;;  %v2442_v35 = vadd.f32 %v2441_v25, %v2440_v13  ;;  %v2285_v40 = vpop.f32.mrb[11].mxu1 }
 0x1c6   :  { %v1362_v36 = vadd.f32 %v1361_v26, %v1360_v14  ;;  %v1433_v37 = vrot.slane %v1432_v27, 1  ;;  %v2379_v42 = vrot.slane %v2378_v31, 1  ;;  %v2450_v43 = vadd.f32 %v2449_v32, %v2448_v22 }
 0x1c7   :  { %v1426_v41 = vadd.f32 %v1425_v30, %v1424_v20  ;;  %v1403_v44 = vmul.f32 %v1261_v4, %v1261_v4  ;;  %v2372_v45 = vadd.f32 %v2371_v34, %v2370_v24  ;;  %v2443_v46 = vrot.slane %v2442_v35, 1 }
 0x1c8   :  { %v1434_v47 = vadd.f32 %v1433_v37, %v1432_v27  ;;  %v2421_v49 = vmul.f32 %v2279_v0, %v2279_v0  ;;  %v1271_v50 = vpop.f32.mrb[12].mxu0  ;;  %v2380_v51 = vadd.f32 %v2379_v42, %v2378_v31  ;;  %v2451_v53 = vrot.slane %v2450_v43, 1 }
 0x1c9   :  { %v1404_v54 = vmul.f32 %v1263_v11, %v1263_v11  ;;  %v2422_v55 = vmul.f32 %v2281_v28, %v2281_v28  ;;  %v1273_v57 = vpop.f32.mrb[13].mxu0  ;;  %v2413_v58 = vadd.f32 %v2372_v45, %v1354_v29  ;;  %v2444_v59 = vadd.f32 %v2443_v46, %v2442_v35 }
 0x1ca   :  { %v1363_v52 = vadd.f32 %v1265_v17, %v1261_v4  ;;  %v1409_v60 = vmul.f32 %v1265_v17, %v1265_v17  ;;  %v1275_v56 = vpop.f32.mrb[14].mxu0  ;;  %v2414_v61 = vadd.f32 %v2380_v51, %v1362_v36  ;;  %v2452_v62 = vadd.f32 %v2451_v53, %v2450_v43  ;;  %v2289_v1 = vpop.f32.mrb[12].mxu1 }
 0x1cb   :  { %v2381_v38 = vadd.f32 %v2283_v33, %v2279_v0  ;;  %v2427_v63 = vmul.f32 %v2283_v33, %v2283_v33  ;;  %v1276_v8 = vpop.f32.mrb[15].mxu0  ;;  %v2485_v9 = vadd.f32 %v2444_v59, %v1426_v41  ;;  %v1371_v16 = vadd.f32 %v1267_v23, %v1263_v11  ;;  %v2291_v2 = vpop.f32.mrb[13].mxu1 }
 0x1cc   :  { %v1435_v39 = vadd.f32 %v1409_v60, %v1403_v44  ;;  %v1410_v19 = vmul.f32 %v1267_v23, %v1267_v23  ;;  %v2486_v3 = vadd.f32 %v2452_v62, %v1434_v47  ;;  %v2389_v7 = vadd.f32 %v2285_v40, %v2281_v28  ;;  %v2293_v5 = vpop.f32.mrb[14].mxu1 }
 0x1cd   :  { %v2453_v6 = vadd.f32 %v2427_v63, %v2421_v49  ;;  %v2428_v10 = vmul.f32 %v2285_v40, %v2285_v40  ;;  %v2492_v4 = vsel %vm2491_vm5, %v2413_v58, %v2485_v9  ;;  %v1364_v13 = vadd.f32 %v1363_v52, %v1271_v50  ;;  %v2294_v15 = vpop.f32.mrb[15].mxu1 }
 0x1ce   :  { %v1443_v12 = vadd.f32 %v1410_v19, %v1404_v54  ;;  %v1415_v14 = vmul.f32 %v1271_v50, %v1271_v50  ;;  %v2493_v17 = vsel %vm2491_vm5, %v2414_v61, %v2486_v3  ;;  %v2382_v20 = vadd.f32 %v2381_v38, %v2289_v1 }
 0x1cf   :  { %v2461_v18 = vadd.f32 %v2428_v10, %v2422_v55  ;;  %v2433_v21 = vmul.f32 %v2289_v1, %v2289_v1  ;;  %v2504_v22 = vcombine.low %v2492_v4, %v2493_v17  ;;  %v1365_v11 = vrot.slane %v1364_v13, 4 }
 0x1d0   :  { %v1436_v0 = vadd.f32 %v1435_v39, %v1415_v14  ;;  %v1372_v23 = vadd.f32 %v1371_v16, %v1273_v57  ;;  %v3313_v24 = vpop.f32.mrb[16].mxu0  ;;  %v2383_v25 = vrot.slane %v2382_v20, 4  ;;  %v1416_v27 = vmul.f32 %v1273_v57, %v1273_v57 }
 0x1d1   :  { %v2454_v26 = vadd.f32 %v2453_v6, %v2433_v21  ;;  %v2390_v28 = vadd.f32 %v2389_v7, %v2291_v2  ;;  %v3315_v29 = vpop.f32.mrb[17].mxu0  ;;  %v3318_v30 = vrot.slane %v2504_v22, %v3309_v48  ;;  %v1366_v31 = vadd.f32 %v1365_v11, %v1364_v13 }
 0x1d2   :  { %v1437_v32 = vrot.slane %v1436_v0, 4  ;;  %v1373_v33 = vrot.slane %v1372_v23, 4  ;;  %v3320_v34 = vpop.f32.mrb[18].mxu0  ;;  %v2384_v35 = vadd.f32 %v2383_v25, %v2382_v20  ;;  %v1444_v37 = vadd.f32 %v1443_v12, %v1416_v27  ;;  %v3322_v41 = vpop.f32.mrb[16].mxu1 }
 0x1d3   :  { %v2455_v36 = vrot.slane %v2454_v26, 4  ;;  %v2391_v40 = vrot.slane %v2390_v28, 4  ;;  %v3324_v42 = vpop.f32.mrb[19].mxu0  ;;  %v1367_v43 = vrot.slane %v1366_v31, 2  ;;  %v2434_v46 = vmul.f32 %v2291_v2, %v2291_v2  ;;  %v2332_v47 = vpop.f32.mrb[17].mxu1 }
 0x1d4   :  { %v1438_v44 = vadd.f32 %v1437_v32, %v1436_v0  ;;  %v1374_v45 = vadd.f32 %v1373_v33, %v1372_v23  ;;  %v2385_v49 = vrot.slane %v2384_v35, 2  ;;  %v1445_v51 = vrot.slane %v1444_v37, 4  ;;  %v2334_v54 = vpop.f32.mrb[18].mxu1 }
 0x1d5   :  { %v2456_v50 = vadd.f32 %v2455_v36, %v2454_v26  ;;  %v2392_v53 = vadd.f32 %v2391_v40, %v2390_v28  ;;  %v1368_v55 = vadd.f32 %v1367_v43, %v1366_v31  ;;  %v2462_v59 = vadd.f32 %v2461_v18, %v2434_v46  ;;  %v2336_v52 = vpop.f32.mrb[19].mxu1 }
 0x1d6   :  { %v1439_v57 = vrot.slane %v1438_v44, 2  ;;  %v1375_v58 = vrot.slane %v1374_v45, 2  ;;  %v2386_v60 = vadd.f32 %v2385_v49, %v2384_v35  ;;  %v1446_v61 = vadd.f32 %v1445_v51, %v1444_v37 }
 0x1d7   :  { %v2457_v56 = vrot.slane %v2456_v50, 2  ;;  %v2393_v62 = vrot.slane %v2392_v53, 2  ;;  %v1369_v38 = vrot.slane %v1368_v55, 1  ;;  %v2463_v8 = vrot.slane %v2462_v59, 4 }
 0x1d8   :  { %v1440_v63 = vadd.f32 %v1439_v57, %v1438_v44  ;;  %v1376_v1 = vadd.f32 %v1375_v58, %v1374_v45  ;;  %v1322_v9 = vpop.f32.mrb[20].mxu0  ;;  %v2387_v39 = vrot.slane %v2386_v60, 1  ;;  %v1447_v19 = vrot.slane %v1446_v61, 2 }
 0x1d9   :  { %v2458_v16 = vadd.f32 %v2457_v56, %v2456_v50  ;;  %v2394_v2 = vadd.f32 %v2393_v62, %v2392_v53  ;;  %v1324_v3 = vpop.f32.mrb[21].mxu0  ;;  %v1370_v6 = vadd.f32 %v1369_v38, %v1368_v55  ;;  %v2464_v5 = vadd.f32 %v2463_v8, %v2462_v59 }
 0x1da   :  { %v1441_v7 = vrot.slane %v1440_v63, 1  ;;  %v1377_v10 = vrot.slane %v1376_v1, 1  ;;  %v1326_v4 = vpop.f32.mrb[22].mxu0  ;;  %v2388_v12 = vadd.f32 %v2387_v39, %v2386_v60  ;;  %v1448_v14 = vadd.f32 %v1447_v19, %v1446_v61  ;;  %v2340_v17 = vpop.f32.mrb[20].mxu1 }
 0x1db   :  { %v2459_v13 = vrot.slane %v2458_v16, 1  ;;  %v2395_v15 = vrot.slane %v2394_v2, 1  ;;  %v1327_v18 = vpop.f32.mrb[23].mxu0  ;;  %v2465_v22 = vrot.slane %v2464_v5, 2  ;;  %v1405_v11 = vmul.f32 %v3313_v24, %v3313_v24  ;;  %v3328_v0 = vpop.f32.mrb[21].mxu1 }
 0x1dc   :  { %v1442_v20 = vadd.f32 %v1441_v7, %v1440_v63  ;;  %v1378_v21 = vadd.f32 %v1377_v10, %v1376_v1  ;;  %v2415_v23 = vadd.f32 %v2388_v12, %v1370_v6  ;;  %v1449_v26 = vrot.slane %v1448_v14, 1  ;;  %v2344_v28 = vpop.f32.mrb[22].mxu1 }
 0x1dd   :  { %v2460_v25 = vadd.f32 %v2459_v13, %v2458_v16  ;;  %v2396_v27 = vadd.f32 %v2395_v15, %v2394_v2  ;;  %v2466_v31 = vadd.f32 %v2465_v22, %v2464_v5  ;;  %v2423_v32 = vmul.f32 %v3322_v41, %v3322_v41  ;;  %v2345_v36 = vpop.f32.mrb[23].mxu1 }
 0x1de   :  { %v1406_v33 = vmul.f32 %v3315_v29, %v3315_v29  ;;  %v2424_v35 = vmul.f32 %v2332_v47, %v2332_v47  ;;  %v1450_v40 = vadd.f32 %v1449_v26, %v1448_v14  ;;  %v1379_v44 = vadd.f32 %v3320_v34, %v3313_v24 }
 0x1df   :  { %v2487_v37 = vadd.f32 %v2460_v25, %v1442_v20  ;;  %v2416_v43 = vadd.f32 %v2396_v27, %v1378_v21  ;;  %v2467_v45 = vrot.slane %v2466_v31, 1  ;;  %v1411_v46 = vmul.f32 %v3320_v34, %v3320_v34 }
 0x1e0   :  { %v2397_v49 = vadd.f32 %v2334_v54, %v3322_v41  ;;  %v2429_v50 = vmul.f32 %v2334_v54, %v2334_v54  ;;  %v1387_v53 = vadd.f32 %v3324_v42, %v3315_v29  ;;  %v1412_v55 = vmul.f32 %v3324_v42, %v3324_v42 }
 0x1e1   :  { %v2494_v51 = vsel %vm2491_vm5, %v2415_v23, %v2487_v37  ;;  %v2405_v57 = vadd.f32 %v2336_v52, %v2332_v47  ;;  %v2468_v58 = vadd.f32 %v2467_v45, %v2466_v31  ;;  %v1451_v59 = vadd.f32 %v1411_v46, %v1405_v11 }
 0x1e2   :  { %v2469_v60 = vadd.f32 %v2429_v50, %v2423_v32  ;;  %v2430_v24 = vmul.f32 %v2336_v52, %v2336_v52  ;;  %v1459_v56 = vadd.f32 %v1412_v55, %v1406_v33  ;;  %v1380_v61 = vadd.f32 %v1379_v44, %v1322_v9 }
 0x1e3   :  { %v1417_v62 = vmul.f32 %v1322_v9, %v1322_v9  ;;  %v2398_v34 = vadd.f32 %v2397_v49, %v2340_v17  ;;  %v2488_v38 = vadd.f32 %v2468_v58, %v1450_v40  ;;  %v2435_v54 = vmul.f32 %v2340_v17, %v2340_v17 }
 0x1e4   :  { %v2477_v41 = vadd.f32 %v2430_v24, %v2424_v35  ;;  %v1388_v63 = vadd.f32 %v1387_v53, %v1324_v3  ;;  %v1381_v1 = vrot.slane %v1380_v61, 4  ;;  %v1418_v29 = vmul.f32 %v1324_v3, %v1324_v3 }
 0x1e5   :  { %v1452_v8 = vadd.f32 %v1451_v59, %v1417_v62  ;;  %v2399_v39 = vrot.slane %v2398_v34, 4  ;;  %v2495_v16 = vsel %vm2491_vm5, %v2416_v43, %v2488_v38  ;;  %v2470_v42 = vadd.f32 %v2469_v60, %v2435_v54 }
 0x1e6   :  { %v1389_v47 = vrot.slane %v1388_v63, 4  ;;  %v2406_v19 = vadd.f32 %v2405_v57, %v3328_v0  ;;  %v2505_v2 = vcombine.low %v2494_v51, %v2495_v16  ;;  %v1382_v52 = vadd.f32 %v1381_v1, %v1380_v61 }
 0x1e7   :  { %v1453_v6 = vrot.slane %v1452_v8, 4  ;;  %v2400_v7 = vadd.f32 %v2399_v39, %v2398_v34  ;;  %v2471_v9 = vrot.slane %v2470_v42, 4  ;;  %v1460_v5 = vadd.f32 %v1459_v56, %v1418_v29 }
 0x1e8   :  { %v1390_v10 = vadd.f32 %v1389_v47, %v1388_v63  ;;  %v2407_v4 = vrot.slane %v2406_v19, 4  ;;  %v2519_v12 = vrot.slane %v2505_v2, %v3309_v48  ;;  %v1383_v13 = vrot.slane %v1382_v52, 2 }
 0x1e9   :  { %v1454_v14 = vadd.f32 %v1453_v6, %v1452_v8  ;;  %v2401_v15 = vrot.slane %v2400_v7, 2  ;;  %v2472_v3 = vadd.f32 %v2471_v9, %v2470_v42  ;;  %v1461_v18 = vrot.slane %v1460_v5, 4 }
 0x1ea   :  { %v1391_v17 = vrot.slane %v1390_v10, 2  ;;  %v2408_v20 = vadd.f32 %v2407_v4, %v2406_v19  ;;  %v2520_v21 = vcombine.low %v3318_v30, %v2519_v12  ;;  %v1384_v22 = vadd.f32 %v1383_v13, %v1382_v52 }
 0x1eb   :  { %v1455_v11 = vrot.slane %v1454_v14, 2  ;;  %v2402_v23 = vadd.f32 %v2401_v15, %v2400_v7  ;;  %v2473_v25 = vrot.slane %v2472_v3, 2  ;;  %v1462_v27 = vadd.f32 %v1461_v18, %v1460_v5 }
 0x1ec   :  { %v1392_v26 = vadd.f32 %v1391_v17, %v1390_v10  ;;  %v2409_v28 = vrot.slane %v2408_v20, 2  ;;  %2531 = vst [vmem:[%s3360_s2] sm:$0xff] %v2520_v21  ;;  %v1385_v48 = vrot.slane %v1384_v22, 1  ;;  %v2436_v33 = vmul.f32 %v3328_v0, %v3328_v0 }
 0x1ed   :  { %v1456_v31 = vadd.f32 %v1455_v11, %v1454_v14  ;;  %v2403_v32 = vrot.slane %v2402_v23, 1  ;;  %v2474_v35 = vadd.f32 %v2473_v25, %v2472_v3  ;;  %v1463_v30 = vrot.slane %v1462_v27, 2 }
 0x1ee   :  { %v1393_v36 = vrot.slane %v1392_v26, 1  ;;  %v2410_v37 = vadd.f32 %v2409_v28, %v2408_v20  ;;  %v1386_v40 = vadd.f32 %v1385_v48, %v1384_v22  ;;  %v2478_v45 = vadd.f32 %v2477_v41, %v2436_v33 }
 0x1ef   :  { %v1457_v43 = vrot.slane %v1456_v31, 1  ;;  %v2404_v44 = vadd.f32 %v2403_v32, %v2402_v23  ;;  %v2475_v46 = vrot.slane %v2474_v35, 1  ;;  %v1464_v55 = vadd.f32 %v1463_v30, %v1462_v27 }
 0x1f0   :  { %v1394_v49 = vadd.f32 %v1393_v36, %v1392_v26  ;;  %v2411_v50 = vrot.slane %v2410_v37, 1  ;;  %v2479_v57 = vrot.slane %v2478_v45, 4 }
 0x1f1   :  { %v1458_v51 = vadd.f32 %v1457_v43, %v1456_v31  ;;  %v2417_v53 = vadd.f32 %v2404_v44, %v1386_v40  ;;  %v2476_v58 = vadd.f32 %v2475_v46, %v2474_v35  ;;  %v1465_v56 = vrot.slane %v1464_v55, 1 }
 0x1f2   :  { %v2412_v59 = vadd.f32 %v2411_v50, %v2410_v37  ;;  %v2480_v60 = vadd.f32 %v2479_v57, %v2478_v45 }
 0x1f3   :  { %v2489_v24 = vadd.f32 %v2476_v58, %v1458_v51  ;;  %v1466_v38 = vadd.f32 %v1465_v56, %v1464_v55 }
 0x1f4   :  { %v2418_v0 = vadd.f32 %v2412_v59, %v1394_v49  ;;  %v2481_v61 = vrot.slane %v2480_v60, 2 }
 0x1f5   :  { %v2496_v62 = vsel %vm2491_vm5, %v2417_v53, %v2489_v24 }
 0x1f6   :  { %v2482_v34 = vadd.f32 %v2481_v61, %v2480_v60 }
 0x1f8   :  { %v2483_v54 = vrot.slane %v2482_v34, 1 }
 0x1fa   :  { %v2484_v41 = vadd.f32 %v2483_v54, %v2482_v34 }
 0x1fc   :  { %v2490_v63 = vadd.f32 %v2484_v41, %v1466_v38 }
 0x1fe   :  { %v2497_v1 = vsel %vm2491_vm5, %v2418_v0, %v2490_v63 }
 0x1ff   :  { %v2521_v8 = vcombine.low %v2496_v62, %v2497_v1 }
 0x201   :  { %2698 = vst.sshfl [vmem:[%s3360_s2 + $0x8] sm:$0x33 pattern:$0x76325410] %v2521_v8 }
 0x202   :  { %2537 = vsyncpa [#allocation3], 1 }

// kernel: cnn_forward.5
= control target key start
LH: loop header
LB: loop body
LE: loop exit
PB: predicated region body
PF: predicated region fallthrough
CT: control target
= control target key end

     0   :  { %v22_v0 = vlaneseq  ;;  %v2386_v4 = vmov 0   ;;  %vm101_vm2 = vcmask 1043456   ;;  %v2387_v46 = vmov 0.0   ;;  %s2915_s0 = inlined_call_operand.vmem [shape: f32[2,8,512], index: 0, kind: input, shape index: {}]   ;;  %s2916_s1 = inlined_call_operand.vmem [shape: f32[2,512], index: 1, kind: input, shape index: {}]   ;;  %s2917_s2 = inlined_call_operand.vmem [shape: bf16[4,256,128], index: 2, kind: input, shape index: {}]   ;;  %s2918_s3 = inlined_call_operand.vmem [shape: f32[1,128], index: 3, kind: input, shape index: {}]   ;;  %s2919_s4 = inlined_call_operand.hbm [shape: f32[2,1,128], index: 4, kind: output, shape index: {}]  }
   0x1   :  { %v19_v1 = vld [vmem:[%s2916_s1] ss:$2 sm:$0xf]  ;;  %v1720_v2 = vld [vmem:[%s2916_s1 + $0x1] ss:$2 sm:$0xf]  ;;  %140 = vmatprep.mubr.bf16.mxu0 %v2386_v4  ;;  %184 = vmatprep.mubr.bf16.mxu1 %v2386_v4 }
   0x2   :  { %v23_v3 = vshrl.u32 %v22_v0, 7  ;;  %v36_v5 = vld [vmem:[%s2915_s0 + $0x8] sm:$0xff]  ;;  %v38_v6 = vld [vmem:[%s2915_s0 + $0x18] sm:$0xff]  ;;  %v35_v13 = vld [vmem:[%s2915_s0] sm:$0xff]  ;;  %v25_v30 = vand.u32 127, %v22_v0  ;;  %vm97_vm3 = vcmask 64512  }
   0x3   :  { %v1886_v7 = vld [vmem:[%s2915_s0 + $0x28] sm:$0xff]  ;;  %v1888_v8 = vld [vmem:[%s2915_s0 + $0x38] sm:$0xff]  ;;  %v37_v19 = vld [vmem:[%s2915_s0 + $0x10] sm:$0xff] }
   0x4   :  { %v46_v9 = vsub.s32 1, %v23_v3  ;;  %v54_v10 = vsub.s32 3, %v23_v3  ;;  %v42_v11 = vsub.s32 0, %v23_v3  ;;  %v50_v12 = vsub.s32 2, %v23_v3  ;;  %v2234_v44 = vld [vmem:[%s2917_s2 + $0x40] sm:$0xff]   ;;  %v2238_v56 = vld [vmem:[%s2917_s2 + $0x48] sm:$0xff]  }
   0x5   :  { %v26_v14 = vmul.u32 2, %v23_v3  ;;  %v2236_v50 = vld [vmem:[%s2917_s2 + $0xc0] sm:$0xff]   ;;  %v2240_v57 = vld [vmem:[%s2917_s2 + $0xc8] sm:$0xff]   ;;  %v2242_v60 = vld [vmem:[%s2917_s2 + $0x50] sm:$0xff]  }
   0x6   :  { %v47_v15 = vrot.slane %v19_v1, %v46_v9  ;;  %v55_v16 = vrot.slane %v19_v1, %v54_v10  ;;  %v72_v17 = vrot.slane %v1720_v2, %v46_v9  ;;  %v80_v18 = vrot.slane %v1720_v2, %v54_v10  ;;  %v2235_v51 = vld [vmem:[%s2917_s2] sm:$0xff]   ;;  %v2239_v58 = vld [vmem:[%s2917_s2 + $0x8] sm:$0xff]   ;;  %v2244_v61 = vld [vmem:[%s2917_s2 + $0xd0] sm:$0xff]  }
   0x7   :  { %v2442_v20 = vrot.slane %v19_v1, %v42_v11  ;;  %v2444_v21 = vrot.slane %v19_v1, %v50_v12  ;;  %v2446_v22 = vrot.slane %v1720_v2, %v42_v11  ;;  %v2448_v23 = vrot.slane %v1720_v2, %v50_v12  ;;  %v2237_v55 = vld [vmem:[%s2917_s2 + $0x80] sm:$0xff]   ;;  %v2241_v59 = vld [vmem:[%s2917_s2 + $0x88] sm:$0xff]   ;;  %v2243_v62 = vld [vmem:[%s2917_s2 + $0x10] sm:$0xff]  }
   0x8   :  { %v61_v24 = vmul.f32 %v47_v15, %v36_v5  ;;  %v63_v25 = vmul.f32 %v55_v16, %v38_v6  ;;  %v901_v26 = vmul.f32 %v1886_v7, %v47_v15  ;;  %v903_v27 = vmul.f32 %v1888_v8, %v55_v16  ;;  %v2245_v63 = vld [vmem:[%s2917_s2 + $0x90] sm:$0xff]   ;;  %v2246_v0 = vld [vmem:[%s2917_s2 + $0x58] sm:$0xff]   ;;  %v2250_v5 = vld [vmem:[%s2917_s2 + $0x60] sm:$0xff]  }
   0x9   :  { %v60_v28 = vmul.f32 %v2442_v20, %v35_v13  ;;  %v62_v29 = vmul.f32 %v2444_v21, %v37_v19  ;;  %v30_v31 = vadd.s32 1, %v26_v14  ;;  %vm27_vm0 = vcmp.eq.s32.totalorder %v25_v30, %v26_v14  ;;  %v2248_v1 = vld [vmem:[%s2917_s2 + $0xd8] sm:$0xff]   ;;  %v2252_v6 = vld [vmem:[%s2917_s2 + $0xe0] sm:$0xff]   ;;  %v2254_v9 = vld [vmem:[%s2917_s2 + $0x68] sm:$0xff]  }
   0xa   :  { %v86_v32 = vadd.f32 %v72_v17, %v61_v24  ;;  %v88_v33 = vadd.f32 %v80_v18, %v63_v25  ;;  %v2452_v34 = vadd.f32 %v901_v26, %v72_v17  ;;  %v2454_v35 = vadd.f32 %v903_v27, %v80_v18  ;;  %v2247_v2 = vld [vmem:[%s2917_s2 + $0x18] sm:$0xff]   ;;  %v2251_v7 = vld [vmem:[%s2917_s2 + $0x20] sm:$0xff]   ;;  %v2256_v10 = vld [vmem:[%s2917_s2 + $0xe8] sm:$0xff]  }
   0xb   :  { %v85_v36 = vadd.f32 %v2446_v22, %v60_v28  ;;  %v87_v37 = vadd.f32 %v2448_v23, %v62_v29  ;;  %vm31_vm1 = vcmp.eq.s32.totalorder %v25_v30, %v30_v31  ;;  %v28_v47 = vsel %vm27_vm0, 1.0, %v2387_v46  ;;  %v2249_v3 = vld [vmem:[%s2917_s2 + $0x98] sm:$0xff]   ;;  %v2253_v8 = vld [vmem:[%s2917_s2 + $0xa0] sm:$0xff]   ;;  %v2255_v11 = vld [vmem:[%s2917_s2 + $0x28] sm:$0xff]  }
   0xc   :  { %v90_v38 = vmax.f32 %v86_v32, 0.0  ;;  %v92_v39 = vmax.f32 %v88_v33, 0.0  ;;  %v32_v48 = vsel %vm31_vm1, 1.0, %v2387_v46  ;;  %v2470_v53 = vpack.c.bf16 %v28_v47, %v28_v47  ;;  %v2257_v12 = vld [vmem:[%s2917_s2 + $0xa8] sm:$0xff]   ;;  %v2258_v13 = vld [vmem:[%s2917_s2 + $0x70] sm:$0xff]  }
   0xd   :  { %v89_v40 = vmax.f32 %v85_v36, 0.0  ;;  %v91_v41 = vmax.f32 %v87_v37, 0.0  ;;  %v2472_v54 = vpack.c.bf16 %v32_v48, %v32_v48  ;;  %v2259_v14 = vld [vmem:[%s2917_s2 + $0x30] sm:$0xff]  }
   0xe   :  { %v94_v42 = vmax.f32 %v90_v38, %v92_v39 }
   0xf   :  { %v93_v43 = vmax.f32 %v89_v40, %v91_v41 }
  0x10   :  { %v96_v45 = vpack.c.bf16 %v94_v42, %v94_v42 }
  0x11   :  { %v95_v49 = vpack.c.bf16 %v93_v43, %v93_v43 }
  0x12   :  { %1721 = vmatprep.subr.msk.bf16.mxu0 %vm101_vm2, %v96_v45  ;;  %1723 = vmatprep.subr.msk.bf16.mxu1 %vm101_vm2, %v96_v45 }
  0x13   :  { %v103_v52 = vsel %vm101_vm2, %v95_v49, 0 }
  0x14   :  { %109 = vmatpush1.bf16.msra.mxu0 %v103_v52  ;;  %153 = vmatpush1.bf16.msra.mxu1 %v103_v52 }
  0x15   :  { %2053 = vmatprep.subr.bf16.mxu0 %v2234_v44  ;;  %2075 = vmatprep.subr.bf16.mxu1 %v2236_v50 }
  0x17   :  { %1722 = vmatmul.mubr.msk.bf16.vlgmr.msra.gmra.mrb[0].mxu0 %vm97_vm3, %v2470_v53  ;;  %1724 = vmatmul.mubr.msk.bf16.vlgmr.msra.gmra.mrb[0].mxu1 %vm97_vm3, %v2472_v54 }
  0x18   :  { %2054 = vmatpush3.bf16.msra.mxu0 %v2235_v51  ;;  %2076 = vmatpush3.bf16.msra.mxu1 %v2237_v55 }
  0x19   :  { %2055 = vmatprep.subr.bf16.mxu0 %v2238_v56  ;;  %2077 = vmatprep.subr.bf16.mxu1 %v2240_v57 }
  0x1c   :  { %2056 = vmatpush3.bf16.msra.mxu0 %v2239_v58  ;;  %2078 = vmatpush3.bf16.msra.mxu1 %v2241_v59 }
  0x1d   :  { %2057 = vmatprep.subr.bf16.mxu0 %v2242_v60  ;;  %2079 = vmatprep.subr.bf16.mxu1 %v2244_v61 }
  0x20   :  { %2058 = vmatpush3.bf16.msra.mxu0 %v2243_v62  ;;  %2080 = vmatpush3.bf16.msra.mxu1 %v2245_v63 }
  0x21   :  { %2059 = vmatprep.subr.bf16.mxu0 %v2246_v0  ;;  %2081 = vmatprep.subr.bf16.mxu1 %v2248_v1 }
  0x24   :  { %2060 = vmatpush3.bf16.msra.mxu0 %v2247_v2  ;;  %2082 = vmatpush3.bf16.msra.mxu1 %v2249_v3 }
  0x25   :  { %2061 = vmatprep.subr.bf16.mxu0 %v2250_v5  ;;  %2083 = vmatprep.subr.bf16.mxu1 %v2252_v6 }
  0x28   :  { %2062 = vmatpush3.bf16.msra.mxu0 %v2251_v7  ;;  %2084 = vmatpush3.bf16.msra.mxu1 %v2253_v8 }
  0x29   :  { %2063 = vmatprep.subr.bf16.mxu0 %v2254_v9  ;;  %2085 = vmatprep.subr.bf16.mxu1 %v2256_v10 }
  0x2c   :  { %2064 = vmatpush3.bf16.msra.mxu0 %v2255_v11  ;;  %2086 = vmatpush3.bf16.msra.mxu1 %v2257_v12 }
  0x2d   :  { %2065 = vmatprep.subr.bf16.mxu0 %v2258_v13 }
  0x30   :  { %2066 = vmatpush3.bf16.msra.mxu0 %v2259_v14 }
  0x31   :  { %9 = vsyncpa [#allocation3], 0  ;;  %v2260_v15 = vld [vmem:[%s2917_s2 + $0xf0] sm:$0xff]   ;;  %v2262_v17 = vld [vmem:[%s2917_s2 + $0x78] sm:$0xff]   ;;  %v909_v27 = vmax.f32 %v2452_v34, 0.0  ;;  %v911_v28 = vmax.f32 %v2454_v35, 0.0 }
  0x32   :  { %v2261_v16 = vld [vmem:[%s2917_s2 + $0xb0] sm:$0xff]   ;;  %2087 = vmatprep.subr.bf16.mxu1 %v2260_v15  ;;  %v2263_v18 = vld [vmem:[%s2917_s2 + $0x38] sm:$0xff]   ;;  %2067 = vmatprep.subr.bf16.mxu0 %v2262_v17  ;;  %v2266_v25 = vld [vmem:[%s2917_s2 + $0x140] sm:$0xff]  }
  0x33   :  { %2088 = vmatpush3.bf16.msra.mxu1 %v2261_v16  ;;  %v2264_v19 = vld [vmem:[%s2917_s2 + $0xf8] sm:$0xff]   ;;  %v2268_v26 = vld [vmem:[%s2917_s2 + $0x1c0] sm:$0xff]   ;;  %v2573_v29 = vmax.f32 %v909_v27, %v911_v28  ;;  %v2270_v46 = vld [vmem:[%s2917_s2 + $0x148] sm:$0xff]  }
  0x34   :  { %2068 = vmatpush3.bf16.msra.mxu0 %v2263_v18  ;;  %v2265_v24 = vld [vmem:[%s2917_s2 + $0xb8] sm:$0xff]   ;;  %2089 = vmatprep.subr.bf16.mxu1 %v2264_v19  ;;  %v2267_v34 = vld [vmem:[%s2917_s2 + $0x100] sm:$0xff]   ;;  %v2272_v48 = vld [vmem:[%s2917_s2 + $0x1c8] sm:$0xff]  }
  0x35   :  { %2097 = vmatprep.subr.bf16.mxu0 %v2266_v25  ;;  %v2269_v45 = vld [vmem:[%s2917_s2 + $0x180] sm:$0xff]   ;;  %v2271_v50 = vld [vmem:[%s2917_s2 + $0x108] sm:$0xff]   ;;  %v2274_v51 = vld [vmem:[%s2917_s2 + $0x150] sm:$0xff]   ;;  %v915_v19 = vpack.c.bf16 %v2573_v29, %v2573_v29 }
  0x36   :  { %v2273_v52 = vld [vmem:[%s2917_s2 + $0x188] sm:$0xff]   ;;  %v2276_v55 = vld [vmem:[%s2917_s2 + $0x1d0] sm:$0xff]   ;;  %v2278_v57 = vld [vmem:[%s2917_s2 + $0x158] sm:$0xff]  }
  0x37   :  { %2090 = vmatpush3.bf16.msra.mxu1 %v2265_v24  ;;  %v2275_v56 = vld [vmem:[%s2917_s2 + $0x110] sm:$0xff]   ;;  %v1885_v59 = vld [vmem:[%s2915_s0 + $0x20] sm:$0xff]  ;;  %v2280_v61 = vld [vmem:[%s2917_s2 + $0x1d8] sm:$0xff]  }
  0x38   :  { %2119 = vmatprep.subr.bf16.mxu1 %v2268_v26  ;;  %v2277_v58 = vld [vmem:[%s2917_s2 + $0x190] sm:$0xff]   ;;  %v2279_v62 = vld [vmem:[%s2917_s2 + $0x118] sm:$0xff]   ;;  %v2282_v63 = vld [vmem:[%s2917_s2 + $0x160] sm:$0xff]   ;;  %v900_v0 = vmul.f32 %v1885_v59, %v2442_v20 }
  0x39   :  { %v1887_v60 = vld [vmem:[%s2915_s0 + $0x30] sm:$0xff]  ;;  %v2281_v2 = vld [vmem:[%s2917_s2 + $0x198] sm:$0xff]   ;;  %v2284_v3 = vld [vmem:[%s2917_s2 + $0x1e0] sm:$0xff]  }
  0x3a   :  { %v902_v1 = vmul.f32 %v1887_v60, %v2444_v21  ;;  %v2283_v5 = vld [vmem:[%s2917_s2 + $0x120] sm:$0xff]   ;;  %v2286_v20 = vld [vmem:[%s2917_s2 + $0x168] sm:$0xff]   ;;  %v904_v21 = vadd.f32 %v900_v0, %v2446_v22  ;;  %v2290_v22 = vld [vmem:[%s2917_s2 + $0x170] sm:$0xff]  }
  0x3b   :  { %v2285_v7 = vld [vmem:[%s2917_s2 + $0x1a0] sm:$0xff]   ;;  %v2288_v8 = vld [vmem:[%s2917_s2 + $0x1e8] sm:$0xff]   ;;  %v2292_v12 = vld [vmem:[%s2917_s2 + $0x1f0] sm:$0xff]  }
  0x3c   :  { %v906_v6 = vadd.f32 %v902_v1, %v2448_v23  ;;  %v2287_v9 = vld [vmem:[%s2917_s2 + $0x128] sm:$0xff]   ;;  %v908_v23 = vmax.f32 %v904_v21, 0.0  ;;  %v2291_v13 = vld [vmem:[%s2917_s2 + $0x130] sm:$0xff]   ;;  %v2294_v14 = vld [vmem:[%s2917_s2 + $0x178] sm:$0xff]  }
  0x3d   :  { %v2289_v11 = vld [vmem:[%s2917_s2 + $0x1a8] sm:$0xff]   ;;  %v2293_v16 = vld [vmem:[%s2917_s2 + $0x1b0] sm:$0xff]   ;;  %v2296_v17 = vld [vmem:[%s2917_s2 + $0x1f8] sm:$0xff]  }
  0x3e   :  { %v910_v10 = vmax.f32 %v906_v6, 0.0  ;;  %v2295_v18 = vld [vmem:[%s2917_s2 + $0x138] sm:$0xff]   ;;  %v2298_v29 = vld [vmem:[%s2917_s2 + $0x40] sm:$0xff]  }
  0x3f   :  { %v2297_v25 = vld [vmem:[%s2917_s2 + $0x1b8] sm:$0xff]   ;;  %v2330_v60 = vld [vmem:[%s2917_s2 + $0x140] sm:$0xff]  }
  0x40   :  { %v912_v15 = vmax.f32 %v908_v23, %v910_v10  ;;  %v2329_v59 = vld [vmem:[%s2917_s2 + $0xb8] sm:$0xff]  }
  0x42   :  { %v914_v24 = vpack.c.bf16 %v912_v15, %v912_v15 }
  0x44   :  { %v917_v27 = vsel %vm101_vm2, %v914_v24, 0 }
  0xea   :  { %v142_v30 = vpop.f32.mrb[0].mxu0  ;;  %v186_v31 = vpop.f32.mrb[0].mxu1 }
  0xeb   :  { %v193_v32 = vmax.f32 %v142_v30, %v186_v31  ;;  %v144_v33 = vpop.f32.mrb[1].mxu0  ;;  %v188_v36 = vpop.f32.mrb[1].mxu1  ;;  %v2299_v30 = vld [vmem:[%s2917_s2] sm:$0xff]  }
  0xec   :  { %v194_v37 = vmax.f32 %v144_v33, %v188_v36  ;;  %v146_v38 = vpop.f32.mrb[2].mxu0  ;;  %v190_v39 = vpop.f32.mrb[2].mxu1  ;;  %v2300_v31 = vld [vmem:[%s2917_s2 + $0xc0] sm:$0xff]   ;;  %v2305_v33 = vld [vmem:[%s2917_s2 + $0x88] sm:$0xff]   ;;  %v2306_v36 = vld [vmem:[%s2917_s2 + $0x50] sm:$0xff]  }
  0xed   :  { %v2575_v40 = vpack.c.bf16 %v193_v32, %v193_v32  ;;  %v147_v41 = vpop.f32.mrb[3].mxu0  ;;  %v191_v42 = vpop.f32.mrb[3].mxu1  ;;  %v2303_v32 = vld [vmem:[%s2917_s2 + $0x8] sm:$0xff]   ;;  %v2307_v38 = vld [vmem:[%s2917_s2 + $0x10] sm:$0xff]  }
  0xee   :  { %v196_v43 = vpack.c.bf16 %v194_v37, %v194_v37  ;;  %v2308_v37 = vld [vmem:[%s2917_s2 + $0xd0] sm:$0xff]   ;;  %v2312_v41 = vld [vmem:[%s2917_s2 + $0xd8] sm:$0xff]  }
  0xef   :  { %v400_v47 = vshrl.u32 %v2575_v40, 16  ;;  %v579_v26 = vrot.slane %v2575_v40, 1  ;;  %v2309_v39 = vld [vmem:[%s2917_s2 + $0x90] sm:$0xff]   ;;  %v2311_v42 = vld [vmem:[%s2917_s2 + $0x18] sm:$0xff]  }
  0xf0   :  { %357 = vmatprep.mubr.bf16.mxu0 %v196_v43  ;;  %v403_v35 = vshrl.u32 %v196_v43, 16  ;;  %v580_v44 = vrot.slane %v196_v43, 1  ;;  %v2313_v43 = vld [vmem:[%s2917_s2 + $0x98] sm:$0xff]  }
  0xf1   :  { %358 = vmatmul.mubr.bf16.vlgmr.msra.gmra.mrb[4].mxu0 %v2575_v40  ;;  %v753_v28 = vrot.slane %v400_v47, 1  ;;  %v2310_v40 = vld [vmem:[%s2917_s2 + $0x58] sm:$0xff]  }
  0xf2   :  { %2098 = vmatpush3.bf16.msra.mxu0 %v2267_v34  ;;  %535 = vmatprep.mubr.bf16.mxu1 %v403_v35  ;;  %v754_v49 = vrot.slane %v403_v35, 1  ;;  %v2314_v34 = vld [vmem:[%s2917_s2 + $0x60] sm:$0xff]  }
  0xf3   :  { %711 = vmatprep.mubr.bf16.mxu0 %v580_v44  ;;  %536 = vmatmul.mubr.bf16.vlgmr.msra.gmra.mrb[4].mxu1 %v400_v47  ;;  %v2315_v35 = vld [vmem:[%s2917_s2 + $0x20] sm:$0xff]   ;;  %v2319_v47 = vld [vmem:[%s2917_s2 + $0x28] sm:$0xff]  }
  0xf4   :  { %2120 = vmatpush3.bf16.msra.mxu1 %v2269_v45  ;;  %2099 = vmatprep.subr.bf16.mxu0 %v2270_v46  ;;  %v2316_v44 = vld [vmem:[%s2917_s2 + $0xe0] sm:$0xff]   ;;  %v2318_v46 = vld [vmem:[%s2917_s2 + $0x68] sm:$0xff]  }
  0xf5   :  { %885 = vmatprep.mubr.bf16.mxu1 %v754_v49  ;;  %2121 = vmatprep.subr.bf16.mxu1 %v2272_v48  ;;  %v2317_v45 = vld [vmem:[%s2917_s2 + $0xa0] sm:$0xff]   ;;  %v2320_v48 = vld [vmem:[%s2917_s2 + $0xe8] sm:$0xff]  }
  0xf6   :  { %2100 = vmatpush3.bf16.msra.mxu0 %v2271_v50  ;;  %v2321_v49 = vld [vmem:[%s2917_s2 + $0xa8] sm:$0xff]   ;;  %v2322_v50 = vld [vmem:[%s2917_s2 + $0x70] sm:$0xff]  }
  0xf7   :  { %2101 = vmatprep.subr.bf16.mxu0 %v2274_v51  ;;  %v2323_v51 = vld [vmem:[%s2917_s2 + $0x30] sm:$0xff]  }
  0xf8   :  { %2122 = vmatpush3.bf16.msra.mxu1 %v2273_v52  ;;  %v2324_v52 = vld [vmem:[%s2917_s2 + $0xf0] sm:$0xff]  }
  0xf9   :  { %2123 = vmatprep.subr.bf16.mxu1 %v2276_v55  ;;  %v2325_v55 = vld [vmem:[%s2917_s2 + $0xb0] sm:$0xff]  }
  0xfa   :  { %2102 = vmatpush3.bf16.msra.mxu0 %v2275_v56  ;;  %v2326_v56 = vld [vmem:[%s2917_s2 + $0x78] sm:$0xff]  }
  0xfb   :  { %2103 = vmatprep.subr.bf16.mxu0 %v2278_v57  ;;  %v2327_v57 = vld [vmem:[%s2917_s2 + $0x38] sm:$0xff]  }
  0xfc   :  { %2124 = vmatpush3.bf16.msra.mxu1 %v2277_v58  ;;  %v2328_v58 = vld [vmem:[%s2917_s2 + $0xf8] sm:$0xff]  }
  0xfd   :  { %2125 = vmatprep.subr.bf16.mxu1 %v2280_v61  ;;  %v2332_v61 = vld [vmem:[%s2917_s2 + $0x1c0] sm:$0xff]  }
  0xfe   :  { %2104 = vmatpush3.bf16.msra.mxu0 %v2279_v62 }
  0xff   :  { %2105 = vmatprep.subr.bf16.mxu0 %v2282_v63  ;;  %v2800_v63 = vld [vmem:[%s2918_s3] sm:$0x1] }
 0x100   :  { %2126 = vmatpush3.bf16.msra.mxu1 %v2281_v2 }
 0x101   :  { %2127 = vmatprep.subr.bf16.mxu1 %v2284_v3 }
 0x102   :  { %2106 = vmatpush3.bf16.msra.mxu0 %v2283_v5 }
 0x103   :  { %2107 = vmatprep.subr.bf16.mxu0 %v2286_v20 }
 0x104   :  { %2128 = vmatpush3.bf16.msra.mxu1 %v2285_v7 }
 0x105   :  { %2129 = vmatprep.subr.bf16.mxu1 %v2288_v8 }
 0x106   :  { %2108 = vmatpush3.bf16.msra.mxu0 %v2287_v9 }
 0x107   :  { %2109 = vmatprep.subr.bf16.mxu0 %v2290_v22 }
 0x108   :  { %2130 = vmatpush3.bf16.msra.mxu1 %v2289_v11 }
 0x109   :  { %2131 = vmatprep.subr.bf16.mxu1 %v2292_v12 }
 0x10a   :  { %2110 = vmatpush3.bf16.msra.mxu0 %v2291_v13 }
 0x10b   :  { %2111 = vmatprep.subr.bf16.mxu0 %v2294_v14 }
 0x10c   :  { %2132 = vmatpush3.bf16.msra.mxu1 %v2293_v16 }
 0x10d   :  { %2133 = vmatprep.subr.bf16.mxu1 %v2296_v17 }
 0x10e   :  { %2112 = vmatpush3.bf16.msra.mxu0 %v2295_v18 }
 0x10f   :  { %1889 = vmatprep.subr.msk.bf16.mxu0 %vm101_vm2, %v915_v19 }
 0x110   :  { %2134 = vmatpush3.bf16.msra.mxu1 %v2297_v25 }
 0x111   :  { %712 = vmatmul.mubr.bf16.vlgmr.msra.gmra.mrb[8].mxu0 %v579_v26  ;;  %1891 = vmatprep.subr.msk.bf16.mxu1 %vm101_vm2, %v915_v19 }
 0x112   :  { %923 = vmatpush1.bf16.msra.mxu0 %v917_v27  ;;  %954 = vmatprep.mubr.bf16.mxu0 %v2386_v4 }
 0x113   :  { %886 = vmatmul.mubr.bf16.vlgmr.msra.gmra.mrb[8].mxu1 %v753_v28  ;;  %2141 = vmatprep.subr.bf16.mxu0 %v2298_v29 }
 0x114   :  { %964 = vmatpush1.bf16.msra.mxu1 %v917_v27  ;;  %995 = vmatprep.mubr.bf16.mxu1 %v2386_v4  ;;  %v2301_v4 = vld [vmem:[%s2917_s2 + $0x80] sm:$0xff]  }
 0x115   :  { %2163 = vmatprep.subr.bf16.mxu1 %v2300_v31 }
 0x119   :  { %1890 = vmatmul.mubr.msk.bf16.vlgmr.msra.gmra.mrb[12].mxu0 %vm97_vm3, %v2470_v53  ;;  %v2302_v53 = vld [vmem:[%s2917_s2 + $0x48] sm:$0xff]  }
 0x11a   :  { %2142 = vmatpush3.bf16.msra.mxu0 %v2299_v30 }
 0x11b   :  { %1892 = vmatmul.mubr.msk.bf16.vlgmr.msra.gmra.mrb[12].mxu1 %vm97_vm3, %v2472_v54  ;;  %v2304_v54 = vld [vmem:[%s2917_s2 + $0xc8] sm:$0xff]   ;;  %2143 = vmatprep.subr.bf16.mxu0 %v2302_v53 }
 0x11c   :  { %2164 = vmatpush3.bf16.msra.mxu1 %v2301_v4 }
 0x11d   :  { %2165 = vmatprep.subr.bf16.mxu1 %v2304_v54 }
 0x11e   :  { %2144 = vmatpush3.bf16.msra.mxu0 %v2303_v32 }
 0x11f   :  { %2145 = vmatprep.subr.bf16.mxu0 %v2306_v36 }
 0x120   :  { %2166 = vmatpush3.bf16.msra.mxu1 %v2305_v33  ;;  %v2331_v33 = vld [vmem:[%s2917_s2 + $0x100] sm:$0xff]  }
 0x121   :  { %2167 = vmatprep.subr.bf16.mxu1 %v2308_v37 }
 0x122   :  { %2146 = vmatpush3.bf16.msra.mxu0 %v2307_v38  ;;  %v2333_v38 = vld [vmem:[%s2917_s2 + $0x180] sm:$0xff]  }
 0x123   :  { %2147 = vmatprep.subr.bf16.mxu0 %v2310_v40 }
 0x124   :  { %2168 = vmatpush3.bf16.msra.mxu1 %v2309_v39  ;;  %v2334_v39 = vld [vmem:[%s2917_s2 + $0x148] sm:$0xff]  }
 0x125   :  { %2169 = vmatprep.subr.bf16.mxu1 %v2312_v41  ;;  %v2336_v41 = vld [vmem:[%s2917_s2 + $0x1c8] sm:$0xff]  }
 0x126   :  { %2148 = vmatpush3.bf16.msra.mxu0 %v2311_v42 }
 0x127   :  { %2149 = vmatprep.subr.bf16.mxu0 %v2314_v34  ;;  %v2338_v34 = vld [vmem:[%s2917_s2 + $0x150] sm:$0xff]  }
 0x128   :  { %2170 = vmatpush3.bf16.msra.mxu1 %v2313_v43  ;;  %v2335_v43 = vld [vmem:[%s2917_s2 + $0x108] sm:$0xff]  }
 0x129   :  { %2171 = vmatprep.subr.bf16.mxu1 %v2316_v44  ;;  %v2340_v44 = vld [vmem:[%s2917_s2 + $0x1d0] sm:$0xff]  }
 0x12a   :  { %2150 = vmatpush3.bf16.msra.mxu0 %v2315_v35  ;;  %v2337_v35 = vld [vmem:[%s2917_s2 + $0x188] sm:$0xff]  }
 0x12b   :  { %2151 = vmatprep.subr.bf16.mxu0 %v2318_v46  ;;  %v2342_v46 = vld [vmem:[%s2917_s2 + $0x158] sm:$0xff]  }
 0x12c   :  { %2172 = vmatpush3.bf16.msra.mxu1 %v2317_v45  ;;  %v2339_v45 = vld [vmem:[%s2917_s2 + $0x110] sm:$0xff]  }
 0x12d   :  { %2173 = vmatprep.subr.bf16.mxu1 %v2320_v48  ;;  %v2344_v48 = vld [vmem:[%s2917_s2 + $0x1d8] sm:$0xff]  }
 0x12e   :  { %2152 = vmatpush3.bf16.msra.mxu0 %v2319_v47  ;;  %v2341_v47 = vld [vmem:[%s2917_s2 + $0x190] sm:$0xff]  }
 0x12f   :  { %2153 = vmatprep.subr.bf16.mxu0 %v2322_v50  ;;  %v2346_v50 = vld [vmem:[%s2917_s2 + $0x160] sm:$0xff]  }
 0x130   :  { %2174 = vmatpush3.bf16.msra.mxu1 %v2321_v49  ;;  %v2343_v49 = vld [vmem:[%s2917_s2 + $0x118] sm:$0xff]  }
 0x131   :  { %2175 = vmatprep.subr.bf16.mxu1 %v2324_v52  ;;  %v2348_v52 = vld [vmem:[%s2917_s2 + $0x1e0] sm:$0xff]  }
 0x132   :  { %2154 = vmatpush3.bf16.msra.mxu0 %v2323_v51  ;;  %v2345_v51 = vld [vmem:[%s2917_s2 + $0x198] sm:$0xff]  }
 0x133   :  { %2155 = vmatprep.subr.bf16.mxu0 %v2326_v56  ;;  %v2350_v56 = vld [vmem:[%s2917_s2 + $0x168] sm:$0xff]  }
 0x134   :  { %2176 = vmatpush3.bf16.msra.mxu1 %v2325_v55  ;;  %v2347_v55 = vld [vmem:[%s2917_s2 + $0x120] sm:$0xff]  }
 0x135   :  { %2177 = vmatprep.subr.bf16.mxu1 %v2328_v58  ;;  %v2352_v58 = vld [vmem:[%s2917_s2 + $0x1e8] sm:$0xff]  }
 0x136   :  { %2156 = vmatpush3.bf16.msra.mxu0 %v2327_v57  ;;  %v2349_v57 = vld [vmem:[%s2917_s2 + $0x1a0] sm:$0xff]  }
 0x137   :  { %2185 = vmatprep.subr.bf16.mxu0 %v2330_v60  ;;  %v2354_v60 = vld [vmem:[%s2917_s2 + $0x170] sm:$0xff]  }
 0x138   :  { %2178 = vmatpush3.bf16.msra.mxu1 %v2329_v59  ;;  %v2351_v59 = vld [vmem:[%s2917_s2 + $0x128] sm:$0xff]  }
 0x139   :  { %2207 = vmatprep.subr.bf16.mxu1 %v2332_v61  ;;  %v2353_v61 = vld [vmem:[%s2917_s2 + $0x1a8] sm:$0xff]  }
 0x1c4   :  { %v2069_v62 = vpop.f32.mrb[4].mxu0 }
 0x1c5   :  { %v2070_v0 = vpop.f32.mrb[5].mxu0 }
 0x1c6   :  { %v2071_v1 = vadd.f32 %v2070_v0, %v2069_v62  ;;  %v2072_v2 = vpop.f32.mrb[6].mxu0  ;;  %v2091_v3 = vpop.f32.mrb[4].mxu1  ;;  %v2356_v62 = vld [vmem:[%s2917_s2 + $0x1f0] sm:$0xff]  }
 0x1c7   :  { %v2073_v5 = vpop.f32.mrb[7].mxu0  ;;  %v2092_v20 = vpop.f32.mrb[5].mxu1  ;;  %v2355_v0 = vld [vmem:[%s2917_s2 + $0x130] sm:$0xff]  }
 0x1c8   :  { %v365_v21 = vadd.f32 %v2071_v1, %v2800_v63  ;;  %v2093_v6 = vadd.f32 %v2092_v20, %v2091_v3  ;;  %v2094_v7 = vpop.f32.mrb[6].mxu1  ;;  %v2358_v1 = vld [vmem:[%s2917_s2 + $0x178] sm:$0xff]   ;;  %v2357_v2 = vld [vmem:[%s2917_s2 + $0x1b0] sm:$0xff]  }
 0x1c9   :  { %v2095_v8 = vpop.f32.mrb[7].mxu1  ;;  %v2360_v3 = vld [vmem:[%s2917_s2 + $0x1f8] sm:$0xff]  }
 0x1ca   :  { %v543_v9 = vadd.f32 %v2093_v6, %v365_v21  ;;  %v2359_v5 = vld [vmem:[%s2917_s2 + $0x138] sm:$0xff]  }
 0x1cb   :  { %v2361_v20 = vld [vmem:[%s2917_s2 + $0x1b8] sm:$0xff]   ;;  %s2388_s2 = smov [#allocation2]  }
 0x1cc   :  { %s1709_s14 = sshll.u32 %s2388_s2, 4  ;;  %s1710_s14 = int_to_ptr.vmem [resolvable:$true] %s1709_s14 }
 0x1cd   :  { %s2362_s15 = scalar_lea.vmem %s1710_s14, 32  ;;  %p2367_p1 = scmp.lt.s32.totalorder %s1710_s14, %s1710_s14 }
 0x1ce   :  { %p2363_p0 = scmp.ne.s32.totalorder %s1710_s14, %s2362_s15  ;;  %p2368_p2 = scmp.lt.s32.totalorder %s2362_s15, %s2362_s15 }
 0x1d0   :  { %p2369_p3 = por %p2368_p2, %p2367_p1 }
 0x1d2   :  { %p2370_p4 = pnand %p2369_p3, %p2363_p0 }
 0x1e4   :  { %v2113_v22 = vpop.f32.mrb[8].mxu0 }
 0x1e5   :  { %v2114_v23 = vpop.f32.mrb[9].mxu0 }
 0x1e6   :  { %v2115_v10 = vadd.f32 %v2114_v23, %v2113_v22  ;;  %v2116_v11 = vpop.f32.mrb[10].mxu0  ;;  %v2135_v12 = vpop.f32.mrb[8].mxu1 }
 0x1e7   :  { %v2117_v13 = vpop.f32.mrb[11].mxu0  ;;  %v2136_v14 = vpop.f32.mrb[9].mxu1 }
 0x1e8   :  { %v719_v15 = vadd.f32 %v2115_v10, %v543_v9  ;;  %v2137_v16 = vadd.f32 %v2136_v14, %v2135_v12  ;;  %v2138_v17 = vpop.f32.mrb[10].mxu1 }
 0x1e9   :  { %v2139_v18 = vpop.f32.mrb[11].mxu1 }
 0x1ea   :  { %v893_v19 = vadd.f32 %v2137_v16, %v719_v15 }
 0x1ec   :  { %894 = vst [vmem:[#allocation2] sm:$0x1] %v893_v19  ;;  %v956_v24 = vpop.f32.mrb[12].mxu0 }
 0x1ed   :  { %v958_v25 = vpop.f32.mrb[13].mxu0 }
 0x1ee   :  { %v960_v26 = vpop.f32.mrb[14].mxu0  ;;  %v997_v27 = vpop.f32.mrb[12].mxu1 }
 0x1ef   :  { %v1004_v28 = vmax.f32 %v956_v24, %v997_v27  ;;  %v961_v29 = vpop.f32.mrb[15].mxu0  ;;  %v999_v30 = vpop.f32.mrb[13].mxu1 }
 0x1f0   :  { %v1005_v31 = vmax.f32 %v958_v25, %v999_v30  ;;  %v1001_v4 = vpop.f32.mrb[14].mxu1 }
 0x1f1   :  { %v2803_v53 = vpack.c.bf16 %v1004_v28, %v1004_v28  ;;  %v1002_v54 = vpop.f32.mrb[15].mxu1 }
 0x1f2   :  { %v1007_v32 = vpack.c.bf16 %v1005_v31, %v1005_v31 }
 0x1f3   :  { %v1210_v40 = vshrl.u32 %v2803_v53, 16  ;;  %v1388_v21 = vrot.slane %v2803_v53, 1 }
 0x1f4   :  { %1168 = vmatprep.mubr.bf16.mxu0 %v1007_v32  ;;  %v1213_v36 = vshrl.u32 %v1007_v32, 16  ;;  %v1389_v37 = vrot.slane %v1007_v32, 1 }
 0x1f5   :  { %1169 = vmatmul.mubr.bf16.vlgmr.msra.gmra.mrb[16].mxu0 %v2803_v53  ;;  %v1561_v6 = vrot.slane %v1210_v40, 1 }
 0x1f6   :  { %2186 = vmatpush3.bf16.msra.mxu0 %v2331_v33  ;;  %1345 = vmatprep.mubr.bf16.mxu1 %v1213_v36  ;;  %v1562_v42 = vrot.slane %v1213_v36, 1 }
 0x1f7   :  { %1520 = vmatprep.mubr.bf16.mxu0 %v1389_v37  ;;  %1346 = vmatmul.mubr.bf16.vlgmr.msra.gmra.mrb[16].mxu1 %v1210_v40 }
 0x1f8   :  { %2208 = vmatpush3.bf16.msra.mxu1 %v2333_v38  ;;  %2187 = vmatprep.subr.bf16.mxu0 %v2334_v39 }
 0x1f9   :  { %1693 = vmatprep.mubr.bf16.mxu1 %v1562_v42  ;;  %2209 = vmatprep.subr.bf16.mxu1 %v2336_v41 }
 0x1fa   :  { %2188 = vmatpush3.bf16.msra.mxu0 %v2335_v43 }
 0x1fb   :  { %2189 = vmatprep.subr.bf16.mxu0 %v2338_v34 }
 0x1fc   :  { %2210 = vmatpush3.bf16.msra.mxu1 %v2337_v35 }
 0x1fd   :  { %2211 = vmatprep.subr.bf16.mxu1 %v2340_v44 }
 0x1fe   :  { %2190 = vmatpush3.bf16.msra.mxu0 %v2339_v45 }
 0x1ff   :  { %2191 = vmatprep.subr.bf16.mxu0 %v2342_v46 }
 0x200   :  { %2212 = vmatpush3.bf16.msra.mxu1 %v2341_v47 }
 0x201   :  { %2213 = vmatprep.subr.bf16.mxu1 %v2344_v48 }
 0x202   :  { %2192 = vmatpush3.bf16.msra.mxu0 %v2343_v49 }
 0x203   :  { %2193 = vmatprep.subr.bf16.mxu0 %v2346_v50 }
 0x204   :  { %2214 = vmatpush3.bf16.msra.mxu1 %v2345_v51 }
 0x205   :  { %2215 = vmatprep.subr.bf16.mxu1 %v2348_v52 }
 0x206   :  { %2194 = vmatpush3.bf16.msra.mxu0 %v2347_v55 }
 0x207   :  { %2195 = vmatprep.subr.bf16.mxu0 %v2350_v56 }
 0x208   :  { %2216 = vmatpush3.bf16.msra.mxu1 %v2349_v57 }
 0x209   :  { %2217 = vmatprep.subr.bf16.mxu1 %v2352_v58 }
 0x20a   :  { %2196 = vmatpush3.bf16.msra.mxu0 %v2351_v59 }
 0x20b   :  { %2197 = vmatprep.subr.bf16.mxu0 %v2354_v60 }
 0x20c   :  { %2218 = vmatpush3.bf16.msra.mxu1 %v2353_v61 }
 0x20d   :  { %2219 = vmatprep.subr.bf16.mxu1 %v2356_v62 }
 0x20e   :  { %2198 = vmatpush3.bf16.msra.mxu0 %v2355_v0 }
 0x20f   :  { %2199 = vmatprep.subr.bf16.mxu0 %v2358_v1 }
 0x210   :  { %2220 = vmatpush3.bf16.msra.mxu1 %v2357_v2 }
 0x211   :  { %2221 = vmatprep.subr.bf16.mxu1 %v2360_v3 }
 0x212   :  { %2200 = vmatpush3.bf16.msra.mxu0 %v2359_v5 }
 0x214   :  { %2222 = vmatpush3.bf16.msra.mxu1 %v2361_v20 }
 0x215   :  { %1521 = vmatmul.mubr.bf16.vlgmr.msra.gmra.mrb[20].mxu0 %v1388_v21 }
 0x217   :  { %1694 = vmatmul.mubr.bf16.vlgmr.msra.gmra.mrb[20].mxu1 %v1561_v6 }
 0x2c8   :  { %v2157_v7 = vpop.f32.mrb[16].mxu0 }
 0x2c9   :  { %v2158_v8 = vpop.f32.mrb[17].mxu0 }
 0x2ca   :  { %v2159_v9 = vadd.f32 %v2158_v8, %v2157_v7  ;;  %v2160_v22 = vpop.f32.mrb[18].mxu0  ;;  %v2179_v23 = vpop.f32.mrb[16].mxu1 }
 0x2cb   :  { %v2161_v10 = vpop.f32.mrb[19].mxu0  ;;  %v2180_v11 = vpop.f32.mrb[17].mxu1 }
 0x2cc   :  { %v1176_v12 = vadd.f32 %v2159_v9, %v2800_v63  ;;  %v2181_v13 = vadd.f32 %v2180_v11, %v2179_v23  ;;  %v2182_v14 = vpop.f32.mrb[18].mxu1 }
 0x2cd   :  { %v2183_v15 = vpop.f32.mrb[19].mxu1 }
 0x2ce   :  { %v1353_v16 = vadd.f32 %v2181_v13, %v1176_v12 }
 0x2e8   :  { %v2201_v17 = vpop.f32.mrb[20].mxu0 }
 0x2e9   :  { %v2202_v18 = vpop.f32.mrb[21].mxu0 }
 0x2ea   :  { %v2203_v19 = vadd.f32 %v2202_v18, %v2201_v17  ;;  %v2204_v24 = vpop.f32.mrb[22].mxu0  ;;  %v2223_v25 = vpop.f32.mrb[20].mxu1 }
 0x2eb   :  { %v2205_v26 = vpop.f32.mrb[23].mxu0  ;;  %v2224_v27 = vpop.f32.mrb[21].mxu1 }
 0x2ec   :  { %v1528_v28 = vadd.f32 %v2203_v19, %v1353_v16  ;;  %v2225_v29 = vadd.f32 %v2224_v27, %v2223_v25  ;;  %v2226_v30 = vpop.f32.mrb[22].mxu1 }
 0x2ed   :  { %v2227_v31 = vpop.f32.mrb[23].mxu1 }
 0x2ee   :  { %v1701_v4 = vadd.f32 %v2225_v29, %v1528_v28 }
 0x2f0   :  { %1703 = vst [vmem:[#allocation2 + $0x1] sm:$0x1] %v1701_v4 }
 0x2f1   :  { %2373 = shalt.err (!%p2370_p4)
}
 0x2f2   :  { %s2374_s18 = scalar_lea.hbm %s2919_s4, 32 }
 0x2f3   :  { %p2375_p5 = scmp.ne.s32.totalorder %s2919_s4, %s2374_s18  ;;  %p2378_p6 = scmp.lt.u32.totalorder %s2374_s18, %s2919_s4 }
 0x2f5   :  { %p2380_p7 = pnand %p2378_p6, %p2375_p5 }
 0x2f7   :  { %2383 = shalt.err (!%p2380_p7)
}
 0x2f8   :  { %s2389_s0 = smov 16   ;;  %s2390_s23 = smov 1  }
 0x2f9   :  { %1715 = dma.vmem_to_hbm [thread:$0]  %s1710_s14, 32, %s2919_s4, [#allocation3], %s2389_s0, %s2389_s0, %s2390_s23  }
 0x2fa   :  { %2384 = dma.done.wait [#allocation3], 32  }
 0x2fb   :  { %2385 = vsyncadd [#allocation3], 4294967264 }
 0x2fc   :  { %1719 = vsyncpa [#allocation3], 1 }

// kernel: cnn_forward.4
= control target key start
LH: loop header
LB: loop body
LE: loop exit
PB: predicated region body
PF: predicated region fallthrough
CT: control target
= control target key end

     0   :  { %12 = vsyncpa [#allocation3], 0  ;;  %s23308_s0 = inlined_call_operand.vmem [shape: bf16[2,28,28], index: 0, kind: input, shape index: {}]   ;;  %s23309_s1 = inlined_call_operand.hbm [shape: bf16[5,28,768], index: 1, kind: input, shape index: {}]   ;;  %s23310_s2 = inlined_call_operand.vmem [shape: f32[2,768], index: 2, kind: input, shape index: {}]   ;;  %s23311_s3 = inlined_call_operand.hbm [shape: bf16[5,384,512], index: 3, kind: input, shape index: {}]   ;;  %s23312_s4 = inlined_call_operand.hbm [shape: bf16[21,28,512], index: 4, kind: input, shape index: {}]   ;;  %s23313_s5 = inlined_call_operand.vmem [shape: f32[2,8,512], index: 5, kind: output, shape index: {0}]   ;;  %s23314_s6 = inlined_call_operand.vmem [shape: f32[1,2,512], index: 6, kind: output, shape index: {1}]  }
   0x1   :  { %13 = vsyncpa [#allocation5], 0  ;;  %s21953_s21 = smov [#allocation4]   ;;  %s21883_s25 = scalar_lea.hbm %s23311_s3, 61440 }
   0x2   :  { %s35_s22 = sshll.u32 %s21953_s21, 4  ;;  %p21884_p0 = scmp.ne.s32.totalorder %s23311_s3, %s21883_s25  ;;  %s36_s22 = int_to_ptr.vmem [resolvable:$true] %s35_s22 }
   0x3   :  { %p21887_p1 = scmp.lt.u32.totalorder %s21883_s25, %s23311_s3 }
   0x5   :  { %p21889_p2 = pnand %p21887_p1, %p21884_p0 }
   0x7   :  { %21892 = shalt.err (!%p21889_p2)
}
   0x8   :  { %s21893_s30 = scalar_lea.vmem %s36_s22, 61440  ;;  %p21898_p4 = scmp.lt.s32.totalorder %s36_s22, %s36_s22 }
   0x9   :  { %p21894_p3 = scmp.ne.s32.totalorder %s36_s22, %s21893_s30  ;;  %p21899_p5 = scmp.lt.s32.totalorder %s21893_s30, %s21893_s30 }
   0xb   :  { %p21900_p6 = por %p21899_p5, %p21898_p4 }
   0xd   :  { %p21901_p7 = pnand %p21900_p6, %p21894_p3 }
   0xf   :  { %21904 = shalt.err (!%p21901_p7)
}
  0x10   :  { %s21954_s7 = smov 256   ;;  %s21955_s8 = smov 16  }
  0x11   :  { %41 = dma.hbm_to_vmem [thread:$0]  %s23311_s3, 61440, %s36_s22, [#allocation5], %s21954_s7, %s21954_s7, %s21955_s8  }
  0x12   :  { %s21956_s11 = smov [#allocation2]   ;;  %s21905_s15 = scalar_lea.hbm %s23309_s1, 7680 }
  0x13   :  { %s21_s12 = sshll.u32 %s21956_s11, 4  ;;  %p21906_p8 = scmp.ne.s32.totalorder %s23309_s1, %s21905_s15  ;;  %s22_s12 = int_to_ptr.vmem [resolvable:$true] %s21_s12 }
  0x14   :  { %p21909_p9 = scmp.lt.u32.totalorder %s21905_s15, %s23309_s1 }
  0x16   :  { %p21911_p10 = pnand %p21909_p9, %p21906_p8 }
  0x18   :  { %21914 = shalt.err (!%p21911_p10)
}
  0x19   :  { %s21915_s20 = scalar_lea.vmem %s22_s12, 7680  ;;  %p21920_p12 = scmp.lt.s32.totalorder %s22_s12, %s22_s12 }
  0x1a   :  { %p21916_p11 = scmp.ne.s32.totalorder %s22_s12, %s21915_s20  ;;  %p21921_p13 = scmp.lt.s32.totalorder %s21915_s20, %s21915_s20 }
  0x1c   :  { %p21922_p0 = por %p21921_p13, %p21920_p12 }
  0x1e   :  { %p21923_p1 = pnand %p21922_p0, %p21916_p11 }
  0x20   :  { %21926 = shalt.err (!%p21923_p1)
}
  0x21   :  { %s21957_s3 = smov 384   ;;  %s21958_s21 = smov 24  }
  0x22   :  { %27 = dma.hbm_to_vmem [thread:$0]  %s23309_s1, 7680, %s22_s12, [#allocation3], %s21957_s3, %s21957_s3, %s21958_s21  }
  0x23   :  { %s21959_s24 = smov [#allocation6]   ;;  %s21927_s28 = scalar_lea.hbm %s23312_s4, 21504 }
  0x24   :  { %s47_s25 = sshll.u32 %s21959_s24, 4  ;;  %p21928_p2 = scmp.ne.s32.totalorder %s23312_s4, %s21927_s28  ;;  %s48_s25 = int_to_ptr.vmem [resolvable:$true] %s47_s25 }
  0x25   :  { %p21931_p3 = scmp.lt.u32.totalorder %s21927_s28, %s23312_s4 }
  0x27   :  { %p21933_p4 = pnand %p21931_p3, %p21928_p2 }
  0x29   :  { %21936 = shalt.err (!%p21933_p4)
}
  0x2a   :  { %s21937_s11 = scalar_lea.vmem %s48_s25, 21504  ;;  %p21942_p6 = scmp.lt.s32.totalorder %s48_s25, %s48_s25 }
  0x2b   :  { %p21938_p5 = scmp.ne.s32.totalorder %s48_s25, %s21937_s11  ;;  %p21943_p7 = scmp.lt.s32.totalorder %s21937_s11, %s21937_s11 }
  0x2d   :  { %p21944_p8 = por %p21943_p7, %p21942_p6 }
  0x2f   :  { %p21945_p9 = pnand %p21944_p8, %p21938_p5 }
  0x31   :  { %21948 = shalt.err (!%p21945_p9)
}
  0x32   :  { %53 = dma.hbm_to_vmem [thread:$0]  %s23312_s4, 21504, %s48_s25, [#allocation5], %s21954_s7, %s21954_s7, %s21955_s8  }
  0x33   :  { %21949 = dma.done.wait [#allocation3], 7680  }
  0x34   :  { %21950 = vsyncadd [#allocation3], 4294959616 }
  0x35   :  { %21951 = dma.done.wait [#allocation5], 82944  }
  0x36   :  { %21952 = vsyncadd [#allocation5], 4294884352  ;;  %v21960_v0 = vmov 0   ;;  %v19741_v1 = vld [vmem:[#allocation2 + $0x64] ss:$24 sps:$4 sm:$0xff]   ;;  %vm202_vm0 = vcmask 1045504  }
  0x37   :  { %253 = vmatprep.mubr.bf16.mxu0 %v21960_v0  ;;  %304 = vmatprep.mubr.bf16.mxu1 %v21960_v0  ;;  %v19743_v2 = vld [vmem:[#allocation2 + $0x60] ss:$24 sps:$4 sm:$0xff]   ;;  %v19744_v3 = vld [vmem:[#allocation2 + $0x94] ss:$24 sps:$4 sm:$0x3f]   ;;  %vm195_vm2 = vcmask 228352  }
  0x38   :  { %221 = vmatprep.subr.bf16.mxu0 %v19741_v1  ;;  %v19746_v4 = vld [vmem:[#allocation2 + $0x90] ss:$24 sps:$4 sm:$0x3f]   ;;  %v86_v5 = vld [vmem:[%s23308_s0] sm:$0xf]  ;;  %vm618_vm3 = vcmask 1046528  }
  0x39   :  { %222 = vmatpush1.bf16.msra.mxu0 %v19743_v2  ;;  %v87_v6 = vld [vmem:[%s23308_s0 + $0x4] sm:$0xf]  ;;  %v22051_v7 = vld [vmem:[%s23308_s0 + $0x8] sm:$0xf]  ;;  %v204_v8 = vsel %vm202_vm0, %v19746_v4, 0  ;;  %vm1539_vm7 = vcmask 1043456  }
  0x3a   :  { %17359 = vmatprep.subr.msk.bf16.mxu0 %vm202_vm0, %v19744_v3  ;;  %v89_v9 = vld [vmem:[%s23308_s0 + $0xc] sm:$0x3]  ;;  %v22058_v10 = vcombine.low %v86_v5, %v87_v6  ;;  %v19752_v13 = vld [vmem:[#allocation2 + $0x68] ss:$24 sps:$4 sm:$0xff]   ;;  %vm125_vm1 = vsmask.f32 7424  ;;  %v22110_v48 = vcombine.low %v22051_v7, %v22051_v7 }
  0x3b   :  { %v22061_v11 = vcombine.low %v22051_v7, %v89_v9  ;;  %v19750_v12 = vld [vmem:[#allocation2 + $0x6c] ss:$24 sps:$4 sm:$0xff]   ;;  %v19756_v19 = vld [vmem:[#allocation2 + $0x9c] ss:$24 sps:$4 sm:$0x3f]   ;;  %vm1535_vm8 = vcmask 195584  }
  0x3c   :  { %v22064_v14 = vshrl.u32 %v22058_v10, 16  ;;  %v22067_v15 = vshll.u32 %v22058_v10, 16  ;;  %272 = vmatprep.subr.bf16.mxu1 %v19750_v12  ;;  %v19755_v17 = vld [vmem:[#allocation2 + $0x74] ss:$24 sps:$4 sm:$0xff]   ;;  %v19753_v21 = vld [vmem:[#allocation2 + $0x70] ss:$24 sps:$4 sm:$0xff]  }
  0x3d   :  { %224 = vmatpush1.bf16.msra.mxu0 %v204_v8  ;;  %v134_v16 = vshll.u32 %v22061_v11, 16  ;;  %273 = vmatpush1.bf16.msra.mxu1 %v19752_v13  ;;  %v19758_v22 = vld [vmem:[#allocation2 + $0x98] ss:$24 sps:$4 sm:$0x3f]   ;;  %v138_v28 = vshrl.u32 %v22061_v11, 16  ;;  %v22118_v49 = vrot.slane %v22061_v11, 1 }
  0x3e   :  { %v131_v18 = vrot.slane %v22067_v15, 1  ;;  %323 = vmatprep.subr.bf16.mxu0 %v19755_v17  ;;  %17362 = vmatprep.subr.msk.bf16.mxu1 %vm202_vm0, %v19756_v19  ;;  %v19759_v24 = vld [vmem:[#allocation2 + $0xa4] ss:$24 sps:$4 sm:$0x3f]   ;;  %v210_v25 = vsel %vm202_vm0, %v19758_v22, 0  ;;  %v22122_v50 = vrot.slane %v22058_v10, 1 }
  0x3f   :  { %v136_v20 = vrot.slane %v134_v16, 1  ;;  %v19761_v26 = vld [vmem:[#allocation2 + $0xa0] ss:$24 sps:$4 sm:$0x3f]   ;;  %v19764_v29 = vld [vmem:[#allocation2 + $0xc] ss:$24 sps:$4 sm:$0xff]  }
  0x40   :  { %v22074_v23 = vor.u32 %v131_v18, %v22064_v14  ;;  %v216_v30 = vsel %vm202_vm0, %v19761_v26, 0  ;;  %v19762_v31 = vld [vmem:[#allocation2 + $0x8] ss:$24 sps:$4 sm:$0xff]   ;;  %v19767_v32 = vld [vmem:[#allocation2 + $0x4] ss:$24 sps:$4 sm:$0xff]   ;;  %v22127_v54 = vsel %vm618_vm3, %v22122_v50, %v22118_v49  ;;  %v888_v62 = vrot.slane %v138_v28, 1 }
  0x41   :  { %275 = vmatpush1.bf16.msra.mxu1 %v210_v25  ;;  %v19768_v33 = vld [vmem:[#allocation2 + $0x3c] ss:$24 sps:$4 sm:$0x3f]   ;;  %v19770_v34 = vld [vmem:[#allocation2 + $0x38] ss:$24 sps:$4 sm:$0x3f]   ;;  %v22089_v35 = vor.u32 %v138_v28, %v136_v20 }
  0x42   :  { %v137_v27 = vsel %vm125_vm1, %v22074_v23, %v136_v20  ;;  %503 = vmatprep.subr.bf16.mxu1 %v19764_v29  ;;  %v441_v36 = vsel %vm202_vm0, %v19770_v34, 0  ;;  %v19777_v37 = vld [vmem:[#allocation2 + $0xcc] ss:$24 sps:$4 sm:$0xff]   ;;  %v19765_v38 = vld [vmem:[#allocation2] ss:$24 sps:$4 sm:$0xff]   ;;  %v889_v63 = vrot.slane %v134_v16, 2 }
  0x43   :  { %17360 = vmatmul.mubr.msk.bf16.vlgmr.msra.gmra.mrb[0].mxu0 %vm195_vm2, %v137_v27  ;;  %v19771_v39 = vld [vmem:[#allocation2 + $0x34] ss:$24 sps:$4 sm:$0x3f]   ;;  %v19773_v40 = vld [vmem:[#allocation2 + $0x30] ss:$24 sps:$4 sm:$0x3f]  }
  0x44   :  { %263 = vmatprep.mubr.bf16.mxu0 %v21960_v0  ;;  %324 = vmatpush1.bf16.msra.mxu0 %v19753_v21  ;;  %v19775_v41 = vld [vmem:[#allocation2 + $0xc8] ss:$24 sps:$4 sm:$0xff]   ;;  %v19781_v42 = vld [vmem:[#allocation2 + $0xfc] ss:$24 sps:$4 sm:$0x3f]   ;;  %v435_v44 = vsel %vm202_vm0, %v19773_v40, 0  ;;  %v22150_v3 = vor.u32 %v889_v63, %v888_v62 }
  0x45   :  { %17363 = vmatmul.mubr.msk.bf16.vlgmr.msra.gmra.mrb[0].mxu1 %vm195_vm2, %v137_v27  ;;  %17365 = vmatprep.subr.msk.bf16.mxu0 %vm202_vm0, %v19759_v24  ;;  %v19783_v43 = vld [vmem:[#allocation2 + $0xf8] ss:$24 sps:$4 sm:$0x3f]   ;;  %v19780_v45 = vld [vmem:[#allocation2 + $0x14] ss:$24 sps:$4 sm:$0xff]   ;;  %v885_v1 = vrot.slane %v22064_v14, 1 }
  0x46   :  { %314 = vmatprep.mubr.bf16.mxu1 %v21960_v0  ;;  %504 = vmatpush1.bf16.msra.mxu1 %v19762_v31  ;;  %v689_v46 = vsel %vm202_vm0, %v19783_v43, 0  ;;  %v19789_v47 = vld [vmem:[#allocation2 + $0x12c] ss:$24 sps:$4 sm:$0xff]   ;;  %v19778_v51 = vld [vmem:[#allocation2 + $0x10] ss:$24 sps:$4 sm:$0xff]   ;;  %v886_v2 = vrot.slane %v22067_v15, 2 }
  0x47   :  { %17384 = vmatprep.subr.msk.bf16.mxu1 %vm202_vm0, %v19768_v33  ;;  %v19784_v52 = vld [vmem:[#allocation2 + $0x44] ss:$24 sps:$4 sm:$0x3f]   ;;  %v19786_v53 = vld [vmem:[#allocation2 + $0x40] ss:$24 sps:$4 sm:$0x3f]  }
  0x48   :  { %326 = vmatpush1.bf16.msra.mxu0 %v216_v30  ;;  %v19787_v55 = vld [vmem:[#allocation2 + $0x128] ss:$24 sps:$4 sm:$0xff]   ;;  %v19793_v56 = vld [vmem:[#allocation2 + $0x15c] ss:$24 sps:$4 sm:$0x3f]   ;;  %v447_v59 = vsel %vm202_vm0, %v19786_v53, 0  ;;  %v22153_v5 = vor.u32 %v886_v2, %v885_v1 }
  0x49   :  { %452 = vmatprep.subr.bf16.mxu0 %v19767_v32  ;;  %v19795_v57 = vld [vmem:[#allocation2 + $0x158] ss:$24 sps:$4 sm:$0x3f]   ;;  %v19792_v58 = vld [vmem:[#allocation2 + $0xc4] ss:$24 sps:$4 sm:$0xff]   ;;  %v22176_v19 = vrot.slane %v22061_v11, 2 }
  0x4a   :  { %506 = vmatpush1.bf16.msra.mxu1 %v441_v36  ;;  %v19801_v60 = vld [vmem:[#allocation2 + $0x18c] ss:$24 sps:$4 sm:$0xff]   ;;  %v959_v61 = vsel %vm202_vm0, %v19795_v57, 0  ;;  %v19790_v4 = vld [vmem:[#allocation2 + $0xc0] ss:$24 sps:$4 sm:$0xff]   ;;  %v22180_v21 = vrot.slane %v22058_v10, 2 }
  0x4b   :  { %17361 = vmatmul.mubr.msk.bf16.gmra.mrb[4].mxu0 %vm195_vm2, %v22089_v35  ;;  %751 = vmatprep.subr.bf16.mxu1 %v19777_v37  ;;  %vm884_vm4 = vsmask.f32 6400  ;;  %v19796_v6 = vld [vmem:[#allocation2 + $0xf4] ss:$24 sps:$4 sm:$0x3f]   ;;  %vm17306_vm11 = vcmask 1040384  }
  0x4c   :  { %355 = vmatprep.mubr.bf16.mxu0 %v21960_v0  ;;  %v19798_v7 = vld [vmem:[#allocation2 + $0xf0] ss:$24 sps:$4 sm:$0x3f]   ;;  %v19805_v9 = vld [vmem:[#allocation2 + $0x1bc] ss:$24 sps:$4 sm:$0x3f]   ;;  %v22158_v13 = vsel %vm884_vm4, %v22153_v5, %v22150_v3  ;;  %v22185_v25 = vsel %vm202_vm0, %v22180_v21, %v22176_v19 }
  0x4d   :  { %17364 = vmatmul.mubr.msk.bf16.gmra.mrb[4].mxu1 %vm195_vm2, %v22089_v35  ;;  %v19799_v8 = vld [vmem:[#allocation2 + $0x188] ss:$24 sps:$4 sm:$0xff]   ;;  %v19807_v12 = vld [vmem:[#allocation2 + $0x1b8] ss:$24 sps:$4 sm:$0x3f]   ;;  %v683_v17 = vsel %vm202_vm0, %v19798_v7, 0 }
  0x4e   :  { %535 = vmatprep.mubr.bf16.mxu1 %v21960_v0  ;;  %v19804_v16 = vld [vmem:[#allocation2 + $0xd4] ss:$24 sps:$4 sm:$0xff]   ;;  %v1225_v18 = vsel %vm202_vm0, %v19807_v12, 0  ;;  %v19802_v20 = vld [vmem:[#allocation2 + $0xd0] ss:$24 sps:$4 sm:$0xff]  }
  0x4f   :  { %v19808_v22 = vld [vmem:[#allocation2 + $0x104] ss:$24 sps:$4 sm:$0x3f]   ;;  %v19810_v24 = vld [vmem:[#allocation2 + $0x100] ss:$24 sps:$4 sm:$0x3f]  }
  0x50   :  { %v19813_v26 = vld [vmem:[#allocation2 + $0x124] ss:$24 sps:$4 sm:$0xff]   ;;  %v695_v11 = vsel %vm202_vm0, %v19810_v24, 0  ;;  %v19814_v28 = vld [vmem:[#allocation2 + $0x154] ss:$24 sps:$4 sm:$0x3f]  }
  0x51   :  { %v19816_v29 = vld [vmem:[#allocation2 + $0x150] ss:$24 sps:$4 sm:$0x3f]   ;;  %v19819_v30 = vld [vmem:[#allocation2 + $0x134] ss:$24 sps:$4 sm:$0xff]  }
  0x52   :  { %v953_v31 = vsel %vm202_vm0, %v19816_v29, 0  ;;  %v19817_v32 = vld [vmem:[#allocation2 + $0x130] ss:$24 sps:$4 sm:$0xff]   ;;  %v19820_v33 = vld [vmem:[#allocation2 + $0x164] ss:$24 sps:$4 sm:$0x3f]  }
  0x53   :  { %17366 = vmatmul.mubr.msk.bf16.vlgmr.msra.gmra.mrb[8].mxu0 %vm195_vm2, %v137_v27  ;;  %v19811_v27 = vld [vmem:[#allocation2 + $0x120] ss:$24 sps:$4 sm:$0xff]   ;;  %v19825_v36 = vld [vmem:[#allocation2 + $0x184] ss:$24 sps:$4 sm:$0xff]   ;;  %v19829_v43 = vld [vmem:[#allocation2 + $0x190] ss:$24 sps:$4 sm:$0xff]  }
  0x54   :  { %365 = vmatprep.mubr.bf16.mxu0 %v21960_v0  ;;  %453 = vmatpush1.bf16.msra.mxu0 %v19765_v38  ;;  %v19822_v34 = vld [vmem:[#allocation2 + $0x160] ss:$24 sps:$4 sm:$0x3f]   ;;  %v19828_v40 = vld [vmem:[#allocation2 + $0x1b0] ss:$24 sps:$4 sm:$0x3f]  }
  0x55   :  { %17385 = vmatmul.mubr.msk.bf16.vlgmr.msra.gmra.mrb[0].mxu1 %vm195_vm2, %v22058_v10  ;;  %17381 = vmatprep.subr.msk.bf16.mxu0 %vm202_vm0, %v19771_v39  ;;  %v965_v37 = vsel %vm202_vm0, %v19822_v34, 0  ;;  %v19823_v38 = vld [vmem:[#allocation2 + $0x180] ss:$24 sps:$4 sm:$0xff]   ;;  %v19826_v39 = vld [vmem:[#allocation2 + $0x1b4] ss:$24 sps:$4 sm:$0x3f]  }
  0x56   :  { %545 = vmatprep.mubr.bf16.mxu1 %v21960_v0  ;;  %752 = vmatpush1.bf16.msra.mxu1 %v19775_v41  ;;  %v19831_v41 = vld [vmem:[#allocation2 + $0x194] ss:$24 sps:$4 sm:$0xff]   ;;  %v19850_v7 = vld [vmem:[#allocation4 + $0x348] ss:$16 sps:$4 sm:$0xff]  }
  0x57   :  { %17405 = vmatprep.subr.msk.bf16.mxu1 %vm202_vm0, %v19781_v42  ;;  %v1219_v42 = vsel %vm202_vm0, %v19828_v40, 0  ;;  %v19840_v57 = vld [vmem:[#allocation4 + $0x30c] ss:$16 sps:$4 sm:$0xff]  }
  0x58   :  { %455 = vmatpush1.bf16.msra.mxu0 %v435_v44  ;;  %v19832_v44 = vld [vmem:[#allocation2 + $0x1c4] ss:$24 sps:$4 sm:$0x3f]  }
  0x59   :  { %554 = vmatprep.subr.bf16.mxu0 %v19780_v45  ;;  %v19834_v45 = vld [vmem:[#allocation2 + $0x1c0] ss:$24 sps:$4 sm:$0x3f]  }
  0x5a   :  { %754 = vmatpush1.bf16.msra.mxu1 %v689_v46  ;;  %v1231_v46 = vsel %vm202_vm0, %v19834_v45, 0 }
  0x5b   :  { %17367 = vmatmul.mubr.msk.bf16.gmra.mrb[12].mxu0 %vm195_vm2, %v22089_v35  ;;  %1021 = vmatprep.subr.bf16.mxu1 %v19789_v47  ;;  %v67_v47 = vlaneseq }
  0x5c   :  { %484 = vmatprep.mubr.bf16.mxu0 %v21960_v0 }
  0x5d   :  { %17386 = vmatmul.mubr.msk.bf16.gmra.mrb[4].mxu1 %vm195_vm2, %v22110_v48 }
  0x5e   :  { %783 = vmatprep.mubr.bf16.mxu1 %v21960_v0 }
  0x63   :  { %17382 = vmatmul.mubr.msk.bf16.vlgmr.msra.gmra.mrb[0].mxu0 %vm195_vm2, %v22058_v10 }
  0x64   :  { %494 = vmatprep.mubr.bf16.mxu0 %v21960_v0  ;;  %555 = vmatpush1.bf16.msra.mxu0 %v19778_v51  ;;  %v22244_v51 = vld [vmem:[%s23310_s2] ss:$2 sm:$0x3f] }
  0x65   :  { %17406 = vmatmul.mubr.msk.bf16.vlgmr.msra.gmra.mrb[0].mxu1 %vm195_vm2, %v22127_v54  ;;  %17387 = vmatprep.subr.msk.bf16.mxu0 %vm202_vm0, %v19784_v52 }
  0x66   :  { %793 = vmatprep.mubr.bf16.mxu1 %v21960_v0  ;;  %1022 = vmatpush1.bf16.msra.mxu1 %v19787_v55  ;;  %v19838_v55 = vld [vmem:[#allocation4 + $0x308] ss:$16 sps:$4 sm:$0xff]  }
  0x67   :  { %17426 = vmatprep.subr.msk.bf16.mxu1 %vm202_vm0, %v19793_v56 }
  0x68   :  { %557 = vmatpush1.bf16.msra.mxu0 %v447_v59  ;;  %v19844_v59 = vld [vmem:[#allocation4 + $0x328] ss:$16 sps:$4 sm:$0xff]  }
  0x69   :  { %700 = vmatprep.subr.bf16.mxu0 %v19792_v58 }
  0x6a   :  { %1024 = vmatpush1.bf16.msra.mxu1 %v959_v61 }
  0x6b   :  { %17383 = vmatmul.mubr.msk.bf16.gmra.mrb[4].mxu0 %vm195_vm2, %v22110_v48  ;;  %1287 = vmatprep.subr.bf16.mxu1 %v19801_v60  ;;  %v19846_v60 = vld [vmem:[#allocation4 + $0x32c] ss:$16 sps:$4 sm:$0xff]  }
  0x6c   :  { %586 = vmatprep.mubr.bf16.mxu0 %v21960_v0 }
  0x6d   :  { %17407 = vmatmul.mubr.msk.bf16.gmra.mrb[4].mxu1 %vm195_vm2, %v22118_v49 }
  0x6e   :  { %1053 = vmatprep.mubr.bf16.mxu1 %v21960_v0 }
  0x73   :  { %17388 = vmatmul.mubr.msk.bf16.vlgmr.msra.gmra.mrb[8].mxu0 %vm195_vm2, %v22058_v10 }
  0x74   :  { %596 = vmatprep.mubr.bf16.mxu0 %v21960_v0  ;;  %701 = vmatpush1.bf16.msra.mxu0 %v19790_v4 }
  0x75   :  { %17427 = vmatmul.mubr.msk.bf16.vlgmr.msra.gmra.mrb[0].mxu1 %vm195_vm2, %v22158_v13  ;;  %17402 = vmatprep.subr.msk.bf16.mxu0 %vm202_vm0, %v19796_v6 }
  0x76   :  { %1063 = vmatprep.mubr.bf16.mxu1 %v21960_v0  ;;  %1288 = vmatpush1.bf16.msra.mxu1 %v19799_v8  ;;  %v19852_v8 = vld [vmem:[#allocation4 + $0x34c] ss:$16 sps:$4 sm:$0xff]  }
  0x77   :  { %17447 = vmatprep.subr.msk.bf16.mxu1 %vm202_vm0, %v19805_v9 }
  0x78   :  { %703 = vmatpush1.bf16.msra.mxu0 %v683_v17 }
  0x79   :  { %802 = vmatprep.subr.bf16.mxu0 %v19804_v16 }
  0x7a   :  { %1290 = vmatpush1.bf16.msra.mxu1 %v1225_v18 }
  0x7b   :  { %17389 = vmatmul.mubr.msk.bf16.gmra.mrb[12].mxu0 %vm195_vm2, %v22110_v48  ;;  %v22239_v48 = vshrl.u32 %v67_v47, 7 }
  0x7c   :  { %732 = vmatprep.mubr.bf16.mxu0 %v21960_v0 }
  0x7d   :  { %17428 = vmatmul.mubr.msk.bf16.gmra.mrb[4].mxu1 %vm195_vm2, %v22150_v3  ;;  %v1418_v52 = vsub.s32 2, %v22239_v48  ;;  %v1422_v53 = vsub.s32 3, %v22239_v48 }
  0x7e   :  { %1319 = vmatprep.mubr.bf16.mxu1 %v21960_v0 }
  0x7f   :  { %v22254_v56 = vrot.slane %v22244_v51, %v1418_v52  ;;  %v22257_v58 = vrot.slane %v22244_v51, %v1422_v53 }
  0x83   :  { %17403 = vmatmul.mubr.msk.bf16.vlgmr.msra.gmra.mrb[0].mxu0 %vm195_vm2, %v22127_v54 }
  0x84   :  { %742 = vmatprep.mubr.bf16.mxu0 %v21960_v0  ;;  %803 = vmatpush1.bf16.msra.mxu0 %v19802_v20 }
  0x85   :  { %17448 = vmatmul.mubr.msk.bf16.vlgmr.msra.gmra.mrb[0].mxu1 %vm195_vm2, %v22185_v25  ;;  %17408 = vmatprep.subr.msk.bf16.mxu0 %vm202_vm0, %v19808_v22 }
  0x86   :  { %1329 = vmatprep.mubr.bf16.mxu1 %v21960_v0 }
  0x88   :  { %805 = vmatpush1.bf16.msra.mxu0 %v695_v11 }
  0x89   :  { %970 = vmatprep.subr.bf16.mxu0 %v19813_v26 }
  0x8b   :  { %17404 = vmatmul.mubr.msk.bf16.gmra.mrb[4].mxu0 %vm195_vm2, %v22118_v49 }
  0x8c   :  { %834 = vmatprep.mubr.bf16.mxu0 %v21960_v0 }
  0x8d   :  { %17449 = vmatmul.mubr.msk.bf16.gmra.mrb[4].mxu1 %vm195_vm2, %v22176_v19 }
  0x8e   :  { %1590 = vmatprep.mubr.bf16.mxu1 %v21960_v0 }
  0x93   :  { %17409 = vmatmul.mubr.msk.bf16.vlgmr.msra.gmra.mrb[8].mxu0 %vm195_vm2, %v22127_v54  ;;  %v22251_v54 = vld [vmem:[%s23310_s2 + $0x1] ss:$2 sm:$0x3f] }
  0x94   :  { %844 = vmatprep.mubr.bf16.mxu0 %v21960_v0  ;;  %971 = vmatpush1.bf16.msra.mxu0 %v19811_v27  ;;  %v22260_v61 = vrot.slane %v22251_v54, %v1418_v52  ;;  %v22263_v63 = vrot.slane %v22251_v54, %v1422_v53  ;;  %v22296_v52 = vadd.s32 8, %v22239_v48 }
  0x95   :  { %17423 = vmatprep.subr.msk.bf16.mxu0 %vm202_vm0, %v19814_v28 }
  0x98   :  { %973 = vmatpush1.bf16.msra.mxu0 %v953_v31 }
  0x99   :  { %1072 = vmatprep.subr.bf16.mxu0 %v19819_v30 }
  0x9b   :  { %17410 = vmatmul.mubr.msk.bf16.gmra.mrb[12].mxu0 %vm195_vm2, %v22118_v49 }
  0x9c   :  { %1002 = vmatprep.mubr.bf16.mxu0 %v21960_v0 }
  0xa3   :  { %17424 = vmatmul.mubr.msk.bf16.vlgmr.msra.gmra.mrb[0].mxu0 %vm195_vm2, %v22158_v13 }
  0xa4   :  { %1012 = vmatprep.mubr.bf16.mxu0 %v21960_v0  ;;  %1073 = vmatpush1.bf16.msra.mxu0 %v19817_v32  ;;  %v1410_v32 = vsub.s32 0, %v22239_v48 }
  0xa5   :  { %17429 = vmatprep.subr.msk.bf16.mxu0 %vm202_vm0, %v19820_v33  ;;  %v1414_v33 = vsub.s32 1, %v22239_v48 }
  0xa6   :  { %v22280_v34 = vrot.slane %v22244_v51, %v1410_v32 }
  0xa8   :  { %1075 = vmatpush1.bf16.msra.mxu0 %v965_v37  ;;  %v22286_v37 = vrot.slane %v22251_v54, %v1410_v32 }
  0xa9   :  { %1236 = vmatprep.subr.bf16.mxu0 %v19825_v36  ;;  %v22283_v36 = vrot.slane %v22244_v51, %v1414_v33 }
  0xab   :  { %17425 = vmatmul.mubr.msk.bf16.gmra.mrb[4].mxu0 %vm195_vm2, %v22150_v3 }
  0xac   :  { %1104 = vmatprep.mubr.bf16.mxu0 %v21960_v0 }
  0xb3   :  { %17430 = vmatmul.mubr.msk.bf16.vlgmr.msra.gmra.mrb[8].mxu0 %vm195_vm2, %v22158_v13 }
  0xb4   :  { %1114 = vmatprep.mubr.bf16.mxu0 %v21960_v0  ;;  %1237 = vmatpush1.bf16.msra.mxu0 %v19823_v38 }
  0xb5   :  { %17444 = vmatprep.subr.msk.bf16.mxu0 %vm202_vm0, %v19826_v39  ;;  %v22289_v39 = vrot.slane %v22251_v54, %v1414_v33 }
  0xb8   :  { %1239 = vmatpush1.bf16.msra.mxu0 %v1219_v42 }
  0xb9   :  { %1338 = vmatprep.subr.bf16.mxu0 %v19831_v41 }
  0xbb   :  { %17431 = vmatmul.mubr.msk.bf16.gmra.mrb[12].mxu0 %vm195_vm2, %v22150_v3 }
  0xbc   :  { %1268 = vmatprep.mubr.bf16.mxu0 %v21960_v0 }
  0xc3   :  { %17445 = vmatmul.mubr.msk.bf16.vlgmr.msra.gmra.mrb[0].mxu0 %vm195_vm2, %v22185_v25 }
  0xc4   :  { %1278 = vmatprep.mubr.bf16.mxu0 %v21960_v0  ;;  %1339 = vmatpush1.bf16.msra.mxu0 %v19829_v43 }
  0xc5   :  { %17450 = vmatprep.subr.msk.bf16.mxu0 %vm202_vm0, %v19832_v44 }
  0xc8   :  { %1341 = vmatpush1.bf16.msra.mxu0 %v1231_v46 }
  0xc9   :  { %2619 = vmatprep.subr.bf16.mxu0 %v19840_v57 }
  0xcb   :  { %17446 = vmatmul.mubr.msk.bf16.gmra.mrb[4].mxu0 %vm195_vm2, %v22176_v19 }
  0xcc   :  { %1370 = vmatprep.mubr.bf16.mxu0 %v21960_v0 }
  0xd3   :  { %17451 = vmatmul.mubr.msk.bf16.vlgmr.msra.gmra.mrb[8].mxu0 %vm195_vm2, %v22185_v25 }
  0xd4   :  { %1380 = vmatprep.mubr.bf16.mxu0 %v21960_v0  ;;  %2620 = vmatpush1.bf16.msra.mxu0 %v19838_v55 }
  0xd5   :  { %2621 = vmatprep.subr.bf16.mxu0 %v19846_v60  ;;  %v22303_v60 = vand.u32 127, %v67_v47 }
  0xd8   :  { %2622 = vmatpush1.bf16.msra.mxu0 %v19844_v59 }
  0xd9   :  { %2623 = vmatprep.subr.bf16.mxu0 %v19852_v8 }
  0xdb   :  { %17452 = vmatmul.mubr.msk.bf16.gmra.mrb[12].mxu0 %vm195_vm2, %v22176_v19 }
  0xdc   :  { %2624 = vmatpush1.bf16.msra.mxu0 %v19850_v7 }
 0x158   :  { %v1321_v62 = vpop.f32.mrb[0].mxu1 }
 0x159   :  { %v1440_v1 = vmul.f32 %v22254_v56, %v1321_v62  ;;  %v1323_v2 = vpop.f32.mrb[1].mxu1  ;;  %v72_v62 = vmul.u32 2, %v22239_v48 }
 0x15a   :  { %v1441_v4 = vmul.f32 %v22257_v58, %v1323_v2  ;;  %v1325_v6 = vpop.f32.mrb[2].mxu1 }
 0x15b   :  { %v1489_v9 = vadd.f32 %v22260_v61, %v1440_v1  ;;  %v1446_v12 = vmul.f32 %v22254_v56, %v1325_v6  ;;  %v1327_v13 = vpop.f32.mrb[3].mxu1  ;;  %vm74_vm5 = vcmp.eq.s32.totalorder %v22303_v60, %v72_v62 }
 0x15c   :  { %v1490_v16 = vadd.f32 %v22263_v63, %v1441_v4  ;;  %v1447_v17 = vmul.f32 %v22257_v58, %v1327_v13  ;;  %v73_v4 = vmul.u32 2, %v22296_v52 }
 0x15d   :  { %v1507_v18 = vmax.f32 %v1489_v9, 0.0  ;;  %v1495_v20 = vadd.f32 %v22260_v61, %v1446_v12 }
 0x15e   :  { %v1508_v22 = vmax.f32 %v1490_v16, 0.0  ;;  %v1496_v24 = vadd.f32 %v22263_v63, %v1447_v17  ;;  %v1426_v16 = vsub.s32 4, %v22239_v48  ;;  %v1430_v17 = vsub.s32 5, %v22239_v48 }
 0x15f   :  { %v1513_v25 = vmax.f32 %v1495_v20, 0.0  ;;  %vm75_vm6 = vcmp.eq.s32.totalorder %v22303_v60, %v73_v4 }
 0x160   :  { %v1514_v26 = vmax.f32 %v1496_v24, 0.0  ;;  %v1331_v11 = vpop.f32.mrb[4].mxu1 }
 0x161   :  { %v22273_v27 = vpack.c.bf16 %v1513_v25, %v1507_v18  ;;  %v1333_v28 = vpop.f32.mrb[5].mxu1  ;;  %v1452_v47 = vmul.f32 %v22254_v56, %v1331_v11 }
 0x162   :  { %v1335_v29 = vpop.f32.mrb[6].mxu1  ;;  %v22275_v30 = vpack.c.bf16 %v1514_v26, %v1508_v22  ;;  %v1453_v18 = vmul.f32 %v22257_v58, %v1333_v28  ;;  %v22328_v28 = vrot.slane %v22244_v51, %v1426_v16 }
 0x163   :  { %v1336_v31 = vpop.f32.mrb[7].mxu1 }
 0x164   :  { %v1501_v31 = vadd.f32 %v22260_v61, %v1452_v47  ;;  %v1502_v32 = vadd.f32 %v22263_v63, %v1453_v18 }
 0x196   :  { %v1270_v38 = vpop.f32.mrb[0].mxu0 }
 0x197   :  { %v1438_v40 = vmul.f32 %v22280_v34, %v1270_v38  ;;  %v1272_v41 = vpop.f32.mrb[1].mxu0  ;;  %v22333_v38 = vrot.slane %v22244_v51, %v1430_v17 }
 0x198   :  { %v1439_v42 = vmul.f32 %v22283_v36, %v1272_v41  ;;  %v1274_v43 = vpop.f32.mrb[2].mxu0  ;;  %v22336_v41 = vrot.slane %v22251_v54, %v1426_v16 }
 0x199   :  { %v1487_v44 = vadd.f32 %v22286_v37, %v1438_v40  ;;  %v1444_v45 = vmul.f32 %v22280_v34, %v1274_v43  ;;  %v1276_v46 = vpop.f32.mrb[3].mxu0 }
 0x19a   :  { %v1488_v53 = vadd.f32 %v22289_v39, %v1439_v42  ;;  %v1445_v55 = vmul.f32 %v22283_v36, %v1276_v46  ;;  %v21961_v42 = vmov 0.0  }
 0x19b   :  { %v1493_v57 = vadd.f32 %v22286_v37, %v1444_v45  ;;  %v1505_v1 = vmax.f32 %v1487_v44, 0.0  ;;  %v76_v43 = vsel %vm74_vm5, 1.0, %v21961_v42  ;;  %v77_v44 = vsel %vm75_vm6, 1.0, %v21961_v42 }
 0x19c   :  { %v1494_v59 = vadd.f32 %v22289_v39, %v1445_v55  ;;  %v1506_v6 = vmax.f32 %v1488_v53, 0.0  ;;  %v22343_v53 = vrot.slane %v22251_v54, %v1430_v17 }
 0x19d   :  { %v1511_v2 = vmax.f32 %v1493_v57, 0.0 }
 0x19e   :  { %v1512_v7 = vmax.f32 %v1494_v59, 0.0  ;;  %v1280_v8 = vpop.f32.mrb[4].mxu0  ;;  %v1519_v59 = vmax.f32 %v1501_v31, 0.0 }
 0x19f   :  { %v22307_v9 = vpack.c.bf16 %v1511_v2, %v1505_v1  ;;  %v1450_v12 = vmul.f32 %v22280_v34, %v1280_v8  ;;  %v1282_v13 = vpop.f32.mrb[5].mxu0  ;;  %v1520_v1 = vmax.f32 %v1502_v32, 0.0 }
 0x1a0   :  { %v1451_v20 = vmul.f32 %v22283_v36, %v1282_v13  ;;  %v1284_v22 = vpop.f32.mrb[6].mxu0  ;;  %v22315_v24 = vpack.c.bf16 %v1512_v7, %v1506_v6  ;;  %v22350_v7 = vpack.c.bf16 %v77_v44, %v76_v43  ;;  %v1531_v47 = vpack.c.bf16 %v1519_v59, %v1519_v59 }
 0x1a1   :  { %v1499_v25 = vadd.f32 %v22286_v37, %v1450_v12  ;;  %v1285_v26 = vpop.f32.mrb[7].mxu0  ;;  %v1532_v18 = vpack.c.bf16 %v1520_v1, %v1520_v1 }
 0x1a2   :  { %v1500_v29 = vadd.f32 %v22289_v39, %v1451_v20  ;;  %1558 = vmatprep.subr.bf16.mxu1 %v22315_v24  ;;  %v1547_v44 = vsel %vm1539_vm7, %v1531_v47, 0  ;;  %v19859_v47 = vld [vmem:[#allocation4 + $0x380] ss:$16 sps:$4 sm:$0xff]  }
 0x1a3   :  { %v1517_v11 = vmax.f32 %v1499_v25, 0.0  ;;  %1559 = vmatpush1.bf16.msra.mxu1 %v22307_v9 }
 0x1a4   :  { %v1518_v33 = vmax.f32 %v1500_v29, 0.0 }
 0x1a5   :  { %v1529_v40 = vpack.c.bf16 %v1517_v11, %v1517_v11 }
 0x1a6   :  { %v22340_v45 = vpack.c.bf16 %v1518_v33, %v1518_v33  ;;  %v1372_v46 = vpop.f32.mrb[8].mxu0 }
 0x1a7   :  { %v1442_v55 = vmul.f32 %v22328_v28, %v1372_v46  ;;  %v1374_v51 = vpop.f32.mrb[9].mxu0  ;;  %v1541_v57 = vsel %vm1539_vm7, %v1529_v40, 0 }
 0x1a8   :  { %v1443_v2 = vmul.f32 %v22333_v38, %v1374_v51  ;;  %v1376_v6 = vpop.f32.mrb[10].mxu0  ;;  %17453 = vmatprep.subr.msk.bf16.mxu1 %vm1539_vm7, %v22340_v45 }
 0x1a9   :  { %v1491_v8 = vadd.f32 %v22336_v41, %v1442_v55  ;;  %v1448_v54 = vmul.f32 %v22328_v28, %v1376_v6  ;;  %v1378_v12 = vpop.f32.mrb[11].mxu0  ;;  %1561 = vmatpush1.bf16.msra.mxu1 %v1541_v57 }
 0x1aa   :  { %v1492_v13 = vadd.f32 %v22343_v53, %v1443_v2  ;;  %v1449_v16 = vmul.f32 %v22333_v38, %v1378_v12  ;;  %1601 = vmatprep.subr.bf16.mxu1 %v22275_v30  ;;  %v80_v12 = vadd.s32 1, %v73_v4 }
 0x1ab   :  { %v1497_v17 = vadd.f32 %v22336_v41, %v1448_v54  ;;  %v1509_v22 = vmax.f32 %v1491_v8, 0.0  ;;  %v79_v54 = vadd.s32 1, %v72_v62 }
 0x1ac   :  { %v1498_v20 = vadd.f32 %v22343_v53, %v1449_v16  ;;  %17454 = vmatmul.mubr.msk.bf16.vlgmr.msra.gmra.mrb[8].mxu1 %vm1535_vm8, %v22350_v7  ;;  %v1510_v26 = vmax.f32 %v1492_v13, 0.0  ;;  %vm82_vm10 = vcmp.eq.s32.totalorder %v22303_v60, %v80_v12  ;;  %v19856_v16 = vld [vmem:[#allocation4 + $0x368] ss:$16 sps:$4 sm:$0xff]  }
 0x1ad   :  { %v1515_v25 = vmax.f32 %v1497_v17, 0.0  ;;  %1602 = vmatpush1.bf16.msra.mxu1 %v22273_v27  ;;  %1633 = vmatprep.mubr.bf16.mxu1 %v21960_v0  ;;  %vm81_vm9 = vcmp.eq.s32.totalorder %v22303_v60, %v79_v54  ;;  %v84_v62 = vsel %vm82_vm10, 1.0, %v21961_v42  ;;  %v19837_v60 = vld [vmem:[#allocation4 + $0x304] ss:$16 sps:$4 sm:$0xff]   ;;  %v19858_v17 = vld [vmem:[#allocation4 + $0x36c] ss:$16 sps:$4 sm:$0xff]  }
 0x1ae   :  { %v1516_v29 = vmax.f32 %v1498_v20, 0.0  ;;  %v1382_v11 = vpop.f32.mrb[12].mxu0  ;;  %17455 = vmatprep.subr.msk.bf16.mxu1 %vm1539_vm7, %v1532_v18  ;;  %v83_v52 = vsel %vm81_vm9, 1.0, %v21961_v42  ;;  %v19847_v42 = vld [vmem:[#allocation4 + $0x340] ss:$16 sps:$4 sm:$0xff]   ;;  %2625 = vmatprep.subr.bf16.mxu0 %v19858_v17 }
 0x1af   :  { %v1527_v31 = vpack.c.bf16 %v1515_v25, %v1509_v22  ;;  %v1454_v32 = vmul.f32 %v22328_v28, %v1382_v11  ;;  %v1384_v33 = vpop.f32.mrb[13].mxu0  ;;  %v22389_v4 = vpack.c.bf16 %v84_v62, %v83_v52  ;;  %v19862_v20 = vld [vmem:[#allocation4 + $0x388] ss:$16 sps:$4 sm:$0xff]   ;;  %2626 = vmatpush1.bf16.msra.mxu0 %v19856_v16  ;;  %v19864_v22 = vld [vmem:[#allocation4 + $0x38c] ss:$16 sps:$4 sm:$0xff]  }
 0x1b0   :  { %v1455_v40 = vmul.f32 %v22333_v38, %v1384_v33  ;;  %v1386_v43 = vpop.f32.mrb[14].mxu0  ;;  %v1528_v46 = vpack.c.bf16 %v1516_v29, %v1510_v26  ;;  %2627 = vmatprep.subr.bf16.mxu0 %v19864_v22  ;;  %v19865_v25 = vld [vmem:[#allocation4 + $0x3a0] ss:$16 sps:$4 sm:$0xff]   ;;  %v19867_v26 = vld [vmem:[#allocation4 + $0x3a4] ss:$16 sps:$4 sm:$0xff]  }
 0x1b1   :  { %v1503_v55 = vadd.f32 %v22336_v41, %v1454_v32  ;;  %v1387_v51 = vpop.f32.mrb[15].mxu0  ;;  %1604 = vmatpush1.bf16.msra.mxu1 %v1547_v44  ;;  %v19868_v29 = vld [vmem:[#allocation4 + $0x3a8] ss:$16 sps:$4 sm:$0xff]   ;;  %v19870_v11 = vld [vmem:[#allocation4 + $0x3ac] ss:$16 sps:$4 sm:$0xff]  }
 0x1b2   :  { %v1504_v59 = vadd.f32 %v22343_v53, %v1455_v40  ;;  %1644 = vmatprep.subr.bf16.mxu1 %v1528_v46  ;;  %v19873_v32 = vld [vmem:[#allocation4 + $0x3c4] ss:$16 sps:$4 sm:$0xff]   ;;  %v19874_v33 = vld [vmem:[#allocation4 + $0x3c8] ss:$16 sps:$4 sm:$0xff]   ;;  %v19876_v40 = vld [vmem:[#allocation4 + $0x3cc] ss:$16 sps:$4 sm:$0xff]  }
 0x1b3   :  { %v1521_v1 = vmax.f32 %v1503_v55, 0.0  ;;  %2628 = vmatpush1.bf16.msra.mxu0 %v19862_v20  ;;  %v19877_v43 = vld [vmem:[#allocation4 + $0x3e0] ss:$16 sps:$4 sm:$0xff]   ;;  %v19882_v55 = vld [vmem:[#allocation4 + $0x3ec] ss:$16 sps:$4 sm:$0xff]  }
 0x1b4   :  { %v1522_v2 = vmax.f32 %v1504_v59, 0.0  ;;  %17456 = vmatmul.mubr.msk.bf16.vlgmr.msra.gmra.mrb[12].mxu1 %vm1535_vm8, %v22350_v7  ;;  %2629 = vmatprep.subr.bf16.mxu0 %v19870_v11  ;;  %v19883_v51 = vld [vmem:[#allocation4 + $0x400] ss:$16 sps:$4 sm:$0xff]   ;;  %v19885_v59 = vld [vmem:[#allocation4 + $0x404] ss:$16 sps:$4 sm:$0xff]  }
 0x1b5   :  { %v1533_v6 = vpack.c.bf16 %v1521_v1, %v1521_v1  ;;  %1645 = vmatpush1.bf16.msra.mxu1 %v1527_v31  ;;  %1676 = vmatprep.mubr.bf16.mxu1 %v21960_v0  ;;  %v19886_v1 = vld [vmem:[#allocation4 + $0x408] ss:$16 sps:$4 sm:$0xff]   ;;  %v19889_v54 = vld [vmem:[#allocation4 + $0x420] ss:$16 sps:$4 sm:$0xff]   ;;  %v19897_v52 = vld [vmem:[#allocation4 + $0x444] ss:$16 sps:$4 sm:$0xff]  }
 0x1b6   :  { %v1534_v8 = vpack.c.bf16 %v1522_v2, %v1522_v2  ;;  %v19888_v2 = vld [vmem:[#allocation4 + $0x40c] ss:$16 sps:$4 sm:$0xff]   ;;  %v19892_v12 = vld [vmem:[#allocation4 + $0x428] ss:$16 sps:$4 sm:$0xff]   ;;  %v19915_v17 = vld [vmem:[#allocation4 + $0x4a4] ss:$16 sps:$4 sm:$0xff]  }
 0x1b7   :  { %v1553_v13 = vsel %vm1539_vm7, %v1533_v6, 0  ;;  %2630 = vmatpush1.bf16.msra.mxu0 %v19868_v29  ;;  %v19891_v6 = vld [vmem:[#allocation4 + $0x424] ss:$16 sps:$4 sm:$0xff]   ;;  %v19898_v62 = vld [vmem:[#allocation4 + $0x448] ss:$16 sps:$4 sm:$0xff]  }
 0x1b8   :  { %17457 = vmatprep.subr.msk.bf16.mxu1 %vm1539_vm7, %v1534_v8  ;;  %2631 = vmatprep.subr.bf16.mxu0 %v19876_v40  ;;  %v19910_v16 = vld [vmem:[#allocation4 + $0x488] ss:$16 sps:$4 sm:$0xff]   ;;  %v19921_v22 = vld [vmem:[#allocation4 + $0x4c4] ss:$16 sps:$4 sm:$0xff]   ;;  %v19925_v11 = vld [vmem:[#allocation4 + $0x4e0] ss:$16 sps:$4 sm:$0xff]  }
 0x1b9   :  { %1647 = vmatpush1.bf16.msra.mxu1 %v1553_v13  ;;  %v19916_v20 = vld [vmem:[#allocation4 + $0x4a8] ss:$16 sps:$4 sm:$0xff]   ;;  %v19933_v40 = vld [vmem:[#allocation4 + $0x504] ss:$16 sps:$4 sm:$0xff]  }
 0x1ba   :  { %1690 = vmatprep.subr.bf16.mxu1 %v22315_v24  ;;  %v19849_v24 = vld [vmem:[#allocation4 + $0x344] ss:$16 sps:$4 sm:$0xff]   ;;  %v19922_v29 = vld [vmem:[#allocation4 + $0x4c8] ss:$16 sps:$4 sm:$0xff]  }
 0x1bb   :  { %2632 = vmatpush1.bf16.msra.mxu0 %v19874_v33  ;;  %v19930_v33 = vld [vmem:[#allocation4 + $0x4ec] ss:$16 sps:$4 sm:$0xff]  }
 0x1bc   :  { %17458 = vmatmul.mubr.msk.bf16.vlgmr.msra.gmra.mrb[16].mxu1 %vm1535_vm8, %v22350_v7  ;;  %2633 = vmatprep.subr.bf16.mxu0 %v19882_v55 }
 0x1bd   :  { %1691 = vmatpush1.bf16.msra.mxu1 %v22307_v9  ;;  %1722 = vmatprep.mubr.bf16.mxu1 %v21960_v0  ;;  %v19843_v9 = vld [vmem:[#allocation4 + $0x324] ss:$16 sps:$4 sm:$0xff]  }
 0x1be   :  { %17459 = vmatprep.subr.msk.bf16.mxu1 %vm1539_vm7, %v22340_v45  ;;  %v19853_v45 = vld [vmem:[#allocation4 + $0x360] ss:$16 sps:$4 sm:$0xff]  }
 0x1c1   :  { %1693 = vmatpush1.bf16.msra.mxu1 %v1541_v57  ;;  %v19855_v57 = vld [vmem:[#allocation4 + $0x364] ss:$16 sps:$4 sm:$0xff]  }
 0x1c2   :  { %1733 = vmatprep.subr.bf16.mxu1 %v22275_v30  ;;  %v19835_v30 = vld [vmem:[#allocation4 + $0x300] ss:$16 sps:$4 sm:$0xff]  }
 0x1c4   :  { %17460 = vmatmul.mubr.msk.bf16.vlgmr.msra.gmra.mrb[20].mxu1 %vm1535_vm8, %v22389_v4 }
 0x1c5   :  { %1734 = vmatpush1.bf16.msra.mxu1 %v22273_v27  ;;  %1765 = vmatprep.mubr.bf16.mxu1 %v21960_v0  ;;  %v19841_v27 = vld [vmem:[#allocation4 + $0x320] ss:$16 sps:$4 sm:$0xff]  }
 0x1c6   :  { %17461 = vmatprep.subr.msk.bf16.mxu1 %vm1539_vm7, %v1532_v18  ;;  %v19861_v18 = vld [vmem:[#allocation4 + $0x384] ss:$16 sps:$4 sm:$0xff]  }
 0x1c9   :  { %1736 = vmatpush1.bf16.msra.mxu1 %v1547_v44  ;;  %v19879_v44 = vld [vmem:[#allocation4 + $0x3e4] ss:$16 sps:$4 sm:$0xff]  }
 0x1ca   :  { %1776 = vmatprep.subr.bf16.mxu1 %v1528_v46  ;;  %v19880_v46 = vld [vmem:[#allocation4 + $0x3e8] ss:$16 sps:$4 sm:$0xff]  }
 0x1cb   :  { %2634 = vmatpush1.bf16.msra.mxu0 %v19880_v46 }
 0x1cc   :  { %17462 = vmatmul.mubr.msk.bf16.vlgmr.msra.gmra.mrb[24].mxu1 %vm1535_vm8, %v22389_v4  ;;  %2635 = vmatprep.subr.bf16.mxu0 %v19888_v2 }
 0x1cd   :  { %1777 = vmatpush1.bf16.msra.mxu1 %v1527_v31  ;;  %1808 = vmatprep.mubr.bf16.mxu1 %v21960_v0  ;;  %v19871_v31 = vld [vmem:[#allocation4 + $0x3c0] ss:$16 sps:$4 sm:$0xff]  }
 0x1ce   :  { %17463 = vmatprep.subr.msk.bf16.mxu1 %vm1539_vm7, %v1534_v8  ;;  %v19894_v8 = vld [vmem:[#allocation4 + $0x42c] ss:$16 sps:$4 sm:$0xff]  }
 0x1cf   :  { %2636 = vmatpush1.bf16.msra.mxu0 %v19886_v1 }
 0x1d0   :  { %2637 = vmatprep.subr.bf16.mxu0 %v19894_v8 }
 0x1d1   :  { %1779 = vmatpush1.bf16.msra.mxu1 %v1553_v13  ;;  %v19895_v13 = vld [vmem:[#allocation4 + $0x440] ss:$16 sps:$4 sm:$0xff]  }
 0x1d2   :  { %2537 = vmatprep.subr.bf16.mxu1 %v19837_v60  ;;  %v19900_v60 = vld [vmem:[#allocation4 + $0x44c] ss:$16 sps:$4 sm:$0xff]  }
 0x1d3   :  { %2638 = vmatpush1.bf16.msra.mxu0 %v19892_v12 }
 0x1d4   :  { %17464 = vmatmul.mubr.msk.bf16.vlgmr.msra.gmra.mrb[28].mxu1 %vm1535_vm8, %v22389_v4  ;;  %2639 = vmatprep.subr.bf16.mxu0 %v19900_v60 }
 0x1d5   :  { %2538 = vmatpush1.bf16.msra.mxu1 %v19835_v30  ;;  %v19903_v30 = vld [vmem:[#allocation4 + $0x464] ss:$16 sps:$4 sm:$0xff]  }
 0x1d6   :  { %2539 = vmatprep.subr.bf16.mxu1 %v19843_v9  ;;  %v19906_v9 = vld [vmem:[#allocation4 + $0x46c] ss:$16 sps:$4 sm:$0xff]  }
 0x1d7   :  { %2640 = vmatpush1.bf16.msra.mxu0 %v19898_v62 }
 0x1d8   :  { %2641 = vmatprep.subr.bf16.mxu0 %v19906_v9 }
 0x1d9   :  { %2540 = vmatpush1.bf16.msra.mxu1 %v19841_v27  ;;  %v19901_v27 = vld [vmem:[#allocation4 + $0x460] ss:$16 sps:$4 sm:$0xff]  }
 0x1da   :  { %2541 = vmatprep.subr.bf16.mxu1 %v19849_v24  ;;  %v19904_v24 = vld [vmem:[#allocation4 + $0x468] ss:$16 sps:$4 sm:$0xff]  }
 0x1db   :  { %2642 = vmatpush1.bf16.msra.mxu0 %v19904_v24 }
 0x1dd   :  { %2542 = vmatpush1.bf16.msra.mxu1 %v19847_v42  ;;  %v19909_v42 = vld [vmem:[#allocation4 + $0x484] ss:$16 sps:$4 sm:$0xff]  }
 0x1de   :  { %2543 = vmatprep.subr.bf16.mxu1 %v19855_v57  ;;  %v19907_v57 = vld [vmem:[#allocation4 + $0x480] ss:$16 sps:$4 sm:$0xff]  }
 0x1e1   :  { %2544 = vmatpush1.bf16.msra.mxu1 %v19853_v45  ;;  %v19912_v45 = vld [vmem:[#allocation4 + $0x48c] ss:$16 sps:$4 sm:$0xff]  }
 0x1e2   :  { %2545 = vmatprep.subr.bf16.mxu1 %v19861_v18  ;;  %2643 = vmatprep.subr.bf16.mxu0 %v19912_v45  ;;  %v19913_v18 = vld [vmem:[#allocation4 + $0x4a0] ss:$16 sps:$4 sm:$0xff]  }
 0x1e3   :  { %2644 = vmatpush1.bf16.msra.mxu0 %v19910_v16 }
 0x1e5   :  { %2546 = vmatpush1.bf16.msra.mxu1 %v19859_v47  ;;  %v19918_v47 = vld [vmem:[#allocation4 + $0x4ac] ss:$16 sps:$4 sm:$0xff]  }
 0x1e6   :  { %2547 = vmatprep.subr.bf16.mxu1 %v19867_v26  ;;  %2645 = vmatprep.subr.bf16.mxu0 %v19918_v47  ;;  %v19919_v26 = vld [vmem:[#allocation4 + $0x4c0] ss:$16 sps:$4 sm:$0xff]  }
 0x1e7   :  { %2646 = vmatpush1.bf16.msra.mxu0 %v19916_v20 }
 0x1e9   :  { %2548 = vmatpush1.bf16.msra.mxu1 %v19865_v25  ;;  %v19924_v25 = vld [vmem:[#allocation4 + $0x4cc] ss:$16 sps:$4 sm:$0xff]  }
 0x1ea   :  { %2549 = vmatprep.subr.bf16.mxu1 %v19873_v32  ;;  %2647 = vmatprep.subr.bf16.mxu0 %v19924_v25  ;;  %v19928_v32 = vld [vmem:[#allocation4 + $0x4e8] ss:$16 sps:$4 sm:$0xff]  }
 0x1eb   :  { %2648 = vmatpush1.bf16.msra.mxu0 %v19922_v29 }
 0x1ec   :  { %2649 = vmatprep.subr.bf16.mxu0 %v19930_v33 }
 0x1ed   :  { %2550 = vmatpush1.bf16.msra.mxu1 %v19871_v31  ;;  %v19927_v31 = vld [vmem:[#allocation4 + $0x4e4] ss:$16 sps:$4 sm:$0xff]  }
 0x1ee   :  { %2551 = vmatprep.subr.bf16.mxu1 %v19879_v44 }
 0x1ef   :  { %2650 = vmatpush1.bf16.msra.mxu0 %v19928_v32 }
 0x1f1   :  { %2552 = vmatpush1.bf16.msra.mxu1 %v19877_v43  ;;  %v19936_v43 = vld [vmem:[#allocation4 + $0x50c] ss:$16 sps:$4 sm:$0xff]  }
 0x1f2   :  { %2553 = vmatprep.subr.bf16.mxu1 %v19885_v59  ;;  %2660 = vmatprep.subr.bf16.mxu0 %v19936_v43 }
 0x1f5   :  { %2554 = vmatpush1.bf16.msra.mxu1 %v19883_v51 }
 0x1f6   :  { %2555 = vmatprep.subr.bf16.mxu1 %v19891_v6 }
 0x1f9   :  { %2556 = vmatpush1.bf16.msra.mxu1 %v19889_v54 }
 0x1fa   :  { %2557 = vmatprep.subr.bf16.mxu1 %v19897_v52 }
 0x1fd   :  { %2558 = vmatpush1.bf16.msra.mxu1 %v19895_v13 }
 0x1fe   :  { %2559 = vmatprep.subr.bf16.mxu1 %v19903_v30 }
 0x201   :  { %2560 = vmatpush1.bf16.msra.mxu1 %v19901_v27 }
 0x202   :  { %2561 = vmatprep.subr.bf16.mxu1 %v19909_v42 }
 0x205   :  { %2562 = vmatpush1.bf16.msra.mxu1 %v19907_v57 }
 0x206   :  { %2563 = vmatprep.subr.bf16.mxu1 %v19915_v17 }
 0x209   :  { %2564 = vmatpush1.bf16.msra.mxu1 %v19913_v18 }
 0x20a   :  { %2565 = vmatprep.subr.bf16.mxu1 %v19921_v22 }
 0x20d   :  { %2566 = vmatpush1.bf16.msra.mxu1 %v19919_v26 }
 0x20e   :  { %2567 = vmatprep.subr.bf16.mxu1 %v19927_v31 }
 0x211   :  { %2568 = vmatpush1.bf16.msra.mxu1 %v19925_v11 }
 0x212   :  { %2578 = vmatprep.subr.bf16.mxu1 %v19933_v40 }
 0x27f   :  { %v1592_v44 = vpop.f32.mrb[8].mxu1 }
 0x280   :  { %v1594_v46 = vpop.f32.mrb[9].mxu1 }
 0x281   :  { %v1596_v55 = vpop.f32.mrb[10].mxu1 }
 0x282   :  { %v1598_v51 = vpop.f32.mrb[11].mxu1 }
 0x287   :  { %v1635_v59 = vpop.f32.mrb[12].mxu1 }
 0x288   :  { %v1637_v1 = vpop.f32.mrb[13].mxu1 }
 0x289   :  { %v1639_v2 = vpop.f32.mrb[14].mxu1 }
 0x28a   :  { %v1641_v6 = vpop.f32.mrb[15].mxu1 }
 0x28f   :  { %v1678_v8 = vpop.f32.mrb[16].mxu1 }
 0x290   :  { %v1680_v54 = vpop.f32.mrb[17].mxu1 }
 0x291   :  { %v1682_v12 = vpop.f32.mrb[18].mxu1 }
 0x292   :  { %v1684_v13 = vpop.f32.mrb[19].mxu1 }
 0x297   :  { %v1724_v52 = vpop.f32.mrb[20].mxu1 }
 0x298   :  { %v1819_v62 = vmax.f32 %v1592_v44, %v1724_v52  ;;  %v1726_v60 = vpop.f32.mrb[21].mxu1 }
 0x299   :  { %v1820_v30 = vmax.f32 %v1594_v46, %v1726_v60  ;;  %v1728_v9 = vpop.f32.mrb[22].mxu1 }
 0x29a   :  { %v1825_v27 = vmax.f32 %v1596_v55, %v1728_v9  ;;  %v1730_v24 = vpop.f32.mrb[23].mxu1 }
 0x29b   :  { %v1826_v42 = vmax.f32 %v1598_v51, %v1730_v24 }
 0x29f   :  { %v1767_v45 = vpop.f32.mrb[24].mxu1 }
 0x2a0   :  { %v1821_v57 = vmax.f32 %v1635_v59, %v1767_v45  ;;  %v1769_v16 = vpop.f32.mrb[25].mxu1 }
 0x2a1   :  { %v1822_v17 = vmax.f32 %v1637_v1, %v1769_v16  ;;  %v1771_v47 = vpop.f32.mrb[26].mxu1 }
 0x2a2   :  { %v1827_v18 = vmax.f32 %v1639_v2, %v1771_v47  ;;  %v1773_v20 = vpop.f32.mrb[27].mxu1  ;;  %v19934_v47 = vld [vmem:[#allocation4 + $0x508] ss:$16 sps:$4 sm:$0xff]  }
 0x2a3   :  { %v1831_v22 = vmax.f32 %v1819_v62, %v1822_v17  ;;  %v1828_v25 = vmax.f32 %v1641_v6, %v1773_v20  ;;  %v19931_v17 = vld [vmem:[#allocation4 + $0x500] ss:$16 sps:$4 sm:$0xff]  }
 0x2a5   :  { %v1834_v26 = vmax.f32 %v1825_v27, %v1828_v25  ;;  %v19942_v25 = vld [vmem:[#allocation4 + $0x52c] ss:$16 sps:$4 sm:$0xff]  }
 0x2a7   :  { %v22403_v29 = vpack.c.bf16 %v1834_v26, %v1831_v22  ;;  %v1810_v11 = vpop.f32.mrb[28].mxu1  ;;  %v19939_v22 = vld [vmem:[#allocation4 + $0x524] ss:$16 sps:$4 sm:$0xff]  }
 0x2a8   :  { %v1823_v31 = vmax.f32 %v1678_v8, %v1810_v11  ;;  %v1812_v32 = vpop.f32.mrb[29].mxu1 }
 0x2a9   :  { %v1824_v33 = vmax.f32 %v1680_v54, %v1812_v32  ;;  %v1814_v40 = vpop.f32.mrb[30].mxu1  ;;  %v2034_v43 = vshrl.u32 %v22403_v29, 16  ;;  %v2036_v44 = vshll.u32 %v22403_v29, 16  ;;  %v19940_v32 = vld [vmem:[#allocation4 + $0x528] ss:$16 sps:$4 sm:$0xff]  }
 0x2aa   :  { %v1832_v46 = vmax.f32 %v1820_v30, %v1823_v31  ;;  %v1829_v55 = vmax.f32 %v1682_v12, %v1814_v40  ;;  %v1816_v51 = vpop.f32.mrb[31].mxu1  ;;  %v19937_v31 = vld [vmem:[#allocation4 + $0x520] ss:$16 sps:$4 sm:$0xff]   ;;  %v19948_v40 = vld [vmem:[#allocation4 + $0x54c] ss:$16 sps:$4 sm:$0xff]  }
 0x2ab   :  { %v1833_v59 = vmax.f32 %v1821_v57, %v1824_v33  ;;  %v1830_v1 = vmax.f32 %v1684_v13, %v1816_v51  ;;  %v4196_v2 = vrot.slane %v2034_v43, 1  ;;  %v4197_v6 = vrot.slane %v2036_v44, 2  ;;  %v19945_v33 = vld [vmem:[#allocation4 + $0x544] ss:$16 sps:$4 sm:$0xff]   ;;  %v19949_v51 = vld [vmem:[#allocation4 + $0x560] ss:$16 sps:$4 sm:$0xff]  }
 0x2ac   :  { %v1835_v52 = vmax.f32 %v1826_v42, %v1829_v55  ;;  %v2038_v24 = vrot.slane %v2036_v44, 1  ;;  %v19946_v44 = vld [vmem:[#allocation4 + $0x548] ss:$16 sps:$4 sm:$0xff]   ;;  %v19954_v55 = vld [vmem:[#allocation4 + $0x56c] ss:$16 sps:$4 sm:$0xff]  }
 0x2ad   :  { %v1836_v62 = vmax.f32 %v1827_v18, %v1830_v1  ;;  %v22409_v9 = vor.u32 %v4197_v6, %v4196_v2  ;;  %v19957_v1 = vld [vmem:[#allocation4 + $0x584] ss:$16 sps:$4 sm:$0xff]   ;;  %v19960_v2 = vld [vmem:[#allocation4 + $0x58c] ss:$16 sps:$4 sm:$0xff]   ;;  %v19958_v6 = vld [vmem:[#allocation4 + $0x588] ss:$16 sps:$4 sm:$0xff]  }
 0x2ae   :  { %v22407_v60 = vpack.c.bf16 %v1835_v52, %v1832_v46  ;;  %v2039_v20 = vor.u32 %v2038_v24, %v2034_v43  ;;  %v19943_v43 = vld [vmem:[#allocation4 + $0x540] ss:$16 sps:$4 sm:$0xff]   ;;  %v19951_v46 = vld [vmem:[#allocation4 + $0x564] ss:$16 sps:$4 sm:$0xff]   ;;  %v19964_v24 = vld [vmem:[#allocation4 + $0x5a8] ss:$16 sps:$4 sm:$0xff]  }
 0x2af   :  { %v22411_v8 = vpack.c.bf16 %v1836_v62, %v1833_v59  ;;  %v19952_v59 = vld [vmem:[#allocation4 + $0x568] ss:$16 sps:$4 sm:$0xff]   ;;  %v19955_v52 = vld [vmem:[#allocation4 + $0x580] ss:$16 sps:$4 sm:$0xff]   ;;  %v19963_v62 = vld [vmem:[#allocation4 + $0x5a4] ss:$16 sps:$4 sm:$0xff]  }
 0x2b0   :  { %v2041_v54 = vshrl.u32 %v22407_v60, 16  ;;  %v2043_v27 = vshll.u32 %v22407_v60, 16 }
 0x2b1   :  { %v2048_v12 = vshrl.u32 %v22411_v8, 16  ;;  %v2050_v30 = vshll.u32 %v22411_v8, 16 }
 0x2b2   :  { %v2045_v13 = vrot.slane %v2043_v27, 1  ;;  %v4199_v45 = vrot.slane %v2041_v54, 1  ;;  %v4200_v42 = vrot.slane %v2043_v27, 2  ;;  %v19961_v27 = vld [vmem:[#allocation4 + $0x5a0] ss:$16 sps:$4 sm:$0xff]  }
 0x2b3   :  { %v4202_v57 = vrot.slane %v2048_v12, 1  ;;  %v4203_v18 = vrot.slane %v2050_v30, 2 }
 0x2b4   :  { %v2046_v16 = vor.u32 %v2045_v13, %v2041_v54  ;;  %v22421_v26 = vor.u32 %v4200_v42, %v4199_v45  ;;  %v19966_v54 = vld [vmem:[#allocation4 + $0x5ac] ss:$16 sps:$4 sm:$0xff]   ;;  %v19969_v13 = vld [vmem:[#allocation4 + $0x5c4] ss:$16 sps:$4 sm:$0xff]   ;;  %v19967_v42 = vld [vmem:[#allocation4 + $0x5c0] ss:$16 sps:$4 sm:$0xff]  }
 0x2b5   :  { %v22423_v11 = vor.u32 %v4203_v18, %v4202_v57  ;;  %v19972_v45 = vld [vmem:[#allocation4 + $0x5cc] ss:$16 sps:$4 sm:$0xff]   ;;  %v19970_v57 = vld [vmem:[#allocation4 + $0x5c8] ss:$16 sps:$4 sm:$0xff]  }
 0x2b6   :  { %2569 = vmatprep.mubr.bf16.mxu1 %v2046_v16  ;;  %2651 = vmatprep.mubr.bf16.mxu0 %v2046_v16  ;;  %v19975_v16 = vld [vmem:[#allocation4 + $0x5e4] ss:$16 sps:$4 sm:$0xff]   ;;  %v19976_v18 = vld [vmem:[#allocation4 + $0x5e8] ss:$16 sps:$4 sm:$0xff]  }
 0x2b7   :  { %2570 = vmatmul.mubr.bf16.vlgmr.msra.gmra.mrb[32].mxu1 %v2039_v20  ;;  %2652 = vmatmul.mubr.bf16.vlgmr.msra.gmra.mrb[16].mxu0 %v2039_v20  ;;  %v2052_v20 = vrot.slane %v2050_v30, 1  ;;  %v19988_v30 = vld [vmem:[#allocation4 + $0x28] ss:$16 sps:$4 sm:$0xff]  }
 0x2b8   :  { %2579 = vmatpush1.bf16.msra.mxu1 %v19931_v17  ;;  %2661 = vmatpush1.bf16.msra.mxu0 %v19934_v47  ;;  %v19978_v17 = vld [vmem:[#allocation4 + $0x5ec] ss:$16 sps:$4 sm:$0xff]   ;;  %v19973_v47 = vld [vmem:[#allocation4 + $0x5e0] ss:$16 sps:$4 sm:$0xff]  }
 0x2b9   :  { %2580 = vmatprep.subr.bf16.mxu1 %v19939_v22  ;;  %2662 = vmatprep.subr.bf16.mxu0 %v19942_v25  ;;  %v19981_v22 = vld [vmem:[#allocation4 + $0x4] ss:$16 sps:$4 sm:$0xff]   ;;  %v19984_v25 = vld [vmem:[#allocation4 + $0xc] ss:$16 sps:$4 sm:$0xff]  }
 0x2ba   :  { %2610 = vmatprep.mubr.bf16.mxu1 %v21960_v0  ;;  %2692 = vmatprep.mubr.bf16.mxu0 %v21960_v0 }
 0x2bc   :  { %2581 = vmatpush1.bf16.msra.mxu1 %v19937_v31  ;;  %2663 = vmatpush1.bf16.msra.mxu0 %v19940_v32  ;;  %v19979_v31 = vld [vmem:[#allocation4] ss:$16 sps:$4 sm:$0xff]   ;;  %v2053_v32 = vor.u32 %v2052_v20, %v2048_v12  ;;  %v20026_v20 = vld [vmem:[#allocation4 + $0xec] ss:$16 sps:$4 sm:$0xff]  }
 0x2bd   :  { %2582 = vmatprep.subr.bf16.mxu1 %v19945_v33  ;;  %2664 = vmatprep.subr.bf16.mxu0 %v19948_v40  ;;  %v19982_v33 = vld [vmem:[#allocation4 + $0x8] ss:$16 sps:$4 sm:$0xff]   ;;  %v19987_v40 = vld [vmem:[#allocation4 + $0x24] ss:$16 sps:$4 sm:$0xff]   ;;  %v19991_v12 = vld [vmem:[#allocation4 + $0x40] ss:$16 sps:$4 sm:$0xff]  }
 0x2c0   :  { %2583 = vmatpush1.bf16.msra.mxu1 %v19943_v43  ;;  %2665 = vmatpush1.bf16.msra.mxu0 %v19946_v44  ;;  %v19990_v43 = vld [vmem:[#allocation4 + $0x2c] ss:$16 sps:$4 sm:$0xff]   ;;  %v19985_v44 = vld [vmem:[#allocation4 + $0x20] ss:$16 sps:$4 sm:$0xff]  }
 0x2c1   :  { %2584 = vmatprep.subr.bf16.mxu1 %v19951_v46  ;;  %2666 = vmatprep.subr.bf16.mxu0 %v19954_v55  ;;  %v19993_v46 = vld [vmem:[#allocation4 + $0x44] ss:$16 sps:$4 sm:$0xff]   ;;  %v19996_v55 = vld [vmem:[#allocation4 + $0x4c] ss:$16 sps:$4 sm:$0xff]  }
 0x2c4   :  { %2585 = vmatpush1.bf16.msra.mxu1 %v19949_v51  ;;  %2667 = vmatpush1.bf16.msra.mxu0 %v19952_v59  ;;  %v19994_v51 = vld [vmem:[#allocation4 + $0x48] ss:$16 sps:$4 sm:$0xff]   ;;  %v19999_v59 = vld [vmem:[#allocation4 + $0x64] ss:$16 sps:$4 sm:$0xff]  }
 0x2c5   :  { %2586 = vmatprep.subr.bf16.mxu1 %v19957_v1  ;;  %2668 = vmatprep.subr.bf16.mxu0 %v19960_v2  ;;  %v20002_v1 = vld [vmem:[#allocation4 + $0x6c] ss:$16 sps:$4 sm:$0xff]   ;;  %v19997_v2 = vld [vmem:[#allocation4 + $0x60] ss:$16 sps:$4 sm:$0xff]  }
 0x2c8   :  { %2587 = vmatpush1.bf16.msra.mxu1 %v19955_v52  ;;  %2669 = vmatpush1.bf16.msra.mxu0 %v19958_v6  ;;  %v20000_v52 = vld [vmem:[#allocation4 + $0x68] ss:$16 sps:$4 sm:$0xff]   ;;  %v20005_v6 = vld [vmem:[#allocation4 + $0x84] ss:$16 sps:$4 sm:$0xff]  }
 0x2c9   :  { %2588 = vmatprep.subr.bf16.mxu1 %v19963_v62  ;;  %2670 = vmatprep.subr.bf16.mxu0 %v19966_v54  ;;  %v20008_v62 = vld [vmem:[#allocation4 + $0x8c] ss:$16 sps:$4 sm:$0xff]   ;;  %v20003_v54 = vld [vmem:[#allocation4 + $0x80] ss:$16 sps:$4 sm:$0xff]  }
 0x2cc   :  { %2589 = vmatpush1.bf16.msra.mxu1 %v19961_v27  ;;  %2671 = vmatpush1.bf16.msra.mxu0 %v19964_v24  ;;  %v20006_v27 = vld [vmem:[#allocation4 + $0x88] ss:$16 sps:$4 sm:$0xff]   ;;  %v20011_v24 = vld [vmem:[#allocation4 + $0xa4] ss:$16 sps:$4 sm:$0xff]  }
 0x2cd   :  { %2590 = vmatprep.subr.bf16.mxu1 %v19969_v13  ;;  %2672 = vmatprep.subr.bf16.mxu0 %v19972_v45  ;;  %v20014_v13 = vld [vmem:[#allocation4 + $0xac] ss:$16 sps:$4 sm:$0xff]   ;;  %v20009_v45 = vld [vmem:[#allocation4 + $0xa0] ss:$16 sps:$4 sm:$0xff]  }
 0x2d0   :  { %2591 = vmatpush1.bf16.msra.mxu1 %v19967_v42  ;;  %2673 = vmatpush1.bf16.msra.mxu0 %v19970_v57  ;;  %v20012_v42 = vld [vmem:[#allocation4 + $0xa8] ss:$16 sps:$4 sm:$0xff]   ;;  %v20017_v57 = vld [vmem:[#allocation4 + $0xc4] ss:$16 sps:$4 sm:$0xff]  }
 0x2d1   :  { %2592 = vmatprep.subr.bf16.mxu1 %v19975_v16  ;;  %2674 = vmatprep.subr.bf16.mxu0 %v19978_v17  ;;  %v20020_v16 = vld [vmem:[#allocation4 + $0xcc] ss:$16 sps:$4 sm:$0xff]   ;;  %v20015_v17 = vld [vmem:[#allocation4 + $0xc0] ss:$16 sps:$4 sm:$0xff]  }
 0x2d4   :  { %2593 = vmatpush1.bf16.msra.mxu1 %v19973_v47  ;;  %2675 = vmatpush1.bf16.msra.mxu0 %v19976_v18  ;;  %v20018_v47 = vld [vmem:[#allocation4 + $0xc8] ss:$16 sps:$4 sm:$0xff]   ;;  %v20023_v18 = vld [vmem:[#allocation4 + $0xe4] ss:$16 sps:$4 sm:$0xff]  }
 0x2d5   :  { %3181 = vmatprep.subr.bf16.mxu1 %v19981_v22  ;;  %3263 = vmatprep.subr.bf16.mxu0 %v19984_v25  ;;  %v20021_v22 = vld [vmem:[#allocation4 + $0xe0] ss:$16 sps:$4 sm:$0xff]   ;;  %v20024_v25 = vld [vmem:[#allocation4 + $0xe8] ss:$16 sps:$4 sm:$0xff]  }
 0x2d7   :  { %2611 = vmatmul.mubr.bf16.vlgmr.msra.gmra.mrb[32].mxu1 %v2053_v32  ;;  %2693 = vmatmul.mubr.bf16.vlgmr.msra.gmra.mrb[16].mxu0 %v2053_v32  ;;  %v20032_v32 = vld [vmem:[#allocation4 + $0x10c] ss:$16 sps:$4 sm:$0xff]  }
 0x2d8   :  { %3182 = vmatpush1.bf16.msra.mxu1 %v19979_v31  ;;  %3213 = vmatprep.mubr.bf16.mxu1 %v22407_v60  ;;  %v20029_v31 = vld [vmem:[#allocation4 + $0x104] ss:$16 sps:$4 sm:$0xff]  }
 0x2d9   :  { %3264 = vmatpush1.bf16.msra.mxu0 %v19982_v33  ;;  %3295 = vmatprep.mubr.bf16.mxu0 %v22407_v60  ;;  %v20027_v33 = vld [vmem:[#allocation4 + $0x100] ss:$16 sps:$4 sm:$0xff]  }
 0x2da   :  { %3183 = vmatprep.subr.bf16.mxu1 %v19987_v40  ;;  %3265 = vmatprep.subr.bf16.mxu0 %v19990_v43  ;;  %v20030_v40 = vld [vmem:[#allocation4 + $0x108] ss:$16 sps:$4 sm:$0xff]   ;;  %v20035_v43 = vld [vmem:[#allocation4 + $0x124] ss:$16 sps:$4 sm:$0xff]  }
 0x2dc   :  { %3184 = vmatpush1.bf16.msra.mxu1 %v19985_v44  ;;  %v20038_v44 = vld [vmem:[#allocation4 + $0x12c] ss:$16 sps:$4 sm:$0xff]  }
 0x2dd   :  { %3266 = vmatpush1.bf16.msra.mxu0 %v19988_v30  ;;  %3185 = vmatprep.subr.bf16.mxu1 %v19993_v46  ;;  %v20033_v30 = vld [vmem:[#allocation4 + $0x120] ss:$16 sps:$4 sm:$0xff]   ;;  %v20036_v46 = vld [vmem:[#allocation4 + $0x128] ss:$16 sps:$4 sm:$0xff]  }
 0x2de   :  { %3267 = vmatprep.subr.bf16.mxu0 %v19996_v55  ;;  %v20041_v55 = vld [vmem:[#allocation4 + $0x144] ss:$16 sps:$4 sm:$0xff]  }
 0x2e0   :  { %3186 = vmatpush1.bf16.msra.mxu1 %v19991_v12  ;;  %v20044_v12 = vld [vmem:[#allocation4 + $0x14c] ss:$16 sps:$4 sm:$0xff]  }
 0x2e1   :  { %3268 = vmatpush1.bf16.msra.mxu0 %v19994_v51  ;;  %3187 = vmatprep.subr.bf16.mxu1 %v19999_v59  ;;  %v20039_v51 = vld [vmem:[#allocation4 + $0x140] ss:$16 sps:$4 sm:$0xff]   ;;  %v20042_v59 = vld [vmem:[#allocation4 + $0x148] ss:$16 sps:$4 sm:$0xff]  }
 0x2e2   :  { %3269 = vmatprep.subr.bf16.mxu0 %v20002_v1  ;;  %v20047_v1 = vld [vmem:[#allocation4 + $0x164] ss:$16 sps:$4 sm:$0xff]  }
 0x2e4   :  { %3188 = vmatpush1.bf16.msra.mxu1 %v19997_v2  ;;  %v20050_v2 = vld [vmem:[#allocation4 + $0x16c] ss:$16 sps:$4 sm:$0xff]  }
 0x2e5   :  { %3270 = vmatpush1.bf16.msra.mxu0 %v20000_v52  ;;  %3189 = vmatprep.subr.bf16.mxu1 %v20005_v6  ;;  %v20045_v52 = vld [vmem:[#allocation4 + $0x160] ss:$16 sps:$4 sm:$0xff]   ;;  %v20048_v6 = vld [vmem:[#allocation4 + $0x168] ss:$16 sps:$4 sm:$0xff]  }
 0x2e6   :  { %3271 = vmatprep.subr.bf16.mxu0 %v20008_v62  ;;  %v20053_v62 = vld [vmem:[#allocation4 + $0x184] ss:$16 sps:$4 sm:$0xff]  }
 0x2e8   :  { %3190 = vmatpush1.bf16.msra.mxu1 %v20003_v54  ;;  %v20056_v54 = vld [vmem:[#allocation4 + $0x18c] ss:$16 sps:$4 sm:$0xff]  }
 0x2e9   :  { %3272 = vmatpush1.bf16.msra.mxu0 %v20006_v27  ;;  %3191 = vmatprep.subr.bf16.mxu1 %v20011_v24  ;;  %v20051_v27 = vld [vmem:[#allocation4 + $0x180] ss:$16 sps:$4 sm:$0xff]   ;;  %v20054_v24 = vld [vmem:[#allocation4 + $0x188] ss:$16 sps:$4 sm:$0xff]  }
 0x2ea   :  { %3273 = vmatprep.subr.bf16.mxu0 %v20014_v13  ;;  %v20059_v13 = vld [vmem:[#allocation4 + $0x1a4] ss:$16 sps:$4 sm:$0xff]  }
 0x2ec   :  { %3192 = vmatpush1.bf16.msra.mxu1 %v20009_v45  ;;  %v20062_v45 = vld [vmem:[#allocation4 + $0x1ac] ss:$16 sps:$4 sm:$0xff]  }
 0x2ed   :  { %3274 = vmatpush1.bf16.msra.mxu0 %v20012_v42  ;;  %3193 = vmatprep.subr.bf16.mxu1 %v20017_v57  ;;  %v20057_v42 = vld [vmem:[#allocation4 + $0x1a0] ss:$16 sps:$4 sm:$0xff]   ;;  %v20060_v57 = vld [vmem:[#allocation4 + $0x1a8] ss:$16 sps:$4 sm:$0xff]  }
 0x2ee   :  { %3275 = vmatprep.subr.bf16.mxu0 %v20020_v16  ;;  %v20065_v16 = vld [vmem:[#allocation4 + $0x1c4] ss:$16 sps:$4 sm:$0xff]  }
 0x2f0   :  { %3194 = vmatpush1.bf16.msra.mxu1 %v20015_v17  ;;  %v20068_v17 = vld [vmem:[#allocation4 + $0x1cc] ss:$16 sps:$4 sm:$0xff]  }
 0x2f1   :  { %3276 = vmatpush1.bf16.msra.mxu0 %v20018_v47  ;;  %3195 = vmatprep.subr.bf16.mxu1 %v20023_v18  ;;  %v20063_v47 = vld [vmem:[#allocation4 + $0x1c0] ss:$16 sps:$4 sm:$0xff]   ;;  %v20066_v18 = vld [vmem:[#allocation4 + $0x1c8] ss:$16 sps:$4 sm:$0xff]  }
 0x2f2   :  { %3277 = vmatprep.subr.bf16.mxu0 %v20026_v20  ;;  %v20071_v20 = vld [vmem:[#allocation4 + $0x1e4] ss:$16 sps:$4 sm:$0xff]  }
 0x2f4   :  { %3196 = vmatpush1.bf16.msra.mxu1 %v20021_v22  ;;  %v20074_v22 = vld [vmem:[#allocation4 + $0x1ec] ss:$16 sps:$4 sm:$0xff]  }
 0x2f5   :  { %3278 = vmatpush1.bf16.msra.mxu0 %v20024_v25  ;;  %3197 = vmatprep.subr.bf16.mxu1 %v20029_v31  ;;  %v20069_v25 = vld [vmem:[#allocation4 + $0x1e0] ss:$16 sps:$4 sm:$0xff]   ;;  %v20072_v31 = vld [vmem:[#allocation4 + $0x1e8] ss:$16 sps:$4 sm:$0xff]  }
 0x2f6   :  { %3279 = vmatprep.subr.bf16.mxu0 %v20032_v32  ;;  %v20077_v32 = vld [vmem:[#allocation4 + $0x204] ss:$16 sps:$4 sm:$0xff]  }
 0x2f8   :  { %3198 = vmatpush1.bf16.msra.mxu1 %v20027_v33  ;;  %v20080_v33 = vld [vmem:[#allocation4 + $0x20c] ss:$16 sps:$4 sm:$0xff]  }
 0x2f9   :  { %3280 = vmatpush1.bf16.msra.mxu0 %v20030_v40  ;;  %3199 = vmatprep.subr.bf16.mxu1 %v20035_v43  ;;  %v20075_v40 = vld [vmem:[#allocation4 + $0x200] ss:$16 sps:$4 sm:$0xff]   ;;  %v20078_v43 = vld [vmem:[#allocation4 + $0x208] ss:$16 sps:$4 sm:$0xff]  }
 0x2fa   :  { %3281 = vmatprep.subr.bf16.mxu0 %v20038_v44  ;;  %v20083_v44 = vld [vmem:[#allocation4 + $0x224] ss:$16 sps:$4 sm:$0xff]  }
 0x2fc   :  { %3200 = vmatpush1.bf16.msra.mxu1 %v20033_v30  ;;  %v20086_v30 = vld [vmem:[#allocation4 + $0x22c] ss:$16 sps:$4 sm:$0xff]  }
 0x2fd   :  { %3282 = vmatpush1.bf16.msra.mxu0 %v20036_v46  ;;  %3201 = vmatprep.subr.bf16.mxu1 %v20041_v55  ;;  %v20081_v46 = vld [vmem:[#allocation4 + $0x220] ss:$16 sps:$4 sm:$0xff]   ;;  %v20084_v55 = vld [vmem:[#allocation4 + $0x228] ss:$16 sps:$4 sm:$0xff]  }
 0x2fe   :  { %3283 = vmatprep.subr.bf16.mxu0 %v20044_v12  ;;  %v20089_v12 = vld [vmem:[#allocation4 + $0x244] ss:$16 sps:$4 sm:$0xff]  }
 0x300   :  { %3202 = vmatpush1.bf16.msra.mxu1 %v20039_v51  ;;  %v20092_v51 = vld [vmem:[#allocation4 + $0x24c] ss:$16 sps:$4 sm:$0xff]  }
 0x301   :  { %3284 = vmatpush1.bf16.msra.mxu0 %v20042_v59  ;;  %3203 = vmatprep.subr.bf16.mxu1 %v20047_v1  ;;  %v20087_v59 = vld [vmem:[#allocation4 + $0x240] ss:$16 sps:$4 sm:$0xff]   ;;  %v20090_v1 = vld [vmem:[#allocation4 + $0x248] ss:$16 sps:$4 sm:$0xff]  }
 0x302   :  { %3285 = vmatprep.subr.bf16.mxu0 %v20050_v2  ;;  %v20095_v2 = vld [vmem:[#allocation4 + $0x264] ss:$16 sps:$4 sm:$0xff]  }
 0x304   :  { %3204 = vmatpush1.bf16.msra.mxu1 %v20045_v52  ;;  %v20098_v52 = vld [vmem:[#allocation4 + $0x26c] ss:$16 sps:$4 sm:$0xff]  }
 0x305   :  { %3286 = vmatpush1.bf16.msra.mxu0 %v20048_v6  ;;  %3205 = vmatprep.subr.bf16.mxu1 %v20053_v62  ;;  %v20093_v6 = vld [vmem:[#allocation4 + $0x260] ss:$16 sps:$4 sm:$0xff]   ;;  %v20096_v62 = vld [vmem:[#allocation4 + $0x268] ss:$16 sps:$4 sm:$0xff]  }
 0x306   :  { %3287 = vmatprep.subr.bf16.mxu0 %v20056_v54  ;;  %v20101_v54 = vld [vmem:[#allocation4 + $0x284] ss:$16 sps:$4 sm:$0xff]  }
 0x308   :  { %3206 = vmatpush1.bf16.msra.mxu1 %v20051_v27  ;;  %v20104_v27 = vld [vmem:[#allocation4 + $0x28c] ss:$16 sps:$4 sm:$0xff]  }
 0x309   :  { %3288 = vmatpush1.bf16.msra.mxu0 %v20054_v24  ;;  %3207 = vmatprep.subr.bf16.mxu1 %v20059_v13  ;;  %v20099_v24 = vld [vmem:[#allocation4 + $0x280] ss:$16 sps:$4 sm:$0xff]   ;;  %v20102_v13 = vld [vmem:[#allocation4 + $0x288] ss:$16 sps:$4 sm:$0xff]  }
 0x30a   :  { %3289 = vmatprep.subr.bf16.mxu0 %v20062_v45  ;;  %v20107_v45 = vld [vmem:[#allocation4 + $0x2a4] ss:$16 sps:$4 sm:$0xff]  }
 0x30c   :  { %3208 = vmatpush1.bf16.msra.mxu1 %v20057_v42  ;;  %v20110_v42 = vld [vmem:[#allocation4 + $0x2ac] ss:$16 sps:$4 sm:$0xff]  }
 0x30d   :  { %3290 = vmatpush1.bf16.msra.mxu0 %v20060_v57  ;;  %3209 = vmatprep.subr.bf16.mxu1 %v20065_v16  ;;  %v20105_v57 = vld [vmem:[#allocation4 + $0x2a0] ss:$16 sps:$4 sm:$0xff]   ;;  %v20108_v16 = vld [vmem:[#allocation4 + $0x2a8] ss:$16 sps:$4 sm:$0xff]  }
 0x30e   :  { %3291 = vmatprep.subr.bf16.mxu0 %v20068_v17  ;;  %v20113_v17 = vld [vmem:[#allocation4 + $0x2c4] ss:$16 sps:$4 sm:$0xff]  }
 0x310   :  { %3210 = vmatpush1.bf16.msra.mxu1 %v20063_v47  ;;  %v20116_v47 = vld [vmem:[#allocation4 + $0x2cc] ss:$16 sps:$4 sm:$0xff]  }
 0x311   :  { %3292 = vmatpush1.bf16.msra.mxu0 %v20066_v18  ;;  %3211 = vmatprep.subr.bf16.mxu1 %v20071_v20  ;;  %v20111_v18 = vld [vmem:[#allocation4 + $0x2c0] ss:$16 sps:$4 sm:$0xff]   ;;  %v20114_v20 = vld [vmem:[#allocation4 + $0x2c8] ss:$16 sps:$4 sm:$0xff]  }
 0x312   :  { %3293 = vmatprep.subr.bf16.mxu0 %v20074_v22  ;;  %v20119_v22 = vld [vmem:[#allocation4 + $0x2e4] ss:$16 sps:$4 sm:$0xff]  }
 0x314   :  { %3212 = vmatpush1.bf16.msra.mxu1 %v20069_v25  ;;  %v20122_v25 = vld [vmem:[#allocation4 + $0x2ec] ss:$16 sps:$4 sm:$0xff]  }
 0x315   :  { %3294 = vmatpush1.bf16.msra.mxu0 %v20072_v31  ;;  %3222 = vmatprep.subr.bf16.mxu1 %v20077_v32  ;;  %v20117_v31 = vld [vmem:[#allocation4 + $0x2e0] ss:$16 sps:$4 sm:$0xff]   ;;  %v20120_v32 = vld [vmem:[#allocation4 + $0x2e8] ss:$16 sps:$4 sm:$0xff]  }
 0x316   :  { %3304 = vmatprep.subr.bf16.mxu0 %v20080_v33  ;;  %v20125_v33 = vld [vmem:[#allocation4 + $0x604] ss:$16 sps:$4 sm:$0xff]  }
 0x317   :  { %3214 = vmatmul.mubr.bf16.vlgmr.msra.gmra.mrb[32].mxu1 %v22403_v29 }
 0x318   :  { %3296 = vmatmul.mubr.bf16.vlgmr.msra.gmra.mrb[16].mxu0 %v22403_v29  ;;  %3223 = vmatpush1.bf16.msra.mxu1 %v20075_v40  ;;  %v20128_v40 = vld [vmem:[#allocation4 + $0x60c] ss:$16 sps:$4 sm:$0xff]  }
 0x319   :  { %3305 = vmatpush1.bf16.msra.mxu0 %v20078_v43  ;;  %3224 = vmatprep.subr.bf16.mxu1 %v20083_v44  ;;  %v20123_v43 = vld [vmem:[#allocation4 + $0x600] ss:$16 sps:$4 sm:$0xff]   ;;  %v20126_v44 = vld [vmem:[#allocation4 + $0x608] ss:$16 sps:$4 sm:$0xff]  }
 0x31a   :  { %3306 = vmatprep.subr.bf16.mxu0 %v20086_v30  ;;  %3254 = vmatprep.mubr.bf16.mxu1 %v21960_v0  ;;  %v20131_v30 = vld [vmem:[#allocation4 + $0x624] ss:$16 sps:$4 sm:$0xff]  }
 0x31b   :  { %3336 = vmatprep.mubr.bf16.mxu0 %v21960_v0 }
 0x31c   :  { %3225 = vmatpush1.bf16.msra.mxu1 %v20081_v46  ;;  %v3446_v46 = vrot.slane %v22407_v60, 1 }
 0x31d   :  { %3307 = vmatpush1.bf16.msra.mxu0 %v20084_v55  ;;  %3226 = vmatprep.subr.bf16.mxu1 %v20089_v12  ;;  %v20134_v55 = vld [vmem:[#allocation4 + $0x62c] ss:$16 sps:$4 sm:$0xff]   ;;  %v20129_v12 = vld [vmem:[#allocation4 + $0x620] ss:$16 sps:$4 sm:$0xff]  }
 0x31e   :  { %3308 = vmatprep.subr.bf16.mxu0 %v20092_v51  ;;  %v20132_v51 = vld [vmem:[#allocation4 + $0x628] ss:$16 sps:$4 sm:$0xff]  }
 0x320   :  { %3227 = vmatpush1.bf16.msra.mxu1 %v20087_v59  ;;  %v20137_v59 = vld [vmem:[#allocation4 + $0x644] ss:$16 sps:$4 sm:$0xff]  }
 0x321   :  { %3309 = vmatpush1.bf16.msra.mxu0 %v20090_v1  ;;  %3228 = vmatprep.subr.bf16.mxu1 %v20095_v2  ;;  %v20140_v1 = vld [vmem:[#allocation4 + $0x64c] ss:$16 sps:$4 sm:$0xff]   ;;  %v20135_v2 = vld [vmem:[#allocation4 + $0x640] ss:$16 sps:$4 sm:$0xff]  }
 0x322   :  { %3310 = vmatprep.subr.bf16.mxu0 %v20098_v52  ;;  %v20138_v52 = vld [vmem:[#allocation4 + $0x648] ss:$16 sps:$4 sm:$0xff]  }
 0x324   :  { %3229 = vmatpush1.bf16.msra.mxu1 %v20093_v6  ;;  %v20143_v6 = vld [vmem:[#allocation4 + $0x664] ss:$16 sps:$4 sm:$0xff]  }
 0x325   :  { %3311 = vmatpush1.bf16.msra.mxu0 %v20096_v62  ;;  %3230 = vmatprep.subr.bf16.mxu1 %v20101_v54  ;;  %v20146_v62 = vld [vmem:[#allocation4 + $0x66c] ss:$16 sps:$4 sm:$0xff]   ;;  %v20141_v54 = vld [vmem:[#allocation4 + $0x660] ss:$16 sps:$4 sm:$0xff]  }
 0x326   :  { %3312 = vmatprep.subr.bf16.mxu0 %v20104_v27  ;;  %v20144_v27 = vld [vmem:[#allocation4 + $0x668] ss:$16 sps:$4 sm:$0xff]  }
 0x328   :  { %3231 = vmatpush1.bf16.msra.mxu1 %v20099_v24  ;;  %v20149_v24 = vld [vmem:[#allocation4 + $0x684] ss:$16 sps:$4 sm:$0xff]  }
 0x329   :  { %3313 = vmatpush1.bf16.msra.mxu0 %v20102_v13  ;;  %3232 = vmatprep.subr.bf16.mxu1 %v20107_v45  ;;  %v20152_v13 = vld [vmem:[#allocation4 + $0x68c] ss:$16 sps:$4 sm:$0xff]   ;;  %v20147_v45 = vld [vmem:[#allocation4 + $0x680] ss:$16 sps:$4 sm:$0xff]  }
 0x32a   :  { %3314 = vmatprep.subr.bf16.mxu0 %v20110_v42  ;;  %v20150_v42 = vld [vmem:[#allocation4 + $0x688] ss:$16 sps:$4 sm:$0xff]  }
 0x32c   :  { %3233 = vmatpush1.bf16.msra.mxu1 %v20105_v57  ;;  %v20155_v57 = vld [vmem:[#allocation4 + $0x6a4] ss:$16 sps:$4 sm:$0xff]  }
 0x32d   :  { %3315 = vmatpush1.bf16.msra.mxu0 %v20108_v16  ;;  %3234 = vmatprep.subr.bf16.mxu1 %v20113_v17  ;;  %v20158_v16 = vld [vmem:[#allocation4 + $0x6ac] ss:$16 sps:$4 sm:$0xff]   ;;  %v20153_v17 = vld [vmem:[#allocation4 + $0x6a0] ss:$16 sps:$4 sm:$0xff]  }
 0x32e   :  { %3316 = vmatprep.subr.bf16.mxu0 %v20116_v47  ;;  %v20156_v47 = vld [vmem:[#allocation4 + $0x6a8] ss:$16 sps:$4 sm:$0xff]  }
 0x330   :  { %3235 = vmatpush1.bf16.msra.mxu1 %v20111_v18  ;;  %v20161_v18 = vld [vmem:[#allocation4 + $0x6c4] ss:$16 sps:$4 sm:$0xff]  }
 0x331   :  { %3317 = vmatpush1.bf16.msra.mxu0 %v20114_v20  ;;  %3236 = vmatprep.subr.bf16.mxu1 %v20119_v22  ;;  %v20164_v20 = vld [vmem:[#allocation4 + $0x6cc] ss:$16 sps:$4 sm:$0xff]   ;;  %v20159_v22 = vld [vmem:[#allocation4 + $0x6c0] ss:$16 sps:$4 sm:$0xff]  }
 0x332   :  { %3318 = vmatprep.subr.bf16.mxu0 %v20122_v25  ;;  %v20162_v25 = vld [vmem:[#allocation4 + $0x6c8] ss:$16 sps:$4 sm:$0xff]  }
 0x334   :  { %3237 = vmatpush1.bf16.msra.mxu1 %v20117_v31  ;;  %v20167_v31 = vld [vmem:[#allocation4 + $0x6e4] ss:$16 sps:$4 sm:$0xff]  }
 0x335   :  { %3319 = vmatpush1.bf16.msra.mxu0 %v20120_v32  ;;  %3931 = vmatprep.subr.bf16.mxu1 %v20125_v33  ;;  %v20170_v32 = vld [vmem:[#allocation4 + $0x6ec] ss:$16 sps:$4 sm:$0xff]   ;;  %v20165_v33 = vld [vmem:[#allocation4 + $0x6e0] ss:$16 sps:$4 sm:$0xff]  }
 0x336   :  { %4013 = vmatprep.subr.bf16.mxu0 %v20128_v40  ;;  %v20168_v40 = vld [vmem:[#allocation4 + $0x6e8] ss:$16 sps:$4 sm:$0xff]  }
 0x337   :  { %3255 = vmatmul.mubr.bf16.vlgmr.msra.gmra.mrb[32].mxu1 %v22411_v8 }
 0x338   :  { %3337 = vmatmul.mubr.bf16.vlgmr.msra.gmra.mrb[16].mxu0 %v22411_v8  ;;  %3932 = vmatpush1.bf16.msra.mxu1 %v20123_v43  ;;  %v20173_v43 = vld [vmem:[#allocation4 + $0x704] ss:$16 sps:$4 sm:$0xff]  }
 0x339   :  { %3963 = vmatprep.mubr.bf16.mxu1 %v3446_v46  ;;  %4014 = vmatpush1.bf16.msra.mxu0 %v20126_v44  ;;  %v20176_v44 = vld [vmem:[#allocation4 + $0x70c] ss:$16 sps:$4 sm:$0xff]  }
 0x33a   :  { %4045 = vmatprep.mubr.bf16.mxu0 %v3446_v46  ;;  %3933 = vmatprep.subr.bf16.mxu1 %v20131_v30  ;;  %v20171_v30 = vld [vmem:[#allocation4 + $0x700] ss:$16 sps:$4 sm:$0xff]   ;;  %v20174_v46 = vld [vmem:[#allocation4 + $0x708] ss:$16 sps:$4 sm:$0xff]  }
 0x33b   :  { %4015 = vmatprep.subr.bf16.mxu0 %v20134_v55  ;;  %v20179_v55 = vld [vmem:[#allocation4 + $0x724] ss:$16 sps:$4 sm:$0xff]  }
 0x33c   :  { %3934 = vmatpush1.bf16.msra.mxu1 %v20129_v12  ;;  %v20182_v12 = vld [vmem:[#allocation4 + $0x72c] ss:$16 sps:$4 sm:$0xff]  }
 0x33d   :  { %4016 = vmatpush1.bf16.msra.mxu0 %v20132_v51  ;;  %3935 = vmatprep.subr.bf16.mxu1 %v20137_v59  ;;  %v20177_v51 = vld [vmem:[#allocation4 + $0x720] ss:$16 sps:$4 sm:$0xff]   ;;  %v20180_v59 = vld [vmem:[#allocation4 + $0x728] ss:$16 sps:$4 sm:$0xff]  }
 0x33e   :  { %4017 = vmatprep.subr.bf16.mxu0 %v20140_v1  ;;  %v20185_v1 = vld [vmem:[#allocation4 + $0x744] ss:$16 sps:$4 sm:$0xff]  }
 0x340   :  { %3936 = vmatpush1.bf16.msra.mxu1 %v20135_v2  ;;  %v20188_v2 = vld [vmem:[#allocation4 + $0x74c] ss:$16 sps:$4 sm:$0xff]  }
 0x341   :  { %4018 = vmatpush1.bf16.msra.mxu0 %v20138_v52  ;;  %3937 = vmatprep.subr.bf16.mxu1 %v20143_v6  ;;  %v20183_v52 = vld [vmem:[#allocation4 + $0x740] ss:$16 sps:$4 sm:$0xff]   ;;  %v20186_v6 = vld [vmem:[#allocation4 + $0x748] ss:$16 sps:$4 sm:$0xff]  }
 0x342   :  { %4019 = vmatprep.subr.bf16.mxu0 %v20146_v62  ;;  %v20191_v62 = vld [vmem:[#allocation4 + $0x764] ss:$16 sps:$4 sm:$0xff]  }
 0x344   :  { %3938 = vmatpush1.bf16.msra.mxu1 %v20141_v54  ;;  %v20194_v54 = vld [vmem:[#allocation4 + $0x76c] ss:$16 sps:$4 sm:$0xff]  }
 0x345   :  { %4020 = vmatpush1.bf16.msra.mxu0 %v20144_v27  ;;  %3939 = vmatprep.subr.bf16.mxu1 %v20149_v24  ;;  %v20189_v27 = vld [vmem:[#allocation4 + $0x760] ss:$16 sps:$4 sm:$0xff]   ;;  %v20192_v24 = vld [vmem:[#allocation4 + $0x768] ss:$16 sps:$4 sm:$0xff]  }
 0x346   :  { %4021 = vmatprep.subr.bf16.mxu0 %v20152_v13  ;;  %v20197_v13 = vld [vmem:[#allocation4 + $0x784] ss:$16 sps:$4 sm:$0xff]  }
 0x348   :  { %3940 = vmatpush1.bf16.msra.mxu1 %v20147_v45  ;;  %v20200_v45 = vld [vmem:[#allocation4 + $0x78c] ss:$16 sps:$4 sm:$0xff]  }
 0x349   :  { %4022 = vmatpush1.bf16.msra.mxu0 %v20150_v42  ;;  %3941 = vmatprep.subr.bf16.mxu1 %v20155_v57  ;;  %v20195_v42 = vld [vmem:[#allocation4 + $0x780] ss:$16 sps:$4 sm:$0xff]   ;;  %v20198_v57 = vld [vmem:[#allocation4 + $0x788] ss:$16 sps:$4 sm:$0xff]  }
 0x34a   :  { %4023 = vmatprep.subr.bf16.mxu0 %v20158_v16  ;;  %v20203_v16 = vld [vmem:[#allocation4 + $0x7a4] ss:$16 sps:$4 sm:$0xff]  }
 0x34c   :  { %3942 = vmatpush1.bf16.msra.mxu1 %v20153_v17  ;;  %v20206_v17 = vld [vmem:[#allocation4 + $0x7ac] ss:$16 sps:$4 sm:$0xff]  }
 0x34d   :  { %4024 = vmatpush1.bf16.msra.mxu0 %v20156_v47  ;;  %3943 = vmatprep.subr.bf16.mxu1 %v20161_v18  ;;  %v20201_v47 = vld [vmem:[#allocation4 + $0x7a0] ss:$16 sps:$4 sm:$0xff]   ;;  %v20204_v18 = vld [vmem:[#allocation4 + $0x7a8] ss:$16 sps:$4 sm:$0xff]  }
 0x34e   :  { %4025 = vmatprep.subr.bf16.mxu0 %v20164_v20  ;;  %v20209_v20 = vld [vmem:[#allocation4 + $0x7c4] ss:$16 sps:$4 sm:$0xff]  }
 0x350   :  { %3944 = vmatpush1.bf16.msra.mxu1 %v20159_v22  ;;  %v20212_v22 = vld [vmem:[#allocation4 + $0x7cc] ss:$16 sps:$4 sm:$0xff]  }
 0x351   :  { %4026 = vmatpush1.bf16.msra.mxu0 %v20162_v25  ;;  %3945 = vmatprep.subr.bf16.mxu1 %v20167_v31  ;;  %v20207_v25 = vld [vmem:[#allocation4 + $0x7c0] ss:$16 sps:$4 sm:$0xff]   ;;  %v20210_v31 = vld [vmem:[#allocation4 + $0x7c8] ss:$16 sps:$4 sm:$0xff]  }
 0x352   :  { %4027 = vmatprep.subr.bf16.mxu0 %v20170_v32  ;;  %v20215_v32 = vld [vmem:[#allocation4 + $0x7e4] ss:$16 sps:$4 sm:$0xff]  }
 0x354   :  { %3946 = vmatpush1.bf16.msra.mxu1 %v20165_v33  ;;  %v20218_v33 = vld [vmem:[#allocation4 + $0x7ec] ss:$16 sps:$4 sm:$0xff]  }
 0x355   :  { %4028 = vmatpush1.bf16.msra.mxu0 %v20168_v40  ;;  %3947 = vmatprep.subr.bf16.mxu1 %v20173_v43  ;;  %v20213_v40 = vld [vmem:[#allocation4 + $0x7e0] ss:$16 sps:$4 sm:$0xff]   ;;  %v20216_v43 = vld [vmem:[#allocation4 + $0x7e8] ss:$16 sps:$4 sm:$0xff]  }
 0x356   :  { %4029 = vmatprep.subr.bf16.mxu0 %v20176_v44  ;;  %v20221_v44 = vld [vmem:[#allocation4 + $0x804] ss:$16 sps:$4 sm:$0xff]  }
 0x358   :  { %3948 = vmatpush1.bf16.msra.mxu1 %v20171_v30  ;;  %v20224_v30 = vld [vmem:[#allocation4 + $0x80c] ss:$16 sps:$4 sm:$0xff]  }
 0x359   :  { %4030 = vmatpush1.bf16.msra.mxu0 %v20174_v46  ;;  %3949 = vmatprep.subr.bf16.mxu1 %v20179_v55  ;;  %v20219_v46 = vld [vmem:[#allocation4 + $0x800] ss:$16 sps:$4 sm:$0xff]   ;;  %v3445_v55 = vrot.slane %v22403_v29, 1 }
 0x35a   :  { %4031 = vmatprep.subr.bf16.mxu0 %v20182_v12  ;;  %v20222_v12 = vld [vmem:[#allocation4 + $0x808] ss:$16 sps:$4 sm:$0xff]  }
 0x35c   :  { %3950 = vmatpush1.bf16.msra.mxu1 %v20177_v51  ;;  %v20227_v51 = vld [vmem:[#allocation4 + $0x824] ss:$16 sps:$4 sm:$0xff]  }
 0x35d   :  { %4032 = vmatpush1.bf16.msra.mxu0 %v20180_v59  ;;  %3951 = vmatprep.subr.bf16.mxu1 %v20185_v1  ;;  %v20230_v59 = vld [vmem:[#allocation4 + $0x82c] ss:$16 sps:$4 sm:$0xff]   ;;  %v20225_v1 = vld [vmem:[#allocation4 + $0x820] ss:$16 sps:$4 sm:$0xff]  }
 0x35e   :  { %4033 = vmatprep.subr.bf16.mxu0 %v20188_v2  ;;  %v20228_v2 = vld [vmem:[#allocation4 + $0x828] ss:$16 sps:$4 sm:$0xff]  }
 0x360   :  { %3952 = vmatpush1.bf16.msra.mxu1 %v20183_v52  ;;  %v20233_v52 = vld [vmem:[#allocation4 + $0x844] ss:$16 sps:$4 sm:$0xff]  }
 0x361   :  { %4034 = vmatpush1.bf16.msra.mxu0 %v20186_v6  ;;  %3953 = vmatprep.subr.bf16.mxu1 %v20191_v62  ;;  %v20236_v6 = vld [vmem:[#allocation4 + $0x84c] ss:$16 sps:$4 sm:$0xff]   ;;  %v20231_v62 = vld [vmem:[#allocation4 + $0x840] ss:$16 sps:$4 sm:$0xff]  }
 0x362   :  { %4035 = vmatprep.subr.bf16.mxu0 %v20194_v54  ;;  %v20234_v54 = vld [vmem:[#allocation4 + $0x848] ss:$16 sps:$4 sm:$0xff]  }
 0x364   :  { %3954 = vmatpush1.bf16.msra.mxu1 %v20189_v27  ;;  %v20239_v27 = vld [vmem:[#allocation4 + $0x864] ss:$16 sps:$4 sm:$0xff]  }
 0x365   :  { %4036 = vmatpush1.bf16.msra.mxu0 %v20192_v24  ;;  %3955 = vmatprep.subr.bf16.mxu1 %v20197_v13  ;;  %v20242_v24 = vld [vmem:[#allocation4 + $0x86c] ss:$16 sps:$4 sm:$0xff]   ;;  %v20237_v13 = vld [vmem:[#allocation4 + $0x860] ss:$16 sps:$4 sm:$0xff]  }
 0x366   :  { %4037 = vmatprep.subr.bf16.mxu0 %v20200_v45  ;;  %v20240_v45 = vld [vmem:[#allocation4 + $0x868] ss:$16 sps:$4 sm:$0xff]  }
 0x368   :  { %3956 = vmatpush1.bf16.msra.mxu1 %v20195_v42  ;;  %v20245_v42 = vld [vmem:[#allocation4 + $0x884] ss:$16 sps:$4 sm:$0xff]  }
 0x369   :  { %4038 = vmatpush1.bf16.msra.mxu0 %v20198_v57  ;;  %3957 = vmatprep.subr.bf16.mxu1 %v20203_v16  ;;  %v20248_v57 = vld [vmem:[#allocation4 + $0x88c] ss:$16 sps:$4 sm:$0xff]   ;;  %v20243_v16 = vld [vmem:[#allocation4 + $0x880] ss:$16 sps:$4 sm:$0xff]  }
 0x36a   :  { %4039 = vmatprep.subr.bf16.mxu0 %v20206_v17  ;;  %v20246_v17 = vld [vmem:[#allocation4 + $0x888] ss:$16 sps:$4 sm:$0xff]  }
 0x36c   :  { %3958 = vmatpush1.bf16.msra.mxu1 %v20201_v47  ;;  %v20251_v47 = vld [vmem:[#allocation4 + $0x8a4] ss:$16 sps:$4 sm:$0xff]  }
 0x36d   :  { %4040 = vmatpush1.bf16.msra.mxu0 %v20204_v18  ;;  %3959 = vmatprep.subr.bf16.mxu1 %v20209_v20  ;;  %v20254_v18 = vld [vmem:[#allocation4 + $0x8ac] ss:$16 sps:$4 sm:$0xff]   ;;  %v20249_v20 = vld [vmem:[#allocation4 + $0x8a0] ss:$16 sps:$4 sm:$0xff]  }
 0x36e   :  { %4041 = vmatprep.subr.bf16.mxu0 %v20212_v22  ;;  %v20252_v22 = vld [vmem:[#allocation4 + $0x8a8] ss:$16 sps:$4 sm:$0xff]  }
 0x370   :  { %3960 = vmatpush1.bf16.msra.mxu1 %v20207_v25  ;;  %v20257_v25 = vld [vmem:[#allocation4 + $0x8c4] ss:$16 sps:$4 sm:$0xff]  }
 0x371   :  { %4042 = vmatpush1.bf16.msra.mxu0 %v20210_v31  ;;  %3961 = vmatprep.subr.bf16.mxu1 %v20215_v32  ;;  %v20260_v31 = vld [vmem:[#allocation4 + $0x8cc] ss:$16 sps:$4 sm:$0xff]   ;;  %v20255_v32 = vld [vmem:[#allocation4 + $0x8c0] ss:$16 sps:$4 sm:$0xff]  }
 0x372   :  { %4043 = vmatprep.subr.bf16.mxu0 %v20218_v33  ;;  %v20258_v33 = vld [vmem:[#allocation4 + $0x8c8] ss:$16 sps:$4 sm:$0xff]  }
 0x374   :  { %3962 = vmatpush1.bf16.msra.mxu1 %v20213_v40  ;;  %v20263_v40 = vld [vmem:[#allocation4 + $0x8e4] ss:$16 sps:$4 sm:$0xff]  }
 0x375   :  { %4044 = vmatpush1.bf16.msra.mxu0 %v20216_v43  ;;  %3972 = vmatprep.subr.bf16.mxu1 %v20221_v44  ;;  %v20266_v43 = vld [vmem:[#allocation4 + $0x8ec] ss:$16 sps:$4 sm:$0xff]   ;;  %v20261_v44 = vld [vmem:[#allocation4 + $0x8e0] ss:$16 sps:$4 sm:$0xff]  }
 0x376   :  { %4054 = vmatprep.subr.bf16.mxu0 %v20224_v30  ;;  %v20264_v30 = vld [vmem:[#allocation4 + $0x8e8] ss:$16 sps:$4 sm:$0xff]  }
 0x377   :  { %3964 = vmatmul.mubr.bf16.vlgmr.msra.gmra.mrb[32].mxu1 %v3445_v55 }
 0x378   :  { %4046 = vmatmul.mubr.bf16.vlgmr.msra.gmra.mrb[16].mxu0 %v3445_v55  ;;  %3973 = vmatpush1.bf16.msra.mxu1 %v20219_v46  ;;  %v20269_v46 = vld [vmem:[#allocation4 + $0x904] ss:$16 sps:$4 sm:$0xff]   ;;  %v20272_v55 = vld [vmem:[#allocation4 + $0x90c] ss:$16 sps:$4 sm:$0xff]  }
 0x379   :  { %4055 = vmatpush1.bf16.msra.mxu0 %v20222_v12  ;;  %3974 = vmatprep.subr.bf16.mxu1 %v20227_v51  ;;  %v20267_v12 = vld [vmem:[#allocation4 + $0x900] ss:$16 sps:$4 sm:$0xff]   ;;  %v3447_v51 = vrot.slane %v22411_v8, 1 }
 0x37a   :  { %4056 = vmatprep.subr.bf16.mxu0 %v20230_v59  ;;  %4004 = vmatprep.mubr.bf16.mxu1 %v21960_v0  ;;  %v20270_v59 = vld [vmem:[#allocation4 + $0x908] ss:$16 sps:$4 sm:$0xff]  }
 0x37b   :  { %4086 = vmatprep.mubr.bf16.mxu0 %v21960_v0 }
 0x37c   :  { %3975 = vmatpush1.bf16.msra.mxu1 %v20225_v1  ;;  %v20275_v1 = vld [vmem:[#allocation4 + $0x924] ss:$16 sps:$4 sm:$0xff]  }
 0x37d   :  { %4057 = vmatpush1.bf16.msra.mxu0 %v20228_v2  ;;  %3976 = vmatprep.subr.bf16.mxu1 %v20233_v52  ;;  %v20278_v2 = vld [vmem:[#allocation4 + $0x92c] ss:$16 sps:$4 sm:$0xff]   ;;  %v20273_v52 = vld [vmem:[#allocation4 + $0x920] ss:$16 sps:$4 sm:$0xff]  }
 0x37e   :  { %4058 = vmatprep.subr.bf16.mxu0 %v20236_v6  ;;  %v20276_v6 = vld [vmem:[#allocation4 + $0x928] ss:$16 sps:$4 sm:$0xff]  }
 0x380   :  { %3977 = vmatpush1.bf16.msra.mxu1 %v20231_v62  ;;  %v20281_v62 = vld [vmem:[#allocation4 + $0x944] ss:$16 sps:$4 sm:$0xff]  }
 0x381   :  { %4059 = vmatpush1.bf16.msra.mxu0 %v20234_v54  ;;  %3978 = vmatprep.subr.bf16.mxu1 %v20239_v27  ;;  %v20284_v54 = vld [vmem:[#allocation4 + $0x94c] ss:$16 sps:$4 sm:$0xff]   ;;  %v20279_v27 = vld [vmem:[#allocation4 + $0x940] ss:$16 sps:$4 sm:$0xff]  }
 0x382   :  { %4060 = vmatprep.subr.bf16.mxu0 %v20242_v24  ;;  %v20282_v24 = vld [vmem:[#allocation4 + $0x948] ss:$16 sps:$4 sm:$0xff]  }
 0x384   :  { %3979 = vmatpush1.bf16.msra.mxu1 %v20237_v13  ;;  %v20287_v13 = vld [vmem:[#allocation4 + $0x964] ss:$16 sps:$4 sm:$0xff]  }
 0x385   :  { %4061 = vmatpush1.bf16.msra.mxu0 %v20240_v45  ;;  %3980 = vmatprep.subr.bf16.mxu1 %v20245_v42  ;;  %v20290_v45 = vld [vmem:[#allocation4 + $0x96c] ss:$16 sps:$4 sm:$0xff]   ;;  %v20285_v42 = vld [vmem:[#allocation4 + $0x960] ss:$16 sps:$4 sm:$0xff]  }
 0x386   :  { %4062 = vmatprep.subr.bf16.mxu0 %v20248_v57  ;;  %v20288_v57 = vld [vmem:[#allocation4 + $0x968] ss:$16 sps:$4 sm:$0xff]  }
 0x388   :  { %3981 = vmatpush1.bf16.msra.mxu1 %v20243_v16  ;;  %v20293_v16 = vld [vmem:[#allocation4 + $0x984] ss:$16 sps:$4 sm:$0xff]  }
 0x389   :  { %4063 = vmatpush1.bf16.msra.mxu0 %v20246_v17  ;;  %3982 = vmatprep.subr.bf16.mxu1 %v20251_v47  ;;  %v20296_v17 = vld [vmem:[#allocation4 + $0x98c] ss:$16 sps:$4 sm:$0xff]   ;;  %v20294_v47 = vld [vmem:[#allocation4 + $0x988] ss:$16 sps:$4 sm:$0xff]  }
 0x38a   :  { %4064 = vmatprep.subr.bf16.mxu0 %v20254_v18  ;;  %v20299_v18 = vld [vmem:[#allocation4 + $0x9a4] ss:$16 sps:$4 sm:$0xff]  }
 0x38c   :  { %3983 = vmatpush1.bf16.msra.mxu1 %v20249_v20  ;;  %v20302_v20 = vld [vmem:[#allocation4 + $0x9ac] ss:$16 sps:$4 sm:$0xff]  }
 0x38d   :  { %4065 = vmatpush1.bf16.msra.mxu0 %v20252_v22  ;;  %3984 = vmatprep.subr.bf16.mxu1 %v20257_v25  ;;  %v20297_v22 = vld [vmem:[#allocation4 + $0x9a0] ss:$16 sps:$4 sm:$0xff]   ;;  %v20300_v25 = vld [vmem:[#allocation4 + $0x9a8] ss:$16 sps:$4 sm:$0xff]  }
 0x38e   :  { %4066 = vmatprep.subr.bf16.mxu0 %v20260_v31  ;;  %v20305_v31 = vld [vmem:[#allocation4 + $0x9c4] ss:$16 sps:$4 sm:$0xff]  }
 0x390   :  { %3985 = vmatpush1.bf16.msra.mxu1 %v20255_v32  ;;  %v20308_v32 = vld [vmem:[#allocation4 + $0x9cc] ss:$16 sps:$4 sm:$0xff]  }
 0x391   :  { %4067 = vmatpush1.bf16.msra.mxu0 %v20258_v33  ;;  %3986 = vmatprep.subr.bf16.mxu1 %v20263_v40  ;;  %v20303_v33 = vld [vmem:[#allocation4 + $0x9c0] ss:$16 sps:$4 sm:$0xff]   ;;  %v20306_v40 = vld [vmem:[#allocation4 + $0x9c8] ss:$16 sps:$4 sm:$0xff]  }
 0x392   :  { %4068 = vmatprep.subr.bf16.mxu0 %v20266_v43  ;;  %v20311_v43 = vld [vmem:[#allocation4 + $0x9e4] ss:$16 sps:$4 sm:$0xff]  }
 0x394   :  { %3987 = vmatpush1.bf16.msra.mxu1 %v20261_v44  ;;  %v20314_v44 = vld [vmem:[#allocation4 + $0x9ec] ss:$16 sps:$4 sm:$0xff]  }
 0x395   :  { %4069 = vmatpush1.bf16.msra.mxu0 %v20264_v30  ;;  %4688 = vmatprep.subr.bf16.mxu1 %v20269_v46  ;;  %v20309_v30 = vld [vmem:[#allocation4 + $0x9e0] ss:$16 sps:$4 sm:$0xff]   ;;  %v20312_v46 = vld [vmem:[#allocation4 + $0x9e8] ss:$16 sps:$4 sm:$0xff]  }
 0x396   :  { %4770 = vmatprep.subr.bf16.mxu0 %v20272_v55  ;;  %v20317_v55 = vld [vmem:[#allocation4 + $0xa04] ss:$16 sps:$4 sm:$0xff]  }
 0x397   :  { %4005 = vmatmul.mubr.bf16.vlgmr.msra.gmra.mrb[32].mxu1 %v3447_v51 }
 0x398   :  { %4087 = vmatmul.mubr.bf16.vlgmr.msra.gmra.mrb[16].mxu0 %v3447_v51  ;;  %4689 = vmatpush1.bf16.msra.mxu1 %v20267_v12  ;;  %v20320_v12 = vld [vmem:[#allocation4 + $0xa0c] ss:$16 sps:$4 sm:$0xff]   ;;  %v20315_v51 = vld [vmem:[#allocation4 + $0xa00] ss:$16 sps:$4 sm:$0xff]  }
 0x399   :  { %4720 = vmatprep.mubr.bf16.mxu1 %v22421_v26  ;;  %4771 = vmatpush1.bf16.msra.mxu0 %v20270_v59  ;;  %v20318_v59 = vld [vmem:[#allocation4 + $0xa08] ss:$16 sps:$4 sm:$0xff]  }
 0x39a   :  { %4802 = vmatprep.mubr.bf16.mxu0 %v22421_v26  ;;  %4690 = vmatprep.subr.bf16.mxu1 %v20275_v1  ;;  %v20291_v26 = vld [vmem:[#allocation4 + $0x980] ss:$16 sps:$4 sm:$0xff]   ;;  %v20323_v1 = vld [vmem:[#allocation4 + $0xa24] ss:$16 sps:$4 sm:$0xff]  }
 0x39b   :  { %4772 = vmatprep.subr.bf16.mxu0 %v20278_v2  ;;  %v20326_v2 = vld [vmem:[#allocation4 + $0xa2c] ss:$16 sps:$4 sm:$0xff]  }
 0x39c   :  { %4691 = vmatpush1.bf16.msra.mxu1 %v20273_v52  ;;  %v20321_v52 = vld [vmem:[#allocation4 + $0xa20] ss:$16 sps:$4 sm:$0xff]  }
 0x39d   :  { %4773 = vmatpush1.bf16.msra.mxu0 %v20276_v6  ;;  %4692 = vmatprep.subr.bf16.mxu1 %v20281_v62  ;;  %v20324_v6 = vld [vmem:[#allocation4 + $0xa28] ss:$16 sps:$4 sm:$0xff]   ;;  %v20329_v62 = vld [vmem:[#allocation4 + $0xa44] ss:$16 sps:$4 sm:$0xff]  }
 0x39e   :  { %4774 = vmatprep.subr.bf16.mxu0 %v20284_v54  ;;  %v20332_v54 = vld [vmem:[#allocation4 + $0xa4c] ss:$16 sps:$4 sm:$0xff]  }
 0x3a0   :  { %4693 = vmatpush1.bf16.msra.mxu1 %v20279_v27  ;;  %v20327_v27 = vld [vmem:[#allocation4 + $0xa40] ss:$16 sps:$4 sm:$0xff]  }
 0x3a1   :  { %4775 = vmatpush1.bf16.msra.mxu0 %v20282_v24  ;;  %4694 = vmatprep.subr.bf16.mxu1 %v20287_v13  ;;  %v20330_v24 = vld [vmem:[#allocation4 + $0xa48] ss:$16 sps:$4 sm:$0xff]   ;;  %v20335_v13 = vld [vmem:[#allocation4 + $0xa64] ss:$16 sps:$4 sm:$0xff]  }
 0x3a2   :  { %4776 = vmatprep.subr.bf16.mxu0 %v20290_v45  ;;  %v20338_v45 = vld [vmem:[#allocation4 + $0xa6c] ss:$16 sps:$4 sm:$0xff]  }
 0x3a4   :  { %4695 = vmatpush1.bf16.msra.mxu1 %v20285_v42  ;;  %v20333_v42 = vld [vmem:[#allocation4 + $0xa60] ss:$16 sps:$4 sm:$0xff]  }
 0x3a5   :  { %4777 = vmatpush1.bf16.msra.mxu0 %v20288_v57  ;;  %4696 = vmatprep.subr.bf16.mxu1 %v20293_v16  ;;  %v20336_v57 = vld [vmem:[#allocation4 + $0xa68] ss:$16 sps:$4 sm:$0xff]   ;;  %v20341_v16 = vld [vmem:[#allocation4 + $0xa84] ss:$16 sps:$4 sm:$0xff]  }
 0x3a6   :  { %4778 = vmatprep.subr.bf16.mxu0 %v20296_v17  ;;  %v20344_v17 = vld [vmem:[#allocation4 + $0xa8c] ss:$16 sps:$4 sm:$0xff]  }
 0x3a8   :  { %4697 = vmatpush1.bf16.msra.mxu1 %v20291_v26  ;;  %v20339_v26 = vld [vmem:[#allocation4 + $0xa80] ss:$16 sps:$4 sm:$0xff]  }
 0x3a9   :  { %4779 = vmatpush1.bf16.msra.mxu0 %v20294_v47  ;;  %4698 = vmatprep.subr.bf16.mxu1 %v20299_v18  ;;  %v20342_v47 = vld [vmem:[#allocation4 + $0xa88] ss:$16 sps:$4 sm:$0xff]   ;;  %v20347_v18 = vld [vmem:[#allocation4 + $0xaa4] ss:$16 sps:$4 sm:$0xff]  }
 0x3aa   :  { %4780 = vmatprep.subr.bf16.mxu0 %v20302_v20  ;;  %v20350_v20 = vld [vmem:[#allocation4 + $0xaac] ss:$16 sps:$4 sm:$0xff]  }
 0x3ac   :  { %4699 = vmatpush1.bf16.msra.mxu1 %v20297_v22  ;;  %v20345_v22 = vld [vmem:[#allocation4 + $0xaa0] ss:$16 sps:$4 sm:$0xff]  }
 0x3ad   :  { %4781 = vmatpush1.bf16.msra.mxu0 %v20300_v25  ;;  %4700 = vmatprep.subr.bf16.mxu1 %v20305_v31  ;;  %v20348_v25 = vld [vmem:[#allocation4 + $0xaa8] ss:$16 sps:$4 sm:$0xff]   ;;  %v20353_v31 = vld [vmem:[#allocation4 + $0xac4] ss:$16 sps:$4 sm:$0xff]  }
 0x3ae   :  { %4782 = vmatprep.subr.bf16.mxu0 %v20308_v32  ;;  %v20356_v32 = vld [vmem:[#allocation4 + $0xacc] ss:$16 sps:$4 sm:$0xff]  }
 0x3b0   :  { %4701 = vmatpush1.bf16.msra.mxu1 %v20303_v33  ;;  %v20351_v33 = vld [vmem:[#allocation4 + $0xac0] ss:$16 sps:$4 sm:$0xff]  }
 0x3b1   :  { %4783 = vmatpush1.bf16.msra.mxu0 %v20306_v40  ;;  %4702 = vmatprep.subr.bf16.mxu1 %v20311_v43  ;;  %v20354_v40 = vld [vmem:[#allocation4 + $0xac8] ss:$16 sps:$4 sm:$0xff]   ;;  %v20359_v43 = vld [vmem:[#allocation4 + $0xae4] ss:$16 sps:$4 sm:$0xff]  }
 0x3b2   :  { %4784 = vmatprep.subr.bf16.mxu0 %v20314_v44  ;;  %v20362_v44 = vld [vmem:[#allocation4 + $0xaec] ss:$16 sps:$4 sm:$0xff]  }
 0x3b4   :  { %4703 = vmatpush1.bf16.msra.mxu1 %v20309_v30  ;;  %v20357_v30 = vld [vmem:[#allocation4 + $0xae0] ss:$16 sps:$4 sm:$0xff]  }
 0x3b5   :  { %4785 = vmatpush1.bf16.msra.mxu0 %v20312_v46  ;;  %4704 = vmatprep.subr.bf16.mxu1 %v20317_v55  ;;  %v20360_v46 = vld [vmem:[#allocation4 + $0xae8] ss:$16 sps:$4 sm:$0xff]   ;;  %v20365_v55 = vld [vmem:[#allocation4 + $0xb04] ss:$16 sps:$4 sm:$0xff]  }
 0x3b6   :  { %4786 = vmatprep.subr.bf16.mxu0 %v20320_v12  ;;  %v20368_v12 = vld [vmem:[#allocation4 + $0xb0c] ss:$16 sps:$4 sm:$0xff]  }
 0x3b8   :  { %4705 = vmatpush1.bf16.msra.mxu1 %v20315_v51  ;;  %v20363_v51 = vld [vmem:[#allocation4 + $0xb00] ss:$16 sps:$4 sm:$0xff]  }
 0x3b9   :  { %4787 = vmatpush1.bf16.msra.mxu0 %v20318_v59  ;;  %4706 = vmatprep.subr.bf16.mxu1 %v20323_v1  ;;  %v20366_v59 = vld [vmem:[#allocation4 + $0xb08] ss:$16 sps:$4 sm:$0xff]   ;;  %v20371_v1 = vld [vmem:[#allocation4 + $0xb24] ss:$16 sps:$4 sm:$0xff]  }
 0x3ba   :  { %4788 = vmatprep.subr.bf16.mxu0 %v20326_v2  ;;  %v20374_v2 = vld [vmem:[#allocation4 + $0xb2c] ss:$16 sps:$4 sm:$0xff]  }
 0x3bc   :  { %4707 = vmatpush1.bf16.msra.mxu1 %v20321_v52  ;;  %v20369_v52 = vld [vmem:[#allocation4 + $0xb20] ss:$16 sps:$4 sm:$0xff]  }
 0x3bd   :  { %4789 = vmatpush1.bf16.msra.mxu0 %v20324_v6  ;;  %4708 = vmatprep.subr.bf16.mxu1 %v20329_v62  ;;  %v20372_v6 = vld [vmem:[#allocation4 + $0xb28] ss:$16 sps:$4 sm:$0xff]   ;;  %v20377_v62 = vld [vmem:[#allocation4 + $0xb44] ss:$16 sps:$4 sm:$0xff]  }
 0x3be   :  { %4790 = vmatprep.subr.bf16.mxu0 %v20332_v54  ;;  %v20380_v54 = vld [vmem:[#allocation4 + $0xb4c] ss:$16 sps:$4 sm:$0xff]  }
 0x3c0   :  { %4709 = vmatpush1.bf16.msra.mxu1 %v20327_v27  ;;  %v20375_v27 = vld [vmem:[#allocation4 + $0xb40] ss:$16 sps:$4 sm:$0xff]  }
 0x3c1   :  { %4791 = vmatpush1.bf16.msra.mxu0 %v20330_v24  ;;  %4710 = vmatprep.subr.bf16.mxu1 %v20335_v13  ;;  %v20378_v24 = vld [vmem:[#allocation4 + $0xb48] ss:$16 sps:$4 sm:$0xff]   ;;  %v20383_v13 = vld [vmem:[#allocation4 + $0xb64] ss:$16 sps:$4 sm:$0xff]  }
 0x3c2   :  { %4792 = vmatprep.subr.bf16.mxu0 %v20338_v45  ;;  %v20381_v45 = vld [vmem:[#allocation4 + $0xb60] ss:$16 sps:$4 sm:$0xff]  }
 0x3c4   :  { %4711 = vmatpush1.bf16.msra.mxu1 %v20333_v42  ;;  %v20384_v42 = vld [vmem:[#allocation4 + $0xb68] ss:$16 sps:$4 sm:$0xff]  }
 0x3c5   :  { %4793 = vmatpush1.bf16.msra.mxu0 %v20336_v57  ;;  %4712 = vmatprep.subr.bf16.mxu1 %v20341_v16  ;;  %v20389_v57 = vld [vmem:[#allocation4 + $0xb84] ss:$16 sps:$4 sm:$0xff]   ;;  %v20392_v16 = vld [vmem:[#allocation4 + $0xb8c] ss:$16 sps:$4 sm:$0xff]  }
 0x3c6   :  { %4794 = vmatprep.subr.bf16.mxu0 %v20344_v17  ;;  %v20387_v17 = vld [vmem:[#allocation4 + $0xb80] ss:$16 sps:$4 sm:$0xff]  }
 0x3c8   :  { %4713 = vmatpush1.bf16.msra.mxu1 %v20339_v26  ;;  %v20390_v26 = vld [vmem:[#allocation4 + $0xb88] ss:$16 sps:$4 sm:$0xff]  }
 0x3c9   :  { %4795 = vmatpush1.bf16.msra.mxu0 %v20342_v47  ;;  %4714 = vmatprep.subr.bf16.mxu1 %v20347_v18  ;;  %v20395_v47 = vld [vmem:[#allocation4 + $0xba4] ss:$16 sps:$4 sm:$0xff]   ;;  %v20398_v18 = vld [vmem:[#allocation4 + $0xbac] ss:$16 sps:$4 sm:$0xff]  }
 0x3ca   :  { %4796 = vmatprep.subr.bf16.mxu0 %v20350_v20  ;;  %v20393_v20 = vld [vmem:[#allocation4 + $0xba0] ss:$16 sps:$4 sm:$0xff]  }
 0x3cc   :  { %4715 = vmatpush1.bf16.msra.mxu1 %v20345_v22  ;;  %v20396_v22 = vld [vmem:[#allocation4 + $0xba8] ss:$16 sps:$4 sm:$0xff]  }
 0x3cd   :  { %4797 = vmatpush1.bf16.msra.mxu0 %v20348_v25  ;;  %4716 = vmatprep.subr.bf16.mxu1 %v20353_v31  ;;  %v20401_v25 = vld [vmem:[#allocation4 + $0xbc4] ss:$16 sps:$4 sm:$0xff]   ;;  %v20404_v31 = vld [vmem:[#allocation4 + $0xbcc] ss:$16 sps:$4 sm:$0xff]  }
 0x3ce   :  { %4798 = vmatprep.subr.bf16.mxu0 %v20356_v32  ;;  %v20399_v32 = vld [vmem:[#allocation4 + $0xbc0] ss:$16 sps:$4 sm:$0xff]  }
 0x3d0   :  { %4717 = vmatpush1.bf16.msra.mxu1 %v20351_v33  ;;  %v20402_v33 = vld [vmem:[#allocation4 + $0xbc8] ss:$16 sps:$4 sm:$0xff]  }
 0x3d1   :  { %4799 = vmatpush1.bf16.msra.mxu0 %v20354_v40  ;;  %4718 = vmatprep.subr.bf16.mxu1 %v20359_v43  ;;  %v20407_v40 = vld [vmem:[#allocation4 + $0xbe4] ss:$16 sps:$4 sm:$0xff]   ;;  %v20410_v43 = vld [vmem:[#allocation4 + $0xbec] ss:$16 sps:$4 sm:$0xff]  }
 0x3d2   :  { %4800 = vmatprep.subr.bf16.mxu0 %v20362_v44  ;;  %v20405_v44 = vld [vmem:[#allocation4 + $0xbe0] ss:$16 sps:$4 sm:$0xff]  }
 0x3d4   :  { %4719 = vmatpush1.bf16.msra.mxu1 %v20357_v30  ;;  %v20408_v30 = vld [vmem:[#allocation4 + $0xbe8] ss:$16 sps:$4 sm:$0xff]  }
 0x3d5   :  { %4801 = vmatpush1.bf16.msra.mxu0 %v20360_v46  ;;  %4729 = vmatprep.subr.bf16.mxu1 %v20365_v55  ;;  %v20413_v46 = vld [vmem:[#allocation4 + $0xc04] ss:$16 sps:$4 sm:$0xff]   ;;  %v20416_v55 = vld [vmem:[#allocation4 + $0xc0c] ss:$16 sps:$4 sm:$0xff]  }
 0x3d6   :  { %4811 = vmatprep.subr.bf16.mxu0 %v20368_v12  ;;  %v20411_v12 = vld [vmem:[#allocation4 + $0xc00] ss:$16 sps:$4 sm:$0xff]  }
 0x3d7   :  { %4721 = vmatmul.mubr.bf16.vlgmr.msra.gmra.mrb[32].mxu1 %v22409_v9 }
 0x3d8   :  { %4803 = vmatmul.mubr.bf16.vlgmr.msra.gmra.mrb[16].mxu0 %v22409_v9  ;;  %4730 = vmatpush1.bf16.msra.mxu1 %v20363_v51  ;;  %v20386_v9 = vld [vmem:[#allocation4 + $0xb6c] ss:$16 sps:$4 sm:$0xff]   ;;  %v20414_v51 = vld [vmem:[#allocation4 + $0xc08] ss:$16 sps:$4 sm:$0xff]  }
 0x3d9   :  { %4812 = vmatpush1.bf16.msra.mxu0 %v20366_v59  ;;  %4731 = vmatprep.subr.bf16.mxu1 %v20371_v1  ;;  %v20419_v59 = vld [vmem:[#allocation4 + $0xc24] ss:$16 sps:$4 sm:$0xff]   ;;  %v4954_v1 = vrot.slane %v22407_v60, 2  ;;  %v20434_v60 = vld [vmem:[#allocation4 + $0xc6c] ss:$16 sps:$4 sm:$0xff]  }
 0x3da   :  { %4813 = vmatprep.subr.bf16.mxu0 %v20374_v2  ;;  %4761 = vmatprep.mubr.bf16.mxu1 %v21960_v0  ;;  %v20422_v2 = vld [vmem:[#allocation4 + $0xc2c] ss:$16 sps:$4 sm:$0xff]  }
 0x3db   :  { %4843 = vmatprep.mubr.bf16.mxu0 %v21960_v0 }
 0x3dc   :  { %4732 = vmatpush1.bf16.msra.mxu1 %v20369_v52  ;;  %v20417_v52 = vld [vmem:[#allocation4 + $0xc20] ss:$16 sps:$4 sm:$0xff]  }
 0x3dd   :  { %4814 = vmatpush1.bf16.msra.mxu0 %v20372_v6  ;;  %4733 = vmatprep.subr.bf16.mxu1 %v20377_v62  ;;  %v20420_v6 = vld [vmem:[#allocation4 + $0xc28] ss:$16 sps:$4 sm:$0xff]   ;;  %v20425_v62 = vld [vmem:[#allocation4 + $0xc44] ss:$16 sps:$4 sm:$0xff]  }
 0x3de   :  { %4815 = vmatprep.subr.bf16.mxu0 %v20380_v54  ;;  %v20428_v54 = vld [vmem:[#allocation4 + $0xc4c] ss:$16 sps:$4 sm:$0xff]  }
 0x3e0   :  { %4734 = vmatpush1.bf16.msra.mxu1 %v20375_v27  ;;  %v20423_v27 = vld [vmem:[#allocation4 + $0xc40] ss:$16 sps:$4 sm:$0xff]  }
 0x3e1   :  { %4816 = vmatpush1.bf16.msra.mxu0 %v20378_v24  ;;  %4735 = vmatprep.subr.bf16.mxu1 %v20383_v13  ;;  %v20426_v24 = vld [vmem:[#allocation4 + $0xc48] ss:$16 sps:$4 sm:$0xff]   ;;  %v20431_v13 = vld [vmem:[#allocation4 + $0xc64] ss:$16 sps:$4 sm:$0xff]  }
 0x3e2   :  { %4817 = vmatprep.subr.bf16.mxu0 %v20386_v9  ;;  %v20432_v9 = vld [vmem:[#allocation4 + $0xc68] ss:$16 sps:$4 sm:$0xff]  }
 0x3e4   :  { %4736 = vmatpush1.bf16.msra.mxu1 %v20381_v45  ;;  %v20437_v45 = vld [vmem:[#allocation4 + $0xc84] ss:$16 sps:$4 sm:$0xff]  }
 0x3e5   :  { %4818 = vmatpush1.bf16.msra.mxu0 %v20384_v42  ;;  %4737 = vmatprep.subr.bf16.mxu1 %v20389_v57  ;;  %v20440_v42 = vld [vmem:[#allocation4 + $0xc8c] ss:$16 sps:$4 sm:$0xff]   ;;  %v20435_v57 = vld [vmem:[#allocation4 + $0xc80] ss:$16 sps:$4 sm:$0xff]  }
 0x3e6   :  { %4819 = vmatprep.subr.bf16.mxu0 %v20392_v16  ;;  %v20438_v16 = vld [vmem:[#allocation4 + $0xc88] ss:$16 sps:$4 sm:$0xff]  }
 0x3e8   :  { %4738 = vmatpush1.bf16.msra.mxu1 %v20387_v17  ;;  %v20443_v17 = vld [vmem:[#allocation4 + $0xca4] ss:$16 sps:$4 sm:$0xff]  }
 0x3e9   :  { %4820 = vmatpush1.bf16.msra.mxu0 %v20390_v26  ;;  %4739 = vmatprep.subr.bf16.mxu1 %v20395_v47  ;;  %v20446_v26 = vld [vmem:[#allocation4 + $0xcac] ss:$16 sps:$4 sm:$0xff]   ;;  %v20441_v47 = vld [vmem:[#allocation4 + $0xca0] ss:$16 sps:$4 sm:$0xff]  }
 0x3ea   :  { %4821 = vmatprep.subr.bf16.mxu0 %v20398_v18  ;;  %v20444_v18 = vld [vmem:[#allocation4 + $0xca8] ss:$16 sps:$4 sm:$0xff]  }
 0x3ec   :  { %4740 = vmatpush1.bf16.msra.mxu1 %v20393_v20  ;;  %v20449_v20 = vld [vmem:[#allocation4 + $0xcc4] ss:$16 sps:$4 sm:$0xff]  }
 0x3ed   :  { %4822 = vmatpush1.bf16.msra.mxu0 %v20396_v22  ;;  %4741 = vmatprep.subr.bf16.mxu1 %v20401_v25  ;;  %v20452_v22 = vld [vmem:[#allocation4 + $0xccc] ss:$16 sps:$4 sm:$0xff]   ;;  %v20447_v25 = vld [vmem:[#allocation4 + $0xcc0] ss:$16 sps:$4 sm:$0xff]  }
 0x3ee   :  { %4823 = vmatprep.subr.bf16.mxu0 %v20404_v31  ;;  %v20450_v31 = vld [vmem:[#allocation4 + $0xcc8] ss:$16 sps:$4 sm:$0xff]  }
 0x3f0   :  { %4742 = vmatpush1.bf16.msra.mxu1 %v20399_v32  ;;  %v20455_v32 = vld [vmem:[#allocation4 + $0xce4] ss:$16 sps:$4 sm:$0xff]  }
 0x3f1   :  { %4824 = vmatpush1.bf16.msra.mxu0 %v20402_v33  ;;  %4743 = vmatprep.subr.bf16.mxu1 %v20407_v40  ;;  %v20458_v33 = vld [vmem:[#allocation4 + $0xcec] ss:$16 sps:$4 sm:$0xff]   ;;  %v20453_v40 = vld [vmem:[#allocation4 + $0xce0] ss:$16 sps:$4 sm:$0xff]  }
 0x3f2   :  { %4825 = vmatprep.subr.bf16.mxu0 %v20410_v43  ;;  %v20456_v43 = vld [vmem:[#allocation4 + $0xce8] ss:$16 sps:$4 sm:$0xff]  }
 0x3f4   :  { %4744 = vmatpush1.bf16.msra.mxu1 %v20405_v44  ;;  %v20461_v44 = vld [vmem:[#allocation4 + $0xd04] ss:$16 sps:$4 sm:$0xff]  }
 0x3f5   :  { %4826 = vmatpush1.bf16.msra.mxu0 %v20408_v30  ;;  %5439 = vmatprep.subr.bf16.mxu1 %v20413_v46  ;;  %v20464_v30 = vld [vmem:[#allocation4 + $0xd0c] ss:$16 sps:$4 sm:$0xff]   ;;  %v20459_v46 = vld [vmem:[#allocation4 + $0xd00] ss:$16 sps:$4 sm:$0xff]  }
 0x3f6   :  { %5521 = vmatprep.subr.bf16.mxu0 %v20416_v55  ;;  %v20462_v55 = vld [vmem:[#allocation4 + $0xd08] ss:$16 sps:$4 sm:$0xff]  }
 0x3f7   :  { %4762 = vmatmul.mubr.bf16.vlgmr.msra.gmra.mrb[32].mxu1 %v22423_v11 }
 0x3f8   :  { %4844 = vmatmul.mubr.bf16.vlgmr.msra.gmra.mrb[16].mxu0 %v22423_v11  ;;  %5440 = vmatpush1.bf16.msra.mxu1 %v20411_v12  ;;  %v20429_v11 = vld [vmem:[#allocation4 + $0xc60] ss:$16 sps:$4 sm:$0xff]   ;;  %v20467_v12 = vld [vmem:[#allocation4 + $0xd24] ss:$16 sps:$4 sm:$0xff]  }
 0x3f9   :  { %5471 = vmatprep.mubr.bf16.mxu1 %v4954_v1  ;;  %5522 = vmatpush1.bf16.msra.mxu0 %v20414_v51  ;;  %v20470_v51 = vld [vmem:[#allocation4 + $0xd2c] ss:$16 sps:$4 sm:$0xff]  }
 0x3fa   :  { %5553 = vmatprep.mubr.bf16.mxu0 %v4954_v1  ;;  %5441 = vmatprep.subr.bf16.mxu1 %v20419_v59  ;;  %v20465_v59 = vld [vmem:[#allocation4 + $0xd20] ss:$16 sps:$4 sm:$0xff]   ;;  %v20468_v1 = vld [vmem:[#allocation4 + $0xd28] ss:$16 sps:$4 sm:$0xff]  }
 0x3fb   :  { %5523 = vmatprep.subr.bf16.mxu0 %v20422_v2  ;;  %v20473_v2 = vld [vmem:[#allocation4 + $0xd44] ss:$16 sps:$4 sm:$0xff]  }
 0x3fc   :  { %5442 = vmatpush1.bf16.msra.mxu1 %v20417_v52  ;;  %v20476_v52 = vld [vmem:[#allocation4 + $0xd4c] ss:$16 sps:$4 sm:$0xff]  }
 0x3fd   :  { %5524 = vmatpush1.bf16.msra.mxu0 %v20420_v6  ;;  %5443 = vmatprep.subr.bf16.mxu1 %v20425_v62  ;;  %v20471_v6 = vld [vmem:[#allocation4 + $0xd40] ss:$16 sps:$4 sm:$0xff]   ;;  %v20474_v62 = vld [vmem:[#allocation4 + $0xd48] ss:$16 sps:$4 sm:$0xff]  }
 0x3fe   :  { %5525 = vmatprep.subr.bf16.mxu0 %v20428_v54  ;;  %v20479_v54 = vld [vmem:[#allocation4 + $0xd64] ss:$16 sps:$4 sm:$0xff]  }
 0x400   :  { %5444 = vmatpush1.bf16.msra.mxu1 %v20423_v27  ;;  %v20482_v27 = vld [vmem:[#allocation4 + $0xd6c] ss:$16 sps:$4 sm:$0xff]  }
 0x401   :  { %5526 = vmatpush1.bf16.msra.mxu0 %v20426_v24  ;;  %5445 = vmatprep.subr.bf16.mxu1 %v20431_v13  ;;  %v20477_v24 = vld [vmem:[#allocation4 + $0xd60] ss:$16 sps:$4 sm:$0xff]   ;;  %v20480_v13 = vld [vmem:[#allocation4 + $0xd68] ss:$16 sps:$4 sm:$0xff]  }
 0x402   :  { %5527 = vmatprep.subr.bf16.mxu0 %v20434_v60  ;;  %v20485_v60 = vld [vmem:[#allocation4 + $0xd84] ss:$16 sps:$4 sm:$0xff]  }
 0x404   :  { %5446 = vmatpush1.bf16.msra.mxu1 %v20429_v11  ;;  %v20488_v11 = vld [vmem:[#allocation4 + $0xd8c] ss:$16 sps:$4 sm:$0xff]  }
 0x405   :  { %5528 = vmatpush1.bf16.msra.mxu0 %v20432_v9  ;;  %5447 = vmatprep.subr.bf16.mxu1 %v20437_v45  ;;  %v20483_v9 = vld [vmem:[#allocation4 + $0xd80] ss:$16 sps:$4 sm:$0xff]   ;;  %v20486_v45 = vld [vmem:[#allocation4 + $0xd88] ss:$16 sps:$4 sm:$0xff]  }
 0x406   :  { %5529 = vmatprep.subr.bf16.mxu0 %v20440_v42  ;;  %v20491_v42 = vld [vmem:[#allocation4 + $0xda4] ss:$16 sps:$4 sm:$0xff]  }
 0x408   :  { %5448 = vmatpush1.bf16.msra.mxu1 %v20435_v57  ;;  %v20494_v57 = vld [vmem:[#allocation4 + $0xdac] ss:$16 sps:$4 sm:$0xff]  }
 0x409   :  { %5530 = vmatpush1.bf16.msra.mxu0 %v20438_v16  ;;  %5449 = vmatprep.subr.bf16.mxu1 %v20443_v17  ;;  %v20489_v16 = vld [vmem:[#allocation4 + $0xda0] ss:$16 sps:$4 sm:$0xff]   ;;  %v20492_v17 = vld [vmem:[#allocation4 + $0xda8] ss:$16 sps:$4 sm:$0xff]  }
 0x40a   :  { %5531 = vmatprep.subr.bf16.mxu0 %v20446_v26  ;;  %v20497_v26 = vld [vmem:[#allocation4 + $0xdc4] ss:$16 sps:$4 sm:$0xff]  }
 0x40c   :  { %5450 = vmatpush1.bf16.msra.mxu1 %v20441_v47  ;;  %v20500_v47 = vld [vmem:[#allocation4 + $0xdcc] ss:$16 sps:$4 sm:$0xff]  }
 0x40d   :  { %5532 = vmatpush1.bf16.msra.mxu0 %v20444_v18  ;;  %5451 = vmatprep.subr.bf16.mxu1 %v20449_v20  ;;  %v20495_v18 = vld [vmem:[#allocation4 + $0xdc0] ss:$16 sps:$4 sm:$0xff]   ;;  %v20498_v20 = vld [vmem:[#allocation4 + $0xdc8] ss:$16 sps:$4 sm:$0xff]  }
 0x40e   :  { %5533 = vmatprep.subr.bf16.mxu0 %v20452_v22  ;;  %v20503_v22 = vld [vmem:[#allocation4 + $0xde4] ss:$16 sps:$4 sm:$0xff]  }
 0x410   :  { %5452 = vmatpush1.bf16.msra.mxu1 %v20447_v25  ;;  %v20506_v25 = vld [vmem:[#allocation4 + $0xdec] ss:$16 sps:$4 sm:$0xff]  }
 0x411   :  { %5534 = vmatpush1.bf16.msra.mxu0 %v20450_v31  ;;  %5453 = vmatprep.subr.bf16.mxu1 %v20455_v32  ;;  %v20501_v31 = vld [vmem:[#allocation4 + $0xde0] ss:$16 sps:$4 sm:$0xff]   ;;  %v20504_v32 = vld [vmem:[#allocation4 + $0xde8] ss:$16 sps:$4 sm:$0xff]  }
 0x412   :  { %5535 = vmatprep.subr.bf16.mxu0 %v20458_v33  ;;  %v20509_v33 = vld [vmem:[#allocation4 + $0xe04] ss:$16 sps:$4 sm:$0xff]  }
 0x414   :  { %5454 = vmatpush1.bf16.msra.mxu1 %v20453_v40  ;;  %v20512_v40 = vld [vmem:[#allocation4 + $0xe0c] ss:$16 sps:$4 sm:$0xff]  }
 0x415   :  { %5536 = vmatpush1.bf16.msra.mxu0 %v20456_v43  ;;  %5455 = vmatprep.subr.bf16.mxu1 %v20461_v44  ;;  %v20507_v43 = vld [vmem:[#allocation4 + $0xe00] ss:$16 sps:$4 sm:$0xff]   ;;  %v4953_v44 = vrot.slane %v22403_v29, 2 }
 0x416   :  { %5537 = vmatprep.subr.bf16.mxu0 %v20464_v30  ;;  %v20510_v30 = vld [vmem:[#allocation4 + $0xe08] ss:$16 sps:$4 sm:$0xff]   ;;  %v20519_v29 = vld [vmem:[#allocation4 + $0xe40] ss:$16 sps:$4 sm:$0xff]  }
 0x418   :  { %5456 = vmatpush1.bf16.msra.mxu1 %v20459_v46  ;;  %v20515_v46 = vld [vmem:[#allocation4 + $0xe24] ss:$16 sps:$4 sm:$0xff]  }
 0x419   :  { %5538 = vmatpush1.bf16.msra.mxu0 %v20462_v55  ;;  %5457 = vmatprep.subr.bf16.mxu1 %v20467_v12  ;;  %v20518_v55 = vld [vmem:[#allocation4 + $0xe2c] ss:$16 sps:$4 sm:$0xff]   ;;  %v20513_v12 = vld [vmem:[#allocation4 + $0xe20] ss:$16 sps:$4 sm:$0xff]  }
 0x41a   :  { %5539 = vmatprep.subr.bf16.mxu0 %v20470_v51  ;;  %v20516_v51 = vld [vmem:[#allocation4 + $0xe28] ss:$16 sps:$4 sm:$0xff]  }
 0x41c   :  { %5458 = vmatpush1.bf16.msra.mxu1 %v20465_v59  ;;  %v20521_v59 = vld [vmem:[#allocation4 + $0xe44] ss:$16 sps:$4 sm:$0xff]  }
 0x41d   :  { %5540 = vmatpush1.bf16.msra.mxu0 %v20468_v1  ;;  %5459 = vmatprep.subr.bf16.mxu1 %v20473_v2  ;;  %v20524_v1 = vld [vmem:[#allocation4 + $0xe4c] ss:$16 sps:$4 sm:$0xff]   ;;  %v20522_v2 = vld [vmem:[#allocation4 + $0xe48] ss:$16 sps:$4 sm:$0xff]  }
 0x41e   :  { %5541 = vmatprep.subr.bf16.mxu0 %v20476_v52  ;;  %v20527_v52 = vld [vmem:[#allocation4 + $0xe64] ss:$16 sps:$4 sm:$0xff]  }
 0x420   :  { %5460 = vmatpush1.bf16.msra.mxu1 %v20471_v6  ;;  %v20530_v6 = vld [vmem:[#allocation4 + $0xe6c] ss:$16 sps:$4 sm:$0xff]  }
 0x421   :  { %5542 = vmatpush1.bf16.msra.mxu0 %v20474_v62  ;;  %5461 = vmatprep.subr.bf16.mxu1 %v20479_v54  ;;  %v20525_v62 = vld [vmem:[#allocation4 + $0xe60] ss:$16 sps:$4 sm:$0xff]   ;;  %v20528_v54 = vld [vmem:[#allocation4 + $0xe68] ss:$16 sps:$4 sm:$0xff]  }
 0x422   :  { %5543 = vmatprep.subr.bf16.mxu0 %v20482_v27  ;;  %v20533_v27 = vld [vmem:[#allocation4 + $0xe84] ss:$16 sps:$4 sm:$0xff]  }
 0x424   :  { %5462 = vmatpush1.bf16.msra.mxu1 %v20477_v24  ;;  %v20536_v24 = vld [vmem:[#allocation4 + $0xe8c] ss:$16 sps:$4 sm:$0xff]  }
 0x425   :  { %5544 = vmatpush1.bf16.msra.mxu0 %v20480_v13  ;;  %5463 = vmatprep.subr.bf16.mxu1 %v20485_v60  ;;  %v20531_v13 = vld [vmem:[#allocation4 + $0xe80] ss:$16 sps:$4 sm:$0xff]   ;;  %v20534_v60 = vld [vmem:[#allocation4 + $0xe88] ss:$16 sps:$4 sm:$0xff]  }
 0x426   :  { %5545 = vmatprep.subr.bf16.mxu0 %v20488_v11  ;;  %v20539_v11 = vld [vmem:[#allocation4 + $0xea4] ss:$16 sps:$4 sm:$0xff]  }
 0x428   :  { %5464 = vmatpush1.bf16.msra.mxu1 %v20483_v9  ;;  %v20542_v9 = vld [vmem:[#allocation4 + $0xeac] ss:$16 sps:$4 sm:$0xff]  }
 0x429   :  { %5546 = vmatpush1.bf16.msra.mxu0 %v20486_v45  ;;  %5465 = vmatprep.subr.bf16.mxu1 %v20491_v42  ;;  %v20537_v45 = vld [vmem:[#allocation4 + $0xea0] ss:$16 sps:$4 sm:$0xff]   ;;  %v20540_v42 = vld [vmem:[#allocation4 + $0xea8] ss:$16 sps:$4 sm:$0xff]  }
 0x42a   :  { %5547 = vmatprep.subr.bf16.mxu0 %v20494_v57  ;;  %v20545_v57 = vld [vmem:[#allocation4 + $0xec4] ss:$16 sps:$4 sm:$0xff]  }
 0x42c   :  { %5466 = vmatpush1.bf16.msra.mxu1 %v20489_v16  ;;  %v20548_v16 = vld [vmem:[#allocation4 + $0xecc] ss:$16 sps:$4 sm:$0xff]  }
 0x42d   :  { %5548 = vmatpush1.bf16.msra.mxu0 %v20492_v17  ;;  %5467 = vmatprep.subr.bf16.mxu1 %v20497_v26  ;;  %v20543_v17 = vld [vmem:[#allocation4 + $0xec0] ss:$16 sps:$4 sm:$0xff]   ;;  %v20546_v26 = vld [vmem:[#allocation4 + $0xec8] ss:$16 sps:$4 sm:$0xff]  }
 0x42e   :  { %5549 = vmatprep.subr.bf16.mxu0 %v20500_v47  ;;  %v20551_v47 = vld [vmem:[#allocation4 + $0xee4] ss:$16 sps:$4 sm:$0xff]  }
 0x430   :  { %5468 = vmatpush1.bf16.msra.mxu1 %v20495_v18  ;;  %v20554_v18 = vld [vmem:[#allocation4 + $0xeec] ss:$16 sps:$4 sm:$0xff]  }
 0x431   :  { %5550 = vmatpush1.bf16.msra.mxu0 %v20498_v20  ;;  %5469 = vmatprep.subr.bf16.mxu1 %v20503_v22  ;;  %v20549_v20 = vld [vmem:[#allocation4 + $0xee0] ss:$16 sps:$4 sm:$0xff]   ;;  %v20552_v22 = vld [vmem:[#allocation4 + $0xee8] ss:$16 sps:$4 sm:$0xff]  }
 0x432   :  { %5551 = vmatprep.subr.bf16.mxu0 %v20506_v25  ;;  %v20557_v25 = vld [vmem:[#allocation6 + $0x44] ss:$16 sps:$4 sm:$0xff]  }
 0x434   :  { %5470 = vmatpush1.bf16.msra.mxu1 %v20501_v31  ;;  %v20560_v31 = vld [vmem:[#allocation6 + $0x4c] ss:$16 sps:$4 sm:$0xff]  }
 0x435   :  { %5552 = vmatpush1.bf16.msra.mxu0 %v20504_v32  ;;  %5480 = vmatprep.subr.bf16.mxu1 %v20509_v33  ;;  %v4955_v32 = vrot.slane %v22411_v8, 2  ;;  %v20555_v33 = vld [vmem:[#allocation6 + $0x40] ss:$16 sps:$4 sm:$0xff]  }
 0x436   :  { %5562 = vmatprep.subr.bf16.mxu0 %v20512_v40  ;;  %v20558_v40 = vld [vmem:[#allocation6 + $0x48] ss:$16 sps:$4 sm:$0xff]  }
 0x437   :  { %5472 = vmatmul.mubr.bf16.vlgmr.msra.gmra.mrb[32].mxu1 %v4953_v44 }
 0x438   :  { %5554 = vmatmul.mubr.bf16.vlgmr.msra.gmra.mrb[16].mxu0 %v4953_v44  ;;  %5481 = vmatpush1.bf16.msra.mxu1 %v20507_v43  ;;  %v20561_v43 = vld [vmem:[#allocation6 + $0x64] ss:$16 sps:$4 sm:$0x3f]   ;;  %v20565_v44 = vld [vmem:[#allocation6 + $0x60] ss:$16 sps:$4 sm:$0x3f]  }
 0x439   :  { %5563 = vmatpush1.bf16.msra.mxu0 %v20510_v30  ;;  %5482 = vmatprep.subr.bf16.mxu1 %v20515_v46  ;;  %v20563_v30 = vld [vmem:[#allocation6 + $0x6c] ss:$16 sps:$4 sm:$0x3f]   ;;  %v20566_v46 = vld [vmem:[#allocation6 + $0x68] ss:$16 sps:$4 sm:$0x3f]  }
 0x43a   :  { %5564 = vmatprep.subr.bf16.mxu0 %v20518_v55  ;;  %5512 = vmatprep.mubr.bf16.mxu1 %v21960_v0  ;;  %v5664_v55 = vsel %vm202_vm0, %v20565_v44, 0  ;;  %v5670_v8 = vsel %vm202_vm0, %v20566_v46, 0  ;;  %v20606_v44 = vld [vmem:[#allocation6 + $0x108] ss:$16 sps:$4 sm:$0xff]  }
 0x43b   :  { %5594 = vmatprep.mubr.bf16.mxu0 %v21960_v0  ;;  %v20613_v46 = vld [vmem:[#allocation6 + $0x120] ss:$16 sps:$4 sm:$0x3f]  }
 0x43c   :  { %5483 = vmatpush1.bf16.msra.mxu1 %v20513_v12  ;;  %v20569_v12 = vld [vmem:[#allocation6 + $0x4] ss:$16 sps:$4 sm:$0xff]  }
 0x43d   :  { %5565 = vmatpush1.bf16.msra.mxu0 %v20516_v51  ;;  %5484 = vmatprep.subr.bf16.mxu1 %v20521_v59  ;;  %v20572_v51 = vld [vmem:[#allocation6 + $0xc] ss:$16 sps:$4 sm:$0xff]   ;;  %v20567_v59 = vld [vmem:[#allocation6] ss:$16 sps:$4 sm:$0xff]  }
 0x43e   :  { %5566 = vmatprep.subr.bf16.mxu0 %v20524_v1  ;;  %v20570_v1 = vld [vmem:[#allocation6 + $0x8] ss:$16 sps:$4 sm:$0xff]  }
 0x440   :  { %5485 = vmatpush1.bf16.msra.mxu1 %v20519_v29  ;;  %v20573_v29 = vld [vmem:[#allocation6 + $0x24] ss:$16 sps:$4 sm:$0x3f]  }
 0x441   :  { %5567 = vmatpush1.bf16.msra.mxu0 %v20522_v2  ;;  %5486 = vmatprep.subr.bf16.mxu1 %v20527_v52  ;;  %v20577_v2 = vld [vmem:[#allocation6 + $0x20] ss:$16 sps:$4 sm:$0x3f]   ;;  %v20575_v52 = vld [vmem:[#allocation6 + $0x2c] ss:$16 sps:$4 sm:$0x3f]  }
 0x442   :  { %5568 = vmatprep.subr.bf16.mxu0 %v20530_v6  ;;  %v20578_v6 = vld [vmem:[#allocation6 + $0x28] ss:$16 sps:$4 sm:$0x3f]  }
 0x444   :  { %5487 = vmatpush1.bf16.msra.mxu1 %v20525_v62  ;;  %v5797_v62 = vsel %vm202_vm0, %v20577_v2, 0  ;;  %v20621_v2 = vld [vmem:[#allocation6 + $0x164] ss:$16 sps:$4 sm:$0x3f]  }
 0x445   :  { %5569 = vmatpush1.bf16.msra.mxu0 %v20528_v54  ;;  %5488 = vmatprep.subr.bf16.mxu1 %v20533_v27  ;;  %v20581_v54 = vld [vmem:[#allocation6 + $0x84] ss:$16 sps:$4 sm:$0xff]   ;;  %v5803_v27 = vsel %vm202_vm0, %v20578_v6, 0  ;;  %v20623_v6 = vld [vmem:[#allocation6 + $0x16c] ss:$16 sps:$4 sm:$0x3f]  }
 0x446   :  { %5570 = vmatprep.subr.bf16.mxu0 %v20536_v24  ;;  %v20584_v24 = vld [vmem:[#allocation6 + $0x8c] ss:$16 sps:$4 sm:$0xff]  }
 0x448   :  { %5489 = vmatpush1.bf16.msra.mxu1 %v20531_v13  ;;  %v20582_v13 = vld [vmem:[#allocation6 + $0x88] ss:$16 sps:$4 sm:$0xff]  }
 0x449   :  { %5571 = vmatpush1.bf16.msra.mxu0 %v20534_v60  ;;  %5490 = vmatprep.subr.bf16.mxu1 %v20539_v11  ;;  %v20585_v60 = vld [vmem:[#allocation6 + $0xa4] ss:$16 sps:$4 sm:$0x3f]   ;;  %v20589_v11 = vld [vmem:[#allocation6 + $0xa0] ss:$16 sps:$4 sm:$0x3f]  }
 0x44a   :  { %5572 = vmatprep.subr.bf16.mxu0 %v20542_v9  ;;  %v20587_v9 = vld [vmem:[#allocation6 + $0xac] ss:$16 sps:$4 sm:$0x3f]  }
 0x44c   :  { %5491 = vmatpush1.bf16.msra.mxu1 %v20537_v45  ;;  %v20590_v45 = vld [vmem:[#allocation6 + $0xa8] ss:$16 sps:$4 sm:$0x3f]  }
 0x44d   :  { %5573 = vmatpush1.bf16.msra.mxu0 %v20540_v42  ;;  %5492 = vmatprep.subr.bf16.mxu1 %v20545_v57  ;;  %v21873_v42 = vld [vmem:[%s23308_s0] sm:$0xf]  ;;  %v5939_v57 = vsel %vm202_vm0, %v20589_v11, 0 }
 0x44e   :  { %5574 = vmatprep.subr.bf16.mxu0 %v20548_v16  ;;  %v20593_v16 = vld [vmem:[#allocation6 + $0xc4] ss:$16 sps:$4 sm:$0xff]   ;;  %v20627_v11 = vld [vmem:[#allocation6 + $0x180] ss:$16 sps:$4 sm:$0xff]  }
 0x450   :  { %5493 = vmatpush1.bf16.msra.mxu1 %v20543_v17  ;;  %v5945_v17 = vsel %vm202_vm0, %v20590_v45, 0  ;;  %v20633_v45 = vld [vmem:[#allocation6 + $0x1a4] ss:$16 sps:$4 sm:$0x3f]  }
 0x451   :  { %5575 = vmatpush1.bf16.msra.mxu0 %v20546_v26  ;;  %5494 = vmatprep.subr.bf16.mxu1 %v20551_v47  ;;  %v20596_v26 = vld [vmem:[#allocation6 + $0xcc] ss:$16 sps:$4 sm:$0xff]   ;;  %v20591_v47 = vld [vmem:[#allocation6 + $0xc0] ss:$16 sps:$4 sm:$0xff]  }
 0x452   :  { %5576 = vmatprep.subr.bf16.mxu0 %v20554_v18  ;;  %v20594_v18 = vld [vmem:[#allocation6 + $0xc8] ss:$16 sps:$4 sm:$0xff]  }
 0x454   :  { %5495 = vmatpush1.bf16.msra.mxu1 %v20549_v20  ;;  %v20597_v20 = vld [vmem:[#allocation6 + $0xe4] ss:$16 sps:$4 sm:$0x3f]  }
 0x455   :  { %5577 = vmatpush1.bf16.msra.mxu0 %v20552_v22  ;;  %5675 = vmatprep.subr.bf16.mxu1 %v20557_v25  ;;  %v20601_v22 = vld [vmem:[#allocation6 + $0xe0] ss:$16 sps:$4 sm:$0x3f]   ;;  %v20599_v25 = vld [vmem:[#allocation6 + $0xec] ss:$16 sps:$4 sm:$0x3f]  }
 0x456   :  { %5716 = vmatprep.subr.bf16.mxu0 %v20560_v31  ;;  %v20602_v31 = vld [vmem:[#allocation6 + $0xe8] ss:$16 sps:$4 sm:$0x3f]  }
 0x457   :  { %5513 = vmatmul.mubr.bf16.vlgmr.msra.gmra.mrb[32].mxu1 %v4955_v32 }
 0x458   :  { %5595 = vmatmul.mubr.bf16.vlgmr.msra.gmra.mrb[16].mxu0 %v4955_v32  ;;  %5676 = vmatpush1.bf16.msra.mxu1 %v20555_v33  ;;  %v6085_v32 = vsel %vm202_vm0, %v20601_v22, 0  ;;  %v20605_v33 = vld [vmem:[#allocation6 + $0x104] ss:$16 sps:$4 sm:$0xff]   ;;  %v20639_v22 = vld [vmem:[#allocation6 + $0x1c0] ss:$16 sps:$4 sm:$0xff]  }
 0x459   :  { %5717 = vmatpush1.bf16.msra.mxu0 %v20558_v40  ;;  %17953 = vmatprep.subr.msk.bf16.mxu1 %vm202_vm0, %v20561_v43  ;;  %v6091_v40 = vsel %vm202_vm0, %v20602_v31, 0  ;;  %v20608_v43 = vld [vmem:[#allocation6 + $0x10c] ss:$16 sps:$4 sm:$0xff]   ;;  %v20645_v31 = vld [vmem:[#allocation6 + $0x1e4] ss:$16 sps:$4 sm:$0x3f]  }
 0x45a   :  { %17955 = vmatprep.subr.msk.bf16.mxu0 %vm202_vm0, %v20563_v30  ;;  %5707 = vmatprep.mubr.bf16.mxu1 %v21960_v0  ;;  %v20609_v30 = vld [vmem:[#allocation6 + $0x124] ss:$16 sps:$4 sm:$0x3f]  }
 0x45b   :  { %5748 = vmatprep.mubr.bf16.mxu0 %v21960_v0 }
 0x45c   :  { %5678 = vmatpush1.bf16.msra.mxu1 %v5664_v55  ;;  %v20611_v55 = vld [vmem:[#allocation6 + $0x12c] ss:$16 sps:$4 sm:$0x3f]  }
 0x45d   :  { %5719 = vmatpush1.bf16.msra.mxu0 %v5670_v8  ;;  %5808 = vmatprep.subr.bf16.mxu1 %v20569_v12  ;;  %v20614_v12 = vld [vmem:[#allocation6 + $0x128] ss:$16 sps:$4 sm:$0x3f]   ;;  %v6231_v8 = vsel %vm202_vm0, %v20613_v46, 0  ;;  %v6634_v46 = vrot.slane %v22067_v15, 4 }
 0x45e   :  { %5849 = vmatprep.subr.bf16.mxu0 %v20572_v51  ;;  %v20617_v51 = vld [vmem:[#allocation6 + $0x144] ss:$16 sps:$4 sm:$0xff]  }
 0x463   :  { %17954 = vmatmul.mubr.msk.bf16.vlgmr.msra.gmra.mrb[32].mxu1 %vm195_vm2, %v22074_v23 }
 0x464   :  { %17956 = vmatmul.mubr.msk.bf16.vlgmr.msra.gmra.mrb[16].mxu0 %vm195_vm2, %v22074_v23  ;;  %5809 = vmatpush1.bf16.msra.mxu1 %v20567_v59  ;;  %v20579_v23 = vld [vmem:[#allocation6 + $0x80] ss:$16 sps:$4 sm:$0xff]   ;;  %v6237_v59 = vsel %vm202_vm0, %v20614_v12, 0 }
 0x465   :  { %5850 = vmatpush1.bf16.msra.mxu0 %v20570_v1  ;;  %17965 = vmatprep.subr.msk.bf16.mxu1 %vm202_vm0, %v20573_v29  ;;  %v20620_v1 = vld [vmem:[#allocation6 + $0x14c] ss:$16 sps:$4 sm:$0xff]   ;;  %v20618_v29 = vld [vmem:[#allocation6 + $0x148] ss:$16 sps:$4 sm:$0xff]   ;;  %v20651_v12 = vld [vmem:[#allocation6 + $0x200] ss:$16 sps:$4 sm:$0xff]  }
 0x466   :  { %17967 = vmatprep.subr.msk.bf16.mxu0 %vm202_vm0, %v20575_v52  ;;  %5840 = vmatprep.mubr.bf16.mxu1 %v21960_v0  ;;  %v20625_v52 = vld [vmem:[#allocation6 + $0x160] ss:$16 sps:$4 sm:$0x3f]  }
 0x467   :  { %5881 = vmatprep.mubr.bf16.mxu0 %v21960_v0 }
 0x468   :  { %5811 = vmatpush1.bf16.msra.mxu1 %v5797_v62  ;;  %v20626_v62 = vld [vmem:[#allocation6 + $0x168] ss:$16 sps:$4 sm:$0x3f]  }
 0x469   :  { %5852 = vmatpush1.bf16.msra.mxu0 %v5803_v27  ;;  %5950 = vmatprep.subr.bf16.mxu1 %v20581_v54  ;;  %v6380_v54 = vsel %vm202_vm0, %v20625_v52, 0  ;;  %v20629_v27 = vld [vmem:[#allocation6 + $0x184] ss:$16 sps:$4 sm:$0xff]  }
 0x46a   :  { %5991 = vmatprep.subr.bf16.mxu0 %v20584_v24  ;;  %v6386_v24 = vsel %vm202_vm0, %v20626_v62, 0  ;;  %v21874_v52 = vld [vmem:[%s23308_s0 + $0x4] sm:$0xf] }
 0x46f   :  { %17966 = vmatmul.mubr.msk.bf16.vlgmr.msra.gmra.mrb[32].mxu1 %vm195_vm2, %v21873_v42 }
 0x470   :  { %17968 = vmatmul.mubr.msk.bf16.vlgmr.msra.gmra.mrb[16].mxu0 %vm195_vm2, %v21873_v42  ;;  %5951 = vmatpush1.bf16.msra.mxu1 %v20579_v23  ;;  %v20632_v23 = vld [vmem:[#allocation6 + $0x18c] ss:$16 sps:$4 sm:$0xff]   ;;  %v20637_v42 = vld [vmem:[#allocation6 + $0x1a0] ss:$16 sps:$4 sm:$0x3f]  }
 0x471   :  { %5992 = vmatpush1.bf16.msra.mxu0 %v20582_v13  ;;  %17977 = vmatprep.subr.msk.bf16.mxu1 %vm202_vm0, %v20585_v60  ;;  %v6337_v13 = vrot.slane %v22064_v14, 2 }
 0x472   :  { %17979 = vmatprep.subr.msk.bf16.mxu0 %vm202_vm0, %v20587_v9  ;;  %5982 = vmatprep.mubr.bf16.mxu1 %v21960_v0  ;;  %v20630_v9 = vld [vmem:[#allocation6 + $0x188] ss:$16 sps:$4 sm:$0xff]  }
 0x473   :  { %6023 = vmatprep.mubr.bf16.mxu0 %v21960_v0 }
 0x474   :  { %5953 = vmatpush1.bf16.msra.mxu1 %v5939_v57  ;;  %v20635_v57 = vld [vmem:[#allocation6 + $0x1ac] ss:$16 sps:$4 sm:$0x3f]  }
 0x475   :  { %5994 = vmatpush1.bf16.msra.mxu0 %v5945_v17  ;;  %6096 = vmatprep.subr.bf16.mxu1 %v20593_v16  ;;  %v20638_v16 = vld [vmem:[#allocation6 + $0x1a8] ss:$16 sps:$4 sm:$0x3f]   ;;  %v6527_v17 = vsel %vm202_vm0, %v20637_v42, 0  ;;  %v20680_v42 = vld [vmem:[#allocation6 + $0x28c] ss:$16 sps:$4 sm:$0xff]  }
 0x476   :  { %6137 = vmatprep.subr.bf16.mxu0 %v20596_v26  ;;  %v20641_v26 = vld [vmem:[#allocation6 + $0x1c4] ss:$16 sps:$4 sm:$0xff]  }
 0x47b   :  { %17978 = vmatmul.mubr.msk.bf16.vlgmr.msra.gmra.mrb[32].mxu1 %vm195_vm2, %v22122_v50 }
 0x47c   :  { %17980 = vmatmul.mubr.msk.bf16.vlgmr.msra.gmra.mrb[16].mxu0 %vm195_vm2, %v22122_v50  ;;  %6097 = vmatpush1.bf16.msra.mxu1 %v20591_v47  ;;  %v20603_v50 = vld [vmem:[#allocation6 + $0x100] ss:$16 sps:$4 sm:$0xff]   ;;  %v6533_v47 = vsel %vm202_vm0, %v20638_v16, 0 }
 0x47d   :  { %6138 = vmatpush1.bf16.msra.mxu0 %v20594_v18  ;;  %17989 = vmatprep.subr.msk.bf16.mxu1 %vm202_vm0, %v20597_v20  ;;  %v20644_v18 = vld [vmem:[#allocation6 + $0x1cc] ss:$16 sps:$4 sm:$0xff]   ;;  %v6486_v20 = vrot.slane %v22058_v10, 3 }
 0x47e   :  { %17991 = vmatprep.subr.msk.bf16.mxu0 %vm202_vm0, %v20599_v25  ;;  %6128 = vmatprep.mubr.bf16.mxu1 %v21960_v0  ;;  %v20642_v25 = vld [vmem:[#allocation6 + $0x1c8] ss:$16 sps:$4 sm:$0xff]  }
 0x47f   :  { %6169 = vmatprep.mubr.bf16.mxu0 %v21960_v0 }
 0x480   :  { %6099 = vmatpush1.bf16.msra.mxu1 %v6085_v32  ;;  %v20649_v32 = vld [vmem:[#allocation6 + $0x1e0] ss:$16 sps:$4 sm:$0x3f]  }
 0x481   :  { %6140 = vmatpush1.bf16.msra.mxu0 %v6091_v40  ;;  %6242 = vmatprep.subr.bf16.mxu1 %v20605_v33  ;;  %v20647_v33 = vld [vmem:[#allocation6 + $0x1ec] ss:$16 sps:$4 sm:$0x3f]   ;;  %v20650_v40 = vld [vmem:[#allocation6 + $0x1e8] ss:$16 sps:$4 sm:$0x3f]  }
 0x482   :  { %6283 = vmatprep.subr.bf16.mxu0 %v20608_v43  ;;  %v6676_v43 = vsel %vm202_vm0, %v20649_v32, 0  ;;  %v6682_v10 = vsel %vm202_vm0, %v20650_v40, 0  ;;  %v20689_v32 = vld [vmem:[#allocation6 + $0x2c4] ss:$16 sps:$4 sm:$0xff]   ;;  %v20692_v40 = vld [vmem:[#allocation6 + $0x2cc] ss:$16 sps:$4 sm:$0xff]  }
 0x487   :  { %17990 = vmatmul.mubr.msk.bf16.vlgmr.msra.gmra.mrb[32].mxu1 %vm195_vm2, %v22153_v5 }
 0x488   :  { %17992 = vmatmul.mubr.msk.bf16.vlgmr.msra.gmra.mrb[16].mxu0 %vm195_vm2, %v22153_v5  ;;  %6243 = vmatpush1.bf16.msra.mxu1 %v20603_v50  ;;  %v20615_v5 = vld [vmem:[#allocation6 + $0x140] ss:$16 sps:$4 sm:$0xff]   ;;  %v20653_v50 = vld [vmem:[#allocation6 + $0x204] ss:$16 sps:$4 sm:$0xff]  }
 0x489   :  { %6284 = vmatpush1.bf16.msra.mxu0 %v20606_v44  ;;  %18001 = vmatprep.subr.msk.bf16.mxu1 %vm202_vm0, %v20609_v30  ;;  %v20656_v44 = vld [vmem:[#allocation6 + $0x20c] ss:$16 sps:$4 sm:$0xff]   ;;  %v6633_v30 = vrot.slane %v22064_v14, 3 }
 0x48a   :  { %18003 = vmatprep.subr.msk.bf16.mxu0 %vm202_vm0, %v20611_v55  ;;  %6274 = vmatprep.mubr.bf16.mxu1 %v21960_v0 }
 0x48b   :  { %6315 = vmatprep.mubr.bf16.mxu0 %v21960_v0  ;;  %v6635_v55 = vor.u32 %v6634_v46, %v6633_v30  ;;  %v20697_v30 = vld [vmem:[#allocation6 + $0x2e0] ss:$16 sps:$4 sm:$0x3f]   ;;  %v20695_v46 = vld [vmem:[#allocation6 + $0x2ec] ss:$16 sps:$4 sm:$0x3f]  }
 0x48c   :  { %6245 = vmatpush1.bf16.msra.mxu1 %v6231_v8  ;;  %v20654_v8 = vld [vmem:[#allocation6 + $0x208] ss:$16 sps:$4 sm:$0xff]  }
 0x48d   :  { %6286 = vmatpush1.bf16.msra.mxu0 %v6237_v59  ;;  %6391 = vmatprep.subr.bf16.mxu1 %v20617_v51  ;;  %v20657_v51 = vld [vmem:[#allocation6 + $0x224] ss:$16 sps:$4 sm:$0x3f]   ;;  %v20661_v59 = vld [vmem:[#allocation6 + $0x220] ss:$16 sps:$4 sm:$0x3f]  }
 0x48e   :  { %6432 = vmatprep.subr.bf16.mxu0 %v20620_v1  ;;  %v20659_v1 = vld [vmem:[#allocation6 + $0x22c] ss:$16 sps:$4 sm:$0x3f]   ;;  %v6822_v14 = vsel %vm202_vm0, %v20661_v59, 0 }
 0x48f   :  { %v20704_v59 = vld [vmem:[#allocation6 + $0x30c] ss:$16 sps:$4 sm:$0xff]  }
 0x493   :  { %18002 = vmatmul.mubr.msk.bf16.vlgmr.msra.gmra.mrb[32].mxu1 %vm195_vm2, %v22180_v21 }
 0x494   :  { %18004 = vmatmul.mubr.msk.bf16.vlgmr.msra.gmra.mrb[16].mxu0 %vm195_vm2, %v22180_v21  ;;  %6392 = vmatpush1.bf16.msra.mxu1 %v20615_v5  ;;  %v6338_v21 = vrot.slane %v22067_v15, 3  ;;  %v20662_v5 = vld [vmem:[#allocation6 + $0x228] ss:$16 sps:$4 sm:$0x3f]   ;;  %v20665_v15 = vld [vmem:[#allocation6 + $0x244] ss:$16 sps:$4 sm:$0xff]  }
 0x495   :  { %6433 = vmatpush1.bf16.msra.mxu0 %v20618_v29  ;;  %18013 = vmatprep.subr.msk.bf16.mxu1 %vm202_vm0, %v20621_v2  ;;  %v6828_v29 = vsel %vm202_vm0, %v20662_v5, 0  ;;  %v20668_v2 = vld [vmem:[#allocation6 + $0x24c] ss:$16 sps:$4 sm:$0xff]  }
 0x496   :  { %18015 = vmatprep.subr.msk.bf16.mxu0 %vm202_vm0, %v20623_v6  ;;  %6423 = vmatprep.mubr.bf16.mxu1 %v21960_v0  ;;  %v6339_v60 = vor.u32 %v6338_v21, %v6337_v13  ;;  %v22549_v6 = vld [vmem:[%s23308_s0 + $0x8] sm:$0xf]  ;;  %v20671_v13 = vld [vmem:[#allocation6 + $0x26c] ss:$16 sps:$4 sm:$0x3f]  }
 0x497   :  { %6464 = vmatprep.mubr.bf16.mxu0 %v21960_v0  ;;  %v22552_v62 = vcombine.low %v21874_v52, %v22549_v6  ;;  %v20674_v21 = vld [vmem:[#allocation6 + $0x268] ss:$16 sps:$4 sm:$0x3f]  }
 0x498   :  { %6394 = vmatpush1.bf16.msra.mxu1 %v6380_v54  ;;  %v20663_v54 = vld [vmem:[#allocation6 + $0x240] ss:$16 sps:$4 sm:$0xff]  }
 0x499   :  { %6435 = vmatpush1.bf16.msra.mxu0 %v6386_v24  ;;  %6538 = vmatprep.subr.bf16.mxu1 %v20629_v27  ;;  %v20666_v27 = vld [vmem:[#allocation6 + $0x248] ss:$16 sps:$4 sm:$0xff]   ;;  %v20669_v24 = vld [vmem:[#allocation6 + $0x264] ss:$16 sps:$4 sm:$0x3f]  }
 0x49a   :  { %6579 = vmatprep.subr.bf16.mxu0 %v20632_v23  ;;  %v20673_v23 = vld [vmem:[#allocation6 + $0x260] ss:$16 sps:$4 sm:$0x3f]  }
 0x49f   :  { %18014 = vmatmul.mubr.msk.bf16.vlgmr.msra.gmra.mrb[32].mxu1 %vm195_vm2, %v6339_v60 }
 0x4a0   :  { %18016 = vmatmul.mubr.msk.bf16.vlgmr.msra.gmra.mrb[16].mxu0 %vm195_vm2, %v6339_v60  ;;  %6539 = vmatpush1.bf16.msra.mxu1 %v20627_v11  ;;  %v22556_v60 = vshll.u32 %v22552_v62, 16  ;;  %v6976_v11 = vsel %vm202_vm0, %v20673_v23, 0  ;;  %v20713_v23 = vld [vmem:[#allocation6 + $0x344] ss:$16 sps:$4 sm:$0xff]  }
 0x4a1   :  { %6580 = vmatpush1.bf16.msra.mxu0 %v20630_v9  ;;  %18025 = vmatprep.subr.msk.bf16.mxu1 %vm202_vm0, %v20633_v45  ;;  %v20677_v9 = vld [vmem:[#allocation6 + $0x284] ss:$16 sps:$4 sm:$0xff]   ;;  %v6982_v45 = vsel %vm202_vm0, %v20674_v21, 0  ;;  %v20716_v21 = vld [vmem:[#allocation6 + $0x34c] ss:$16 sps:$4 sm:$0xff]  }
 0x4a2   :  { %18027 = vmatprep.subr.msk.bf16.mxu0 %vm202_vm0, %v20635_v57  ;;  %6570 = vmatprep.mubr.bf16.mxu1 %v21960_v0  ;;  %v22566_v57 = vshrl.u32 %v22552_v62, 16  ;;  %v6934_v16 = vrot.slane %v22556_v60, 1  ;;  %v7230_v5 = vrot.slane %v22556_v60, 2 }
 0x4a3   :  { %6611 = vmatprep.mubr.bf16.mxu0 %v21960_v0 }
 0x4a4   :  { %6541 = vmatpush1.bf16.msra.mxu1 %v6527_v17  ;;  %v6935_v17 = vor.u32 %v6934_v16, %v22566_v57  ;;  %v20721_v16 = vld [vmem:[#allocation6 + $0x360] ss:$16 sps:$4 sm:$0x3f]  }
 0x4a5   :  { %6582 = vmatpush1.bf16.msra.mxu0 %v6533_v47  ;;  %6687 = vmatprep.subr.bf16.mxu1 %v20641_v26  ;;  %v20675_v26 = vld [vmem:[#allocation6 + $0x280] ss:$16 sps:$4 sm:$0xff]   ;;  %v20678_v47 = vld [vmem:[#allocation6 + $0x288] ss:$16 sps:$4 sm:$0xff]  }
 0x4a6   :  { %6728 = vmatprep.subr.bf16.mxu0 %v20644_v18  ;;  %v20681_v18 = vld [vmem:[#allocation6 + $0x2a4] ss:$16 sps:$4 sm:$0x3f]  }
 0x4ab   :  { %18026 = vmatmul.mubr.msk.bf16.vlgmr.msra.gmra.mrb[32].mxu1 %vm195_vm2, %v6486_v20 }
 0x4ac   :  { %18028 = vmatmul.mubr.msk.bf16.vlgmr.msra.gmra.mrb[16].mxu0 %vm195_vm2, %v6486_v20  ;;  %6688 = vmatpush1.bf16.msra.mxu1 %v20639_v22  ;;  %v20685_v20 = vld [vmem:[#allocation6 + $0x2a0] ss:$16 sps:$4 sm:$0x3f]   ;;  %v20683_v22 = vld [vmem:[#allocation6 + $0x2ac] ss:$16 sps:$4 sm:$0x3f]  }
 0x4ad   :  { %6729 = vmatpush1.bf16.msra.mxu0 %v20642_v25  ;;  %18037 = vmatprep.subr.msk.bf16.mxu1 %vm202_vm0, %v20645_v31  ;;  %v20686_v25 = vld [vmem:[#allocation6 + $0x2a8] ss:$16 sps:$4 sm:$0x3f]   ;;  %v7123_v31 = vsel %vm202_vm0, %v20685_v20, 0 }
 0x4ae   :  { %18039 = vmatprep.subr.msk.bf16.mxu0 %vm202_vm0, %v20647_v33  ;;  %6719 = vmatprep.mubr.bf16.mxu1 %v21960_v0  ;;  %v7129_v33 = vsel %vm202_vm0, %v20686_v25, 0  ;;  %v7525_v25 = vrot.slane %v22566_v57, 2 }
 0x4af   :  { %6760 = vmatprep.mubr.bf16.mxu0 %v21960_v0 }
 0x4b0   :  { %6690 = vmatpush1.bf16.msra.mxu1 %v6676_v43  ;;  %v7082_v43 = vrot.slane %v22552_v62, 1 }
 0x4b1   :  { %6731 = vmatpush1.bf16.msra.mxu0 %v6682_v10  ;;  %6833 = vmatprep.subr.bf16.mxu1 %v20653_v50  ;;  %v20687_v50 = vld [vmem:[#allocation6 + $0x2c0] ss:$16 sps:$4 sm:$0xff]   ;;  %v20690_v10 = vld [vmem:[#allocation6 + $0x2c8] ss:$16 sps:$4 sm:$0xff]  }
 0x4b2   :  { %6874 = vmatprep.subr.bf16.mxu0 %v20656_v44  ;;  %v20693_v44 = vld [vmem:[#allocation6 + $0x2e4] ss:$16 sps:$4 sm:$0x3f]  }
 0x4b7   :  { %18038 = vmatmul.mubr.msk.bf16.vlgmr.msra.gmra.mrb[32].mxu1 %vm195_vm2, %v6635_v55 }
 0x4b8   :  { %18040 = vmatmul.mubr.msk.bf16.vlgmr.msra.gmra.mrb[16].mxu0 %vm195_vm2, %v6635_v55  ;;  %6834 = vmatpush1.bf16.msra.mxu1 %v20651_v12  ;;  %v20698_v55 = vld [vmem:[#allocation6 + $0x2e8] ss:$16 sps:$4 sm:$0x3f]   ;;  %v7272_v12 = vsel %vm202_vm0, %v20697_v30, 0 }
 0x4b9   :  { %6875 = vmatpush1.bf16.msra.mxu0 %v20654_v8  ;;  %18049 = vmatprep.subr.msk.bf16.mxu1 %vm202_vm0, %v20657_v51  ;;  %v20701_v8 = vld [vmem:[#allocation6 + $0x304] ss:$16 sps:$4 sm:$0xff]   ;;  %v7278_v51 = vsel %vm202_vm0, %v20698_v55, 0 }
 0x4ba   :  { %18051 = vmatprep.subr.msk.bf16.mxu0 %vm202_vm0, %v20659_v1  ;;  %6865 = vmatprep.mubr.bf16.mxu1 %v21960_v0  ;;  %v7229_v1 = vrot.slane %v22566_v57, 1 }
 0x4bb   :  { %6906 = vmatprep.mubr.bf16.mxu0 %v21960_v0 }
 0x4bc   :  { %6836 = vmatpush1.bf16.msra.mxu1 %v6822_v14  ;;  %v7231_v14 = vor.u32 %v7230_v5, %v7229_v1  ;;  %v20741_v1 = vld [vmem:[#allocation6 + $0x3e4] ss:$16 sps:$4 sm:$0x3f]   ;;  %v20745_v5 = vld [vmem:[#allocation6 + $0x3e0] ss:$16 sps:$4 sm:$0x3f]  }
 0x4bd   :  { %6877 = vmatpush1.bf16.msra.mxu0 %v6828_v29  ;;  %6987 = vmatprep.subr.bf16.mxu1 %v20665_v15  ;;  %v20699_v15 = vld [vmem:[#allocation6 + $0x300] ss:$16 sps:$4 sm:$0xff]   ;;  %v20702_v29 = vld [vmem:[#allocation6 + $0x308] ss:$16 sps:$4 sm:$0xff]  }
 0x4be   :  { %7028 = vmatprep.subr.bf16.mxu0 %v20668_v2  ;;  %v20705_v2 = vld [vmem:[#allocation6 + $0x324] ss:$16 sps:$4 sm:$0x3f]  }
 0x4c3   :  { %18050 = vmatmul.mubr.msk.bf16.vlgmr.msra.gmra.mrb[32].mxu1 %vm195_vm2, %v21874_v52 }
 0x4c4   :  { %18052 = vmatmul.mubr.msk.bf16.vlgmr.msra.gmra.mrb[16].mxu0 %vm195_vm2, %v21874_v52  ;;  %6988 = vmatpush1.bf16.msra.mxu1 %v20663_v54  ;;  %v20709_v52 = vld [vmem:[#allocation6 + $0x320] ss:$16 sps:$4 sm:$0x3f]   ;;  %v20707_v54 = vld [vmem:[#allocation6 + $0x32c] ss:$16 sps:$4 sm:$0x3f]  }
 0x4c5   :  { %7029 = vmatpush1.bf16.msra.mxu0 %v20666_v27  ;;  %18062 = vmatprep.subr.msk.bf16.mxu1 %vm202_vm0, %v20669_v24  ;;  %v20710_v27 = vld [vmem:[#allocation6 + $0x328] ss:$16 sps:$4 sm:$0x3f]   ;;  %v7419_v24 = vsel %vm202_vm0, %v20709_v52, 0  ;;  %v20752_v52 = vld [vmem:[#allocation6 + $0x40c] ss:$16 sps:$4 sm:$0xff]  }
 0x4c6   :  { %18064 = vmatprep.subr.msk.bf16.mxu0 %vm202_vm0, %v20671_v13  ;;  %7019 = vmatprep.mubr.bf16.mxu1 %v21960_v0  ;;  %v7425_v13 = vsel %vm202_vm0, %v20710_v27, 0  ;;  %v7822_v27 = vrot.slane %v22556_v60, 4 }
 0x4c7   :  { %7060 = vmatprep.mubr.bf16.mxu0 %v21960_v0 }
 0x4c8   :  { %6990 = vmatpush1.bf16.msra.mxu1 %v6976_v11  ;;  %v7378_v11 = vrot.slane %v22552_v62, 2 }
 0x4c9   :  { %7031 = vmatpush1.bf16.msra.mxu0 %v6982_v45  ;;  %7134 = vmatprep.subr.bf16.mxu1 %v20677_v9  ;;  %v20711_v9 = vld [vmem:[#allocation6 + $0x340] ss:$16 sps:$4 sm:$0xff]   ;;  %v20714_v45 = vld [vmem:[#allocation6 + $0x348] ss:$16 sps:$4 sm:$0xff]  }
 0x4ca   :  { %7175 = vmatprep.subr.bf16.mxu0 %v20680_v42  ;;  %v20717_v42 = vld [vmem:[#allocation6 + $0x364] ss:$16 sps:$4 sm:$0x3f]  }
 0x4cf   :  { %18063 = vmatmul.mubr.msk.bf16.vlgmr.msra.gmra.mrb[32].mxu1 %vm195_vm2, %v6935_v17 }
 0x4d0   :  { %18065 = vmatmul.mubr.msk.bf16.vlgmr.msra.gmra.mrb[16].mxu0 %vm195_vm2, %v6935_v17  ;;  %7135 = vmatpush1.bf16.msra.mxu1 %v20675_v26  ;;  %v20719_v17 = vld [vmem:[#allocation6 + $0x36c] ss:$16 sps:$4 sm:$0x3f]   ;;  %v20722_v26 = vld [vmem:[#allocation6 + $0x368] ss:$16 sps:$4 sm:$0x3f]  }
 0x4d1   :  { %7176 = vmatpush1.bf16.msra.mxu0 %v20678_v47  ;;  %18074 = vmatprep.subr.msk.bf16.mxu1 %vm202_vm0, %v20681_v18  ;;  %v7568_v47 = vsel %vm202_vm0, %v20721_v16, 0  ;;  %v20725_v18 = vld [vmem:[#allocation6 + $0x384] ss:$16 sps:$4 sm:$0xff]   ;;  %v7574_v20 = vsel %vm202_vm0, %v20722_v26, 0  ;;  %v20764_v16 = vld [vmem:[#allocation6 + $0x44c] ss:$16 sps:$4 sm:$0xff]  }
 0x4d2   :  { %18076 = vmatprep.subr.msk.bf16.mxu0 %vm202_vm0, %v20683_v22  ;;  %7166 = vmatprep.mubr.bf16.mxu1 %v21960_v0  ;;  %v20728_v22 = vld [vmem:[#allocation6 + $0x38c] ss:$16 sps:$4 sm:$0xff]   ;;  %v20762_v26 = vld [vmem:[#allocation6 + $0x448] ss:$16 sps:$4 sm:$0xff]  }
 0x4d3   :  { %7207 = vmatprep.mubr.bf16.mxu0 %v21960_v0 }
 0x4d4   :  { %7137 = vmatpush1.bf16.msra.mxu1 %v7123_v31  ;;  %v7526_v31 = vrot.slane %v22556_v60, 3 }
 0x4d5   :  { %7178 = vmatpush1.bf16.msra.mxu0 %v7129_v33  ;;  %7283 = vmatprep.subr.bf16.mxu1 %v20689_v32  ;;  %v20723_v33 = vld [vmem:[#allocation6 + $0x380] ss:$16 sps:$4 sm:$0xff]  }
 0x4d6   :  { %7324 = vmatprep.subr.bf16.mxu0 %v20692_v40  ;;  %v7527_v32 = vor.u32 %v7526_v31, %v7525_v25  ;;  %v20726_v40 = vld [vmem:[#allocation6 + $0x388] ss:$16 sps:$4 sm:$0xff]   ;;  %v20773_v31 = vld [vmem:[#allocation6 + $0x484] ss:$16 sps:$4 sm:$0xff]  }
 0x4db   :  { %18075 = vmatmul.mubr.msk.bf16.vlgmr.msra.gmra.mrb[32].mxu1 %vm195_vm2, %v7082_v43 }
 0x4dc   :  { %18077 = vmatmul.mubr.msk.bf16.vlgmr.msra.gmra.mrb[16].mxu0 %vm195_vm2, %v7082_v43  ;;  %7284 = vmatpush1.bf16.msra.mxu1 %v20687_v50  ;;  %v20729_v43 = vld [vmem:[#allocation6 + $0x3a4] ss:$16 sps:$4 sm:$0x3f]   ;;  %v20733_v50 = vld [vmem:[#allocation6 + $0x3a0] ss:$16 sps:$4 sm:$0x3f]  }
 0x4dd   :  { %7325 = vmatpush1.bf16.msra.mxu0 %v20690_v10  ;;  %18086 = vmatprep.subr.msk.bf16.mxu1 %vm202_vm0, %v20693_v44  ;;  %v20731_v10 = vld [vmem:[#allocation6 + $0x3ac] ss:$16 sps:$4 sm:$0x3f]   ;;  %v20734_v44 = vld [vmem:[#allocation6 + $0x3a8] ss:$16 sps:$4 sm:$0x3f]  }
 0x4de   :  { %18088 = vmatprep.subr.msk.bf16.mxu0 %vm202_vm0, %v20695_v46  ;;  %7315 = vmatprep.mubr.bf16.mxu1 %v21960_v0  ;;  %v7715_v30 = vsel %vm202_vm0, %v20733_v50, 0  ;;  %v20737_v46 = vld [vmem:[#allocation6 + $0x3c4] ss:$16 sps:$4 sm:$0xff]   ;;  %v7721_v55 = vsel %vm202_vm0, %v20734_v44, 0 }
 0x4df   :  { %7356 = vmatprep.mubr.bf16.mxu0 %v21960_v0  ;;  %v20781_v50 = vld [vmem:[#allocation6 + $0x4a0] ss:$16 sps:$4 sm:$0x3f]   ;;  %v20782_v44 = vld [vmem:[#allocation6 + $0x4a8] ss:$16 sps:$4 sm:$0x3f]  }
 0x4e0   :  { %7286 = vmatpush1.bf16.msra.mxu1 %v7272_v12  ;;  %v20740_v12 = vld [vmem:[#allocation6 + $0x3cc] ss:$16 sps:$4 sm:$0xff]  }
 0x4e1   :  { %7327 = vmatpush1.bf16.msra.mxu0 %v7278_v51  ;;  %7430 = vmatprep.subr.bf16.mxu1 %v20701_v8  ;;  %v7674_v8 = vrot.slane %v22552_v62, 3  ;;  %v20735_v51 = vld [vmem:[#allocation6 + $0x3c0] ss:$16 sps:$4 sm:$0xff]  }
 0x4e2   :  { %7471 = vmatprep.subr.bf16.mxu0 %v20704_v59  ;;  %v20738_v59 = vld [vmem:[#allocation6 + $0x3c8] ss:$16 sps:$4 sm:$0xff]  }
 0x4e7   :  { %18087 = vmatmul.mubr.msk.bf16.vlgmr.msra.gmra.mrb[32].mxu1 %vm195_vm2, %v7231_v14 }
 0x4e8   :  { %18089 = vmatmul.mubr.msk.bf16.vlgmr.msra.gmra.mrb[16].mxu0 %vm195_vm2, %v7231_v14  ;;  %7431 = vmatpush1.bf16.msra.mxu1 %v20699_v15  ;;  %v20743_v14 = vld [vmem:[#allocation6 + $0x3ec] ss:$16 sps:$4 sm:$0x3f]   ;;  %v20746_v15 = vld [vmem:[#allocation6 + $0x3e8] ss:$16 sps:$4 sm:$0x3f]  }
 0x4e9   :  { %7472 = vmatpush1.bf16.msra.mxu0 %v20702_v29  ;;  %18098 = vmatprep.subr.msk.bf16.mxu1 %vm202_vm0, %v20705_v2  ;;  %v7864_v29 = vsel %vm202_vm0, %v20745_v5, 0  ;;  %v20749_v2 = vld [vmem:[#allocation6 + $0x404] ss:$16 sps:$4 sm:$0xff]   ;;  %v7870_v62 = vsel %vm202_vm0, %v20746_v15, 0 }
 0x4ea   :  { %18100 = vmatprep.subr.msk.bf16.mxu0 %vm202_vm0, %v20707_v54  ;;  %7462 = vmatprep.mubr.bf16.mxu1 %v21960_v0  ;;  %v7821_v54 = vrot.slane %v22566_v57, 3  ;;  %v20761_v57 = vld [vmem:[#allocation6 + $0x444] ss:$16 sps:$4 sm:$0xff]   ;;  %v20794_v5 = vld [vmem:[#allocation6 + $0x4e8] ss:$16 sps:$4 sm:$0x3f]  }
 0x4eb   :  { %7503 = vmatprep.mubr.bf16.mxu0 %v21960_v0  ;;  %v20797_v15 = vld [vmem:[#allocation6 + $0x504] ss:$16 sps:$4 sm:$0xff]  }
 0x4ec   :  { %7433 = vmatpush1.bf16.msra.mxu1 %v7419_v24  ;;  %v7823_v24 = vor.u32 %v7822_v27, %v7821_v54  ;;  %v20798_v54 = vld [vmem:[#allocation6 + $0x508] ss:$16 sps:$4 sm:$0xff]   ;;  %v18198_v27 = vld [vmem:[%s23308_s0 + $0x10] sm:$0xf] }
 0x4ed   :  { %7474 = vmatpush1.bf16.msra.mxu0 %v7425_v13  ;;  %7579 = vmatprep.subr.bf16.mxu1 %v20713_v23  ;;  %v20747_v23 = vld [vmem:[#allocation6 + $0x400] ss:$16 sps:$4 sm:$0xff]   ;;  %v20750_v13 = vld [vmem:[#allocation6 + $0x408] ss:$16 sps:$4 sm:$0xff]  }
 0x4ee   :  { %7620 = vmatprep.subr.bf16.mxu0 %v20716_v21  ;;  %v20753_v21 = vld [vmem:[#allocation6 + $0x424] ss:$16 sps:$4 sm:$0x3f]  }
 0x4f3   :  { %18099 = vmatmul.mubr.msk.bf16.vlgmr.msra.gmra.mrb[32].mxu1 %vm195_vm2, %v7378_v11 }
 0x4f4   :  { %18101 = vmatmul.mubr.msk.bf16.vlgmr.msra.gmra.mrb[16].mxu0 %vm195_vm2, %v7378_v11  ;;  %7580 = vmatpush1.bf16.msra.mxu1 %v20711_v9  ;;  %v20757_v11 = vld [vmem:[#allocation6 + $0x420] ss:$16 sps:$4 sm:$0x3f]   ;;  %v20755_v9 = vld [vmem:[#allocation6 + $0x42c] ss:$16 sps:$4 sm:$0x3f]  }
 0x4f5   :  { %7621 = vmatpush1.bf16.msra.mxu0 %v20714_v45  ;;  %18110 = vmatprep.subr.msk.bf16.mxu1 %vm202_vm0, %v20717_v42  ;;  %v20758_v45 = vld [vmem:[#allocation6 + $0x428] ss:$16 sps:$4 sm:$0x3f]   ;;  %v8010_v60 = vsel %vm202_vm0, %v20757_v11, 0 }
 0x4f6   :  { %18112 = vmatprep.subr.msk.bf16.mxu0 %vm202_vm0, %v20719_v17  ;;  %7611 = vmatprep.mubr.bf16.mxu1 %v21960_v0  ;;  %v8016_v42 = vsel %vm202_vm0, %v20758_v45, 0  ;;  %v20759_v17 = vld [vmem:[#allocation6 + $0x440] ss:$16 sps:$4 sm:$0xff]   ;;  %v22682_v45 = vld [vmem:[%s23308_s0 + $0x18] sm:$0xf] }
 0x4f7   :  { %7652 = vmatprep.mubr.bf16.mxu0 %v21960_v0 }
 0x4f8   :  { %7582 = vmatpush1.bf16.msra.mxu1 %v7568_v47  ;;  %v20765_v47 = vld [vmem:[#allocation6 + $0x464] ss:$16 sps:$4 sm:$0x3f]  }
 0x4f9   :  { %7623 = vmatpush1.bf16.msra.mxu0 %v7574_v20  ;;  %7726 = vmatprep.subr.bf16.mxu1 %v20725_v18  ;;  %v20769_v18 = vld [vmem:[#allocation6 + $0x460] ss:$16 sps:$4 sm:$0x3f]   ;;  %v20767_v20 = vld [vmem:[#allocation6 + $0x46c] ss:$16 sps:$4 sm:$0x3f]  }
 0x4fa   :  { %7767 = vmatprep.subr.bf16.mxu0 %v20728_v22  ;;  %v20770_v22 = vld [vmem:[#allocation6 + $0x468] ss:$16 sps:$4 sm:$0x3f]   ;;  %v8153_v25 = vsel %vm202_vm0, %v20769_v18, 0 }
 0x4ff   :  { %18111 = vmatmul.mubr.msk.bf16.vlgmr.msra.gmra.mrb[32].mxu1 %vm195_vm2, %v7527_v32 }
 0x500   :  { %18113 = vmatmul.mubr.msk.bf16.vlgmr.msra.gmra.mrb[16].mxu0 %vm195_vm2, %v7527_v32  ;;  %7727 = vmatpush1.bf16.msra.mxu1 %v20723_v33  ;;  %v8159_v32 = vsel %vm202_vm0, %v20770_v22, 0  ;;  %v20776_v33 = vld [vmem:[#allocation6 + $0x48c] ss:$16 sps:$4 sm:$0xff]   ;;  %v20812_v22 = vld [vmem:[#allocation2 + $0x90] ss:$24 sps:$4 sm:$0x3f]  }
 0x501   :  { %7768 = vmatpush1.bf16.msra.mxu0 %v20726_v40  ;;  %18122 = vmatprep.subr.msk.bf16.mxu1 %vm202_vm0, %v20729_v43  ;;  %v20774_v40 = vld [vmem:[#allocation6 + $0x488] ss:$16 sps:$4 sm:$0xff]   ;;  %v20777_v43 = vld [vmem:[#allocation6 + $0x4a4] ss:$16 sps:$4 sm:$0x3f]  }
 0x502   :  { %18124 = vmatprep.subr.msk.bf16.mxu0 %vm202_vm0, %v20731_v10  ;;  %7758 = vmatprep.mubr.bf16.mxu1 %v21960_v0  ;;  %v20779_v10 = vld [vmem:[#allocation6 + $0x4ac] ss:$16 sps:$4 sm:$0x3f]  }
 0x503   :  { %7799 = vmatprep.mubr.bf16.mxu0 %v21960_v0 }
 0x504   :  { %7729 = vmatpush1.bf16.msra.mxu1 %v7715_v30  ;;  %v8296_v30 = vsel %vm202_vm0, %v20781_v50, 0  ;;  %v20835_v50 = vld [vmem:[#allocation2 + $0x14] ss:$24 sps:$4 sm:$0xff]  }
 0x505   :  { %7770 = vmatpush1.bf16.msra.mxu0 %v7721_v55  ;;  %7875 = vmatprep.subr.bf16.mxu1 %v20737_v46  ;;  %v20785_v46 = vld [vmem:[#allocation6 + $0x4c4] ss:$16 sps:$4 sm:$0xff]   ;;  %v8302_v55 = vsel %vm202_vm0, %v20782_v44, 0  ;;  %v20815_v44 = vld [vmem:[#allocation2 + $0x68] ss:$24 sps:$4 sm:$0xff]  }
 0x506   :  { %7916 = vmatprep.subr.bf16.mxu0 %v20740_v12  ;;  %v20788_v12 = vld [vmem:[#allocation6 + $0x4cc] ss:$16 sps:$4 sm:$0xff]  }
 0x50b   :  { %18123 = vmatmul.mubr.msk.bf16.vlgmr.msra.gmra.mrb[32].mxu1 %vm195_vm2, %v7674_v8 }
 0x50c   :  { %18125 = vmatmul.mubr.msk.bf16.vlgmr.msra.gmra.mrb[16].mxu0 %vm195_vm2, %v7674_v8  ;;  %7876 = vmatpush1.bf16.msra.mxu1 %v20735_v51  ;;  %v20786_v8 = vld [vmem:[#allocation6 + $0x4c8] ss:$16 sps:$4 sm:$0xff]   ;;  %v20789_v51 = vld [vmem:[#allocation6 + $0x4e4] ss:$16 sps:$4 sm:$0x3f]  }
 0x50d   :  { %7917 = vmatpush1.bf16.msra.mxu0 %v20738_v59  ;;  %18134 = vmatprep.subr.msk.bf16.mxu1 %vm202_vm0, %v20741_v1  ;;  %v20793_v59 = vld [vmem:[#allocation6 + $0x4e0] ss:$16 sps:$4 sm:$0x3f]   ;;  %v20791_v1 = vld [vmem:[#allocation6 + $0x4ec] ss:$16 sps:$4 sm:$0x3f]  }
 0x50e   :  { %18136 = vmatprep.subr.msk.bf16.mxu0 %vm202_vm0, %v20743_v14  ;;  %7907 = vmatprep.mubr.bf16.mxu1 %v21960_v0  ;;  %v8439_v14 = vsel %vm202_vm0, %v20793_v59, 0  ;;  %v20826_v59 = vld [vmem:[#allocation2 + $0x4] ss:$24 sps:$4 sm:$0xff]  }
 0x50f   :  { %7948 = vmatprep.mubr.bf16.mxu0 %v21960_v0 }
 0x510   :  { %7878 = vmatpush1.bf16.msra.mxu1 %v7864_v29  ;;  %v8445_v29 = vsel %vm202_vm0, %v20794_v5, 0 }
 0x511   :  { %7919 = vmatpush1.bf16.msra.mxu0 %v7870_v62  ;;  %8021 = vmatprep.subr.bf16.mxu1 %v20749_v2  ;;  %v20800_v2 = vld [vmem:[#allocation6 + $0x50c] ss:$16 sps:$4 sm:$0xff]   ;;  %v20801_v62 = vld [vmem:[#allocation6 + $0x524] ss:$16 sps:$4 sm:$0x3f]  }
 0x512   :  { %8062 = vmatprep.subr.bf16.mxu0 %v20752_v52  ;;  %v20805_v52 = vld [vmem:[#allocation6 + $0x520] ss:$16 sps:$4 sm:$0x3f]  }
 0x517   :  { %18135 = vmatmul.mubr.msk.bf16.vlgmr.msra.gmra.mrb[32].mxu1 %vm195_vm2, %v7823_v24 }
 0x518   :  { %18137 = vmatmul.mubr.msk.bf16.vlgmr.msra.gmra.mrb[16].mxu0 %vm195_vm2, %v7823_v24  ;;  %8022 = vmatpush1.bf16.msra.mxu1 %v20747_v23  ;;  %v18199_v24 = vld [vmem:[%s23308_s0 + $0x14] sm:$0xf]  ;;  %v20803_v23 = vld [vmem:[#allocation6 + $0x52c] ss:$16 sps:$4 sm:$0x3f]  }
 0x519   :  { %8063 = vmatpush1.bf16.msra.mxu0 %v20750_v13  ;;  %18146 = vmatprep.subr.msk.bf16.mxu1 %vm202_vm0, %v20753_v21  ;;  %v20806_v13 = vld [vmem:[#allocation6 + $0x528] ss:$16 sps:$4 sm:$0x3f]   ;;  %v8582_v21 = vsel %vm202_vm0, %v20805_v52, 0  ;;  %v22676_v11 = vcombine.low %v18198_v27, %v18199_v24  ;;  %v20838_v27 = vld [vmem:[#allocation2 + $0xc] ss:$24 sps:$4 sm:$0xff]  }
 0x51a   :  { %18148 = vmatprep.subr.msk.bf16.mxu0 %vm202_vm0, %v20755_v9  ;;  %8053 = vmatprep.mubr.bf16.mxu1 %v21960_v0  ;;  %v20809_v9 = vld [vmem:[#allocation2 + $0x64] ss:$24 sps:$4 sm:$0xff]   ;;  %v20854_v52 = vld [vmem:[#allocation2 + $0x100] ss:$24 sps:$4 sm:$0x3f]  }
 0x51b   :  { %8094 = vmatprep.mubr.bf16.mxu0 %v21960_v0  ;;  %v9351_v24 = vsel %vm202_vm0, %v20854_v52, 0  ;;  %v20873_v52 = vld [vmem:[#allocation2 + $0x120] ss:$24 sps:$4 sm:$0xff]  }
 0x51c   :  { %8024 = vmatpush1.bf16.msra.mxu1 %v8010_v60  ;;  %v18201_v60 = vld [vmem:[%s23308_s0 + $0x1c] sm:$0x3] }
 0x51d   :  { %8065 = vmatpush1.bf16.msra.mxu0 %v8016_v42  ;;  %8164 = vmatprep.subr.bf16.mxu1 %v20761_v57  ;;  %v20823_v57 = vld [vmem:[#allocation2 + $0x74] ss:$24 sps:$4 sm:$0xff]   ;;  %v22692_v42 = vcombine.low %v22682_v45, %v18201_v60  ;;  %v20836_v60 = vld [vmem:[#allocation2 + $0x8] ss:$24 sps:$4 sm:$0xff]  }
 0x51e   :  { %8205 = vmatprep.subr.bf16.mxu0 %v20764_v16  ;;  %v22695_v16 = vshll.u32 %v22676_v11, 16 }
 0x51f   :  { %v8794_v18 = vshll.u32 %v22692_v42, 16 }
 0x523   :  { %18147 = vmatmul.mubr.msk.bf16.vlgmr.msra.gmra.mrb[32].mxu1 %vm195_vm2, %v22549_v6 }
 0x524   :  { %18149 = vmatmul.mubr.msk.bf16.vlgmr.msra.gmra.mrb[16].mxu0 %vm195_vm2, %v22549_v6  ;;  %8165 = vmatpush1.bf16.msra.mxu1 %v20759_v17  ;;  %v20771_v6 = vld [vmem:[#allocation6 + $0x480] ss:$16 sps:$4 sm:$0xff]  }
 0x525   :  { %8206 = vmatpush1.bf16.msra.mxu0 %v20762_v26  ;;  %18158 = vmatprep.subr.msk.bf16.mxu1 %vm202_vm0, %v20765_v47  ;;  %v20807_v17 = vld [vmem:[#allocation2 + $0x60] ss:$24 sps:$4 sm:$0xff]   ;;  %v22698_v26 = vshrl.u32 %v22676_v11, 16  ;;  %v8791_v47 = vrot.slane %v22695_v16, 1 }
 0x526   :  { %18160 = vmatprep.subr.msk.bf16.mxu0 %vm202_vm0, %v20767_v20  ;;  %8196 = vmatprep.mubr.bf16.mxu1 %v21960_v0  ;;  %v20810_v20 = vld [vmem:[#allocation2 + $0x94] ss:$24 sps:$4 sm:$0x3f]  }
 0x527   :  { %8237 = vmatprep.mubr.bf16.mxu0 %v21960_v0 }
 0x528   :  { %8167 = vmatpush1.bf16.msra.mxu1 %v8153_v25  ;;  %v20821_v25 = vld [vmem:[#allocation2 + $0x70] ss:$24 sps:$4 sm:$0xff]  }
 0x529   :  { %8208 = vmatpush1.bf16.msra.mxu0 %v8159_v32  ;;  %8307 = vmatprep.subr.bf16.mxu1 %v20773_v31  ;;  %v20827_v31 = vld [vmem:[#allocation2 + $0xa4] ss:$24 sps:$4 sm:$0x3f]   ;;  %v20829_v32 = vld [vmem:[#allocation2 + $0xa0] ss:$24 sps:$4 sm:$0x3f]  }
 0x52a   :  { %8348 = vmatprep.subr.bf16.mxu0 %v20776_v33  ;;  %v22707_v33 = vor.u32 %v8791_v47, %v22698_v26  ;;  %v20864_v47 = vld [vmem:[#allocation2 + $0x164] ss:$24 sps:$4 sm:$0x3f]  }
 0x52f   :  { %18159 = vmatmul.mubr.msk.bf16.vlgmr.msra.gmra.mrb[32].mxu1 %vm195_vm2, %v22089_v35 }
 0x530   :  { %18161 = vmatmul.mubr.msk.bf16.vlgmr.msra.gmra.mrb[16].mxu0 %vm195_vm2, %v22089_v35  ;;  %8308 = vmatpush1.bf16.msra.mxu1 %v20771_v6  ;;  %v20783_v35 = vld [vmem:[#allocation6 + $0x4c0] ss:$16 sps:$4 sm:$0xff]   ;;  %v8796_v6 = vrot.slane %v8794_v18, 1 }
 0x531   :  { %8349 = vmatpush1.bf16.msra.mxu0 %v20774_v40  ;;  %18170 = vmatprep.subr.msk.bf16.mxu1 %vm202_vm0, %v20777_v43  ;;  %v8862_v40 = vsel %vm202_vm0, %v20812_v22, 0  ;;  %v20817_v43 = vld [vmem:[#allocation2 + $0x6c] ss:$24 sps:$4 sm:$0xff]  }
 0x532   :  { %18172 = vmatprep.subr.msk.bf16.mxu0 %vm202_vm0, %v20779_v10  ;;  %8339 = vmatprep.mubr.bf16.mxu1 %v21960_v0  ;;  %v8797_v10 = vsel %vm125_vm1, %v22707_v33, %v8796_v6 }
 0x533   :  { %8380 = vmatprep.mubr.bf16.mxu0 %v21960_v0 }
 0x534   :  { %8310 = vmatpush1.bf16.msra.mxu1 %v8296_v30  ;;  %v20818_v30 = vld [vmem:[#allocation2 + $0x9c] ss:$24 sps:$4 sm:$0x3f]  }
 0x535   :  { %8351 = vmatpush1.bf16.msra.mxu0 %v8302_v55  ;;  %8450 = vmatprep.subr.bf16.mxu1 %v20785_v46  ;;  %v20820_v46 = vld [vmem:[#allocation2 + $0x98] ss:$24 sps:$4 sm:$0x3f]   ;;  %v8798_v55 = vshrl.u32 %v22692_v42, 16 }
 0x536   :  { %8491 = vmatprep.subr.bf16.mxu0 %v20788_v12  ;;  %v20833_v12 = vld [vmem:[#allocation2 + $0x10] ss:$24 sps:$4 sm:$0xff]  }
 0x53b   :  { %18171 = vmatmul.mubr.msk.bf16.vlgmr.msra.gmra.mrb[32].mxu1 %vm195_vm2, %v22118_v49 }
 0x53c   :  { %18173 = vmatmul.mubr.msk.bf16.vlgmr.msra.gmra.mrb[16].mxu0 %vm195_vm2, %v22118_v49  ;;  %8451 = vmatpush1.bf16.msra.mxu1 %v20783_v35  ;;  %v20795_v49 = vld [vmem:[#allocation6 + $0x500] ss:$16 sps:$4 sm:$0xff]   ;;  %v20839_v35 = vld [vmem:[#allocation2 + $0x44] ss:$24 sps:$4 sm:$0x3f]  }
 0x53d   :  { %8492 = vmatpush1.bf16.msra.mxu0 %v20786_v8  ;;  %18182 = vmatprep.subr.msk.bf16.mxu1 %vm202_vm0, %v20789_v51  ;;  %v20842_v8 = vld [vmem:[#allocation2 + $0x40] ss:$24 sps:$4 sm:$0x3f]   ;;  %v8868_v51 = vsel %vm202_vm0, %v20820_v46, 0 }
 0x53e   :  { %18184 = vmatprep.subr.msk.bf16.mxu0 %vm202_vm0, %v20791_v1  ;;  %8482 = vmatprep.mubr.bf16.mxu1 %v21960_v0  ;;  %v22728_v1 = vor.u32 %v8798_v55, %v8796_v6  ;;  %v9105_v5 = vsel %vm202_vm0, %v20842_v8, 0  ;;  %v9543_v6 = vrot.slane %v8794_v18, 2 }
 0x53f   :  { %8523 = vmatprep.mubr.bf16.mxu0 %v21960_v0 }
 0x540   :  { %8453 = vmatpush1.bf16.msra.mxu1 %v8439_v14  ;;  %v20848_v14 = vld [vmem:[#allocation2 + $0xd4] ss:$24 sps:$4 sm:$0xff]  }
 0x541   :  { %8494 = vmatpush1.bf16.msra.mxu0 %v8445_v29  ;;  %8593 = vmatprep.subr.bf16.mxu1 %v20797_v15  ;;  %v20824_v15 = vld [vmem:[#allocation2] ss:$24 sps:$4 sm:$0xff]   ;;  %v20830_v29 = vld [vmem:[#allocation2 + $0x34] ss:$24 sps:$4 sm:$0x3f]  }
 0x542   :  { %8634 = vmatprep.subr.bf16.mxu0 %v20800_v2  ;;  %v20832_v2 = vld [vmem:[#allocation2 + $0x30] ss:$24 sps:$4 sm:$0x3f]  }
 0x547   :  { %18183 = vmatmul.mubr.msk.bf16.vlgmr.msra.gmra.mrb[32].mxu1 %vm195_vm2, %v22150_v3 }
 0x548   :  { %18185 = vmatmul.mubr.msk.bf16.vlgmr.msra.gmra.mrb[16].mxu0 %vm195_vm2, %v22150_v3  ;;  %8594 = vmatpush1.bf16.msra.mxu1 %v20795_v49  ;;  %v8588_v3 = vsel %vm202_vm0, %v20806_v13, 0  ;;  %v20846_v49 = vld [vmem:[#allocation2 + $0xd0] ss:$24 sps:$4 sm:$0xff]   ;;  %v18225_v13 = vcombine.low %v22682_v45, %v22682_v45 }
 0x549   :  { %8635 = vmatpush1.bf16.msra.mxu0 %v20798_v54  ;;  %18194 = vmatprep.subr.msk.bf16.mxu1 %vm202_vm0, %v20801_v62  ;;  %v20852_v62 = vld [vmem:[#allocation2 + $0x104] ss:$24 sps:$4 sm:$0x3f]   ;;  %v9093_v54 = vsel %vm202_vm0, %v20832_v2, 0 }
 0x54a   :  { %18196 = vmatprep.subr.msk.bf16.mxu0 %vm202_vm0, %v20803_v23  ;;  %8625 = vmatprep.mubr.bf16.mxu1 %v21960_v0  ;;  %v20860_v23 = vld [vmem:[#allocation2 + $0x134] ss:$24 sps:$4 sm:$0xff]   ;;  %v20869_v2 = vld [vmem:[#allocation2 + $0xf8] ss:$24 sps:$4 sm:$0x3f]  }
 0x54b   :  { %8666 = vmatprep.mubr.bf16.mxu0 %v21960_v0 }
 0x54c   :  { %8596 = vmatpush1.bf16.msra.mxu1 %v8582_v21  ;;  %v22755_v21 = vrot.slane %v22676_v11, 1 }
 0x54d   :  { %8637 = vmatpush1.bf16.msra.mxu0 %v8588_v3  ;;  %8879 = vmatprep.subr.bf16.mxu1 %v20809_v9  ;;  %v22758_v9 = vrot.slane %v22692_v42, 1  ;;  %v20843_v3 = vld [vmem:[#allocation2 + $0x3c] ss:$24 sps:$4 sm:$0x3f]  }
 0x54e   :  { %8981 = vmatprep.subr.bf16.mxu0 %v20823_v57  ;;  %v20845_v57 = vld [vmem:[#allocation2 + $0x38] ss:$24 sps:$4 sm:$0x3f]  }
 0x54f   :  { %v22763_v45 = vsel %vm618_vm3, %v22755_v21, %v22758_v9  ;;  %v9099_v22 = vsel %vm202_vm0, %v20845_v57, 0 }
 0x553   :  { %18195 = vmatmul.mubr.msk.bf16.vlgmr.msra.gmra.mrb[32].mxu1 %vm195_vm2, %v22176_v19 }
 0x554   :  { %18197 = vmatmul.mubr.msk.bf16.vlgmr.msra.gmra.mrb[16].mxu0 %vm195_vm2, %v22176_v19  ;;  %8880 = vmatpush1.bf16.msra.mxu1 %v20807_v17  ;;  %v8874_v19 = vsel %vm202_vm0, %v20829_v32, 0  ;;  %v20858_v17 = vld [vmem:[#allocation2 + $0x130] ss:$24 sps:$4 sm:$0xff]   ;;  %v20872_v32 = vld [vmem:[#allocation2 + $0x194] ss:$24 sps:$4 sm:$0xff]  }
 0x555   :  { %18216 = vmatprep.subr.msk.bf16.mxu1 %vm202_vm0, %v20810_v20  ;;  %8911 = vmatprep.mubr.bf16.mxu1 %v21960_v0  ;;  %v20866_v20 = vld [vmem:[#allocation2 + $0x160] ss:$24 sps:$4 sm:$0x3f]  }
 0x556   :  { %8982 = vmatpush1.bf16.msra.mxu0 %v20821_v25  ;;  %9013 = vmatprep.mubr.bf16.mxu0 %v21960_v0  ;;  %v20851_v25 = vld [vmem:[#allocation2 + $0xc4] ss:$24 sps:$4 sm:$0xff]  }
 0x557   :  { %18222 = vmatprep.subr.msk.bf16.mxu0 %vm202_vm0, %v20827_v31  ;;  %v9619_v31 = vsel %vm202_vm0, %v20866_v20, 0  ;;  %v20893_v20 = vld [vmem:[#allocation2 + $0x1b0] ss:$24 sps:$4 sm:$0x3f]  }
 0x558   :  { %8882 = vmatpush1.bf16.msra.mxu1 %v8862_v40  ;;  %v9542_v40 = vrot.slane %v8798_v55, 1  ;;  %v20870_v55 = vld [vmem:[#allocation2 + $0x190] ss:$24 sps:$4 sm:$0xff]  }
 0x559   :  { %8930 = vmatprep.subr.bf16.mxu1 %v20817_v43  ;;  %v9539_v43 = vrot.slane %v22698_v26, 1 }
 0x55a   :  { %8984 = vmatpush1.bf16.msra.mxu0 %v8874_v19  ;;  %v9540_v19 = vrot.slane %v22695_v16, 2 }
 0x55b   :  { %18217 = vmatmul.mubr.msk.bf16.vlgmr.msra.gmra.mrb[36].mxu1 %vm195_vm2, %v8797_v10  ;;  %9212 = vmatprep.subr.bf16.mxu0 %v20835_v50  ;;  %v22785_v50 = vor.u32 %v9543_v6, %v9542_v40  ;;  %v20899_v6 = vld [vmem:[#allocation2 + $0x1b8] ss:$24 sps:$4 sm:$0x3f]  }
 0x55c   :  { %8921 = vmatprep.mubr.bf16.mxu1 %v21960_v0  ;;  %8931 = vmatpush1.bf16.msra.mxu1 %v20815_v44  ;;  %v22788_v18 = vor.u32 %v9540_v19, %v9539_v43  ;;  %v20855_v44 = vld [vmem:[#allocation2 + $0xf4] ss:$24 sps:$4 sm:$0x3f]   ;;  %v9877_v40 = vsel %vm202_vm0, %v20899_v6, 0  ;;  %v20915_v6 = vld [vmem:[#allocation4 + $0x348] ss:$16 sps:$4 sm:$0xff]  }
 0x55d   :  { %18219 = vmatprep.subr.msk.bf16.mxu1 %vm202_vm0, %v20818_v30  ;;  %18223 = vmatmul.mubr.msk.bf16.vlgmr.msra.gmra.mrb[20].mxu0 %vm195_vm2, %v8797_v10  ;;  %v20857_v30 = vld [vmem:[#allocation2 + $0xf0] ss:$24 sps:$4 sm:$0x3f]  }
 0x55e   :  { %9023 = vmatprep.mubr.bf16.mxu0 %v21960_v0  ;;  %9213 = vmatpush1.bf16.msra.mxu0 %v20833_v12  ;;  %v22793_v46 = vsel %vm884_vm4, %v22788_v18, %v22785_v50  ;;  %v20876_v12 = vld [vmem:[#allocation2 + $0x1c4] ss:$24 sps:$4 sm:$0x3f]   ;;  %v9339_v8 = vsel %vm202_vm0, %v20857_v30, 0 }
 0x55f   :  { %18244 = vmatprep.subr.msk.bf16.mxu0 %vm202_vm0, %v20839_v35  ;;  %v20878_v35 = vld [vmem:[#allocation2 + $0x1c0] ss:$24 sps:$4 sm:$0x3f]  }
 0x560   :  { %8933 = vmatpush1.bf16.msra.mxu1 %v8868_v51  ;;  %v20863_v51 = vld [vmem:[#allocation2 + $0xcc] ss:$24 sps:$4 sm:$0xff]  }
 0x561   :  { %9110 = vmatprep.subr.bf16.mxu1 %v20826_v59  ;;  %v9883_v59 = vsel %vm202_vm0, %v20878_v35, 0 }
 0x562   :  { %9215 = vmatpush1.bf16.msra.mxu0 %v9105_v5  ;;  %v22811_v5 = vrot.slane %v22676_v11, 2 }
 0x563   :  { %18218 = vmatmul.mubr.msk.bf16.gmra.mrb[40].mxu1 %vm195_vm2, %v22728_v1  ;;  %9458 = vmatprep.subr.bf16.mxu0 %v20848_v14  ;;  %v22814_v14 = vrot.slane %v22692_v42, 2  ;;  %v20875_v42 = vld [vmem:[#allocation2 + $0x124] ss:$24 sps:$4 sm:$0xff]  }
 0x564   :  { %8962 = vmatprep.mubr.bf16.mxu1 %v21960_v0 }
 0x565   :  { %18224 = vmatmul.mubr.msk.bf16.gmra.mrb[24].mxu0 %vm195_vm2, %v22728_v1 }
 0x566   :  { %9244 = vmatprep.mubr.bf16.mxu0 %v21960_v0 }
 0x56b   :  { %18220 = vmatmul.mubr.msk.bf16.vlgmr.msra.gmra.mrb[44].mxu1 %vm195_vm2, %v8797_v10  ;;  %v20849_v10 = vld [vmem:[#allocation2 + $0xc0] ss:$24 sps:$4 sm:$0xff]  }
 0x56c   :  { %8972 = vmatprep.mubr.bf16.mxu1 %v21960_v0  ;;  %9111 = vmatpush1.bf16.msra.mxu1 %v20824_v15  ;;  %v20861_v15 = vld [vmem:[#allocation2 + $0xc8] ss:$24 sps:$4 sm:$0xff]  }
 0x56d   :  { %18238 = vmatprep.subr.msk.bf16.mxu1 %vm202_vm0, %v20830_v29  ;;  %18245 = vmatmul.mubr.msk.bf16.vlgmr.msra.gmra.mrb[20].mxu0 %vm195_vm2, %v22676_v11  ;;  %v20867_v29 = vld [vmem:[#allocation2 + $0xfc] ss:$24 sps:$4 sm:$0x3f]  }
 0x56e   :  { %9254 = vmatprep.mubr.bf16.mxu0 %v21960_v0  ;;  %9459 = vmatpush1.bf16.msra.mxu0 %v20846_v49  ;;  %v22819_v49 = vsel %vm202_vm0, %v22811_v5, %v22814_v14 }
 0x56f   :  { %18265 = vmatprep.subr.msk.bf16.mxu0 %vm202_vm0, %v20852_v62  ;;  %v9345_v62 = vsel %vm202_vm0, %v20869_v2, 0 }
 0x570   :  { %9113 = vmatpush1.bf16.msra.mxu1 %v9093_v54  ;;  %v20879_v54 = vld [vmem:[#allocation2 + $0x154] ss:$24 sps:$4 sm:$0x3f]  }
 0x571   :  { %9161 = vmatprep.subr.bf16.mxu1 %v20838_v27  ;;  %v20881_v27 = vld [vmem:[#allocation2 + $0x150] ss:$24 sps:$4 sm:$0x3f]  }
 0x572   :  { %9461 = vmatpush1.bf16.msra.mxu0 %v9351_v24  ;;  %v9607_v24 = vsel %vm202_vm0, %v20881_v27, 0 }
 0x573   :  { %18221 = vmatmul.mubr.msk.bf16.gmra.mrb[48].mxu1 %vm195_vm2, %v22728_v1  ;;  %9726 = vmatprep.subr.bf16.mxu0 %v20860_v23  ;;  %v20884_v23 = vld [vmem:[#allocation2 + $0x12c] ss:$24 sps:$4 sm:$0xff]  }
 0x574   :  { %9142 = vmatprep.mubr.bf16.mxu1 %v21960_v0 }
 0x575   :  { %18246 = vmatmul.mubr.msk.bf16.gmra.mrb[24].mxu0 %vm195_vm2, %v18225_v13 }
 0x576   :  { %9490 = vmatprep.mubr.bf16.mxu0 %v21960_v0 }
 0x57b   :  { %18239 = vmatmul.mubr.msk.bf16.vlgmr.msra.gmra.mrb[36].mxu1 %vm195_vm2, %v22676_v11 }
 0x57c   :  { %9152 = vmatprep.mubr.bf16.mxu1 %v21960_v0  ;;  %9162 = vmatpush1.bf16.msra.mxu1 %v20836_v60  ;;  %v20885_v60 = vld [vmem:[#allocation2 + $0x15c] ss:$24 sps:$4 sm:$0x3f]  }
 0x57d   :  { %18241 = vmatprep.subr.msk.bf16.mxu1 %vm202_vm0, %v20843_v3  ;;  %18266 = vmatmul.mubr.msk.bf16.vlgmr.msra.gmra.mrb[20].mxu0 %vm195_vm2, %v22763_v45  ;;  %v20887_v3 = vld [vmem:[#allocation2 + $0x158] ss:$24 sps:$4 sm:$0x3f]  }
 0x57e   :  { %9500 = vmatprep.mubr.bf16.mxu0 %v21960_v0  ;;  %9727 = vmatpush1.bf16.msra.mxu0 %v20858_v17  ;;  %v9613_v57 = vsel %vm202_vm0, %v20887_v3, 0  ;;  %v20888_v17 = vld [vmem:[#allocation2 + $0x180] ss:$24 sps:$4 sm:$0xff]   ;;  %v20911_v3 = vld [vmem:[#allocation4 + $0x32c] ss:$16 sps:$4 sm:$0xff]  }
 0x57f   :  { %18286 = vmatprep.subr.msk.bf16.mxu0 %vm202_vm0, %v20864_v47  ;;  %v20891_v47 = vld [vmem:[#allocation2 + $0x1b4] ss:$24 sps:$4 sm:$0x3f]  }
 0x580   :  { %9164 = vmatpush1.bf16.msra.mxu1 %v9099_v22  ;;  %v9871_v22 = vsel %vm202_vm0, %v20893_v20, 0 }
 0x581   :  { %9356 = vmatprep.subr.bf16.mxu1 %v20851_v25  ;;  %v20896_v25 = vld [vmem:[#allocation2 + $0x18c] ss:$24 sps:$4 sm:$0xff]  }
 0x582   :  { %9729 = vmatpush1.bf16.msra.mxu0 %v9619_v31  ;;  %v20894_v31 = vld [vmem:[#allocation2 + $0x188] ss:$24 sps:$4 sm:$0xff]  }
 0x583   :  { %18240 = vmatmul.mubr.msk.bf16.gmra.mrb[40].mxu1 %vm195_vm2, %v18225_v13  ;;  %9990 = vmatprep.subr.bf16.mxu0 %v20872_v32  ;;  %v20897_v32 = vld [vmem:[#allocation2 + $0x1bc] ss:$24 sps:$4 sm:$0x3f]  }
 0x584   :  { %9193 = vmatprep.mubr.bf16.mxu1 %v21960_v0 }
 0x585   :  { %18267 = vmatmul.mubr.msk.bf16.gmra.mrb[24].mxu0 %vm195_vm2, %v22758_v9 }
 0x586   :  { %9758 = vmatprep.mubr.bf16.mxu0 %v21960_v0 }
 0x58b   :  { %18242 = vmatmul.mubr.msk.bf16.vlgmr.msra.gmra.mrb[44].mxu1 %vm195_vm2, %v22676_v11 }
 0x58c   :  { %9203 = vmatprep.mubr.bf16.mxu1 %v21960_v0  ;;  %9357 = vmatpush1.bf16.msra.mxu1 %v20849_v10 }
 0x58d   :  { %18259 = vmatprep.subr.msk.bf16.mxu1 %vm202_vm0, %v20855_v44  ;;  %18287 = vmatmul.mubr.msk.bf16.vlgmr.msra.gmra.mrb[20].mxu0 %vm195_vm2, %v22793_v46 }
 0x58e   :  { %9768 = vmatprep.mubr.bf16.mxu0 %v21960_v0  ;;  %9991 = vmatpush1.bf16.msra.mxu0 %v20870_v55 }
 0x58f   :  { %18307 = vmatprep.subr.msk.bf16.mxu0 %vm202_vm0, %v20876_v12 }
 0x590   :  { %9359 = vmatpush1.bf16.msra.mxu1 %v9339_v8 }
 0x591   :  { %9407 = vmatprep.subr.bf16.mxu1 %v20863_v51 }
 0x592   :  { %9993 = vmatpush1.bf16.msra.mxu0 %v9883_v59 }
 0x593   :  { %18243 = vmatmul.mubr.msk.bf16.gmra.mrb[48].mxu1 %vm195_vm2, %v18225_v13  ;;  %v20882_v13 = vld [vmem:[#allocation2 + $0x128] ss:$24 sps:$4 sm:$0xff]  }
 0x594   :  { %9388 = vmatprep.mubr.bf16.mxu1 %v21960_v0 }
 0x595   :  { %18288 = vmatmul.mubr.msk.bf16.gmra.mrb[24].mxu0 %vm195_vm2, %v22785_v50 }
 0x596   :  { %10022 = vmatprep.mubr.bf16.mxu0 %v21960_v0 }
 0x59b   :  { %18260 = vmatmul.mubr.msk.bf16.vlgmr.msra.gmra.mrb[36].mxu1 %vm195_vm2, %v22763_v45 }
 0x59c   :  { %9398 = vmatprep.mubr.bf16.mxu1 %v21960_v0  ;;  %9408 = vmatpush1.bf16.msra.mxu1 %v20861_v15 }
 0x59d   :  { %18262 = vmatprep.subr.msk.bf16.mxu1 %vm202_vm0, %v20867_v29  ;;  %18308 = vmatmul.mubr.msk.bf16.vlgmr.msra.gmra.mrb[20].mxu0 %vm195_vm2, %v22819_v49 }
 0x59e   :  { %10032 = vmatprep.mubr.bf16.mxu0 %v21960_v0 }
 0x5a0   :  { %9410 = vmatpush1.bf16.msra.mxu1 %v9345_v62 }
 0x5a1   :  { %9624 = vmatprep.subr.bf16.mxu1 %v20875_v42 }
 0x5a3   :  { %18261 = vmatmul.mubr.msk.bf16.gmra.mrb[40].mxu1 %vm195_vm2, %v22758_v9 }
 0x5a4   :  { %9439 = vmatprep.mubr.bf16.mxu1 %v21960_v0 }
 0x5a5   :  { %18309 = vmatmul.mubr.msk.bf16.gmra.mrb[24].mxu0 %vm195_vm2, %v22814_v14 }
 0x5a6   :  { %10175 = vmatprep.mubr.bf16.mxu0 %v21960_v0 }
 0x5ab   :  { %18263 = vmatmul.mubr.msk.bf16.vlgmr.msra.gmra.mrb[44].mxu1 %vm195_vm2, %v22763_v45  ;;  %v20890_v45 = vld [vmem:[#allocation2 + $0x184] ss:$24 sps:$4 sm:$0xff]  }
 0x5ac   :  { %9449 = vmatprep.mubr.bf16.mxu1 %v21960_v0  ;;  %9625 = vmatpush1.bf16.msra.mxu1 %v20873_v52  ;;  %v20903_v52 = vld [vmem:[#allocation4 + $0x308] ss:$16 sps:$4 sm:$0xff]  }
 0x5ad   :  { %18280 = vmatprep.subr.msk.bf16.mxu1 %vm202_vm0, %v20879_v54 }
 0x5b0   :  { %9627 = vmatpush1.bf16.msra.mxu1 %v9607_v24  ;;  %v20905_v24 = vld [vmem:[#allocation4 + $0x30c] ss:$16 sps:$4 sm:$0xff]  }
 0x5b1   :  { %9675 = vmatprep.subr.bf16.mxu1 %v20884_v23 }
 0x5b3   :  { %18264 = vmatmul.mubr.msk.bf16.gmra.mrb[48].mxu1 %vm195_vm2, %v22758_v9 }
 0x5b4   :  { %9656 = vmatprep.mubr.bf16.mxu1 %v21960_v0 }
 0x5bb   :  { %18281 = vmatmul.mubr.msk.bf16.vlgmr.msra.gmra.mrb[36].mxu1 %vm195_vm2, %v22793_v46 }
 0x5bc   :  { %9666 = vmatprep.mubr.bf16.mxu1 %v21960_v0  ;;  %9676 = vmatpush1.bf16.msra.mxu1 %v20882_v13 }
 0x5bd   :  { %18283 = vmatprep.subr.msk.bf16.mxu1 %vm202_vm0, %v20885_v60 }
 0x5c0   :  { %9678 = vmatpush1.bf16.msra.mxu1 %v9613_v57 }
 0x5c1   :  { %9888 = vmatprep.subr.bf16.mxu1 %v20890_v45 }
 0x5c3   :  { %18282 = vmatmul.mubr.msk.bf16.gmra.mrb[40].mxu1 %vm195_vm2, %v22785_v50 }
 0x5c4   :  { %9707 = vmatprep.mubr.bf16.mxu1 %v21960_v0 }
 0x5cb   :  { %18284 = vmatmul.mubr.msk.bf16.vlgmr.msra.gmra.mrb[44].mxu1 %vm195_vm2, %v22793_v46 }
 0x5cc   :  { %9717 = vmatprep.mubr.bf16.mxu1 %v21960_v0  ;;  %9889 = vmatpush1.bf16.msra.mxu1 %v20888_v17  ;;  %v20909_v17 = vld [vmem:[#allocation4 + $0x328] ss:$16 sps:$4 sm:$0xff]  }
 0x5cd   :  { %18301 = vmatprep.subr.msk.bf16.mxu1 %vm202_vm0, %v20891_v47 }
 0x5d0   :  { %9891 = vmatpush1.bf16.msra.mxu1 %v9871_v22 }
 0x5d1   :  { %9939 = vmatprep.subr.bf16.mxu1 %v20896_v25 }
 0x5d3   :  { %18285 = vmatmul.mubr.msk.bf16.gmra.mrb[48].mxu1 %vm195_vm2, %v22785_v50 }
 0x5d4   :  { %9920 = vmatprep.mubr.bf16.mxu1 %v21960_v0 }
 0x5db   :  { %18302 = vmatmul.mubr.msk.bf16.vlgmr.msra.gmra.mrb[36].mxu1 %vm195_vm2, %v22819_v49 }
 0x5dc   :  { %9930 = vmatprep.mubr.bf16.mxu1 %v21960_v0  ;;  %9940 = vmatpush1.bf16.msra.mxu1 %v20894_v31  ;;  %v20917_v31 = vld [vmem:[#allocation4 + $0x34c] ss:$16 sps:$4 sm:$0xff]  }
 0x5dd   :  { %18304 = vmatprep.subr.msk.bf16.mxu1 %vm202_vm0, %v20897_v32 }
 0x5e0   :  { %9942 = vmatpush1.bf16.msra.mxu1 %v9877_v40 }
 0x5e1   :  { %11200 = vmatprep.subr.bf16.mxu1 %v20905_v24 }
 0x5e3   :  { %18303 = vmatmul.mubr.msk.bf16.gmra.mrb[40].mxu1 %vm195_vm2, %v22814_v14 }
 0x5e4   :  { %9971 = vmatprep.mubr.bf16.mxu1 %v21960_v0 }
 0x5eb   :  { %18305 = vmatmul.mubr.msk.bf16.vlgmr.msra.gmra.mrb[44].mxu1 %vm195_vm2, %v22819_v49 }
 0x5ec   :  { %9981 = vmatprep.mubr.bf16.mxu1 %v21960_v0  ;;  %11201 = vmatpush1.bf16.msra.mxu1 %v20903_v52 }
 0x5ed   :  { %11202 = vmatprep.subr.bf16.mxu1 %v20911_v3 }
 0x5f0   :  { %11203 = vmatpush1.bf16.msra.mxu1 %v20909_v17 }
 0x5f1   :  { %11204 = vmatprep.subr.bf16.mxu1 %v20917_v31 }
 0x5f3   :  { %18306 = vmatmul.mubr.msk.bf16.gmra.mrb[48].mxu1 %vm195_vm2, %v22814_v14 }
 0x5f4   :  { %11205 = vmatpush1.bf16.msra.mxu1 %v20915_v6 }
 0x626   :  { %v8627_v43 = vpop.f32.mrb[32].mxu1 }
 0x627   :  { %8683 = vst [vmem:[%s23313_s5] sm:$0xff] %v8627_v43  ;;  %v8668_v19 = vpop.f32.mrb[16].mxu0  ;;  %v8629_v10 = vpop.f32.mrb[33].mxu1 }
 0x628   :  { %8685 = vst [vmem:[%s23313_s5 + $0x10] sm:$0xff] %v8668_v19  ;;  %8684 = vst [vmem:[%s23313_s5 + $0x8] sm:$0xff] %v8629_v10  ;;  %v8670_v44 = vpop.f32.mrb[17].mxu0  ;;  %v8631_v30 = vpop.f32.mrb[34].mxu1 }
 0x629   :  { %8686 = vst [vmem:[%s23313_s5 + $0x18] sm:$0xff] %v8670_v44  ;;  %v8672_v46 = vpop.f32.mrb[18].mxu0  ;;  %v8632_v55 = vpop.f32.mrb[35].mxu1 }
 0x62a   :  { %v8673_v12 = vpop.f32.mrb[19].mxu0 }
 0x670   :  { %v10024_v35 = vpop.f32.mrb[20].mxu0 }
 0x671   :  { %v10063_v8 = vmul.f32 %v10024_v35, %v22328_v28  ;;  %v10026_v51 = vpop.f32.mrb[21].mxu0 }
 0x672   :  { %v10064_v59 = vmul.f32 %v10026_v51, %v22333_v38  ;;  %v10028_v15 = vpop.f32.mrb[22].mxu0 }
 0x673   :  { %v10081_v29 = vadd.f32 %v10063_v8, %v22336_v41  ;;  %v10069_v2 = vmul.f32 %v10028_v15, %v22328_v28  ;;  %v10030_v49 = vpop.f32.mrb[23].mxu0 }
 0x674   :  { %v10082_v62 = vadd.f32 %v10064_v59, %v22343_v53  ;;  %v10070_v42 = vmul.f32 %v10030_v49, %v22333_v38 }
 0x675   :  { %v10099_v54 = vmax.f32 %v10081_v29, 0.0  ;;  %v10087_v27 = vadd.f32 %v10069_v2, %v22336_v41 }
 0x676   :  { %v10100_v23 = vmax.f32 %v10082_v62, 0.0  ;;  %v10088_v13 = vadd.f32 %v10070_v42, %v22343_v53 }
 0x677   :  { %v10105_v60 = vmax.f32 %v10087_v27, 0.0 }
 0x678   :  { %v10106_v57 = vmax.f32 %v10088_v13, 0.0  ;;  %v22892_v45 = vpop.f32.mrb[24].mxu0 }
 0x679   :  { %v22894_v47 = vpack.c.bf16 %v10105_v60, %v10099_v54  ;;  %v22896_v20 = vpop.f32.mrb[25].mxu0 }
 0x67a   :  { %v10038_v22 = vpop.f32.mrb[26].mxu0  ;;  %v22898_v25 = vpack.c.bf16 %v10106_v57, %v10100_v23 }
 0x67b   :  { %v10039_v32 = vpop.f32.mrb[27].mxu0 }
 0x6ae   :  { %v9922_v40 = vpop.f32.mrb[36].mxu1 }
 0x6af   :  { %v10059_v43 = vmul.f32 %v9922_v40, %v22280_v34  ;;  %v9924_v19 = vpop.f32.mrb[37].mxu1 }
 0x6b0   :  { %v10060_v10 = vmul.f32 %v9924_v19, %v22283_v36  ;;  %v9926_v44 = vpop.f32.mrb[38].mxu1 }
 0x6b1   :  { %v10077_v30 = vadd.f32 %v10059_v43, %v22286_v37  ;;  %v10065_v46 = vmul.f32 %v9926_v44, %v22280_v34  ;;  %v9928_v55 = vpop.f32.mrb[39].mxu1 }
 0x6b2   :  { %v10078_v12 = vadd.f32 %v10060_v10, %v22289_v39  ;;  %v10066_v35 = vmul.f32 %v9928_v55, %v22283_v36 }
 0x6b3   :  { %v10083_v8 = vadd.f32 %v10065_v46, %v22286_v37  ;;  %v10095_v59 = vmax.f32 %v10077_v30, 0.0 }
 0x6b4   :  { %v10084_v51 = vadd.f32 %v10066_v35, %v22289_v39  ;;  %v10096_v29 = vmax.f32 %v10078_v12, 0.0 }
 0x6b5   :  { %v10101_v15 = vmax.f32 %v10083_v8, 0.0 }
 0x6b6   :  { %v10102_v2 = vmax.f32 %v10084_v51, 0.0  ;;  %v9932_v49 = vpop.f32.mrb[40].mxu1 }
 0x6b7   :  { %v22908_v62 = vpack.c.bf16 %v10101_v15, %v10095_v59  ;;  %v10071_v42 = vmul.f32 %v9932_v49, %v22280_v34  ;;  %v9934_v52 = vpop.f32.mrb[41].mxu1 }
 0x6b8   :  { %v10072_v54 = vmul.f32 %v9934_v52, %v22283_v36  ;;  %v9936_v27 = vpop.f32.mrb[42].mxu1  ;;  %v22912_v24 = vpack.c.bf16 %v10102_v2, %v10096_v29  ;;  %v10075_v29 = vmul.f32 %v22892_v45, %v22328_v28  ;;  %v10076_v2 = vmul.f32 %v22896_v20, %v22333_v38 }
 0x6b9   :  { %v10089_v23 = vadd.f32 %v10071_v42, %v22286_v37  ;;  %v9937_v13 = vpop.f32.mrb[43].mxu1 }
 0x6ba   :  { %v10090_v60 = vadd.f32 %v10072_v54, %v22289_v39  ;;  %10143 = vmatprep.subr.bf16.mxu0 %v22912_v24 }
 0x6bb   :  { %v10107_v3 = vmax.f32 %v10089_v23, 0.0  ;;  %10144 = vmatpush1.bf16.msra.mxu0 %v22908_v62 }
 0x6bc   :  { %v10108_v57 = vmax.f32 %v10090_v60, 0.0  ;;  %v10094_v60 = vadd.f32 %v10076_v2, %v22343_v53  ;;  %v20902_v53 = vld [vmem:[#allocation4 + $0x304] ss:$16 sps:$4 sm:$0xff]   ;;  %v20954_v2 = vld [vmem:[#allocation4 + $0x420] ss:$16 sps:$4 sm:$0xff]  }
 0x6bd   :  { %v10119_v17 = vpack.c.bf16 %v10107_v3, %v10107_v3 }
 0x6be   :  { %v10120_v22 = vpack.c.bf16 %v10108_v57, %v10108_v57  ;;  %v9973_v34 = vpop.f32.mrb[44].mxu1  ;;  %v10112_v20 = vmax.f32 %v10094_v60, 0.0  ;;  %v20912_v57 = vld [vmem:[#allocation4 + $0x340] ss:$16 sps:$4 sm:$0xff]   ;;  %v20969_v60 = vld [vmem:[#allocation4 + $0x468] ss:$16 sps:$4 sm:$0xff]  }
 0x6bf   :  { %v10061_v31 = vmul.f32 %v9973_v34, %v22254_v56  ;;  %v9975_v36 = vpop.f32.mrb[45].mxu1  ;;  %v10126_v32 = vsel %vm1539_vm7, %v10119_v17, 0  ;;  %v20920_v17 = vld [vmem:[#allocation4 + $0x364] ss:$16 sps:$4 sm:$0xff]   ;;  %v20923_v34 = vld [vmem:[#allocation4 + $0x36c] ss:$16 sps:$4 sm:$0xff]  }
 0x6c0   :  { %v10062_v6 = vmul.f32 %v9975_v36, %v22257_v58  ;;  %v9977_v37 = vpop.f32.mrb[46].mxu1  ;;  %18310 = vmatprep.subr.msk.bf16.mxu0 %vm1539_vm7, %v10120_v22  ;;  %11206 = vmatprep.subr.bf16.mxu1 %v20923_v34  ;;  %v20926_v36 = vld [vmem:[#allocation4 + $0x384] ss:$16 sps:$4 sm:$0xff]  }
 0x6c1   :  { %v10079_v39 = vadd.f32 %v10061_v31, %v22260_v61  ;;  %v10067_v40 = vmul.f32 %v9977_v37, %v22254_v56  ;;  %v9979_v43 = vpop.f32.mrb[47].mxu1  ;;  %10146 = vmatpush1.bf16.msra.mxu0 %v10126_v32  ;;  %v20924_v31 = vld [vmem:[#allocation4 + $0x380] ss:$16 sps:$4 sm:$0xff]   ;;  %v20932_v37 = vld [vmem:[#allocation4 + $0x3a4] ss:$16 sps:$4 sm:$0xff]  }
 0x6c2   :  { %v10080_v19 = vadd.f32 %v10062_v6, %v22263_v63  ;;  %v10068_v10 = vmul.f32 %v9979_v43, %v22257_v58  ;;  %v20930_v6 = vld [vmem:[#allocation4 + $0x3a0] ss:$16 sps:$4 sm:$0xff]  }
 0x6c3   :  { %v10085_v44 = vadd.f32 %v10067_v40, %v22260_v61  ;;  %v10097_v46 = vmax.f32 %v10079_v39, 0.0  ;;  %v20933_v39 = vld [vmem:[#allocation4 + $0x3a8] ss:$16 sps:$4 sm:$0xff]   ;;  %v20935_v40 = vld [vmem:[#allocation4 + $0x3ac] ss:$16 sps:$4 sm:$0xff]  }
 0x6c4   :  { %v10086_v30 = vadd.f32 %v10068_v10, %v22263_v63  ;;  %18311 = vmatmul.mubr.msk.bf16.vlgmr.msra.gmra.mrb[28].mxu0 %vm1535_vm8, %v22350_v7  ;;  %v10098_v12 = vmax.f32 %v10080_v19, 0.0  ;;  %v20936_v43 = vld [vmem:[#allocation4 + $0x3c0] ss:$16 sps:$4 sm:$0xff]   ;;  %v20938_v19 = vld [vmem:[#allocation4 + $0x3c4] ss:$16 sps:$4 sm:$0xff]  }
 0x6c5   :  { %v10103_v55 = vmax.f32 %v10085_v44, 0.0  ;;  %10218 = vmatprep.mubr.bf16.mxu0 %v21960_v0  ;;  %v20939_v10 = vld [vmem:[#allocation4 + $0x3c8] ss:$16 sps:$4 sm:$0xff]   ;;  %v20941_v44 = vld [vmem:[#allocation4 + $0x3cc] ss:$16 sps:$4 sm:$0xff]  }
 0x6c6   :  { %v10104_v35 = vmax.f32 %v10086_v30, 0.0  ;;  %v9983_v8 = vpop.f32.mrb[48].mxu1  ;;  %v20942_v30 = vld [vmem:[#allocation4 + $0x3e0] ss:$16 sps:$4 sm:$0xff]  }
 0x6c7   :  { %v10115_v51 = vpack.c.bf16 %v10103_v55, %v10097_v46  ;;  %v10073_v59 = vmul.f32 %v9983_v8, %v22254_v56  ;;  %v9985_v15 = vpop.f32.mrb[49].mxu1  ;;  %v10093_v56 = vadd.f32 %v10075_v29, %v22336_v41  ;;  %v20944_v46 = vld [vmem:[#allocation4 + $0x3e4] ss:$16 sps:$4 sm:$0xff]   ;;  %v20945_v55 = vld [vmem:[#allocation4 + $0x3e8] ss:$16 sps:$4 sm:$0xff]  }
 0x6c8   :  { %v10074_v49 = vmul.f32 %v9985_v15, %v22257_v58  ;;  %v9987_v42 = vpop.f32.mrb[50].mxu1  ;;  %v10116_v52 = vpack.c.bf16 %v10104_v35, %v10098_v12  ;;  %v20947_v12 = vld [vmem:[#allocation4 + $0x3ec] ss:$16 sps:$4 sm:$0xff]   ;;  %v20948_v35 = vld [vmem:[#allocation4 + $0x400] ss:$16 sps:$4 sm:$0xff]  }
 0x6c9   :  { %v10091_v54 = vadd.f32 %v10073_v59, %v22260_v61  ;;  %v9988_v27 = vpop.f32.mrb[51].mxu1  ;;  %v10111_v58 = vmax.f32 %v10093_v56, 0.0  ;;  %v20950_v8 = vld [vmem:[#allocation4 + $0x404] ss:$16 sps:$4 sm:$0xff]   ;;  %v20953_v59 = vld [vmem:[#allocation4 + $0x40c] ss:$16 sps:$4 sm:$0xff]  }
 0x6ca   :  { %v10092_v23 = vadd.f32 %v10074_v49, %v22263_v63  ;;  %10186 = vmatprep.subr.bf16.mxu0 %v10116_v52  ;;  %v10124_v63 = vpack.c.bf16 %v10112_v20, %v10112_v20  ;;  %v20956_v15 = vld [vmem:[#allocation4 + $0x424] ss:$16 sps:$4 sm:$0xff]   ;;  %v20959_v29 = vld [vmem:[#allocation4 + $0x42c] ss:$16 sps:$4 sm:$0xff]   ;;  %v20957_v49 = vld [vmem:[#allocation4 + $0x428] ss:$16 sps:$4 sm:$0xff]  }
 0x6cb   :  { %v10109_v13 = vmax.f32 %v10091_v54, 0.0  ;;  %10187 = vmatpush1.bf16.msra.mxu0 %v10115_v51  ;;  %v10123_v61 = vpack.c.bf16 %v10111_v58, %v10111_v58  ;;  %v20962_v42 = vld [vmem:[#allocation4 + $0x444] ss:$16 sps:$4 sm:$0xff]   ;;  %v20960_v54 = vld [vmem:[#allocation4 + $0x440] ss:$16 sps:$4 sm:$0xff]  }
 0x6cc   :  { %v10110_v28 = vmax.f32 %v10092_v23, 0.0  ;;  %v20963_v27 = vld [vmem:[#allocation4 + $0x448] ss:$16 sps:$4 sm:$0xff]   ;;  %v20968_v23 = vld [vmem:[#allocation4 + $0x464] ss:$16 sps:$4 sm:$0xff]  }
 0x6cd   :  { %v10121_v45 = vpack.c.bf16 %v10109_v13, %v10109_v13  ;;  %v10138_v41 = vsel %vm1539_vm7, %v10123_v61, 0  ;;  %v20971_v13 = vld [vmem:[#allocation4 + $0x46c] ss:$16 sps:$4 sm:$0xff]   ;;  %v20966_v56 = vld [vmem:[#allocation4 + $0x460] ss:$16 sps:$4 sm:$0xff]  }
 0x6ce   :  { %v10122_v3 = vpack.c.bf16 %v10110_v28, %v10110_v28  ;;  %v20974_v28 = vld [vmem:[#allocation4 + $0x484] ss:$16 sps:$4 sm:$0xff]   ;;  %v20983_v20 = vld [vmem:[#allocation4 + $0x4ac] ss:$16 sps:$4 sm:$0xff]   ;;  %v20978_v61 = vld [vmem:[#allocation4 + $0x4a0] ss:$16 sps:$4 sm:$0xff]  }
 0x6cf   :  { %v10132_v38 = vsel %vm1539_vm7, %v10121_v45, 0  ;;  %v20977_v45 = vld [vmem:[#allocation4 + $0x48c] ss:$16 sps:$4 sm:$0xff]   ;;  %v20980_v58 = vld [vmem:[#allocation4 + $0x4a4] ss:$16 sps:$4 sm:$0xff]  }
 0x6d0   :  { %18312 = vmatprep.subr.msk.bf16.mxu0 %vm1539_vm7, %v10122_v3 }
 0x6d1   :  { %10189 = vmatpush1.bf16.msra.mxu0 %v10132_v38 }
 0x6d2   :  { %10229 = vmatprep.subr.bf16.mxu0 %v22898_v25 }
 0x6d4   :  { %18313 = vmatmul.mubr.msk.bf16.vlgmr.msra.gmra.mrb[32].mxu0 %vm1535_vm8, %v22350_v7 }
 0x6d5   :  { %10230 = vmatpush1.bf16.msra.mxu0 %v22894_v47  ;;  %10261 = vmatprep.mubr.bf16.mxu0 %v21960_v0 }
 0x6d6   :  { %18314 = vmatprep.subr.msk.bf16.mxu0 %vm1539_vm7, %v10124_v63 }
 0x6d9   :  { %10232 = vmatpush1.bf16.msra.mxu0 %v10138_v41 }
 0x6da   :  { %10272 = vmatprep.subr.bf16.mxu0 %v22912_v24  ;;  %v20906_v24 = vld [vmem:[#allocation4 + $0x320] ss:$16 sps:$4 sm:$0xff]  }
 0x6dc   :  { %18315 = vmatmul.mubr.msk.bf16.vlgmr.msra.gmra.mrb[36].mxu0 %vm1535_vm8, %v22350_v7  ;;  %v20900_v7 = vld [vmem:[#allocation4 + $0x300] ss:$16 sps:$4 sm:$0xff]  }
 0x6dd   :  { %10273 = vmatpush1.bf16.msra.mxu0 %v22908_v62  ;;  %10304 = vmatprep.mubr.bf16.mxu0 %v21960_v0  ;;  %v20908_v62 = vld [vmem:[#allocation4 + $0x324] ss:$16 sps:$4 sm:$0xff]  }
 0x6de   :  { %18316 = vmatprep.subr.msk.bf16.mxu0 %vm1539_vm7, %v10120_v22  ;;  %v20921_v22 = vld [vmem:[#allocation4 + $0x368] ss:$16 sps:$4 sm:$0xff]  }
 0x6df   :  { %11207 = vmatpush1.bf16.msra.mxu1 %v20921_v22  ;;  %v21001_v22 = vld [vmem:[#allocation4 + $0x50c] ss:$16 sps:$4 sm:$0xff]  }
 0x6e1   :  { %10275 = vmatpush1.bf16.msra.mxu0 %v10126_v32  ;;  %v20927_v32 = vld [vmem:[#allocation4 + $0x388] ss:$16 sps:$4 sm:$0xff]  }
 0x6e2   :  { %10315 = vmatprep.subr.bf16.mxu0 %v10116_v52  ;;  %v20965_v52 = vld [vmem:[#allocation4 + $0x44c] ss:$16 sps:$4 sm:$0xff]  }
 0x6e4   :  { %18317 = vmatmul.mubr.msk.bf16.vlgmr.msra.gmra.mrb[40].mxu0 %vm1535_vm8, %v22389_v4 }
 0x6e5   :  { %10316 = vmatpush1.bf16.msra.mxu0 %v10115_v51  ;;  %10347 = vmatprep.mubr.bf16.mxu0 %v21960_v0  ;;  %v20951_v51 = vld [vmem:[#allocation4 + $0x408] ss:$16 sps:$4 sm:$0xff]  }
 0x6e6   :  { %18318 = vmatprep.subr.msk.bf16.mxu0 %vm1539_vm7, %v10122_v3  ;;  %v20972_v3 = vld [vmem:[#allocation4 + $0x480] ss:$16 sps:$4 sm:$0xff]  }
 0x6e9   :  { %10318 = vmatpush1.bf16.msra.mxu0 %v10132_v38  ;;  %v20975_v38 = vld [vmem:[#allocation4 + $0x488] ss:$16 sps:$4 sm:$0xff]  }
 0x6ea   :  { %10358 = vmatprep.subr.bf16.mxu0 %v22898_v25  ;;  %v20914_v25 = vld [vmem:[#allocation4 + $0x344] ss:$16 sps:$4 sm:$0xff]  }
 0x6ec   :  { %18319 = vmatmul.mubr.msk.bf16.vlgmr.msra.gmra.mrb[44].mxu0 %vm1535_vm8, %v22389_v4 }
 0x6ed   :  { %10359 = vmatpush1.bf16.msra.mxu0 %v22894_v47  ;;  %10390 = vmatprep.mubr.bf16.mxu0 %v21960_v0  ;;  %v20918_v47 = vld [vmem:[#allocation4 + $0x360] ss:$16 sps:$4 sm:$0xff]  }
 0x6ee   :  { %18320 = vmatprep.subr.msk.bf16.mxu0 %vm1539_vm7, %v10124_v63  ;;  %v20981_v63 = vld [vmem:[#allocation4 + $0x4a8] ss:$16 sps:$4 sm:$0xff]  }
 0x6f1   :  { %10361 = vmatpush1.bf16.msra.mxu0 %v10138_v41  ;;  %v20986_v41 = vld [vmem:[#allocation4 + $0x4c4] ss:$16 sps:$4 sm:$0xff]  }
 0x6f2   :  { %11118 = vmatprep.subr.bf16.mxu0 %v20902_v53  ;;  %v20989_v53 = vld [vmem:[#allocation4 + $0x4cc] ss:$16 sps:$4 sm:$0xff]  }
 0x6f4   :  { %18321 = vmatmul.mubr.msk.bf16.vlgmr.msra.gmra.mrb[48].mxu0 %vm1535_vm8, %v22389_v4  ;;  %v20929_v4 = vld [vmem:[#allocation4 + $0x38c] ss:$16 sps:$4 sm:$0xff]  }
 0x6f5   :  { %11119 = vmatpush1.bf16.msra.mxu0 %v20900_v7  ;;  %11208 = vmatprep.subr.bf16.mxu1 %v20929_v4  ;;  %v20984_v7 = vld [vmem:[#allocation4 + $0x4c0] ss:$16 sps:$4 sm:$0xff]  }
 0x6f6   :  { %11120 = vmatprep.subr.bf16.mxu0 %v20908_v62  ;;  %11209 = vmatpush1.bf16.msra.mxu1 %v20927_v32  ;;  %v20987_v62 = vld [vmem:[#allocation4 + $0x4c8] ss:$16 sps:$4 sm:$0xff]  }
 0x6f7   :  { %11210 = vmatprep.subr.bf16.mxu1 %v20935_v40 }
 0x6f9   :  { %11121 = vmatpush1.bf16.msra.mxu0 %v20906_v24  ;;  %v20992_v24 = vld [vmem:[#allocation4 + $0x4e4] ss:$16 sps:$4 sm:$0xff]  }
 0x6fa   :  { %11122 = vmatprep.subr.bf16.mxu0 %v20914_v25  ;;  %11211 = vmatpush1.bf16.msra.mxu1 %v20933_v39  ;;  %v20995_v25 = vld [vmem:[#allocation4 + $0x4ec] ss:$16 sps:$4 sm:$0xff]  }
 0x6fb   :  { %11212 = vmatprep.subr.bf16.mxu1 %v20941_v44 }
 0x6fd   :  { %11123 = vmatpush1.bf16.msra.mxu0 %v20912_v57  ;;  %v20990_v57 = vld [vmem:[#allocation4 + $0x4e0] ss:$16 sps:$4 sm:$0xff]  }
 0x6fe   :  { %11124 = vmatprep.subr.bf16.mxu0 %v20920_v17  ;;  %11213 = vmatpush1.bf16.msra.mxu1 %v20939_v10  ;;  %v20998_v17 = vld [vmem:[#allocation4 + $0x504] ss:$16 sps:$4 sm:$0xff]  }
 0x6ff   :  { %11214 = vmatprep.subr.bf16.mxu1 %v20947_v12 }
 0x701   :  { %11125 = vmatpush1.bf16.msra.mxu0 %v20918_v47  ;;  %v20993_v47 = vld [vmem:[#allocation4 + $0x4e8] ss:$16 sps:$4 sm:$0xff]  }
 0x702   :  { %11126 = vmatprep.subr.bf16.mxu0 %v20926_v36  ;;  %11215 = vmatpush1.bf16.msra.mxu1 %v20945_v55 }
 0x703   :  { %11216 = vmatprep.subr.bf16.mxu1 %v20953_v59 }
 0x705   :  { %11127 = vmatpush1.bf16.msra.mxu0 %v20924_v31 }
 0x706   :  { %11128 = vmatprep.subr.bf16.mxu0 %v20932_v37  ;;  %11217 = vmatpush1.bf16.msra.mxu1 %v20951_v51 }
 0x707   :  { %11218 = vmatprep.subr.bf16.mxu1 %v20959_v29 }
 0x709   :  { %11129 = vmatpush1.bf16.msra.mxu0 %v20930_v6 }
 0x70a   :  { %11130 = vmatprep.subr.bf16.mxu0 %v20938_v19  ;;  %11219 = vmatpush1.bf16.msra.mxu1 %v20957_v49 }
 0x70b   :  { %11220 = vmatprep.subr.bf16.mxu1 %v20965_v52 }
 0x70d   :  { %11131 = vmatpush1.bf16.msra.mxu0 %v20936_v43 }
 0x70e   :  { %11132 = vmatprep.subr.bf16.mxu0 %v20944_v46  ;;  %11221 = vmatpush1.bf16.msra.mxu1 %v20963_v27 }
 0x70f   :  { %11222 = vmatprep.subr.bf16.mxu1 %v20971_v13 }
 0x711   :  { %11133 = vmatpush1.bf16.msra.mxu0 %v20942_v30 }
 0x712   :  { %11134 = vmatprep.subr.bf16.mxu0 %v20950_v8  ;;  %11223 = vmatpush1.bf16.msra.mxu1 %v20969_v60 }
 0x713   :  { %11224 = vmatprep.subr.bf16.mxu1 %v20977_v45 }
 0x715   :  { %11135 = vmatpush1.bf16.msra.mxu0 %v20948_v35 }
 0x716   :  { %11136 = vmatprep.subr.bf16.mxu0 %v20956_v15  ;;  %11225 = vmatpush1.bf16.msra.mxu1 %v20975_v38 }
 0x717   :  { %11226 = vmatprep.subr.bf16.mxu1 %v20983_v20 }
 0x719   :  { %11137 = vmatpush1.bf16.msra.mxu0 %v20954_v2 }
 0x71a   :  { %11138 = vmatprep.subr.bf16.mxu0 %v20962_v42  ;;  %11227 = vmatpush1.bf16.msra.mxu1 %v20981_v63 }
 0x71b   :  { %11228 = vmatprep.subr.bf16.mxu1 %v20989_v53 }
 0x71d   :  { %11139 = vmatpush1.bf16.msra.mxu0 %v20960_v54 }
 0x71e   :  { %11140 = vmatprep.subr.bf16.mxu0 %v20968_v23  ;;  %11229 = vmatpush1.bf16.msra.mxu1 %v20987_v62 }
 0x71f   :  { %11230 = vmatprep.subr.bf16.mxu1 %v20995_v25 }
 0x721   :  { %11141 = vmatpush1.bf16.msra.mxu0 %v20966_v56 }
 0x722   :  { %11142 = vmatprep.subr.bf16.mxu0 %v20974_v28  ;;  %11231 = vmatpush1.bf16.msra.mxu1 %v20993_v47 }
 0x723   :  { %11241 = vmatprep.subr.bf16.mxu1 %v21001_v22 }
 0x725   :  { %11143 = vmatpush1.bf16.msra.mxu0 %v20972_v3 }
 0x726   :  { %11144 = vmatprep.subr.bf16.mxu0 %v20980_v58 }
 0x729   :  { %11145 = vmatpush1.bf16.msra.mxu0 %v20978_v61 }
 0x72a   :  { %11146 = vmatprep.subr.bf16.mxu0 %v20986_v41 }
 0x72d   :  { %11147 = vmatpush1.bf16.msra.mxu0 %v20984_v7 }
 0x72e   :  { %11148 = vmatprep.subr.bf16.mxu0 %v20992_v24 }
 0x731   :  { %11149 = vmatpush1.bf16.msra.mxu0 %v20990_v57 }
 0x732   :  { %11159 = vmatprep.subr.bf16.mxu0 %v20998_v17 }
 0x797   :  { %v10177_v34 = vpop.f32.mrb[28].mxu0 }
 0x798   :  { %v10179_v31 = vpop.f32.mrb[29].mxu0 }
 0x799   :  { %v10181_v36 = vpop.f32.mrb[30].mxu0 }
 0x79a   :  { %v10183_v32 = vpop.f32.mrb[31].mxu0 }
 0x7a7   :  { %v10220_v4 = vpop.f32.mrb[32].mxu0 }
 0x7a8   :  { %v10222_v6 = vpop.f32.mrb[33].mxu0 }
 0x7a9   :  { %v10224_v37 = vpop.f32.mrb[34].mxu0 }
 0x7aa   :  { %v10226_v39 = vpop.f32.mrb[35].mxu0 }
 0x7af   :  { %v10263_v40 = vpop.f32.mrb[36].mxu0 }
 0x7b0   :  { %v10265_v43 = vpop.f32.mrb[37].mxu0 }
 0x7b1   :  { %v10267_v19 = vpop.f32.mrb[38].mxu0 }
 0x7b2   :  { %v10269_v10 = vpop.f32.mrb[39].mxu0 }
 0x7b7   :  { %v10306_v44 = vpop.f32.mrb[40].mxu0 }
 0x7b8   :  { %v10401_v30 = vmax.f32 %v10177_v34, %v10306_v44  ;;  %v10308_v46 = vpop.f32.mrb[41].mxu0 }
 0x7b9   :  { %v10402_v55 = vmax.f32 %v10179_v31, %v10308_v46  ;;  %v10310_v12 = vpop.f32.mrb[42].mxu0  ;;  %v21007_v46 = vld [vmem:[#allocation4 + $0x52c] ss:$16 sps:$4 sm:$0xff]  }
 0x7ba   :  { %v10407_v35 = vmax.f32 %v10181_v36, %v10310_v12  ;;  %v10312_v8 = vpop.f32.mrb[43].mxu0 }
 0x7bb   :  { %v10408_v51 = vmax.f32 %v10183_v32, %v10312_v8  ;;  %v21005_v8 = vld [vmem:[#allocation4 + $0x528] ss:$16 sps:$4 sm:$0xff]  }
 0x7bf   :  { %v10349_v59 = vpop.f32.mrb[44].mxu0 }
 0x7c0   :  { %v10403_v15 = vmax.f32 %v10220_v4, %v10349_v59  ;;  %v10351_v29 = vpop.f32.mrb[45].mxu0  ;;  %v21013_v59 = vld [vmem:[#allocation4 + $0x54c] ss:$16 sps:$4 sm:$0xff]  }
 0x7c1   :  { %v10404_v2 = vmax.f32 %v10222_v6, %v10351_v29  ;;  %v10353_v49 = vpop.f32.mrb[46].mxu0  ;;  %v21011_v29 = vld [vmem:[#allocation4 + $0x548] ss:$16 sps:$4 sm:$0xff]  }
 0x7c2   :  { %v10409_v42 = vmax.f32 %v10224_v37, %v10353_v49  ;;  %v10355_v52 = vpop.f32.mrb[47].mxu0  ;;  %v21019_v49 = vld [vmem:[#allocation4 + $0x56c] ss:$16 sps:$4 sm:$0xff]  }
 0x7c3   :  { %v10413_v54 = vmax.f32 %v10401_v30, %v10404_v2  ;;  %v10410_v27 = vmax.f32 %v10226_v39, %v10355_v52  ;;  %v21004_v30 = vld [vmem:[#allocation4 + $0x524] ss:$16 sps:$4 sm:$0xff]   ;;  %v21017_v52 = vld [vmem:[#allocation4 + $0x568] ss:$16 sps:$4 sm:$0xff]  }
 0x7c4   :  { %v21016_v2 = vld [vmem:[#allocation4 + $0x564] ss:$16 sps:$4 sm:$0xff]  }
 0x7c5   :  { %v10416_v23 = vmax.f32 %v10407_v35, %v10410_v27  ;;  %v21002_v35 = vld [vmem:[#allocation4 + $0x520] ss:$16 sps:$4 sm:$0xff]   ;;  %v21025_v27 = vld [vmem:[#allocation4 + $0x58c] ss:$16 sps:$4 sm:$0xff]  }
 0x7c7   :  { %v22968_v13 = vpack.c.bf16 %v10416_v23, %v10413_v54  ;;  %v10392_v56 = vpop.f32.mrb[48].mxu0  ;;  %v21022_v54 = vld [vmem:[#allocation4 + $0x584] ss:$16 sps:$4 sm:$0xff]   ;;  %v21020_v23 = vld [vmem:[#allocation4 + $0x580] ss:$16 sps:$4 sm:$0xff]  }
 0x7c8   :  { %v10405_v60 = vmax.f32 %v10263_v40, %v10392_v56  ;;  %v10394_v28 = vpop.f32.mrb[49].mxu0  ;;  %v21023_v56 = vld [vmem:[#allocation4 + $0x588] ss:$16 sps:$4 sm:$0xff]  }
 0x7c9   :  { %v10406_v45 = vmax.f32 %v10265_v43, %v10394_v28  ;;  %v10396_v3 = vpop.f32.mrb[50].mxu0  ;;  %v10615_v38 = vshrl.u32 %v22968_v13, 16  ;;  %v10617_v58 = vshll.u32 %v22968_v13, 16  ;;  %v20996_v43 = vld [vmem:[#allocation4 + $0x500] ss:$16 sps:$4 sm:$0xff]  }
 0x7ca   :  { %v10414_v20 = vmax.f32 %v10402_v55, %v10405_v60  ;;  %v10411_v61 = vmax.f32 %v10267_v19, %v10396_v3  ;;  %v10398_v63 = vpop.f32.mrb[51].mxu0  ;;  %v20999_v19 = vld [vmem:[#allocation4 + $0x508] ss:$16 sps:$4 sm:$0xff]   ;;  %v21028_v60 = vld [vmem:[#allocation4 + $0x5a4] ss:$16 sps:$4 sm:$0xff]  }
 0x7cb   :  { %v10415_v41 = vmax.f32 %v10403_v15, %v10406_v45  ;;  %v10412_v53 = vmax.f32 %v10269_v10, %v10398_v63  ;;  %v12775_v7 = vrot.slane %v10615_v38, 1  ;;  %v12776_v24 = vrot.slane %v10617_v58, 2  ;;  %v21008_v15 = vld [vmem:[#allocation4 + $0x540] ss:$16 sps:$4 sm:$0xff]   ;;  %v21031_v28 = vld [vmem:[#allocation4 + $0x5ac] ss:$16 sps:$4 sm:$0xff]  }
 0x7cc   :  { %v10417_v62 = vmax.f32 %v10408_v51, %v10411_v61  ;;  %v10619_v31 = vrot.slane %v10617_v58, 1  ;;  %v21010_v51 = vld [vmem:[#allocation4 + $0x544] ss:$16 sps:$4 sm:$0xff]   ;;  %v21026_v45 = vld [vmem:[#allocation4 + $0x5a0] ss:$16 sps:$4 sm:$0xff]  }
 0x7cd   :  { %v10418_v25 = vmax.f32 %v10409_v42, %v10412_v53  ;;  %v22974_v47 = vor.u32 %v12776_v24, %v12775_v7  ;;  %v21014_v42 = vld [vmem:[#allocation4 + $0x560] ss:$16 sps:$4 sm:$0xff]   ;;  %v21029_v3 = vld [vmem:[#allocation4 + $0x5a8] ss:$16 sps:$4 sm:$0xff]   ;;  %v21037_v58 = vld [vmem:[#allocation4 + $0x5cc] ss:$16 sps:$4 sm:$0xff]  }
 0x7ce   :  { %v22972_v57 = vpack.c.bf16 %v10417_v62, %v10414_v20  ;;  %v10620_v44 = vor.u32 %v10619_v31, %v10615_v38  ;;  %v21034_v38 = vld [vmem:[#allocation4 + $0x5c4] ss:$16 sps:$4 sm:$0xff]   ;;  %v21032_v20 = vld [vmem:[#allocation4 + $0x5c0] ss:$16 sps:$4 sm:$0xff]   ;;  %v21035_v61 = vld [vmem:[#allocation4 + $0x5c8] ss:$16 sps:$4 sm:$0xff]  }
 0x7cf   :  { %v22976_v17 = vpack.c.bf16 %v10418_v25, %v10415_v41  ;;  %v21040_v63 = vld [vmem:[#allocation4 + $0x5e4] ss:$16 sps:$4 sm:$0xff]   ;;  %v21043_v41 = vld [vmem:[#allocation4 + $0x5ec] ss:$16 sps:$4 sm:$0xff]   ;;  %v21038_v53 = vld [vmem:[#allocation4 + $0x5e0] ss:$16 sps:$4 sm:$0xff]  }
 0x7d0   :  { %v10622_v22 = vshrl.u32 %v22972_v57, 16  ;;  %v10624_v34 = vshll.u32 %v22972_v57, 16  ;;  %v21041_v7 = vld [vmem:[#allocation4 + $0x5e8] ss:$16 sps:$4 sm:$0xff]   ;;  %v21046_v24 = vld [vmem:[#allocation4 + $0x4] ss:$16 sps:$4 sm:$0xff]  }
 0x7d1   :  { %v10629_v36 = vshrl.u32 %v22976_v17, 16  ;;  %v10631_v32 = vshll.u32 %v22976_v17, 16  ;;  %v21049_v25 = vld [vmem:[#allocation4 + $0xc] ss:$16 sps:$4 sm:$0xff]   ;;  %v21047_v31 = vld [vmem:[#allocation4 + $0x8] ss:$16 sps:$4 sm:$0xff]  }
 0x7d2   :  { %v10626_v4 = vrot.slane %v10624_v34, 1  ;;  %v12778_v6 = vrot.slane %v10622_v22, 1  ;;  %v12779_v37 = vrot.slane %v10624_v34, 2 }
 0x7d3   :  { %v12781_v39 = vrot.slane %v10629_v36, 1  ;;  %v12782_v10 = vrot.slane %v10631_v32, 2  ;;  %v10633_v62 = vrot.slane %v10631_v32, 1  ;;  %v21053_v32 = vld [vmem:[#allocation4 + $0x28] ss:$16 sps:$4 sm:$0xff]  }
 0x7d4   :  { %v10627_v40 = vor.u32 %v10626_v4, %v10622_v22  ;;  %v22986_v55 = vor.u32 %v12779_v37, %v12778_v6  ;;  %v21044_v22 = vld [vmem:[#allocation4] ss:$16 sps:$4 sm:$0xff]   ;;  %v21052_v4 = vld [vmem:[#allocation4 + $0x24] ss:$16 sps:$4 sm:$0xff]   ;;  %v21055_v6 = vld [vmem:[#allocation4 + $0x2c] ss:$16 sps:$4 sm:$0xff]  }
 0x7d5   :  { %v22988_v12 = vor.u32 %v12782_v10, %v12781_v39  ;;  %v10634_v34 = vor.u32 %v10633_v62, %v10629_v36  ;;  %v21050_v37 = vld [vmem:[#allocation4 + $0x20] ss:$16 sps:$4 sm:$0xff]   ;;  %v21058_v39 = vld [vmem:[#allocation4 + $0x44] ss:$16 sps:$4 sm:$0xff]   ;;  %v21067_v10 = vld [vmem:[#allocation4 + $0x6c] ss:$16 sps:$4 sm:$0xff]  }
 0x7d6   :  { %11150 = vmatprep.mubr.bf16.mxu0 %v10627_v40  ;;  %11232 = vmatprep.mubr.bf16.mxu1 %v10627_v40  ;;  %v21061_v40 = vld [vmem:[#allocation4 + $0x4c] ss:$16 sps:$4 sm:$0xff]   ;;  %v21056_v36 = vld [vmem:[#allocation4 + $0x40] ss:$16 sps:$4 sm:$0xff]   ;;  %v21107_v62 = vld [vmem:[#allocation4 + $0x148] ss:$16 sps:$4 sm:$0xff]  }
 0x7d7   :  { %11151 = vmatmul.mubr.bf16.vlgmr.msra.gmra.mrb[52].mxu0 %v10620_v44  ;;  %11233 = vmatmul.mubr.bf16.vlgmr.msra.gmra.mrb[52].mxu1 %v10620_v44  ;;  %v21062_v44 = vld [vmem:[#allocation4 + $0x60] ss:$16 sps:$4 sm:$0xff]  }
 0x7d8   :  { %11160 = vmatpush1.bf16.msra.mxu0 %v20996_v43  ;;  %11242 = vmatpush1.bf16.msra.mxu1 %v20999_v19  ;;  %v21059_v43 = vld [vmem:[#allocation4 + $0x48] ss:$16 sps:$4 sm:$0xff]   ;;  %v21064_v19 = vld [vmem:[#allocation4 + $0x64] ss:$16 sps:$4 sm:$0xff]  }
 0x7d9   :  { %11161 = vmatprep.subr.bf16.mxu0 %v21004_v30  ;;  %11243 = vmatprep.subr.bf16.mxu1 %v21007_v46  ;;  %v21065_v30 = vld [vmem:[#allocation4 + $0x68] ss:$16 sps:$4 sm:$0xff]   ;;  %v21070_v46 = vld [vmem:[#allocation4 + $0x84] ss:$16 sps:$4 sm:$0xff]  }
 0x7da   :  { %11191 = vmatprep.mubr.bf16.mxu0 %v21960_v0  ;;  %11273 = vmatprep.mubr.bf16.mxu1 %v21960_v0 }
 0x7dc   :  { %11162 = vmatpush1.bf16.msra.mxu0 %v21002_v35  ;;  %11244 = vmatpush1.bf16.msra.mxu1 %v21005_v8  ;;  %v21073_v35 = vld [vmem:[#allocation4 + $0x8c] ss:$16 sps:$4 sm:$0xff]   ;;  %v21068_v8 = vld [vmem:[#allocation4 + $0x80] ss:$16 sps:$4 sm:$0xff]  }
 0x7dd   :  { %11163 = vmatprep.subr.bf16.mxu0 %v21010_v51  ;;  %11245 = vmatprep.subr.bf16.mxu1 %v21013_v59  ;;  %v21071_v51 = vld [vmem:[#allocation4 + $0x88] ss:$16 sps:$4 sm:$0xff]   ;;  %v21076_v59 = vld [vmem:[#allocation4 + $0xa4] ss:$16 sps:$4 sm:$0xff]  }
 0x7e0   :  { %11164 = vmatpush1.bf16.msra.mxu0 %v21008_v15  ;;  %11246 = vmatpush1.bf16.msra.mxu1 %v21011_v29  ;;  %v21079_v15 = vld [vmem:[#allocation4 + $0xac] ss:$16 sps:$4 sm:$0xff]   ;;  %v21074_v29 = vld [vmem:[#allocation4 + $0xa0] ss:$16 sps:$4 sm:$0xff]  }
 0x7e1   :  { %11165 = vmatprep.subr.bf16.mxu0 %v21016_v2  ;;  %11247 = vmatprep.subr.bf16.mxu1 %v21019_v49  ;;  %v21077_v2 = vld [vmem:[#allocation4 + $0xa8] ss:$16 sps:$4 sm:$0xff]   ;;  %v21082_v49 = vld [vmem:[#allocation4 + $0xc4] ss:$16 sps:$4 sm:$0xff]  }
 0x7e4   :  { %11166 = vmatpush1.bf16.msra.mxu0 %v21014_v42  ;;  %11248 = vmatpush1.bf16.msra.mxu1 %v21017_v52  ;;  %v21085_v42 = vld [vmem:[#allocation4 + $0xcc] ss:$16 sps:$4 sm:$0xff]   ;;  %v21080_v52 = vld [vmem:[#allocation4 + $0xc0] ss:$16 sps:$4 sm:$0xff]  }
 0x7e5   :  { %11167 = vmatprep.subr.bf16.mxu0 %v21022_v54  ;;  %11249 = vmatprep.subr.bf16.mxu1 %v21025_v27  ;;  %v21083_v54 = vld [vmem:[#allocation4 + $0xc8] ss:$16 sps:$4 sm:$0xff]   ;;  %v21088_v27 = vld [vmem:[#allocation4 + $0xe4] ss:$16 sps:$4 sm:$0xff]  }
 0x7e8   :  { %11168 = vmatpush1.bf16.msra.mxu0 %v21020_v23  ;;  %11250 = vmatpush1.bf16.msra.mxu1 %v21023_v56  ;;  %v21091_v23 = vld [vmem:[#allocation4 + $0xec] ss:$16 sps:$4 sm:$0xff]   ;;  %v21086_v56 = vld [vmem:[#allocation4 + $0xe0] ss:$16 sps:$4 sm:$0xff]  }
 0x7e9   :  { %11169 = vmatprep.subr.bf16.mxu0 %v21028_v60  ;;  %11251 = vmatprep.subr.bf16.mxu1 %v21031_v28  ;;  %v21089_v60 = vld [vmem:[#allocation4 + $0xe8] ss:$16 sps:$4 sm:$0xff]   ;;  %v21094_v28 = vld [vmem:[#allocation4 + $0x104] ss:$16 sps:$4 sm:$0xff]  }
 0x7ec   :  { %11170 = vmatpush1.bf16.msra.mxu0 %v21026_v45  ;;  %11252 = vmatpush1.bf16.msra.mxu1 %v21029_v3  ;;  %v21097_v45 = vld [vmem:[#allocation4 + $0x10c] ss:$16 sps:$4 sm:$0xff]   ;;  %v21092_v3 = vld [vmem:[#allocation4 + $0x100] ss:$16 sps:$4 sm:$0xff]  }
 0x7ed   :  { %11171 = vmatprep.subr.bf16.mxu0 %v21034_v38  ;;  %11253 = vmatprep.subr.bf16.mxu1 %v21037_v58  ;;  %v21095_v38 = vld [vmem:[#allocation4 + $0x108] ss:$16 sps:$4 sm:$0xff]   ;;  %v21100_v58 = vld [vmem:[#allocation4 + $0x124] ss:$16 sps:$4 sm:$0xff]  }
 0x7f0   :  { %11172 = vmatpush1.bf16.msra.mxu0 %v21032_v20  ;;  %11254 = vmatpush1.bf16.msra.mxu1 %v21035_v61  ;;  %v21103_v20 = vld [vmem:[#allocation4 + $0x12c] ss:$16 sps:$4 sm:$0xff]   ;;  %v21098_v61 = vld [vmem:[#allocation4 + $0x120] ss:$16 sps:$4 sm:$0xff]  }
 0x7f1   :  { %11173 = vmatprep.subr.bf16.mxu0 %v21040_v63  ;;  %11255 = vmatprep.subr.bf16.mxu1 %v21043_v41  ;;  %v21101_v63 = vld [vmem:[#allocation4 + $0x128] ss:$16 sps:$4 sm:$0xff]   ;;  %v21106_v41 = vld [vmem:[#allocation4 + $0x144] ss:$16 sps:$4 sm:$0xff]  }
 0x7f4   :  { %11174 = vmatpush1.bf16.msra.mxu0 %v21038_v53  ;;  %11256 = vmatpush1.bf16.msra.mxu1 %v21041_v7  ;;  %v21109_v53 = vld [vmem:[#allocation4 + $0x14c] ss:$16 sps:$4 sm:$0xff]   ;;  %v21104_v7 = vld [vmem:[#allocation4 + $0x140] ss:$16 sps:$4 sm:$0xff]  }
 0x7f5   :  { %11762 = vmatprep.subr.bf16.mxu0 %v21046_v24  ;;  %11844 = vmatprep.subr.bf16.mxu1 %v21049_v25  ;;  %v21112_v24 = vld [vmem:[#allocation4 + $0x164] ss:$16 sps:$4 sm:$0xff]   ;;  %v21115_v25 = vld [vmem:[#allocation4 + $0x16c] ss:$16 sps:$4 sm:$0xff]  }
 0x7f7   :  { %11192 = vmatmul.mubr.bf16.vlgmr.msra.gmra.mrb[52].mxu0 %v10634_v34  ;;  %11274 = vmatmul.mubr.bf16.vlgmr.msra.gmra.mrb[52].mxu1 %v10634_v34  ;;  %v21113_v34 = vld [vmem:[#allocation4 + $0x168] ss:$16 sps:$4 sm:$0xff]  }
 0x7f8   :  { %11763 = vmatpush1.bf16.msra.mxu0 %v21044_v22  ;;  %11794 = vmatprep.mubr.bf16.mxu0 %v22972_v57  ;;  %v21110_v22 = vld [vmem:[#allocation4 + $0x160] ss:$16 sps:$4 sm:$0xff]  }
 0x7f9   :  { %11845 = vmatpush1.bf16.msra.mxu1 %v21047_v31  ;;  %11876 = vmatprep.mubr.bf16.mxu1 %v22972_v57  ;;  %v21118_v31 = vld [vmem:[#allocation4 + $0x184] ss:$16 sps:$4 sm:$0xff]  }
 0x7fa   :  { %11764 = vmatprep.subr.bf16.mxu0 %v21052_v4  ;;  %11846 = vmatprep.subr.bf16.mxu1 %v21055_v6  ;;  %v21121_v4 = vld [vmem:[#allocation4 + $0x18c] ss:$16 sps:$4 sm:$0xff]   ;;  %v21116_v6 = vld [vmem:[#allocation4 + $0x180] ss:$16 sps:$4 sm:$0xff]  }
 0x7fc   :  { %11765 = vmatpush1.bf16.msra.mxu0 %v21050_v37  ;;  %v21119_v37 = vld [vmem:[#allocation4 + $0x188] ss:$16 sps:$4 sm:$0xff]  }
 0x7fd   :  { %11847 = vmatpush1.bf16.msra.mxu1 %v21053_v32  ;;  %11766 = vmatprep.subr.bf16.mxu0 %v21058_v39  ;;  %v21124_v32 = vld [vmem:[#allocation4 + $0x1a4] ss:$16 sps:$4 sm:$0xff]   ;;  %v21127_v39 = vld [vmem:[#allocation4 + $0x1ac] ss:$16 sps:$4 sm:$0xff]  }
 0x7fe   :  { %11848 = vmatprep.subr.bf16.mxu1 %v21061_v40  ;;  %v21122_v40 = vld [vmem:[#allocation4 + $0x1a0] ss:$16 sps:$4 sm:$0xff]  }
 0x800   :  { %11767 = vmatpush1.bf16.msra.mxu0 %v21056_v36  ;;  %v21125_v36 = vld [vmem:[#allocation4 + $0x1a8] ss:$16 sps:$4 sm:$0xff]  }
 0x801   :  { %11849 = vmatpush1.bf16.msra.mxu1 %v21059_v43  ;;  %11768 = vmatprep.subr.bf16.mxu0 %v21064_v19  ;;  %v21130_v43 = vld [vmem:[#allocation4 + $0x1c4] ss:$16 sps:$4 sm:$0xff]   ;;  %v21133_v19 = vld [vmem:[#allocation4 + $0x1cc] ss:$16 sps:$4 sm:$0xff]  }
 0x802   :  { %11850 = vmatprep.subr.bf16.mxu1 %v21067_v10  ;;  %v21128_v10 = vld [vmem:[#allocation4 + $0x1c0] ss:$16 sps:$4 sm:$0xff]  }
 0x804   :  { %11769 = vmatpush1.bf16.msra.mxu0 %v21062_v44  ;;  %v21131_v44 = vld [vmem:[#allocation4 + $0x1c8] ss:$16 sps:$4 sm:$0xff]  }
 0x805   :  { %11851 = vmatpush1.bf16.msra.mxu1 %v21065_v30  ;;  %11770 = vmatprep.subr.bf16.mxu0 %v21070_v46  ;;  %v21136_v30 = vld [vmem:[#allocation4 + $0x1e4] ss:$16 sps:$4 sm:$0xff]   ;;  %v21139_v46 = vld [vmem:[#allocation4 + $0x1ec] ss:$16 sps:$4 sm:$0xff]  }
 0x806   :  { %11852 = vmatprep.subr.bf16.mxu1 %v21073_v35  ;;  %v21134_v35 = vld [vmem:[#allocation4 + $0x1e0] ss:$16 sps:$4 sm:$0xff]  }
 0x808   :  { %11771 = vmatpush1.bf16.msra.mxu0 %v21068_v8  ;;  %v21137_v8 = vld [vmem:[#allocation4 + $0x1e8] ss:$16 sps:$4 sm:$0xff]  }
 0x809   :  { %11853 = vmatpush1.bf16.msra.mxu1 %v21071_v51  ;;  %11772 = vmatprep.subr.bf16.mxu0 %v21076_v59  ;;  %v21142_v51 = vld [vmem:[#allocation4 + $0x204] ss:$16 sps:$4 sm:$0xff]   ;;  %v21145_v59 = vld [vmem:[#allocation4 + $0x20c] ss:$16 sps:$4 sm:$0xff]  }
 0x80a   :  { %11854 = vmatprep.subr.bf16.mxu1 %v21079_v15  ;;  %v21140_v15 = vld [vmem:[#allocation4 + $0x200] ss:$16 sps:$4 sm:$0xff]  }
 0x80c   :  { %11773 = vmatpush1.bf16.msra.mxu0 %v21074_v29  ;;  %v21143_v29 = vld [vmem:[#allocation4 + $0x208] ss:$16 sps:$4 sm:$0xff]  }
 0x80d   :  { %11855 = vmatpush1.bf16.msra.mxu1 %v21077_v2  ;;  %11774 = vmatprep.subr.bf16.mxu0 %v21082_v49  ;;  %v21148_v2 = vld [vmem:[#allocation4 + $0x224] ss:$16 sps:$4 sm:$0xff]   ;;  %v21151_v49 = vld [vmem:[#allocation4 + $0x22c] ss:$16 sps:$4 sm:$0xff]  }
 0x80e   :  { %11856 = vmatprep.subr.bf16.mxu1 %v21085_v42  ;;  %v21146_v42 = vld [vmem:[#allocation4 + $0x220] ss:$16 sps:$4 sm:$0xff]  }
 0x810   :  { %11775 = vmatpush1.bf16.msra.mxu0 %v21080_v52  ;;  %v21149_v52 = vld [vmem:[#allocation4 + $0x228] ss:$16 sps:$4 sm:$0xff]  }
 0x811   :  { %11857 = vmatpush1.bf16.msra.mxu1 %v21083_v54  ;;  %11776 = vmatprep.subr.bf16.mxu0 %v21088_v27  ;;  %v21154_v54 = vld [vmem:[#allocation4 + $0x244] ss:$16 sps:$4 sm:$0xff]   ;;  %v21157_v27 = vld [vmem:[#allocation4 + $0x24c] ss:$16 sps:$4 sm:$0xff]  }
 0x812   :  { %11858 = vmatprep.subr.bf16.mxu1 %v21091_v23  ;;  %v21152_v23 = vld [vmem:[#allocation4 + $0x240] ss:$16 sps:$4 sm:$0xff]  }
 0x814   :  { %11777 = vmatpush1.bf16.msra.mxu0 %v21086_v56  ;;  %v21155_v56 = vld [vmem:[#allocation4 + $0x248] ss:$16 sps:$4 sm:$0xff]  }
 0x815   :  { %11859 = vmatpush1.bf16.msra.mxu1 %v21089_v60  ;;  %11778 = vmatprep.subr.bf16.mxu0 %v21094_v28  ;;  %v21160_v60 = vld [vmem:[#allocation4 + $0x264] ss:$16 sps:$4 sm:$0xff]   ;;  %v21163_v28 = vld [vmem:[#allocation4 + $0x26c] ss:$16 sps:$4 sm:$0xff]  }
 0x816   :  { %11860 = vmatprep.subr.bf16.mxu1 %v21097_v45  ;;  %v21158_v45 = vld [vmem:[#allocation4 + $0x260] ss:$16 sps:$4 sm:$0xff]  }
 0x818   :  { %11779 = vmatpush1.bf16.msra.mxu0 %v21092_v3  ;;  %v21161_v3 = vld [vmem:[#allocation4 + $0x268] ss:$16 sps:$4 sm:$0xff]  }
 0x819   :  { %11861 = vmatpush1.bf16.msra.mxu1 %v21095_v38  ;;  %11780 = vmatprep.subr.bf16.mxu0 %v21100_v58  ;;  %v21166_v38 = vld [vmem:[#allocation4 + $0x284] ss:$16 sps:$4 sm:$0xff]   ;;  %v21169_v58 = vld [vmem:[#allocation4 + $0x28c] ss:$16 sps:$4 sm:$0xff]  }
 0x81a   :  { %11862 = vmatprep.subr.bf16.mxu1 %v21103_v20  ;;  %v21164_v20 = vld [vmem:[#allocation4 + $0x280] ss:$16 sps:$4 sm:$0xff]  }
 0x81c   :  { %11781 = vmatpush1.bf16.msra.mxu0 %v21098_v61  ;;  %v21167_v61 = vld [vmem:[#allocation4 + $0x288] ss:$16 sps:$4 sm:$0xff]  }
 0x81d   :  { %11863 = vmatpush1.bf16.msra.mxu1 %v21101_v63  ;;  %11782 = vmatprep.subr.bf16.mxu0 %v21106_v41  ;;  %v21172_v63 = vld [vmem:[#allocation4 + $0x2a4] ss:$16 sps:$4 sm:$0xff]   ;;  %v21175_v41 = vld [vmem:[#allocation4 + $0x2ac] ss:$16 sps:$4 sm:$0xff]  }
 0x81e   :  { %11864 = vmatprep.subr.bf16.mxu1 %v21109_v53  ;;  %v21170_v53 = vld [vmem:[#allocation4 + $0x2a0] ss:$16 sps:$4 sm:$0xff]  }
 0x820   :  { %11783 = vmatpush1.bf16.msra.mxu0 %v21104_v7  ;;  %v21173_v7 = vld [vmem:[#allocation4 + $0x2a8] ss:$16 sps:$4 sm:$0xff]  }
 0x821   :  { %11865 = vmatpush1.bf16.msra.mxu1 %v21107_v62  ;;  %11784 = vmatprep.subr.bf16.mxu0 %v21112_v24  ;;  %v21178_v62 = vld [vmem:[#allocation4 + $0x2c4] ss:$16 sps:$4 sm:$0xff]   ;;  %v21181_v24 = vld [vmem:[#allocation4 + $0x2cc] ss:$16 sps:$4 sm:$0xff]  }
 0x822   :  { %11866 = vmatprep.subr.bf16.mxu1 %v21115_v25  ;;  %v21176_v25 = vld [vmem:[#allocation4 + $0x2c0] ss:$16 sps:$4 sm:$0xff]  }
 0x824   :  { %11785 = vmatpush1.bf16.msra.mxu0 %v21110_v22  ;;  %v21179_v22 = vld [vmem:[#allocation4 + $0x2c8] ss:$16 sps:$4 sm:$0xff]  }
 0x825   :  { %11867 = vmatpush1.bf16.msra.mxu1 %v21113_v34  ;;  %11786 = vmatprep.subr.bf16.mxu0 %v21118_v31  ;;  %v21184_v34 = vld [vmem:[#allocation4 + $0x2e4] ss:$16 sps:$4 sm:$0xff]   ;;  %v21187_v31 = vld [vmem:[#allocation4 + $0x2ec] ss:$16 sps:$4 sm:$0xff]  }
 0x826   :  { %11868 = vmatprep.subr.bf16.mxu1 %v21121_v4  ;;  %v21182_v4 = vld [vmem:[#allocation4 + $0x2e0] ss:$16 sps:$4 sm:$0xff]  }
 0x828   :  { %11787 = vmatpush1.bf16.msra.mxu0 %v21116_v6  ;;  %v21185_v6 = vld [vmem:[#allocation4 + $0x2e8] ss:$16 sps:$4 sm:$0xff]  }
 0x829   :  { %11869 = vmatpush1.bf16.msra.mxu1 %v21119_v37  ;;  %11788 = vmatprep.subr.bf16.mxu0 %v21124_v32  ;;  %v21190_v37 = vld [vmem:[#allocation4 + $0x604] ss:$16 sps:$4 sm:$0xff]   ;;  %v21193_v32 = vld [vmem:[#allocation4 + $0x60c] ss:$16 sps:$4 sm:$0xff]  }
 0x82a   :  { %11870 = vmatprep.subr.bf16.mxu1 %v21127_v39  ;;  %v21188_v39 = vld [vmem:[#allocation4 + $0x600] ss:$16 sps:$4 sm:$0xff]  }
 0x82c   :  { %11789 = vmatpush1.bf16.msra.mxu0 %v21122_v40  ;;  %v21191_v40 = vld [vmem:[#allocation4 + $0x608] ss:$16 sps:$4 sm:$0xff]  }
 0x82d   :  { %11871 = vmatpush1.bf16.msra.mxu1 %v21125_v36  ;;  %11790 = vmatprep.subr.bf16.mxu0 %v21130_v43  ;;  %v21196_v36 = vld [vmem:[#allocation4 + $0x624] ss:$16 sps:$4 sm:$0xff]   ;;  %v12026_v43 = vrot.slane %v22972_v57, 1 }
 0x82e   :  { %11872 = vmatprep.subr.bf16.mxu1 %v21133_v19  ;;  %v21199_v19 = vld [vmem:[#allocation4 + $0x62c] ss:$16 sps:$4 sm:$0xff]  }
 0x830   :  { %11791 = vmatpush1.bf16.msra.mxu0 %v21128_v10  ;;  %v21194_v10 = vld [vmem:[#allocation4 + $0x620] ss:$16 sps:$4 sm:$0xff]  }
 0x831   :  { %11873 = vmatpush1.bf16.msra.mxu1 %v21131_v44  ;;  %11792 = vmatprep.subr.bf16.mxu0 %v21136_v30  ;;  %v21197_v44 = vld [vmem:[#allocation4 + $0x628] ss:$16 sps:$4 sm:$0xff]   ;;  %v21202_v30 = vld [vmem:[#allocation4 + $0x644] ss:$16 sps:$4 sm:$0xff]  }
 0x832   :  { %11874 = vmatprep.subr.bf16.mxu1 %v21139_v46  ;;  %v21205_v46 = vld [vmem:[#allocation4 + $0x64c] ss:$16 sps:$4 sm:$0xff]  }
 0x834   :  { %11793 = vmatpush1.bf16.msra.mxu0 %v21134_v35  ;;  %v21200_v35 = vld [vmem:[#allocation4 + $0x640] ss:$16 sps:$4 sm:$0xff]  }
 0x835   :  { %11875 = vmatpush1.bf16.msra.mxu1 %v21137_v8  ;;  %11803 = vmatprep.subr.bf16.mxu0 %v21142_v51  ;;  %v21203_v8 = vld [vmem:[#allocation4 + $0x648] ss:$16 sps:$4 sm:$0xff]   ;;  %v21208_v51 = vld [vmem:[#allocation4 + $0x664] ss:$16 sps:$4 sm:$0xff]  }
 0x836   :  { %11885 = vmatprep.subr.bf16.mxu1 %v21145_v59  ;;  %v21211_v59 = vld [vmem:[#allocation4 + $0x66c] ss:$16 sps:$4 sm:$0xff]  }
 0x837   :  { %11795 = vmatmul.mubr.bf16.vlgmr.msra.gmra.mrb[52].mxu0 %v22968_v13 }
 0x838   :  { %11877 = vmatmul.mubr.bf16.vlgmr.msra.gmra.mrb[52].mxu1 %v22968_v13  ;;  %11804 = vmatpush1.bf16.msra.mxu0 %v21140_v15  ;;  %v21206_v15 = vld [vmem:[#allocation4 + $0x660] ss:$16 sps:$4 sm:$0xff]  }
 0x839   :  { %11886 = vmatpush1.bf16.msra.mxu1 %v21143_v29  ;;  %11805 = vmatprep.subr.bf16.mxu0 %v21148_v2  ;;  %v21209_v29 = vld [vmem:[#allocation4 + $0x668] ss:$16 sps:$4 sm:$0xff]   ;;  %v21214_v2 = vld [vmem:[#allocation4 + $0x684] ss:$16 sps:$4 sm:$0xff]  }
 0x83a   :  { %11887 = vmatprep.subr.bf16.mxu1 %v21151_v49  ;;  %11835 = vmatprep.mubr.bf16.mxu0 %v21960_v0  ;;  %v21217_v49 = vld [vmem:[#allocation4 + $0x68c] ss:$16 sps:$4 sm:$0xff]  }
 0x83b   :  { %11917 = vmatprep.mubr.bf16.mxu1 %v21960_v0 }
 0x83c   :  { %11806 = vmatpush1.bf16.msra.mxu0 %v21146_v42  ;;  %v21212_v42 = vld [vmem:[#allocation4 + $0x680] ss:$16 sps:$4 sm:$0xff]  }
 0x83d   :  { %11888 = vmatpush1.bf16.msra.mxu1 %v21149_v52  ;;  %11807 = vmatprep.subr.bf16.mxu0 %v21154_v54  ;;  %v21215_v52 = vld [vmem:[#allocation4 + $0x688] ss:$16 sps:$4 sm:$0xff]   ;;  %v21220_v54 = vld [vmem:[#allocation4 + $0x6a4] ss:$16 sps:$4 sm:$0xff]  }
 0x83e   :  { %11889 = vmatprep.subr.bf16.mxu1 %v21157_v27  ;;  %v21223_v27 = vld [vmem:[#allocation4 + $0x6ac] ss:$16 sps:$4 sm:$0xff]  }
 0x840   :  { %11808 = vmatpush1.bf16.msra.mxu0 %v21152_v23  ;;  %v21218_v23 = vld [vmem:[#allocation4 + $0x6a0] ss:$16 sps:$4 sm:$0xff]  }
 0x841   :  { %11890 = vmatpush1.bf16.msra.mxu1 %v21155_v56  ;;  %11809 = vmatprep.subr.bf16.mxu0 %v21160_v60  ;;  %v21221_v56 = vld [vmem:[#allocation4 + $0x6a8] ss:$16 sps:$4 sm:$0xff]   ;;  %v21226_v60 = vld [vmem:[#allocation4 + $0x6c4] ss:$16 sps:$4 sm:$0xff]  }
 0x842   :  { %11891 = vmatprep.subr.bf16.mxu1 %v21163_v28  ;;  %v21229_v28 = vld [vmem:[#allocation4 + $0x6cc] ss:$16 sps:$4 sm:$0xff]  }
 0x844   :  { %11810 = vmatpush1.bf16.msra.mxu0 %v21158_v45  ;;  %v21224_v45 = vld [vmem:[#allocation4 + $0x6c0] ss:$16 sps:$4 sm:$0xff]  }
 0x845   :  { %11892 = vmatpush1.bf16.msra.mxu1 %v21161_v3  ;;  %11811 = vmatprep.subr.bf16.mxu0 %v21166_v38  ;;  %v21227_v3 = vld [vmem:[#allocation4 + $0x6c8] ss:$16 sps:$4 sm:$0xff]   ;;  %v21232_v38 = vld [vmem:[#allocation4 + $0x6e4] ss:$16 sps:$4 sm:$0xff]  }
 0x846   :  { %11893 = vmatprep.subr.bf16.mxu1 %v21169_v58  ;;  %v21235_v58 = vld [vmem:[#allocation4 + $0x6ec] ss:$16 sps:$4 sm:$0xff]  }
 0x848   :  { %11812 = vmatpush1.bf16.msra.mxu0 %v21164_v20  ;;  %v21230_v20 = vld [vmem:[#allocation4 + $0x6e0] ss:$16 sps:$4 sm:$0xff]  }
 0x849   :  { %11894 = vmatpush1.bf16.msra.mxu1 %v21167_v61  ;;  %11813 = vmatprep.subr.bf16.mxu0 %v21172_v63  ;;  %v21233_v61 = vld [vmem:[#allocation4 + $0x6e8] ss:$16 sps:$4 sm:$0xff]   ;;  %v21238_v63 = vld [vmem:[#allocation4 + $0x704] ss:$16 sps:$4 sm:$0xff]  }
 0x84a   :  { %11895 = vmatprep.subr.bf16.mxu1 %v21175_v41  ;;  %v21241_v41 = vld [vmem:[#allocation4 + $0x70c] ss:$16 sps:$4 sm:$0xff]  }
 0x84c   :  { %11814 = vmatpush1.bf16.msra.mxu0 %v21170_v53  ;;  %v21236_v53 = vld [vmem:[#allocation4 + $0x700] ss:$16 sps:$4 sm:$0xff]  }
 0x84d   :  { %11896 = vmatpush1.bf16.msra.mxu1 %v21173_v7  ;;  %11815 = vmatprep.subr.bf16.mxu0 %v21178_v62  ;;  %v21239_v7 = vld [vmem:[#allocation4 + $0x708] ss:$16 sps:$4 sm:$0xff]   ;;  %v21244_v62 = vld [vmem:[#allocation4 + $0x724] ss:$16 sps:$4 sm:$0xff]  }
 0x84e   :  { %11897 = vmatprep.subr.bf16.mxu1 %v21181_v24  ;;  %v21247_v24 = vld [vmem:[#allocation4 + $0x72c] ss:$16 sps:$4 sm:$0xff]  }
 0x850   :  { %11816 = vmatpush1.bf16.msra.mxu0 %v21176_v25  ;;  %v21242_v25 = vld [vmem:[#allocation4 + $0x720] ss:$16 sps:$4 sm:$0xff]  }
 0x851   :  { %11898 = vmatpush1.bf16.msra.mxu1 %v21179_v22  ;;  %11817 = vmatprep.subr.bf16.mxu0 %v21184_v34  ;;  %v21245_v22 = vld [vmem:[#allocation4 + $0x728] ss:$16 sps:$4 sm:$0xff]   ;;  %v21250_v34 = vld [vmem:[#allocation4 + $0x744] ss:$16 sps:$4 sm:$0xff]  }
 0x852   :  { %11899 = vmatprep.subr.bf16.mxu1 %v21187_v31  ;;  %v21253_v31 = vld [vmem:[#allocation4 + $0x74c] ss:$16 sps:$4 sm:$0xff]  }
 0x854   :  { %11818 = vmatpush1.bf16.msra.mxu0 %v21182_v4  ;;  %v21248_v4 = vld [vmem:[#allocation4 + $0x740] ss:$16 sps:$4 sm:$0xff]  }
 0x855   :  { %11900 = vmatpush1.bf16.msra.mxu1 %v21185_v6  ;;  %12511 = vmatprep.subr.bf16.mxu0 %v21190_v37  ;;  %v21251_v6 = vld [vmem:[#allocation4 + $0x748] ss:$16 sps:$4 sm:$0xff]   ;;  %v21256_v37 = vld [vmem:[#allocation4 + $0x764] ss:$16 sps:$4 sm:$0xff]  }
 0x856   :  { %12593 = vmatprep.subr.bf16.mxu1 %v21193_v32  ;;  %v21259_v32 = vld [vmem:[#allocation4 + $0x76c] ss:$16 sps:$4 sm:$0xff]  }
 0x857   :  { %11836 = vmatmul.mubr.bf16.vlgmr.msra.gmra.mrb[52].mxu0 %v22976_v17 }
 0x858   :  { %11918 = vmatmul.mubr.bf16.vlgmr.msra.gmra.mrb[52].mxu1 %v22976_v17  ;;  %12512 = vmatpush1.bf16.msra.mxu0 %v21188_v39  ;;  %v21254_v39 = vld [vmem:[#allocation4 + $0x760] ss:$16 sps:$4 sm:$0xff]  }
 0x859   :  { %12543 = vmatprep.mubr.bf16.mxu0 %v12026_v43  ;;  %12594 = vmatpush1.bf16.msra.mxu1 %v21191_v40  ;;  %v21257_v40 = vld [vmem:[#allocation4 + $0x768] ss:$16 sps:$4 sm:$0xff]  }
 0x85a   :  { %12625 = vmatprep.mubr.bf16.mxu1 %v12026_v43  ;;  %12513 = vmatprep.subr.bf16.mxu0 %v21196_v36  ;;  %v21262_v36 = vld [vmem:[#allocation4 + $0x784] ss:$16 sps:$4 sm:$0xff]   ;;  %v21265_v43 = vld [vmem:[#allocation4 + $0x78c] ss:$16 sps:$4 sm:$0xff]  }
 0x85b   :  { %12595 = vmatprep.subr.bf16.mxu1 %v21199_v19  ;;  %v21260_v19 = vld [vmem:[#allocation4 + $0x780] ss:$16 sps:$4 sm:$0xff]  }
 0x85c   :  { %12514 = vmatpush1.bf16.msra.mxu0 %v21194_v10  ;;  %v21263_v10 = vld [vmem:[#allocation4 + $0x788] ss:$16 sps:$4 sm:$0xff]  }
 0x85d   :  { %12596 = vmatpush1.bf16.msra.mxu1 %v21197_v44  ;;  %12515 = vmatprep.subr.bf16.mxu0 %v21202_v30  ;;  %v21268_v44 = vld [vmem:[#allocation4 + $0x7a4] ss:$16 sps:$4 sm:$0xff]   ;;  %v21271_v30 = vld [vmem:[#allocation4 + $0x7ac] ss:$16 sps:$4 sm:$0xff]  }
 0x85e   :  { %12597 = vmatprep.subr.bf16.mxu1 %v21205_v46  ;;  %v21266_v46 = vld [vmem:[#allocation4 + $0x7a0] ss:$16 sps:$4 sm:$0xff]  }
 0x860   :  { %12516 = vmatpush1.bf16.msra.mxu0 %v21200_v35  ;;  %v21269_v35 = vld [vmem:[#allocation4 + $0x7a8] ss:$16 sps:$4 sm:$0xff]  }
 0x861   :  { %12598 = vmatpush1.bf16.msra.mxu1 %v21203_v8  ;;  %12517 = vmatprep.subr.bf16.mxu0 %v21208_v51  ;;  %v21274_v8 = vld [vmem:[#allocation4 + $0x7c4] ss:$16 sps:$4 sm:$0xff]   ;;  %v21277_v51 = vld [vmem:[#allocation4 + $0x7cc] ss:$16 sps:$4 sm:$0xff]  }
 0x862   :  { %12599 = vmatprep.subr.bf16.mxu1 %v21211_v59  ;;  %v21272_v59 = vld [vmem:[#allocation4 + $0x7c0] ss:$16 sps:$4 sm:$0xff]  }
 0x864   :  { %12518 = vmatpush1.bf16.msra.mxu0 %v21206_v15  ;;  %v21275_v15 = vld [vmem:[#allocation4 + $0x7c8] ss:$16 sps:$4 sm:$0xff]  }
 0x865   :  { %12600 = vmatpush1.bf16.msra.mxu1 %v21209_v29  ;;  %12519 = vmatprep.subr.bf16.mxu0 %v21214_v2  ;;  %v21280_v29 = vld [vmem:[#allocation4 + $0x7e4] ss:$16 sps:$4 sm:$0xff]   ;;  %v21283_v2 = vld [vmem:[#allocation4 + $0x7ec] ss:$16 sps:$4 sm:$0xff]  }
 0x866   :  { %12601 = vmatprep.subr.bf16.mxu1 %v21217_v49  ;;  %v21278_v49 = vld [vmem:[#allocation4 + $0x7e0] ss:$16 sps:$4 sm:$0xff]  }
 0x868   :  { %12520 = vmatpush1.bf16.msra.mxu0 %v21212_v42  ;;  %v21281_v42 = vld [vmem:[#allocation4 + $0x7e8] ss:$16 sps:$4 sm:$0xff]  }
 0x869   :  { %12602 = vmatpush1.bf16.msra.mxu1 %v21215_v52  ;;  %12521 = vmatprep.subr.bf16.mxu0 %v21220_v54  ;;  %v21286_v52 = vld [vmem:[#allocation4 + $0x804] ss:$16 sps:$4 sm:$0xff]   ;;  %v21289_v54 = vld [vmem:[#allocation4 + $0x80c] ss:$16 sps:$4 sm:$0xff]  }
 0x86a   :  { %12603 = vmatprep.subr.bf16.mxu1 %v21223_v27  ;;  %v21284_v27 = vld [vmem:[#allocation4 + $0x800] ss:$16 sps:$4 sm:$0xff]  }
 0x86c   :  { %12522 = vmatpush1.bf16.msra.mxu0 %v21218_v23  ;;  %v12025_v23 = vrot.slane %v22968_v13, 1 }
 0x86d   :  { %12604 = vmatpush1.bf16.msra.mxu1 %v21221_v56  ;;  %12523 = vmatprep.subr.bf16.mxu0 %v21226_v60  ;;  %v21287_v56 = vld [vmem:[#allocation4 + $0x808] ss:$16 sps:$4 sm:$0xff]   ;;  %v21292_v60 = vld [vmem:[#allocation4 + $0x824] ss:$16 sps:$4 sm:$0xff]  }
 0x86e   :  { %12605 = vmatprep.subr.bf16.mxu1 %v21229_v28  ;;  %v21295_v28 = vld [vmem:[#allocation4 + $0x82c] ss:$16 sps:$4 sm:$0xff]  }
 0x870   :  { %12524 = vmatpush1.bf16.msra.mxu0 %v21224_v45  ;;  %v21290_v45 = vld [vmem:[#allocation4 + $0x820] ss:$16 sps:$4 sm:$0xff]  }
 0x871   :  { %12606 = vmatpush1.bf16.msra.mxu1 %v21227_v3  ;;  %12525 = vmatprep.subr.bf16.mxu0 %v21232_v38  ;;  %v21293_v3 = vld [vmem:[#allocation4 + $0x828] ss:$16 sps:$4 sm:$0xff]   ;;  %v21298_v38 = vld [vmem:[#allocation4 + $0x844] ss:$16 sps:$4 sm:$0xff]  }
 0x872   :  { %12607 = vmatprep.subr.bf16.mxu1 %v21235_v58  ;;  %v21301_v58 = vld [vmem:[#allocation4 + $0x84c] ss:$16 sps:$4 sm:$0xff]  }
 0x874   :  { %12526 = vmatpush1.bf16.msra.mxu0 %v21230_v20  ;;  %v21296_v20 = vld [vmem:[#allocation4 + $0x840] ss:$16 sps:$4 sm:$0xff]  }
 0x875   :  { %12608 = vmatpush1.bf16.msra.mxu1 %v21233_v61  ;;  %12527 = vmatprep.subr.bf16.mxu0 %v21238_v63  ;;  %v21299_v61 = vld [vmem:[#allocation4 + $0x848] ss:$16 sps:$4 sm:$0xff]   ;;  %v21304_v63 = vld [vmem:[#allocation4 + $0x864] ss:$16 sps:$4 sm:$0xff]  }
 0x876   :  { %12609 = vmatprep.subr.bf16.mxu1 %v21241_v41  ;;  %v21307_v41 = vld [vmem:[#allocation4 + $0x86c] ss:$16 sps:$4 sm:$0xff]  }
 0x878   :  { %12528 = vmatpush1.bf16.msra.mxu0 %v21236_v53  ;;  %v21302_v53 = vld [vmem:[#allocation4 + $0x860] ss:$16 sps:$4 sm:$0xff]  }
 0x879   :  { %12610 = vmatpush1.bf16.msra.mxu1 %v21239_v7  ;;  %12529 = vmatprep.subr.bf16.mxu0 %v21244_v62  ;;  %v21305_v7 = vld [vmem:[#allocation4 + $0x868] ss:$16 sps:$4 sm:$0xff]   ;;  %v21310_v62 = vld [vmem:[#allocation4 + $0x884] ss:$16 sps:$4 sm:$0xff]  }
 0x87a   :  { %12611 = vmatprep.subr.bf16.mxu1 %v21247_v24  ;;  %v21313_v24 = vld [vmem:[#allocation4 + $0x88c] ss:$16 sps:$4 sm:$0xff]  }
 0x87c   :  { %12530 = vmatpush1.bf16.msra.mxu0 %v21242_v25  ;;  %v21308_v25 = vld [vmem:[#allocation4 + $0x880] ss:$16 sps:$4 sm:$0xff]  }
 0x87d   :  { %12612 = vmatpush1.bf16.msra.mxu1 %v21245_v22  ;;  %12531 = vmatprep.subr.bf16.mxu0 %v21250_v34  ;;  %v21311_v22 = vld [vmem:[#allocation4 + $0x888] ss:$16 sps:$4 sm:$0xff]   ;;  %v21316_v34 = vld [vmem:[#allocation4 + $0x8a4] ss:$16 sps:$4 sm:$0xff]  }
 0x87e   :  { %12613 = vmatprep.subr.bf16.mxu1 %v21253_v31  ;;  %v21319_v31 = vld [vmem:[#allocation4 + $0x8ac] ss:$16 sps:$4 sm:$0xff]  }
 0x880   :  { %12532 = vmatpush1.bf16.msra.mxu0 %v21248_v4  ;;  %v21314_v4 = vld [vmem:[#allocation4 + $0x8a0] ss:$16 sps:$4 sm:$0xff]  }
 0x881   :  { %12614 = vmatpush1.bf16.msra.mxu1 %v21251_v6  ;;  %12533 = vmatprep.subr.bf16.mxu0 %v21256_v37  ;;  %v21317_v6 = vld [vmem:[#allocation4 + $0x8a8] ss:$16 sps:$4 sm:$0xff]   ;;  %v21322_v37 = vld [vmem:[#allocation4 + $0x8c4] ss:$16 sps:$4 sm:$0xff]  }
 0x882   :  { %12615 = vmatprep.subr.bf16.mxu1 %v21259_v32  ;;  %v21325_v32 = vld [vmem:[#allocation4 + $0x8cc] ss:$16 sps:$4 sm:$0xff]  }
 0x884   :  { %12534 = vmatpush1.bf16.msra.mxu0 %v21254_v39  ;;  %v21320_v39 = vld [vmem:[#allocation4 + $0x8c0] ss:$16 sps:$4 sm:$0xff]  }
 0x885   :  { %12616 = vmatpush1.bf16.msra.mxu1 %v21257_v40  ;;  %12535 = vmatprep.subr.bf16.mxu0 %v21262_v36  ;;  %v21323_v40 = vld [vmem:[#allocation4 + $0x8c8] ss:$16 sps:$4 sm:$0xff]   ;;  %v21328_v36 = vld [vmem:[#allocation4 + $0x8e4] ss:$16 sps:$4 sm:$0xff]  }
 0x886   :  { %12617 = vmatprep.subr.bf16.mxu1 %v21265_v43  ;;  %v21331_v43 = vld [vmem:[#allocation4 + $0x8ec] ss:$16 sps:$4 sm:$0xff]  }
 0x888   :  { %12536 = vmatpush1.bf16.msra.mxu0 %v21260_v19  ;;  %v21326_v19 = vld [vmem:[#allocation4 + $0x8e0] ss:$16 sps:$4 sm:$0xff]  }
 0x889   :  { %12618 = vmatpush1.bf16.msra.mxu1 %v21263_v10  ;;  %12537 = vmatprep.subr.bf16.mxu0 %v21268_v44  ;;  %v21329_v10 = vld [vmem:[#allocation4 + $0x8e8] ss:$16 sps:$4 sm:$0xff]   ;;  %v21334_v44 = vld [vmem:[#allocation4 + $0x904] ss:$16 sps:$4 sm:$0xff]  }
 0x88a   :  { %12619 = vmatprep.subr.bf16.mxu1 %v21271_v30  ;;  %v21337_v30 = vld [vmem:[#allocation4 + $0x90c] ss:$16 sps:$4 sm:$0xff]  }
 0x88c   :  { %12538 = vmatpush1.bf16.msra.mxu0 %v21266_v46  ;;  %v21332_v46 = vld [vmem:[#allocation4 + $0x900] ss:$16 sps:$4 sm:$0xff]  }
 0x88d   :  { %12620 = vmatpush1.bf16.msra.mxu1 %v21269_v35  ;;  %12539 = vmatprep.subr.bf16.mxu0 %v21274_v8  ;;  %v12027_v35 = vrot.slane %v22976_v17, 1  ;;  %v21335_v8 = vld [vmem:[#allocation4 + $0x908] ss:$16 sps:$4 sm:$0xff]  }
 0x88e   :  { %12621 = vmatprep.subr.bf16.mxu1 %v21277_v51  ;;  %v21340_v51 = vld [vmem:[#allocation4 + $0x924] ss:$16 sps:$4 sm:$0xff]  }
 0x890   :  { %12540 = vmatpush1.bf16.msra.mxu0 %v21272_v59  ;;  %v21343_v59 = vld [vmem:[#allocation4 + $0x92c] ss:$16 sps:$4 sm:$0xff]  }
 0x891   :  { %12622 = vmatpush1.bf16.msra.mxu1 %v21275_v15  ;;  %12541 = vmatprep.subr.bf16.mxu0 %v21280_v29  ;;  %v21338_v15 = vld [vmem:[#allocation4 + $0x920] ss:$16 sps:$4 sm:$0xff]   ;;  %v21341_v29 = vld [vmem:[#allocation4 + $0x928] ss:$16 sps:$4 sm:$0xff]  }
 0x892   :  { %12623 = vmatprep.subr.bf16.mxu1 %v21283_v2  ;;  %v21346_v2 = vld [vmem:[#allocation4 + $0x944] ss:$16 sps:$4 sm:$0xff]  }
 0x894   :  { %12542 = vmatpush1.bf16.msra.mxu0 %v21278_v49  ;;  %v21349_v49 = vld [vmem:[#allocation4 + $0x94c] ss:$16 sps:$4 sm:$0xff]  }
 0x895   :  { %12624 = vmatpush1.bf16.msra.mxu1 %v21281_v42  ;;  %12552 = vmatprep.subr.bf16.mxu0 %v21286_v52  ;;  %v21344_v42 = vld [vmem:[#allocation4 + $0x940] ss:$16 sps:$4 sm:$0xff]   ;;  %v21347_v52 = vld [vmem:[#allocation4 + $0x948] ss:$16 sps:$4 sm:$0xff]  }
 0x896   :  { %12634 = vmatprep.subr.bf16.mxu1 %v21289_v54  ;;  %v21352_v54 = vld [vmem:[#allocation4 + $0x964] ss:$16 sps:$4 sm:$0xff]  }
 0x897   :  { %12544 = vmatmul.mubr.bf16.vlgmr.msra.gmra.mrb[52].mxu0 %v12025_v23 }
 0x898   :  { %12626 = vmatmul.mubr.bf16.vlgmr.msra.gmra.mrb[52].mxu1 %v12025_v23  ;;  %12553 = vmatpush1.bf16.msra.mxu0 %v21284_v27  ;;  %v21355_v27 = vld [vmem:[#allocation4 + $0x96c] ss:$16 sps:$4 sm:$0xff]   ;;  %v21350_v23 = vld [vmem:[#allocation4 + $0x960] ss:$16 sps:$4 sm:$0xff]  }
 0x899   :  { %12635 = vmatpush1.bf16.msra.mxu1 %v21287_v56  ;;  %12554 = vmatprep.subr.bf16.mxu0 %v21292_v60  ;;  %v21353_v56 = vld [vmem:[#allocation4 + $0x968] ss:$16 sps:$4 sm:$0xff]   ;;  %v21358_v60 = vld [vmem:[#allocation4 + $0x984] ss:$16 sps:$4 sm:$0xff]  }
 0x89a   :  { %12636 = vmatprep.subr.bf16.mxu1 %v21295_v28  ;;  %12584 = vmatprep.mubr.bf16.mxu0 %v21960_v0  ;;  %v21361_v28 = vld [vmem:[#allocation4 + $0x98c] ss:$16 sps:$4 sm:$0xff]  }
 0x89b   :  { %12666 = vmatprep.mubr.bf16.mxu1 %v21960_v0 }
 0x89c   :  { %12555 = vmatpush1.bf16.msra.mxu0 %v21290_v45  ;;  %v21359_v45 = vld [vmem:[#allocation4 + $0x988] ss:$16 sps:$4 sm:$0xff]  }
 0x89d   :  { %12637 = vmatpush1.bf16.msra.mxu1 %v21293_v3  ;;  %12556 = vmatprep.subr.bf16.mxu0 %v21298_v38  ;;  %v21364_v3 = vld [vmem:[#allocation4 + $0x9a4] ss:$16 sps:$4 sm:$0xff]   ;;  %v21367_v38 = vld [vmem:[#allocation4 + $0x9ac] ss:$16 sps:$4 sm:$0xff]  }
 0x89e   :  { %12638 = vmatprep.subr.bf16.mxu1 %v21301_v58  ;;  %v21362_v58 = vld [vmem:[#allocation4 + $0x9a0] ss:$16 sps:$4 sm:$0xff]  }
 0x8a0   :  { %12557 = vmatpush1.bf16.msra.mxu0 %v21296_v20  ;;  %v21365_v20 = vld [vmem:[#allocation4 + $0x9a8] ss:$16 sps:$4 sm:$0xff]  }
 0x8a1   :  { %12639 = vmatpush1.bf16.msra.mxu1 %v21299_v61  ;;  %12558 = vmatprep.subr.bf16.mxu0 %v21304_v63  ;;  %v21370_v61 = vld [vmem:[#allocation4 + $0x9c4] ss:$16 sps:$4 sm:$0xff]   ;;  %v21373_v63 = vld [vmem:[#allocation4 + $0x9cc] ss:$16 sps:$4 sm:$0xff]  }
 0x8a2   :  { %12640 = vmatprep.subr.bf16.mxu1 %v21307_v41  ;;  %v21368_v41 = vld [vmem:[#allocation4 + $0x9c0] ss:$16 sps:$4 sm:$0xff]  }
 0x8a4   :  { %12559 = vmatpush1.bf16.msra.mxu0 %v21302_v53  ;;  %v21371_v53 = vld [vmem:[#allocation4 + $0x9c8] ss:$16 sps:$4 sm:$0xff]  }
 0x8a5   :  { %12641 = vmatpush1.bf16.msra.mxu1 %v21305_v7  ;;  %12560 = vmatprep.subr.bf16.mxu0 %v21310_v62  ;;  %v21376_v7 = vld [vmem:[#allocation4 + $0x9e4] ss:$16 sps:$4 sm:$0xff]   ;;  %v21379_v62 = vld [vmem:[#allocation4 + $0x9ec] ss:$16 sps:$4 sm:$0xff]  }
 0x8a6   :  { %12642 = vmatprep.subr.bf16.mxu1 %v21313_v24  ;;  %v21374_v24 = vld [vmem:[#allocation4 + $0x9e0] ss:$16 sps:$4 sm:$0xff]  }
 0x8a8   :  { %12561 = vmatpush1.bf16.msra.mxu0 %v21308_v25  ;;  %v21377_v25 = vld [vmem:[#allocation4 + $0x9e8] ss:$16 sps:$4 sm:$0xff]  }
 0x8a9   :  { %12643 = vmatpush1.bf16.msra.mxu1 %v21311_v22  ;;  %12562 = vmatprep.subr.bf16.mxu0 %v21316_v34  ;;  %v21382_v22 = vld [vmem:[#allocation4 + $0xa04] ss:$16 sps:$4 sm:$0xff]   ;;  %v21385_v34 = vld [vmem:[#allocation4 + $0xa0c] ss:$16 sps:$4 sm:$0xff]  }
 0x8aa   :  { %12644 = vmatprep.subr.bf16.mxu1 %v21319_v31  ;;  %v21380_v31 = vld [vmem:[#allocation4 + $0xa00] ss:$16 sps:$4 sm:$0xff]  }
 0x8ac   :  { %12563 = vmatpush1.bf16.msra.mxu0 %v21314_v4  ;;  %v21383_v4 = vld [vmem:[#allocation4 + $0xa08] ss:$16 sps:$4 sm:$0xff]  }
 0x8ad   :  { %12645 = vmatpush1.bf16.msra.mxu1 %v21317_v6  ;;  %12564 = vmatprep.subr.bf16.mxu0 %v21322_v37  ;;  %v21388_v6 = vld [vmem:[#allocation4 + $0xa24] ss:$16 sps:$4 sm:$0xff]   ;;  %v21391_v37 = vld [vmem:[#allocation4 + $0xa2c] ss:$16 sps:$4 sm:$0xff]  }
 0x8ae   :  { %12646 = vmatprep.subr.bf16.mxu1 %v21325_v32  ;;  %v21386_v32 = vld [vmem:[#allocation4 + $0xa20] ss:$16 sps:$4 sm:$0xff]  }
 0x8b0   :  { %12565 = vmatpush1.bf16.msra.mxu0 %v21320_v39  ;;  %v21389_v39 = vld [vmem:[#allocation4 + $0xa28] ss:$16 sps:$4 sm:$0xff]  }
 0x8b1   :  { %12647 = vmatpush1.bf16.msra.mxu1 %v21323_v40  ;;  %12566 = vmatprep.subr.bf16.mxu0 %v21328_v36  ;;  %v21394_v40 = vld [vmem:[#allocation4 + $0xa44] ss:$16 sps:$4 sm:$0xff]   ;;  %v21397_v36 = vld [vmem:[#allocation4 + $0xa4c] ss:$16 sps:$4 sm:$0xff]  }
 0x8b2   :  { %12648 = vmatprep.subr.bf16.mxu1 %v21331_v43  ;;  %v21392_v43 = vld [vmem:[#allocation4 + $0xa40] ss:$16 sps:$4 sm:$0xff]  }
 0x8b4   :  { %12567 = vmatpush1.bf16.msra.mxu0 %v21326_v19  ;;  %v21395_v19 = vld [vmem:[#allocation4 + $0xa48] ss:$16 sps:$4 sm:$0xff]  }
 0x8b5   :  { %12649 = vmatpush1.bf16.msra.mxu1 %v21329_v10  ;;  %13267 = vmatprep.subr.bf16.mxu0 %v21334_v44  ;;  %v21400_v10 = vld [vmem:[#allocation4 + $0xa64] ss:$16 sps:$4 sm:$0xff]   ;;  %v21403_v44 = vld [vmem:[#allocation4 + $0xa6c] ss:$16 sps:$4 sm:$0xff]  }
 0x8b6   :  { %13349 = vmatprep.subr.bf16.mxu1 %v21337_v30  ;;  %v21398_v30 = vld [vmem:[#allocation4 + $0xa60] ss:$16 sps:$4 sm:$0xff]  }
 0x8b7   :  { %12585 = vmatmul.mubr.bf16.vlgmr.msra.gmra.mrb[52].mxu0 %v12027_v35 }
 0x8b8   :  { %12667 = vmatmul.mubr.bf16.vlgmr.msra.gmra.mrb[52].mxu1 %v12027_v35  ;;  %13268 = vmatpush1.bf16.msra.mxu0 %v21332_v46  ;;  %v21401_v46 = vld [vmem:[#allocation4 + $0xa68] ss:$16 sps:$4 sm:$0xff]   ;;  %v21406_v35 = vld [vmem:[#allocation4 + $0xa84] ss:$16 sps:$4 sm:$0xff]  }
 0x8b9   :  { %13299 = vmatprep.mubr.bf16.mxu0 %v22986_v55  ;;  %13350 = vmatpush1.bf16.msra.mxu1 %v21335_v8  ;;  %v21409_v8 = vld [vmem:[#allocation4 + $0xa8c] ss:$16 sps:$4 sm:$0xff]  }
 0x8ba   :  { %13381 = vmatprep.mubr.bf16.mxu1 %v22986_v55  ;;  %13269 = vmatprep.subr.bf16.mxu0 %v21340_v51  ;;  %v21356_v55 = vld [vmem:[#allocation4 + $0x980] ss:$16 sps:$4 sm:$0xff]  }
 0x8bb   :  { %13351 = vmatprep.subr.bf16.mxu1 %v21343_v59  ;;  %v21404_v51 = vld [vmem:[#allocation4 + $0xa80] ss:$16 sps:$4 sm:$0xff]   ;;  %v21407_v59 = vld [vmem:[#allocation4 + $0xa88] ss:$16 sps:$4 sm:$0xff]  }
 0x8bc   :  { %13270 = vmatpush1.bf16.msra.mxu0 %v21338_v15  ;;  %v21412_v15 = vld [vmem:[#allocation4 + $0xaa4] ss:$16 sps:$4 sm:$0xff]  }
 0x8bd   :  { %13352 = vmatpush1.bf16.msra.mxu1 %v21341_v29  ;;  %13271 = vmatprep.subr.bf16.mxu0 %v21346_v2  ;;  %v21415_v29 = vld [vmem:[#allocation4 + $0xaac] ss:$16 sps:$4 sm:$0xff]   ;;  %v21410_v2 = vld [vmem:[#allocation4 + $0xaa0] ss:$16 sps:$4 sm:$0xff]  }
 0x8be   :  { %13353 = vmatprep.subr.bf16.mxu1 %v21349_v49  ;;  %v21413_v49 = vld [vmem:[#allocation4 + $0xaa8] ss:$16 sps:$4 sm:$0xff]  }
 0x8c0   :  { %13272 = vmatpush1.bf16.msra.mxu0 %v21344_v42  ;;  %v21418_v42 = vld [vmem:[#allocation4 + $0xac4] ss:$16 sps:$4 sm:$0xff]  }
 0x8c1   :  { %13354 = vmatpush1.bf16.msra.mxu1 %v21347_v52  ;;  %13273 = vmatprep.subr.bf16.mxu0 %v21352_v54  ;;  %v21421_v52 = vld [vmem:[#allocation4 + $0xacc] ss:$16 sps:$4 sm:$0xff]   ;;  %v21416_v54 = vld [vmem:[#allocation4 + $0xac0] ss:$16 sps:$4 sm:$0xff]  }
 0x8c2   :  { %13355 = vmatprep.subr.bf16.mxu1 %v21355_v27  ;;  %v21419_v27 = vld [vmem:[#allocation4 + $0xac8] ss:$16 sps:$4 sm:$0xff]  }
 0x8c4   :  { %13274 = vmatpush1.bf16.msra.mxu0 %v21350_v23  ;;  %v21424_v23 = vld [vmem:[#allocation4 + $0xae4] ss:$16 sps:$4 sm:$0xff]  }
 0x8c5   :  { %13356 = vmatpush1.bf16.msra.mxu1 %v21353_v56  ;;  %13275 = vmatprep.subr.bf16.mxu0 %v21358_v60  ;;  %v21427_v56 = vld [vmem:[#allocation4 + $0xaec] ss:$16 sps:$4 sm:$0xff]   ;;  %v21422_v60 = vld [vmem:[#allocation4 + $0xae0] ss:$16 sps:$4 sm:$0xff]  }
 0x8c6   :  { %13357 = vmatprep.subr.bf16.mxu1 %v21361_v28  ;;  %v21425_v28 = vld [vmem:[#allocation4 + $0xae8] ss:$16 sps:$4 sm:$0xff]  }
 0x8c8   :  { %13276 = vmatpush1.bf16.msra.mxu0 %v21356_v55  ;;  %v21430_v55 = vld [vmem:[#allocation4 + $0xb04] ss:$16 sps:$4 sm:$0xff]  }
 0x8c9   :  { %13358 = vmatpush1.bf16.msra.mxu1 %v21359_v45  ;;  %13277 = vmatprep.subr.bf16.mxu0 %v21364_v3  ;;  %v21433_v45 = vld [vmem:[#allocation4 + $0xb0c] ss:$16 sps:$4 sm:$0xff]   ;;  %v21428_v3 = vld [vmem:[#allocation4 + $0xb00] ss:$16 sps:$4 sm:$0xff]  }
 0x8ca   :  { %13359 = vmatprep.subr.bf16.mxu1 %v21367_v38  ;;  %v21431_v38 = vld [vmem:[#allocation4 + $0xb08] ss:$16 sps:$4 sm:$0xff]  }
 0x8cc   :  { %13278 = vmatpush1.bf16.msra.mxu0 %v21362_v58  ;;  %v21436_v58 = vld [vmem:[#allocation4 + $0xb24] ss:$16 sps:$4 sm:$0xff]  }
 0x8cd   :  { %13360 = vmatpush1.bf16.msra.mxu1 %v21365_v20  ;;  %13279 = vmatprep.subr.bf16.mxu0 %v21370_v61  ;;  %v21439_v20 = vld [vmem:[#allocation4 + $0xb2c] ss:$16 sps:$4 sm:$0xff]   ;;  %v21434_v61 = vld [vmem:[#allocation4 + $0xb20] ss:$16 sps:$4 sm:$0xff]  }
 0x8ce   :  { %13361 = vmatprep.subr.bf16.mxu1 %v21373_v63  ;;  %v21437_v63 = vld [vmem:[#allocation4 + $0xb28] ss:$16 sps:$4 sm:$0xff]  }
 0x8d0   :  { %13280 = vmatpush1.bf16.msra.mxu0 %v21368_v41  ;;  %v21442_v41 = vld [vmem:[#allocation4 + $0xb44] ss:$16 sps:$4 sm:$0xff]  }
 0x8d1   :  { %13362 = vmatpush1.bf16.msra.mxu1 %v21371_v53  ;;  %13281 = vmatprep.subr.bf16.mxu0 %v21376_v7  ;;  %v21445_v53 = vld [vmem:[#allocation4 + $0xb4c] ss:$16 sps:$4 sm:$0xff]   ;;  %v21440_v7 = vld [vmem:[#allocation4 + $0xb40] ss:$16 sps:$4 sm:$0xff]  }
 0x8d2   :  { %13363 = vmatprep.subr.bf16.mxu1 %v21379_v62  ;;  %v21443_v62 = vld [vmem:[#allocation4 + $0xb48] ss:$16 sps:$4 sm:$0xff]  }
 0x8d4   :  { %13282 = vmatpush1.bf16.msra.mxu0 %v21374_v24  ;;  %v21448_v24 = vld [vmem:[#allocation4 + $0xb64] ss:$16 sps:$4 sm:$0xff]  }
 0x8d5   :  { %13364 = vmatpush1.bf16.msra.mxu1 %v21377_v25  ;;  %13283 = vmatprep.subr.bf16.mxu0 %v21382_v22  ;;  %v21446_v25 = vld [vmem:[#allocation4 + $0xb60] ss:$16 sps:$4 sm:$0xff]   ;;  %v21449_v22 = vld [vmem:[#allocation4 + $0xb68] ss:$16 sps:$4 sm:$0xff]  }
 0x8d6   :  { %13365 = vmatprep.subr.bf16.mxu1 %v21385_v34  ;;  %v21454_v34 = vld [vmem:[#allocation4 + $0xb84] ss:$16 sps:$4 sm:$0xff]  }
 0x8d8   :  { %13284 = vmatpush1.bf16.msra.mxu0 %v21380_v31  ;;  %v21457_v31 = vld [vmem:[#allocation4 + $0xb8c] ss:$16 sps:$4 sm:$0xff]  }
 0x8d9   :  { %13366 = vmatpush1.bf16.msra.mxu1 %v21383_v4  ;;  %13285 = vmatprep.subr.bf16.mxu0 %v21388_v6  ;;  %v21452_v4 = vld [vmem:[#allocation4 + $0xb80] ss:$16 sps:$4 sm:$0xff]   ;;  %v21455_v6 = vld [vmem:[#allocation4 + $0xb88] ss:$16 sps:$4 sm:$0xff]  }
 0x8da   :  { %13367 = vmatprep.subr.bf16.mxu1 %v21391_v37  ;;  %v21460_v37 = vld [vmem:[#allocation4 + $0xba4] ss:$16 sps:$4 sm:$0xff]  }
 0x8dc   :  { %13286 = vmatpush1.bf16.msra.mxu0 %v21386_v32  ;;  %v21463_v32 = vld [vmem:[#allocation4 + $0xbac] ss:$16 sps:$4 sm:$0xff]  }
 0x8dd   :  { %13368 = vmatpush1.bf16.msra.mxu1 %v21389_v39  ;;  %13287 = vmatprep.subr.bf16.mxu0 %v21394_v40  ;;  %v21458_v39 = vld [vmem:[#allocation4 + $0xba0] ss:$16 sps:$4 sm:$0xff]   ;;  %v21461_v40 = vld [vmem:[#allocation4 + $0xba8] ss:$16 sps:$4 sm:$0xff]  }
 0x8de   :  { %13369 = vmatprep.subr.bf16.mxu1 %v21397_v36  ;;  %v21466_v36 = vld [vmem:[#allocation4 + $0xbc4] ss:$16 sps:$4 sm:$0xff]  }
 0x8e0   :  { %13288 = vmatpush1.bf16.msra.mxu0 %v21392_v43  ;;  %v21469_v43 = vld [vmem:[#allocation4 + $0xbcc] ss:$16 sps:$4 sm:$0xff]  }
 0x8e1   :  { %13370 = vmatpush1.bf16.msra.mxu1 %v21395_v19  ;;  %13289 = vmatprep.subr.bf16.mxu0 %v21400_v10  ;;  %v21464_v19 = vld [vmem:[#allocation4 + $0xbc0] ss:$16 sps:$4 sm:$0xff]   ;;  %v21467_v10 = vld [vmem:[#allocation4 + $0xbc8] ss:$16 sps:$4 sm:$0xff]  }
 0x8e2   :  { %13371 = vmatprep.subr.bf16.mxu1 %v21403_v44  ;;  %v21472_v44 = vld [vmem:[#allocation4 + $0xbe4] ss:$16 sps:$4 sm:$0xff]  }
 0x8e4   :  { %13290 = vmatpush1.bf16.msra.mxu0 %v21398_v30  ;;  %v21475_v30 = vld [vmem:[#allocation4 + $0xbec] ss:$16 sps:$4 sm:$0xff]  }
 0x8e5   :  { %13372 = vmatpush1.bf16.msra.mxu1 %v21401_v46  ;;  %13291 = vmatprep.subr.bf16.mxu0 %v21406_v35  ;;  %v21470_v46 = vld [vmem:[#allocation4 + $0xbe0] ss:$16 sps:$4 sm:$0xff]   ;;  %v21473_v35 = vld [vmem:[#allocation4 + $0xbe8] ss:$16 sps:$4 sm:$0xff]  }
 0x8e6   :  { %13373 = vmatprep.subr.bf16.mxu1 %v21409_v8  ;;  %v21478_v8 = vld [vmem:[#allocation4 + $0xc04] ss:$16 sps:$4 sm:$0xff]  }
 0x8e8   :  { %13292 = vmatpush1.bf16.msra.mxu0 %v21404_v51  ;;  %v21481_v51 = vld [vmem:[#allocation4 + $0xc0c] ss:$16 sps:$4 sm:$0xff]  }
 0x8e9   :  { %13374 = vmatpush1.bf16.msra.mxu1 %v21407_v59  ;;  %13293 = vmatprep.subr.bf16.mxu0 %v21412_v15  ;;  %v21476_v59 = vld [vmem:[#allocation4 + $0xc00] ss:$16 sps:$4 sm:$0xff]   ;;  %v21479_v15 = vld [vmem:[#allocation4 + $0xc08] ss:$16 sps:$4 sm:$0xff]  }
 0x8ea   :  { %13375 = vmatprep.subr.bf16.mxu1 %v21415_v29  ;;  %v21484_v29 = vld [vmem:[#allocation4 + $0xc24] ss:$16 sps:$4 sm:$0xff]  }
 0x8ec   :  { %13294 = vmatpush1.bf16.msra.mxu0 %v21410_v2  ;;  %v13532_v2 = vrot.slane %v22972_v57, 2  ;;  %v21499_v57 = vld [vmem:[#allocation4 + $0xc6c] ss:$16 sps:$4 sm:$0xff]  }
 0x8ed   :  { %13376 = vmatpush1.bf16.msra.mxu1 %v21413_v49  ;;  %13295 = vmatprep.subr.bf16.mxu0 %v21418_v42  ;;  %v21487_v49 = vld [vmem:[#allocation4 + $0xc2c] ss:$16 sps:$4 sm:$0xff]   ;;  %v21482_v42 = vld [vmem:[#allocation4 + $0xc20] ss:$16 sps:$4 sm:$0xff]  }
 0x8ee   :  { %13377 = vmatprep.subr.bf16.mxu1 %v21421_v52  ;;  %v21485_v52 = vld [vmem:[#allocation4 + $0xc28] ss:$16 sps:$4 sm:$0xff]  }
 0x8f0   :  { %13296 = vmatpush1.bf16.msra.mxu0 %v21416_v54  ;;  %v21490_v54 = vld [vmem:[#allocation4 + $0xc44] ss:$16 sps:$4 sm:$0xff]  }
 0x8f1   :  { %13378 = vmatpush1.bf16.msra.mxu1 %v21419_v27  ;;  %13297 = vmatprep.subr.bf16.mxu0 %v21424_v23  ;;  %v21493_v27 = vld [vmem:[#allocation4 + $0xc4c] ss:$16 sps:$4 sm:$0xff]   ;;  %v21488_v23 = vld [vmem:[#allocation4 + $0xc40] ss:$16 sps:$4 sm:$0xff]  }
 0x8f2   :  { %13379 = vmatprep.subr.bf16.mxu1 %v21427_v56  ;;  %v21491_v56 = vld [vmem:[#allocation4 + $0xc48] ss:$16 sps:$4 sm:$0xff]  }
 0x8f4   :  { %13298 = vmatpush1.bf16.msra.mxu0 %v21422_v60  ;;  %v21496_v60 = vld [vmem:[#allocation4 + $0xc64] ss:$16 sps:$4 sm:$0xff]  }
 0x8f5   :  { %13380 = vmatpush1.bf16.msra.mxu1 %v21425_v28  ;;  %13308 = vmatprep.subr.bf16.mxu0 %v21430_v55  ;;  %v21497_v28 = vld [vmem:[#allocation4 + $0xc68] ss:$16 sps:$4 sm:$0xff]   ;;  %v21502_v55 = vld [vmem:[#allocation4 + $0xc84] ss:$16 sps:$4 sm:$0xff]  }
 0x8f6   :  { %13390 = vmatprep.subr.bf16.mxu1 %v21433_v45  ;;  %v21505_v45 = vld [vmem:[#allocation4 + $0xc8c] ss:$16 sps:$4 sm:$0xff]  }
 0x8f7   :  { %13300 = vmatmul.mubr.bf16.vlgmr.msra.gmra.mrb[52].mxu0 %v22974_v47 }
 0x8f8   :  { %13382 = vmatmul.mubr.bf16.vlgmr.msra.gmra.mrb[52].mxu1 %v22974_v47  ;;  %13309 = vmatpush1.bf16.msra.mxu0 %v21428_v3  ;;  %v21451_v47 = vld [vmem:[#allocation4 + $0xb6c] ss:$16 sps:$4 sm:$0xff]   ;;  %v21500_v3 = vld [vmem:[#allocation4 + $0xc80] ss:$16 sps:$4 sm:$0xff]  }
 0x8f9   :  { %13391 = vmatpush1.bf16.msra.mxu1 %v21431_v38  ;;  %13310 = vmatprep.subr.bf16.mxu0 %v21436_v58  ;;  %v21503_v38 = vld [vmem:[#allocation4 + $0xc88] ss:$16 sps:$4 sm:$0xff]   ;;  %v21508_v58 = vld [vmem:[#allocation4 + $0xca4] ss:$16 sps:$4 sm:$0xff]  }
 0x8fa   :  { %13392 = vmatprep.subr.bf16.mxu1 %v21439_v20  ;;  %13340 = vmatprep.mubr.bf16.mxu0 %v21960_v0  ;;  %v21511_v20 = vld [vmem:[#allocation4 + $0xcac] ss:$16 sps:$4 sm:$0xff]  }
 0x8fb   :  { %13422 = vmatprep.mubr.bf16.mxu1 %v21960_v0 }
 0x8fc   :  { %13311 = vmatpush1.bf16.msra.mxu0 %v21434_v61  ;;  %v21506_v61 = vld [vmem:[#allocation4 + $0xca0] ss:$16 sps:$4 sm:$0xff]  }
 0x8fd   :  { %13393 = vmatpush1.bf16.msra.mxu1 %v21437_v63  ;;  %13312 = vmatprep.subr.bf16.mxu0 %v21442_v41  ;;  %v21509_v63 = vld [vmem:[#allocation4 + $0xca8] ss:$16 sps:$4 sm:$0xff]   ;;  %v21514_v41 = vld [vmem:[#allocation4 + $0xcc4] ss:$16 sps:$4 sm:$0xff]  }
 0x8fe   :  { %13394 = vmatprep.subr.bf16.mxu1 %v21445_v53  ;;  %v21517_v53 = vld [vmem:[#allocation4 + $0xccc] ss:$16 sps:$4 sm:$0xff]  }
 0x900   :  { %13313 = vmatpush1.bf16.msra.mxu0 %v21440_v7  ;;  %v21512_v7 = vld [vmem:[#allocation4 + $0xcc0] ss:$16 sps:$4 sm:$0xff]  }
 0x901   :  { %13395 = vmatpush1.bf16.msra.mxu1 %v21443_v62  ;;  %13314 = vmatprep.subr.bf16.mxu0 %v21448_v24  ;;  %v21515_v62 = vld [vmem:[#allocation4 + $0xcc8] ss:$16 sps:$4 sm:$0xff]   ;;  %v21520_v24 = vld [vmem:[#allocation4 + $0xce4] ss:$16 sps:$4 sm:$0xff]  }
 0x902   :  { %13396 = vmatprep.subr.bf16.mxu1 %v21451_v47  ;;  %v21523_v47 = vld [vmem:[#allocation4 + $0xcec] ss:$16 sps:$4 sm:$0xff]  }
 0x904   :  { %13315 = vmatpush1.bf16.msra.mxu0 %v21446_v25  ;;  %v21518_v25 = vld [vmem:[#allocation4 + $0xce0] ss:$16 sps:$4 sm:$0xff]  }
 0x905   :  { %13397 = vmatpush1.bf16.msra.mxu1 %v21449_v22  ;;  %13316 = vmatprep.subr.bf16.mxu0 %v21454_v34  ;;  %v21521_v22 = vld [vmem:[#allocation4 + $0xce8] ss:$16 sps:$4 sm:$0xff]   ;;  %v21526_v34 = vld [vmem:[#allocation4 + $0xd04] ss:$16 sps:$4 sm:$0xff]  }
 0x906   :  { %13398 = vmatprep.subr.bf16.mxu1 %v21457_v31  ;;  %v21529_v31 = vld [vmem:[#allocation4 + $0xd0c] ss:$16 sps:$4 sm:$0xff]  }
 0x908   :  { %13317 = vmatpush1.bf16.msra.mxu0 %v21452_v4  ;;  %v21524_v4 = vld [vmem:[#allocation4 + $0xd00] ss:$16 sps:$4 sm:$0xff]  }
 0x909   :  { %13399 = vmatpush1.bf16.msra.mxu1 %v21455_v6  ;;  %13318 = vmatprep.subr.bf16.mxu0 %v21460_v37  ;;  %v21527_v6 = vld [vmem:[#allocation4 + $0xd08] ss:$16 sps:$4 sm:$0xff]   ;;  %v21532_v37 = vld [vmem:[#allocation4 + $0xd24] ss:$16 sps:$4 sm:$0xff]  }
 0x90a   :  { %13400 = vmatprep.subr.bf16.mxu1 %v21463_v32  ;;  %v21535_v32 = vld [vmem:[#allocation4 + $0xd2c] ss:$16 sps:$4 sm:$0xff]  }
 0x90c   :  { %13319 = vmatpush1.bf16.msra.mxu0 %v21458_v39  ;;  %v21530_v39 = vld [vmem:[#allocation4 + $0xd20] ss:$16 sps:$4 sm:$0xff]  }
 0x90d   :  { %13401 = vmatpush1.bf16.msra.mxu1 %v21461_v40  ;;  %13320 = vmatprep.subr.bf16.mxu0 %v21466_v36  ;;  %v21533_v40 = vld [vmem:[#allocation4 + $0xd28] ss:$16 sps:$4 sm:$0xff]   ;;  %v21538_v36 = vld [vmem:[#allocation4 + $0xd44] ss:$16 sps:$4 sm:$0xff]  }
 0x90e   :  { %13402 = vmatprep.subr.bf16.mxu1 %v21469_v43  ;;  %v21541_v43 = vld [vmem:[#allocation4 + $0xd4c] ss:$16 sps:$4 sm:$0xff]  }
 0x910   :  { %13321 = vmatpush1.bf16.msra.mxu0 %v21464_v19  ;;  %v21536_v19 = vld [vmem:[#allocation4 + $0xd40] ss:$16 sps:$4 sm:$0xff]  }
 0x911   :  { %13403 = vmatpush1.bf16.msra.mxu1 %v21467_v10  ;;  %13322 = vmatprep.subr.bf16.mxu0 %v21472_v44  ;;  %v21539_v10 = vld [vmem:[#allocation4 + $0xd48] ss:$16 sps:$4 sm:$0xff]   ;;  %v21544_v44 = vld [vmem:[#allocation4 + $0xd64] ss:$16 sps:$4 sm:$0xff]  }
 0x912   :  { %13404 = vmatprep.subr.bf16.mxu1 %v21475_v30  ;;  %v21547_v30 = vld [vmem:[#allocation4 + $0xd6c] ss:$16 sps:$4 sm:$0xff]  }
 0x914   :  { %13323 = vmatpush1.bf16.msra.mxu0 %v21470_v46  ;;  %v21542_v46 = vld [vmem:[#allocation4 + $0xd60] ss:$16 sps:$4 sm:$0xff]  }
 0x915   :  { %13405 = vmatpush1.bf16.msra.mxu1 %v21473_v35  ;;  %14017 = vmatprep.subr.bf16.mxu0 %v21478_v8  ;;  %v21545_v35 = vld [vmem:[#allocation4 + $0xd68] ss:$16 sps:$4 sm:$0xff]   ;;  %v21550_v8 = vld [vmem:[#allocation4 + $0xd84] ss:$16 sps:$4 sm:$0xff]  }
 0x916   :  { %14099 = vmatprep.subr.bf16.mxu1 %v21481_v51  ;;  %v21553_v51 = vld [vmem:[#allocation4 + $0xd8c] ss:$16 sps:$4 sm:$0xff]  }
 0x917   :  { %13341 = vmatmul.mubr.bf16.vlgmr.msra.gmra.mrb[52].mxu0 %v22988_v12 }
 0x918   :  { %13423 = vmatmul.mubr.bf16.vlgmr.msra.gmra.mrb[52].mxu1 %v22988_v12  ;;  %14018 = vmatpush1.bf16.msra.mxu0 %v21476_v59  ;;  %v21494_v12 = vld [vmem:[#allocation4 + $0xc60] ss:$16 sps:$4 sm:$0xff]  }
 0x919   :  { %14049 = vmatprep.mubr.bf16.mxu0 %v13532_v2  ;;  %14100 = vmatpush1.bf16.msra.mxu1 %v21479_v15  ;;  %v21548_v59 = vld [vmem:[#allocation4 + $0xd80] ss:$16 sps:$4 sm:$0xff]   ;;  %v21551_v15 = vld [vmem:[#allocation4 + $0xd88] ss:$16 sps:$4 sm:$0xff]  }
 0x91a   :  { %14131 = vmatprep.mubr.bf16.mxu1 %v13532_v2  ;;  %14019 = vmatprep.subr.bf16.mxu0 %v21484_v29  ;;  %v21556_v29 = vld [vmem:[#allocation4 + $0xda4] ss:$16 sps:$4 sm:$0xff]   ;;  %v21559_v2 = vld [vmem:[#allocation4 + $0xdac] ss:$16 sps:$4 sm:$0xff]  }
 0x91b   :  { %14101 = vmatprep.subr.bf16.mxu1 %v21487_v49  ;;  %v21554_v49 = vld [vmem:[#allocation4 + $0xda0] ss:$16 sps:$4 sm:$0xff]  }
 0x91c   :  { %14020 = vmatpush1.bf16.msra.mxu0 %v21482_v42  ;;  %v21557_v42 = vld [vmem:[#allocation4 + $0xda8] ss:$16 sps:$4 sm:$0xff]  }
 0x91d   :  { %14102 = vmatpush1.bf16.msra.mxu1 %v21485_v52  ;;  %14021 = vmatprep.subr.bf16.mxu0 %v21490_v54  ;;  %v21562_v52 = vld [vmem:[#allocation4 + $0xdc4] ss:$16 sps:$4 sm:$0xff]   ;;  %v21565_v54 = vld [vmem:[#allocation4 + $0xdcc] ss:$16 sps:$4 sm:$0xff]  }
 0x91e   :  { %14103 = vmatprep.subr.bf16.mxu1 %v21493_v27  ;;  %v21560_v27 = vld [vmem:[#allocation4 + $0xdc0] ss:$16 sps:$4 sm:$0xff]  }
 0x920   :  { %14022 = vmatpush1.bf16.msra.mxu0 %v21488_v23  ;;  %v21563_v23 = vld [vmem:[#allocation4 + $0xdc8] ss:$16 sps:$4 sm:$0xff]  }
 0x921   :  { %14104 = vmatpush1.bf16.msra.mxu1 %v21491_v56  ;;  %14023 = vmatprep.subr.bf16.mxu0 %v21496_v60  ;;  %v21568_v56 = vld [vmem:[#allocation4 + $0xde4] ss:$16 sps:$4 sm:$0xff]   ;;  %v21571_v60 = vld [vmem:[#allocation4 + $0xdec] ss:$16 sps:$4 sm:$0xff]  }
 0x922   :  { %14105 = vmatprep.subr.bf16.mxu1 %v21499_v57  ;;  %v21566_v57 = vld [vmem:[#allocation4 + $0xde0] ss:$16 sps:$4 sm:$0xff]  }
 0x924   :  { %14024 = vmatpush1.bf16.msra.mxu0 %v21494_v12  ;;  %v21569_v12 = vld [vmem:[#allocation4 + $0xde8] ss:$16 sps:$4 sm:$0xff]  }
 0x925   :  { %14106 = vmatpush1.bf16.msra.mxu1 %v21497_v28  ;;  %14025 = vmatprep.subr.bf16.mxu0 %v21502_v55  ;;  %v21574_v28 = vld [vmem:[#allocation4 + $0xe04] ss:$16 sps:$4 sm:$0xff]   ;;  %v21577_v55 = vld [vmem:[#allocation4 + $0xe0c] ss:$16 sps:$4 sm:$0xff]  }
 0x926   :  { %14107 = vmatprep.subr.bf16.mxu1 %v21505_v45  ;;  %v21572_v45 = vld [vmem:[#allocation4 + $0xe00] ss:$16 sps:$4 sm:$0xff]  }
 0x928   :  { %14026 = vmatpush1.bf16.msra.mxu0 %v21500_v3  ;;  %v13531_v3 = vrot.slane %v22968_v13, 2  ;;  %v21584_v13 = vld [vmem:[#allocation4 + $0xe40] ss:$16 sps:$4 sm:$0xff]  }
 0x929   :  { %14108 = vmatpush1.bf16.msra.mxu1 %v21503_v38  ;;  %14027 = vmatprep.subr.bf16.mxu0 %v21508_v58  ;;  %v21575_v38 = vld [vmem:[#allocation4 + $0xe08] ss:$16 sps:$4 sm:$0xff]   ;;  %v21580_v58 = vld [vmem:[#allocation4 + $0xe24] ss:$16 sps:$4 sm:$0xff]  }
 0x92a   :  { %14109 = vmatprep.subr.bf16.mxu1 %v21511_v20  ;;  %v21583_v20 = vld [vmem:[#allocation4 + $0xe2c] ss:$16 sps:$4 sm:$0xff]  }
 0x92c   :  { %14028 = vmatpush1.bf16.msra.mxu0 %v21506_v61  ;;  %v21578_v61 = vld [vmem:[#allocation4 + $0xe20] ss:$16 sps:$4 sm:$0xff]  }
 0x92d   :  { %14110 = vmatpush1.bf16.msra.mxu1 %v21509_v63  ;;  %14029 = vmatprep.subr.bf16.mxu0 %v21514_v41  ;;  %v21581_v63 = vld [vmem:[#allocation4 + $0xe28] ss:$16 sps:$4 sm:$0xff]   ;;  %v21586_v41 = vld [vmem:[#allocation4 + $0xe44] ss:$16 sps:$4 sm:$0xff]  }
 0x92e   :  { %14111 = vmatprep.subr.bf16.mxu1 %v21517_v53  ;;  %v21589_v53 = vld [vmem:[#allocation4 + $0xe4c] ss:$16 sps:$4 sm:$0xff]  }
 0x930   :  { %14030 = vmatpush1.bf16.msra.mxu0 %v21512_v7  ;;  %v21587_v7 = vld [vmem:[#allocation4 + $0xe48] ss:$16 sps:$4 sm:$0xff]  }
 0x931   :  { %14112 = vmatpush1.bf16.msra.mxu1 %v21515_v62  ;;  %14031 = vmatprep.subr.bf16.mxu0 %v21520_v24  ;;  %v21592_v62 = vld [vmem:[#allocation4 + $0xe64] ss:$16 sps:$4 sm:$0xff]   ;;  %v21595_v24 = vld [vmem:[#allocation4 + $0xe6c] ss:$16 sps:$4 sm:$0xff]  }
 0x932   :  { %14113 = vmatprep.subr.bf16.mxu1 %v21523_v47  ;;  %v21590_v47 = vld [vmem:[#allocation4 + $0xe60] ss:$16 sps:$4 sm:$0xff]  }
 0x934   :  { %14032 = vmatpush1.bf16.msra.mxu0 %v21518_v25  ;;  %v21593_v25 = vld [vmem:[#allocation4 + $0xe68] ss:$16 sps:$4 sm:$0xff]  }
 0x935   :  { %14114 = vmatpush1.bf16.msra.mxu1 %v21521_v22  ;;  %14033 = vmatprep.subr.bf16.mxu0 %v21526_v34  ;;  %v21598_v22 = vld [vmem:[#allocation4 + $0xe84] ss:$16 sps:$4 sm:$0xff]   ;;  %v21601_v34 = vld [vmem:[#allocation4 + $0xe8c] ss:$16 sps:$4 sm:$0xff]  }
 0x936   :  { %14115 = vmatprep.subr.bf16.mxu1 %v21529_v31  ;;  %v21596_v31 = vld [vmem:[#allocation4 + $0xe80] ss:$16 sps:$4 sm:$0xff]  }
 0x938   :  { %14034 = vmatpush1.bf16.msra.mxu0 %v21524_v4  ;;  %v21599_v4 = vld [vmem:[#allocation4 + $0xe88] ss:$16 sps:$4 sm:$0xff]  }
 0x939   :  { %14116 = vmatpush1.bf16.msra.mxu1 %v21527_v6  ;;  %14035 = vmatprep.subr.bf16.mxu0 %v21532_v37  ;;  %v21604_v6 = vld [vmem:[#allocation4 + $0xea4] ss:$16 sps:$4 sm:$0xff]   ;;  %v21607_v37 = vld [vmem:[#allocation4 + $0xeac] ss:$16 sps:$4 sm:$0xff]  }
 0x93a   :  { %14117 = vmatprep.subr.bf16.mxu1 %v21535_v32  ;;  %v21602_v32 = vld [vmem:[#allocation4 + $0xea0] ss:$16 sps:$4 sm:$0xff]  }
 0x93c   :  { %14036 = vmatpush1.bf16.msra.mxu0 %v21530_v39  ;;  %v21605_v39 = vld [vmem:[#allocation4 + $0xea8] ss:$16 sps:$4 sm:$0xff]  }
 0x93d   :  { %14118 = vmatpush1.bf16.msra.mxu1 %v21533_v40  ;;  %14037 = vmatprep.subr.bf16.mxu0 %v21538_v36  ;;  %v21610_v40 = vld [vmem:[#allocation4 + $0xec4] ss:$16 sps:$4 sm:$0xff]   ;;  %v21613_v36 = vld [vmem:[#allocation4 + $0xecc] ss:$16 sps:$4 sm:$0xff]  }
 0x93e   :  { %14119 = vmatprep.subr.bf16.mxu1 %v21541_v43  ;;  %v21608_v43 = vld [vmem:[#allocation4 + $0xec0] ss:$16 sps:$4 sm:$0xff]  }
 0x940   :  { %14038 = vmatpush1.bf16.msra.mxu0 %v21536_v19  ;;  %v21611_v19 = vld [vmem:[#allocation4 + $0xec8] ss:$16 sps:$4 sm:$0xff]  }
 0x941   :  { %14120 = vmatpush1.bf16.msra.mxu1 %v21539_v10  ;;  %14039 = vmatprep.subr.bf16.mxu0 %v21544_v44  ;;  %v21616_v10 = vld [vmem:[#allocation4 + $0xee4] ss:$16 sps:$4 sm:$0xff]   ;;  %v21619_v44 = vld [vmem:[#allocation4 + $0xeec] ss:$16 sps:$4 sm:$0xff]  }
 0x942   :  { %14121 = vmatprep.subr.bf16.mxu1 %v21547_v30  ;;  %v21614_v30 = vld [vmem:[#allocation4 + $0xee0] ss:$16 sps:$4 sm:$0xff]  }
 0x944   :  { %14040 = vmatpush1.bf16.msra.mxu0 %v21542_v46  ;;  %v21617_v46 = vld [vmem:[#allocation4 + $0xee8] ss:$16 sps:$4 sm:$0xff]  }
 0x945   :  { %14122 = vmatpush1.bf16.msra.mxu1 %v21545_v35  ;;  %14041 = vmatprep.subr.bf16.mxu0 %v21550_v8  ;;  %v21622_v35 = vld [vmem:[#allocation6 + $0x44] ss:$16 sps:$4 sm:$0xff]   ;;  %v21625_v8 = vld [vmem:[#allocation6 + $0x4c] ss:$16 sps:$4 sm:$0xff]  }
 0x946   :  { %14123 = vmatprep.subr.bf16.mxu1 %v21553_v51  ;;  %v13533_v51 = vrot.slane %v22976_v17, 2 }
 0x948   :  { %14042 = vmatpush1.bf16.msra.mxu0 %v21548_v59  ;;  %v21620_v59 = vld [vmem:[#allocation6 + $0x40] ss:$16 sps:$4 sm:$0xff]  }
 0x949   :  { %14124 = vmatpush1.bf16.msra.mxu1 %v21551_v15  ;;  %14043 = vmatprep.subr.bf16.mxu0 %v21556_v29  ;;  %v21623_v15 = vld [vmem:[#allocation6 + $0x48] ss:$16 sps:$4 sm:$0xff]   ;;  %v21626_v29 = vld [vmem:[#allocation6 + $0x64] ss:$16 sps:$4 sm:$0x3f]  }
 0x94a   :  { %14125 = vmatprep.subr.bf16.mxu1 %v21559_v2  ;;  %v21630_v2 = vld [vmem:[#allocation6 + $0x60] ss:$16 sps:$4 sm:$0x3f]  }
 0x94c   :  { %14044 = vmatpush1.bf16.msra.mxu0 %v21554_v49  ;;  %v21628_v49 = vld [vmem:[#allocation6 + $0x6c] ss:$16 sps:$4 sm:$0x3f]  }
 0x94d   :  { %14126 = vmatpush1.bf16.msra.mxu1 %v21557_v42  ;;  %14045 = vmatprep.subr.bf16.mxu0 %v21562_v52  ;;  %v21631_v42 = vld [vmem:[#allocation6 + $0x68] ss:$16 sps:$4 sm:$0x3f]   ;;  %v14241_v52 = vsel %vm202_vm0, %v21630_v2, 0 }
 0x94e   :  { %14127 = vmatprep.subr.bf16.mxu1 %v21565_v54  ;;  %v21634_v54 = vld [vmem:[#allocation6 + $0x4] ss:$16 sps:$4 sm:$0xff]   ;;  %v14247_v17 = vsel %vm202_vm0, %v21631_v42, 0 }
 0x950   :  { %14046 = vmatpush1.bf16.msra.mxu0 %v21560_v27  ;;  %v21637_v27 = vld [vmem:[#allocation6 + $0xc] ss:$16 sps:$4 sm:$0xff]  }
 0x951   :  { %14128 = vmatpush1.bf16.msra.mxu1 %v21563_v23  ;;  %14047 = vmatprep.subr.bf16.mxu0 %v21568_v56  ;;  %v21632_v23 = vld [vmem:[#allocation6] ss:$16 sps:$4 sm:$0xff]   ;;  %v21635_v56 = vld [vmem:[#allocation6 + $0x8] ss:$16 sps:$4 sm:$0xff]  }
 0x952   :  { %14129 = vmatprep.subr.bf16.mxu1 %v21571_v60  ;;  %v21638_v60 = vld [vmem:[#allocation6 + $0x24] ss:$16 sps:$4 sm:$0x3f]  }
 0x954   :  { %14048 = vmatpush1.bf16.msra.mxu0 %v21566_v57  ;;  %v21642_v57 = vld [vmem:[#allocation6 + $0x20] ss:$16 sps:$4 sm:$0x3f]  }
 0x955   :  { %14130 = vmatpush1.bf16.msra.mxu1 %v21569_v12  ;;  %14058 = vmatprep.subr.bf16.mxu0 %v21574_v28  ;;  %v21640_v12 = vld [vmem:[#allocation6 + $0x2c] ss:$16 sps:$4 sm:$0x3f]   ;;  %v21643_v28 = vld [vmem:[#allocation6 + $0x28] ss:$16 sps:$4 sm:$0x3f]  }
 0x956   :  { %14140 = vmatprep.subr.bf16.mxu1 %v21577_v55  ;;  %v14374_v55 = vsel %vm202_vm0, %v21642_v57, 0  ;;  %v21700_v57 = vld [vmem:[#allocation6 + $0x1ac] ss:$16 sps:$4 sm:$0x3f]  }
 0x957   :  { %14050 = vmatmul.mubr.bf16.vlgmr.msra.gmra.mrb[52].mxu0 %v13531_v3 }
 0x958   :  { %14132 = vmatmul.mubr.bf16.vlgmr.msra.gmra.mrb[52].mxu1 %v13531_v3  ;;  %14059 = vmatpush1.bf16.msra.mxu0 %v21572_v45  ;;  %v21646_v45 = vld [vmem:[#allocation6 + $0x84] ss:$16 sps:$4 sm:$0xff]   ;;  %v14380_v3 = vsel %vm202_vm0, %v21643_v28, 0 }
 0x959   :  { %14141 = vmatpush1.bf16.msra.mxu1 %v21575_v38  ;;  %14060 = vmatprep.subr.bf16.mxu0 %v21580_v58  ;;  %v21649_v38 = vld [vmem:[#allocation6 + $0x8c] ss:$16 sps:$4 sm:$0xff]   ;;  %v21647_v58 = vld [vmem:[#allocation6 + $0x88] ss:$16 sps:$4 sm:$0xff]  }
 0x95a   :  { %14142 = vmatprep.subr.bf16.mxu1 %v21583_v20  ;;  %14090 = vmatprep.mubr.bf16.mxu0 %v21960_v0  ;;  %v21650_v20 = vld [vmem:[#allocation6 + $0xa4] ss:$16 sps:$4 sm:$0x3f]  }
 0x95b   :  { %14172 = vmatprep.mubr.bf16.mxu1 %v21960_v0 }
 0x95c   :  { %14061 = vmatpush1.bf16.msra.mxu0 %v21578_v61  ;;  %v21654_v61 = vld [vmem:[#allocation6 + $0xa0] ss:$16 sps:$4 sm:$0x3f]  }
 0x95d   :  { %14143 = vmatpush1.bf16.msra.mxu1 %v21581_v63  ;;  %14062 = vmatprep.subr.bf16.mxu0 %v21586_v41  ;;  %v21652_v63 = vld [vmem:[#allocation6 + $0xac] ss:$16 sps:$4 sm:$0x3f]   ;;  %v21655_v41 = vld [vmem:[#allocation6 + $0xa8] ss:$16 sps:$4 sm:$0x3f]  }
 0x95e   :  { %14144 = vmatprep.subr.bf16.mxu1 %v21589_v53  ;;  %v21876_v53 = vld [vmem:[%s23308_s0 + $0x10] sm:$0xf] }
 0x960   :  { %14063 = vmatpush1.bf16.msra.mxu0 %v21584_v13  ;;  %v14515_v13 = vsel %vm202_vm0, %v21654_v61, 0  ;;  %v21714_v61 = vld [vmem:[#allocation6 + $0x1e0] ss:$16 sps:$4 sm:$0x3f]  }
 0x961   :  { %14145 = vmatpush1.bf16.msra.mxu1 %v21587_v7  ;;  %14064 = vmatprep.subr.bf16.mxu0 %v21592_v62  ;;  %v21658_v7 = vld [vmem:[#allocation6 + $0xc4] ss:$16 sps:$4 sm:$0xff]   ;;  %v14521_v62 = vsel %vm202_vm0, %v21655_v41, 0  ;;  %v21715_v41 = vld [vmem:[#allocation6 + $0x1e8] ss:$16 sps:$4 sm:$0x3f]  }
 0x962   :  { %14146 = vmatprep.subr.bf16.mxu1 %v21595_v24  ;;  %v21661_v24 = vld [vmem:[#allocation6 + $0xcc] ss:$16 sps:$4 sm:$0xff]  }
 0x964   :  { %14065 = vmatpush1.bf16.msra.mxu0 %v21590_v47  ;;  %v21656_v47 = vld [vmem:[#allocation6 + $0xc0] ss:$16 sps:$4 sm:$0xff]  }
 0x965   :  { %14147 = vmatpush1.bf16.msra.mxu1 %v21593_v25  ;;  %14066 = vmatprep.subr.bf16.mxu0 %v21598_v22  ;;  %v21659_v25 = vld [vmem:[#allocation6 + $0xc8] ss:$16 sps:$4 sm:$0xff]   ;;  %v21662_v22 = vld [vmem:[#allocation6 + $0xe4] ss:$16 sps:$4 sm:$0x3f]  }
 0x966   :  { %14148 = vmatprep.subr.bf16.mxu1 %v21601_v34  ;;  %v21666_v34 = vld [vmem:[#allocation6 + $0xe0] ss:$16 sps:$4 sm:$0x3f]  }
 0x968   :  { %14067 = vmatpush1.bf16.msra.mxu0 %v21596_v31  ;;  %v21664_v31 = vld [vmem:[#allocation6 + $0xec] ss:$16 sps:$4 sm:$0x3f]  }
 0x969   :  { %14149 = vmatpush1.bf16.msra.mxu1 %v21599_v4  ;;  %14068 = vmatprep.subr.bf16.mxu0 %v21604_v6  ;;  %v21667_v4 = vld [vmem:[#allocation6 + $0xe8] ss:$16 sps:$4 sm:$0x3f]   ;;  %v14660_v6 = vsel %vm202_vm0, %v21666_v34, 0 }
 0x96a   :  { %14150 = vmatprep.subr.bf16.mxu1 %v21607_v37  ;;  %v21670_v37 = vld [vmem:[#allocation6 + $0x104] ss:$16 sps:$4 sm:$0xff]  }
 0x96b   :  { %v21722_v34 = vld [vmem:[#allocation6 + $0x224] ss:$16 sps:$4 sm:$0x3f]  }
 0x96c   :  { %14069 = vmatpush1.bf16.msra.mxu0 %v21602_v32  ;;  %v14666_v32 = vsel %vm202_vm0, %v21667_v4, 0  ;;  %v21724_v4 = vld [vmem:[#allocation6 + $0x22c] ss:$16 sps:$4 sm:$0x3f]  }
 0x96d   :  { %14151 = vmatpush1.bf16.msra.mxu1 %v21605_v39  ;;  %14070 = vmatprep.subr.bf16.mxu0 %v21610_v40  ;;  %v21673_v39 = vld [vmem:[#allocation6 + $0x10c] ss:$16 sps:$4 sm:$0xff]   ;;  %v21671_v40 = vld [vmem:[#allocation6 + $0x108] ss:$16 sps:$4 sm:$0xff]  }
 0x96e   :  { %14152 = vmatprep.subr.bf16.mxu1 %v21613_v36  ;;  %v21674_v36 = vld [vmem:[#allocation6 + $0x124] ss:$16 sps:$4 sm:$0x3f]  }
 0x970   :  { %14071 = vmatpush1.bf16.msra.mxu0 %v21608_v43  ;;  %v21678_v43 = vld [vmem:[#allocation6 + $0x120] ss:$16 sps:$4 sm:$0x3f]  }
 0x971   :  { %14153 = vmatpush1.bf16.msra.mxu1 %v21611_v19  ;;  %14072 = vmatprep.subr.bf16.mxu0 %v21616_v10  ;;  %v21676_v19 = vld [vmem:[#allocation6 + $0x12c] ss:$16 sps:$4 sm:$0x3f]   ;;  %v21679_v10 = vld [vmem:[#allocation6 + $0x128] ss:$16 sps:$4 sm:$0x3f]  }
 0x972   :  { %14154 = vmatprep.subr.bf16.mxu1 %v21619_v44  ;;  %v14805_v44 = vsel %vm202_vm0, %v21678_v43, 0  ;;  %v21731_v43 = vld [vmem:[#allocation6 + $0x248] ss:$16 sps:$4 sm:$0xff]  }
 0x974   :  { %14073 = vmatpush1.bf16.msra.mxu0 %v21614_v30  ;;  %v21682_v30 = vld [vmem:[#allocation6 + $0x144] ss:$16 sps:$4 sm:$0xff]  }
 0x975   :  { %14155 = vmatpush1.bf16.msra.mxu1 %v21617_v46  ;;  %14252 = vmatprep.subr.bf16.mxu0 %v21622_v35  ;;  %v14811_v46 = vsel %vm202_vm0, %v21679_v10, 0  ;;  %v21685_v35 = vld [vmem:[#allocation6 + $0x14c] ss:$16 sps:$4 sm:$0xff]   ;;  %v21738_v10 = vld [vmem:[#allocation6 + $0x260] ss:$16 sps:$4 sm:$0x3f]  }
 0x976   :  { %14293 = vmatprep.subr.bf16.mxu1 %v21625_v8  ;;  %v21683_v8 = vld [vmem:[#allocation6 + $0x148] ss:$16 sps:$4 sm:$0xff]  }
 0x977   :  { %14091 = vmatmul.mubr.bf16.vlgmr.msra.gmra.mrb[52].mxu0 %v13533_v51 }
 0x978   :  { %14173 = vmatmul.mubr.bf16.vlgmr.msra.gmra.mrb[52].mxu1 %v13533_v51  ;;  %14253 = vmatpush1.bf16.msra.mxu0 %v21620_v59  ;;  %v21686_v51 = vld [vmem:[#allocation6 + $0x164] ss:$16 sps:$4 sm:$0x3f]   ;;  %v21690_v59 = vld [vmem:[#allocation6 + $0x160] ss:$16 sps:$4 sm:$0x3f]  }
 0x979   :  { %14294 = vmatpush1.bf16.msra.mxu1 %v21623_v15  ;;  %18810 = vmatprep.subr.msk.bf16.mxu0 %vm202_vm0, %v21626_v29  ;;  %v21688_v15 = vld [vmem:[#allocation6 + $0x16c] ss:$16 sps:$4 sm:$0x3f]   ;;  %v21691_v29 = vld [vmem:[#allocation6 + $0x168] ss:$16 sps:$4 sm:$0x3f]  }
 0x97a   :  { %18812 = vmatprep.subr.msk.bf16.mxu1 %vm202_vm0, %v21628_v49  ;;  %14284 = vmatprep.mubr.bf16.mxu0 %v21960_v0  ;;  %v14953_v2 = vsel %vm202_vm0, %v21690_v59, 0  ;;  %v21694_v49 = vld [vmem:[#allocation6 + $0x184] ss:$16 sps:$4 sm:$0xff]   ;;  %v14959_v42 = vsel %vm202_vm0, %v21691_v29, 0 }
 0x97b   :  { %14325 = vmatprep.mubr.bf16.mxu1 %v21960_v0 }
 0x97c   :  { %14255 = vmatpush1.bf16.msra.mxu0 %v14241_v52  ;;  %v21697_v52 = vld [vmem:[#allocation6 + $0x18c] ss:$16 sps:$4 sm:$0xff]  }
 0x97d   :  { %14296 = vmatpush1.bf16.msra.mxu1 %v14247_v17  ;;  %14385 = vmatprep.subr.bf16.mxu0 %v21634_v54  ;;  %v14910_v54 = vrot.slane %v22698_v26, 2 }
 0x97e   :  { %14426 = vmatprep.subr.bf16.mxu1 %v21637_v27  ;;  %v21692_v27 = vld [vmem:[#allocation6 + $0x180] ss:$16 sps:$4 sm:$0xff]  }
 0x983   :  { %18811 = vmatmul.mubr.msk.bf16.vlgmr.msra.gmra.mrb[52].mxu0 %vm195_vm2, %v22707_v33 }
 0x984   :  { %18813 = vmatmul.mubr.msk.bf16.vlgmr.msra.gmra.mrb[52].mxu1 %vm195_vm2, %v22707_v33  ;;  %14386 = vmatpush1.bf16.msra.mxu0 %v21632_v23  ;;  %v21644_v33 = vld [vmem:[#allocation6 + $0x80] ss:$16 sps:$4 sm:$0xff]   ;;  %v21695_v23 = vld [vmem:[#allocation6 + $0x188] ss:$16 sps:$4 sm:$0xff]  }
 0x985   :  { %14427 = vmatpush1.bf16.msra.mxu1 %v21635_v56  ;;  %18822 = vmatprep.subr.msk.bf16.mxu0 %vm202_vm0, %v21638_v60  ;;  %v21698_v56 = vld [vmem:[#allocation6 + $0x1a4] ss:$16 sps:$4 sm:$0x3f]   ;;  %v21702_v60 = vld [vmem:[#allocation6 + $0x1a0] ss:$16 sps:$4 sm:$0x3f]  }
 0x986   :  { %18824 = vmatprep.subr.msk.bf16.mxu1 %vm202_vm0, %v21640_v12  ;;  %14417 = vmatprep.mubr.bf16.mxu0 %v21960_v0  ;;  %v21703_v12 = vld [vmem:[#allocation6 + $0x1a8] ss:$16 sps:$4 sm:$0x3f]   ;;  %v15099_v28 = vsel %vm202_vm0, %v21702_v60, 0 }
 0x987   :  { %14458 = vmatprep.mubr.bf16.mxu1 %v21960_v0 }
 0x988   :  { %14388 = vmatpush1.bf16.msra.mxu0 %v14374_v55  ;;  %v21706_v55 = vld [vmem:[#allocation6 + $0x1c4] ss:$16 sps:$4 sm:$0xff]  }
 0x989   :  { %14429 = vmatpush1.bf16.msra.mxu1 %v14380_v3  ;;  %14526 = vmatprep.subr.bf16.mxu0 %v21646_v45  ;;  %v15105_v45 = vsel %vm202_vm0, %v21703_v12, 0  ;;  %v21709_v3 = vld [vmem:[#allocation6 + $0x1cc] ss:$16 sps:$4 sm:$0xff]   ;;  %v21756_v12 = vld [vmem:[#allocation6 + $0x2c8] ss:$16 sps:$4 sm:$0xff]  }
 0x98a   :  { %14567 = vmatprep.subr.bf16.mxu1 %v21649_v38  ;;  %v15058_v38 = vrot.slane %v22676_v11, 3  ;;  %v15253_v11 = vsel %vm202_vm0, %v21715_v41, 0 }
 0x98f   :  { %18823 = vmatmul.mubr.msk.bf16.vlgmr.msra.gmra.mrb[52].mxu0 %vm195_vm2, %v21876_v53 }
 0x990   :  { %18825 = vmatmul.mubr.msk.bf16.vlgmr.msra.gmra.mrb[52].mxu1 %vm195_vm2, %v21876_v53  ;;  %14527 = vmatpush1.bf16.msra.mxu0 %v21644_v33  ;;  %v21704_v33 = vld [vmem:[#allocation6 + $0x1c0] ss:$16 sps:$4 sm:$0xff]   ;;  %v15247_v53 = vsel %vm202_vm0, %v21714_v61, 0 }
 0x991   :  { %14568 = vmatpush1.bf16.msra.mxu1 %v21647_v58  ;;  %18834 = vmatprep.subr.msk.bf16.mxu0 %vm202_vm0, %v21650_v20  ;;  %v21707_v58 = vld [vmem:[#allocation6 + $0x1c8] ss:$16 sps:$4 sm:$0xff]   ;;  %v21710_v20 = vld [vmem:[#allocation6 + $0x1e4] ss:$16 sps:$4 sm:$0x3f]  }
 0x992   :  { %18836 = vmatprep.subr.msk.bf16.mxu1 %vm202_vm0, %v21652_v63  ;;  %14558 = vmatprep.mubr.bf16.mxu0 %v21960_v0  ;;  %v21712_v63 = vld [vmem:[#allocation6 + $0x1ec] ss:$16 sps:$4 sm:$0x3f]  }
 0x993   :  { %14599 = vmatprep.mubr.bf16.mxu1 %v21960_v0 }
 0x994   :  { %14529 = vmatpush1.bf16.msra.mxu0 %v14515_v13  ;;  %v21718_v13 = vld [vmem:[#allocation6 + $0x204] ss:$16 sps:$4 sm:$0xff]  }
 0x995   :  { %14570 = vmatpush1.bf16.msra.mxu1 %v14521_v62  ;;  %14671 = vmatprep.subr.bf16.mxu0 %v21658_v7  ;;  %v21721_v7 = vld [vmem:[#allocation6 + $0x20c] ss:$16 sps:$4 sm:$0xff]   ;;  %v15204_v62 = vrot.slane %v22698_v26, 3  ;;  %v21730_v26 = vld [vmem:[#allocation6 + $0x244] ss:$16 sps:$4 sm:$0xff]  }
 0x996   :  { %14712 = vmatprep.subr.bf16.mxu1 %v21661_v24  ;;  %v15205_v24 = vrot.slane %v22695_v16, 4 }
 0x99b   :  { %18835 = vmatmul.mubr.msk.bf16.vlgmr.msra.gmra.mrb[52].mxu0 %vm195_vm2, %v22755_v21 }
 0x99c   :  { %18837 = vmatmul.mubr.msk.bf16.vlgmr.msra.gmra.mrb[52].mxu1 %vm195_vm2, %v22755_v21  ;;  %14672 = vmatpush1.bf16.msra.mxu0 %v21656_v47  ;;  %v21668_v21 = vld [vmem:[#allocation6 + $0x100] ss:$16 sps:$4 sm:$0xff]   ;;  %v15206_v47 = vor.u32 %v15205_v24, %v15204_v62  ;;  %v21773_v62 = vld [vmem:[#allocation6 + $0x32c] ss:$16 sps:$4 sm:$0x3f]  }
 0x99d   :  { %14713 = vmatpush1.bf16.msra.mxu1 %v21659_v25  ;;  %18846 = vmatprep.subr.msk.bf16.mxu0 %vm202_vm0, %v21662_v22  ;;  %v21716_v25 = vld [vmem:[#allocation6 + $0x200] ss:$16 sps:$4 sm:$0xff]   ;;  %v21719_v22 = vld [vmem:[#allocation6 + $0x208] ss:$16 sps:$4 sm:$0xff]  }
 0x99e   :  { %18848 = vmatprep.subr.msk.bf16.mxu1 %vm202_vm0, %v21664_v31  ;;  %14703 = vmatprep.mubr.bf16.mxu0 %v21960_v0  ;;  %v21726_v31 = vld [vmem:[#allocation6 + $0x220] ss:$16 sps:$4 sm:$0x3f]   ;;  %v21776_v24 = vld [vmem:[#allocation6 + $0x328] ss:$16 sps:$4 sm:$0x3f]  }
 0x99f   :  { %14744 = vmatprep.mubr.bf16.mxu1 %v21960_v0 }
 0x9a0   :  { %14674 = vmatpush1.bf16.msra.mxu0 %v14660_v6  ;;  %v21727_v6 = vld [vmem:[#allocation6 + $0x228] ss:$16 sps:$4 sm:$0x3f]  }
 0x9a1   :  { %14715 = vmatpush1.bf16.msra.mxu1 %v14666_v32  ;;  %14816 = vmatprep.subr.bf16.mxu0 %v21670_v37  ;;  %v15398_v37 = vsel %vm202_vm0, %v21727_v6, 0  ;;  %v21733_v32 = vld [vmem:[#allocation6 + $0x24c] ss:$16 sps:$4 sm:$0xff]   ;;  %v21780_v6 = vld [vmem:[#allocation6 + $0x348] ss:$16 sps:$4 sm:$0xff]  }
 0x9a2   :  { %14857 = vmatprep.subr.bf16.mxu1 %v21673_v39  ;;  %v21877_v39 = vld [vmem:[%s23308_s0 + $0x14] sm:$0xf] }
 0x9a7   :  { %18847 = vmatmul.mubr.msk.bf16.vlgmr.msra.gmra.mrb[52].mxu0 %vm195_vm2, %v22788_v18 }
 0x9a8   :  { %18849 = vmatmul.mubr.msk.bf16.vlgmr.msra.gmra.mrb[52].mxu1 %vm195_vm2, %v22788_v18  ;;  %14817 = vmatpush1.bf16.msra.mxu0 %v21668_v21  ;;  %v21680_v18 = vld [vmem:[#allocation6 + $0x140] ss:$16 sps:$4 sm:$0xff]   ;;  %v23114_v21 = vld [vmem:[%s23308_s0 + $0x18] sm:$0xf] }
 0x9a9   :  { %14858 = vmatpush1.bf16.msra.mxu1 %v21671_v40  ;;  %18858 = vmatprep.subr.msk.bf16.mxu0 %vm202_vm0, %v21674_v36  ;;  %v23117_v40 = vcombine.low %v21877_v39, %v23114_v21  ;;  %v21728_v36 = vld [vmem:[#allocation6 + $0x240] ss:$16 sps:$4 sm:$0xff]  }
 0x9aa   :  { %18860 = vmatprep.subr.msk.bf16.mxu1 %vm202_vm0, %v21676_v19  ;;  %14848 = vmatprep.mubr.bf16.mxu0 %v21960_v0  ;;  %v21734_v19 = vld [vmem:[#allocation6 + $0x264] ss:$16 sps:$4 sm:$0x3f]  }
 0x9ab   :  { %14889 = vmatprep.mubr.bf16.mxu1 %v21960_v0  ;;  %v23131_v59 = vshrl.u32 %v23117_v40, 16  ;;  %v15650_v60 = vrot.slane %v23117_v40, 1 }
 0x9ac   :  { %14819 = vmatpush1.bf16.msra.mxu0 %v14805_v44  ;;  %v21736_v44 = vld [vmem:[#allocation6 + $0x26c] ss:$16 sps:$4 sm:$0x3f]  }
 0x9ad   :  { %14860 = vmatpush1.bf16.msra.mxu1 %v14811_v46  ;;  %14964 = vmatprep.subr.bf16.mxu0 %v21682_v30  ;;  %v21739_v30 = vld [vmem:[#allocation6 + $0x268] ss:$16 sps:$4 sm:$0x3f]   ;;  %v23121_v46 = vshll.u32 %v23117_v40, 16  ;;  %v15796_v61 = vrot.slane %v23131_v59, 1 }
 0x9ae   :  { %15005 = vmatprep.subr.bf16.mxu1 %v21685_v35  ;;  %v15545_v35 = vsel %vm202_vm0, %v21738_v10, 0  ;;  %v16090_v10 = vrot.slane %v23131_v59, 2 }
 0x9b3   :  { %18859 = vmatmul.mubr.msk.bf16.vlgmr.msra.gmra.mrb[52].mxu0 %vm195_vm2, %v22811_v5 }
 0x9b4   :  { %18861 = vmatmul.mubr.msk.bf16.vlgmr.msra.gmra.mrb[52].mxu1 %vm195_vm2, %v22811_v5  ;;  %14965 = vmatpush1.bf16.msra.mxu0 %v21680_v18  ;;  %v14911_v5 = vrot.slane %v22695_v16, 3  ;;  %v15392_v16 = vsel %vm202_vm0, %v21726_v31, 0  ;;  %v21743_v18 = vld [vmem:[#allocation6 + $0x284] ss:$16 sps:$4 sm:$0xff]   ;;  %v15944_v31 = vrot.slane %v23117_v40, 2 }
 0x9b5   :  { %15006 = vmatpush1.bf16.msra.mxu1 %v21683_v8  ;;  %18870 = vmatprep.subr.msk.bf16.mxu0 %vm202_vm0, %v21686_v51  ;;  %v15551_v8 = vsel %vm202_vm0, %v21739_v30, 0  ;;  %v21746_v51 = vld [vmem:[#allocation6 + $0x28c] ss:$16 sps:$4 sm:$0xff]  }
 0x9b6   :  { %18872 = vmatprep.subr.msk.bf16.mxu1 %vm202_vm0, %v21688_v15  ;;  %14996 = vmatprep.mubr.bf16.mxu0 %v21960_v0  ;;  %v14912_v17 = vor.u32 %v14911_v5, %v14910_v54  ;;  %v15503_v15 = vrot.slane %v23121_v46, 1  ;;  %v21749_v54 = vld [vmem:[#allocation6 + $0x2ac] ss:$16 sps:$4 sm:$0x3f]  }
 0x9b7   :  { %15037 = vmatprep.mubr.bf16.mxu1 %v21960_v0  ;;  %v21752_v5 = vld [vmem:[#allocation6 + $0x2a8] ss:$16 sps:$4 sm:$0x3f]  }
 0x9b8   :  { %14967 = vmatpush1.bf16.msra.mxu0 %v14953_v2  ;;  %v15504_v29 = vor.u32 %v15503_v15, %v23131_v59  ;;  %v21741_v2 = vld [vmem:[#allocation6 + $0x280] ss:$16 sps:$4 sm:$0xff]   ;;  %v21797_v15 = vld [vmem:[#allocation6 + $0x3ac] ss:$16 sps:$4 sm:$0x3f]  }
 0x9b9   :  { %15008 = vmatpush1.bf16.msra.mxu1 %v14959_v42  ;;  %15110 = vmatprep.subr.bf16.mxu0 %v21694_v49  ;;  %v21744_v49 = vld [vmem:[#allocation6 + $0x288] ss:$16 sps:$4 sm:$0xff]   ;;  %v21747_v42 = vld [vmem:[#allocation6 + $0x2a4] ss:$16 sps:$4 sm:$0x3f]  }
 0x9ba   :  { %15151 = vmatprep.subr.bf16.mxu1 %v21697_v52  ;;  %v21751_v52 = vld [vmem:[#allocation6 + $0x2a0] ss:$16 sps:$4 sm:$0x3f]  }
 0x9bf   :  { %18871 = vmatmul.mubr.msk.bf16.vlgmr.msra.gmra.mrb[52].mxu0 %vm195_vm2, %v14912_v17 }
 0x9c0   :  { %18873 = vmatmul.mubr.msk.bf16.vlgmr.msra.gmra.mrb[52].mxu1 %vm195_vm2, %v14912_v17  ;;  %15111 = vmatpush1.bf16.msra.mxu0 %v21692_v27  ;;  %v15691_v17 = vsel %vm202_vm0, %v21751_v52, 0  ;;  %v21755_v27 = vld [vmem:[#allocation6 + $0x2c4] ss:$16 sps:$4 sm:$0xff]   ;;  %v21806_v52 = vld [vmem:[#allocation6 + $0x3cc] ss:$16 sps:$4 sm:$0xff]  }
 0x9c1   :  { %15152 = vmatpush1.bf16.msra.mxu1 %v21695_v23  ;;  %18882 = vmatprep.subr.msk.bf16.mxu0 %vm202_vm0, %v21698_v56  ;;  %v15697_v23 = vsel %vm202_vm0, %v21752_v5, 0  ;;  %v21758_v56 = vld [vmem:[#allocation6 + $0x2cc] ss:$16 sps:$4 sm:$0xff]   ;;  %v21801_v5 = vld [vmem:[#allocation6 + $0x3c0] ss:$16 sps:$4 sm:$0xff]  }
 0x9c2   :  { %18884 = vmatprep.subr.msk.bf16.mxu1 %vm202_vm0, %v21700_v57  ;;  %15142 = vmatprep.mubr.bf16.mxu0 %v21960_v0  ;;  %v21753_v57 = vld [vmem:[#allocation6 + $0x2c0] ss:$16 sps:$4 sm:$0xff]  }
 0x9c3   :  { %15183 = vmatprep.mubr.bf16.mxu1 %v21960_v0 }
 0x9c4   :  { %15113 = vmatpush1.bf16.msra.mxu0 %v15099_v28  ;;  %v21759_v28 = vld [vmem:[#allocation6 + $0x2e4] ss:$16 sps:$4 sm:$0x3f]  }
 0x9c5   :  { %15154 = vmatpush1.bf16.msra.mxu1 %v15105_v45  ;;  %15258 = vmatprep.subr.bf16.mxu0 %v21706_v55  ;;  %v21763_v55 = vld [vmem:[#allocation6 + $0x2e0] ss:$16 sps:$4 sm:$0x3f]   ;;  %v21761_v45 = vld [vmem:[#allocation6 + $0x2ec] ss:$16 sps:$4 sm:$0x3f]  }
 0x9c6   :  { %15299 = vmatprep.subr.bf16.mxu1 %v21709_v3  ;;  %v21764_v3 = vld [vmem:[#allocation6 + $0x2e8] ss:$16 sps:$4 sm:$0x3f]  }
 0x9cb   :  { %18883 = vmatmul.mubr.msk.bf16.vlgmr.msra.gmra.mrb[52].mxu0 %vm195_vm2, %v15058_v38 }
 0x9cc   :  { %18885 = vmatmul.mubr.msk.bf16.vlgmr.msra.gmra.mrb[52].mxu1 %vm195_vm2, %v15058_v38  ;;  %15259 = vmatpush1.bf16.msra.mxu0 %v21704_v33  ;;  %v15839_v38 = vsel %vm202_vm0, %v21763_v55, 0  ;;  %v21767_v33 = vld [vmem:[#allocation6 + $0x304] ss:$16 sps:$4 sm:$0xff]   ;;  %v16384_v55 = vrot.slane %v23131_v59, 3 }
 0x9cd   :  { %15300 = vmatpush1.bf16.msra.mxu1 %v21707_v58  ;;  %18894 = vmatprep.subr.msk.bf16.mxu0 %vm202_vm0, %v21710_v20  ;;  %v15845_v58 = vsel %vm202_vm0, %v21764_v3, 0  ;;  %v21770_v20 = vld [vmem:[#allocation6 + $0x30c] ss:$16 sps:$4 sm:$0xff]   ;;  %v21827_v59 = vld [vmem:[#allocation6 + $0x444] ss:$16 sps:$4 sm:$0xff]  }
 0x9ce   :  { %18896 = vmatprep.subr.msk.bf16.mxu1 %vm202_vm0, %v21712_v63  ;;  %15290 = vmatprep.mubr.bf16.mxu0 %v21960_v0  ;;  %v15797_v63 = vrot.slane %v23121_v46, 2 }
 0x9cf   :  { %15331 = vmatprep.mubr.bf16.mxu1 %v21960_v0 }
 0x9d0   :  { %15261 = vmatpush1.bf16.msra.mxu0 %v15247_v53  ;;  %v15798_v41 = vor.u32 %v15797_v63, %v15796_v61  ;;  %v21765_v53 = vld [vmem:[#allocation6 + $0x300] ss:$16 sps:$4 sm:$0xff]   ;;  %v21821_v61 = vld [vmem:[#allocation6 + $0x42c] ss:$16 sps:$4 sm:$0x3f]  }
 0x9d1   :  { %15302 = vmatpush1.bf16.msra.mxu1 %v15253_v11  ;;  %15403 = vmatprep.subr.bf16.mxu0 %v21718_v13  ;;  %v21768_v13 = vld [vmem:[#allocation6 + $0x308] ss:$16 sps:$4 sm:$0xff]   ;;  %v21771_v11 = vld [vmem:[#allocation6 + $0x324] ss:$16 sps:$4 sm:$0x3f]  }
 0x9d2   :  { %15444 = vmatprep.subr.bf16.mxu1 %v21721_v7  ;;  %v21775_v7 = vld [vmem:[#allocation6 + $0x320] ss:$16 sps:$4 sm:$0x3f]   ;;  %v21824_v63 = vld [vmem:[#allocation6 + $0x428] ss:$16 sps:$4 sm:$0x3f]  }
 0x9d7   :  { %18895 = vmatmul.mubr.msk.bf16.vlgmr.msra.gmra.mrb[52].mxu0 %vm195_vm2, %v15206_v47 }
 0x9d8   :  { %18897 = vmatmul.mubr.msk.bf16.vlgmr.msra.gmra.mrb[52].mxu1 %vm195_vm2, %v15206_v47  ;;  %15404 = vmatpush1.bf16.msra.mxu0 %v21716_v25  ;;  %v15985_v47 = vsel %vm202_vm0, %v21775_v7, 0  ;;  %v21779_v25 = vld [vmem:[#allocation6 + $0x344] ss:$16 sps:$4 sm:$0xff]  }
 0x9d9   :  { %15445 = vmatpush1.bf16.msra.mxu1 %v21719_v22  ;;  %18906 = vmatprep.subr.msk.bf16.mxu0 %vm202_vm0, %v21722_v34  ;;  %v15991_v22 = vsel %vm202_vm0, %v21776_v24, 0  ;;  %v21782_v34 = vld [vmem:[#allocation6 + $0x34c] ss:$16 sps:$4 sm:$0xff]   ;;  %v21831_v7 = vld [vmem:[#allocation6 + $0x464] ss:$16 sps:$4 sm:$0x3f]  }
 0x9da   :  { %18908 = vmatprep.subr.msk.bf16.mxu1 %vm202_vm0, %v21724_v4  ;;  %15435 = vmatprep.mubr.bf16.mxu0 %v21960_v0  ;;  %v21777_v4 = vld [vmem:[#allocation6 + $0x340] ss:$16 sps:$4 sm:$0xff]   ;;  %v21833_v24 = vld [vmem:[#allocation6 + $0x46c] ss:$16 sps:$4 sm:$0x3f]  }
 0x9db   :  { %15476 = vmatprep.mubr.bf16.mxu1 %v21960_v0 }
 0x9dc   :  { %15406 = vmatpush1.bf16.msra.mxu0 %v15392_v16  ;;  %v21783_v16 = vld [vmem:[#allocation6 + $0x364] ss:$16 sps:$4 sm:$0x3f]  }
 0x9dd   :  { %15447 = vmatpush1.bf16.msra.mxu1 %v15398_v37  ;;  %15556 = vmatprep.subr.bf16.mxu0 %v21730_v26  ;;  %v21787_v26 = vld [vmem:[#allocation6 + $0x360] ss:$16 sps:$4 sm:$0x3f]   ;;  %v21785_v37 = vld [vmem:[#allocation6 + $0x36c] ss:$16 sps:$4 sm:$0x3f]  }
 0x9de   :  { %15597 = vmatprep.subr.bf16.mxu1 %v21733_v32  ;;  %v21788_v32 = vld [vmem:[#allocation6 + $0x368] ss:$16 sps:$4 sm:$0x3f]  }
 0x9e3   :  { %18907 = vmatmul.mubr.msk.bf16.vlgmr.msra.gmra.mrb[52].mxu0 %vm195_vm2, %v21877_v39 }
 0x9e4   :  { %18909 = vmatmul.mubr.msk.bf16.vlgmr.msra.gmra.mrb[52].mxu1 %vm195_vm2, %v21877_v39  ;;  %15557 = vmatpush1.bf16.msra.mxu0 %v21728_v36  ;;  %v16133_v39 = vsel %vm202_vm0, %v21787_v26, 0  ;;  %v21791_v36 = vld [vmem:[#allocation6 + $0x384] ss:$16 sps:$4 sm:$0xff]   ;;  %v21845_v26 = vld [vmem:[#allocation6 + $0x4ac] ss:$16 sps:$4 sm:$0x3f]  }
 0x9e5   :  { %15598 = vmatpush1.bf16.msra.mxu1 %v21731_v43  ;;  %18919 = vmatprep.subr.msk.bf16.mxu0 %vm202_vm0, %v21734_v19  ;;  %v16139_v43 = vsel %vm202_vm0, %v21788_v32, 0  ;;  %v21794_v19 = vld [vmem:[#allocation6 + $0x38c] ss:$16 sps:$4 sm:$0xff]  }
 0x9e6   :  { %18921 = vmatprep.subr.msk.bf16.mxu1 %vm202_vm0, %v21736_v44  ;;  %15588 = vmatprep.mubr.bf16.mxu0 %v21960_v0  ;;  %v16091_v44 = vrot.slane %v23121_v46, 3 }
 0x9e7   :  { %15629 = vmatprep.mubr.bf16.mxu1 %v21960_v0 }
 0x9e8   :  { %15559 = vmatpush1.bf16.msra.mxu0 %v15545_v35  ;;  %v16092_v30 = vor.u32 %v16091_v44, %v16090_v10  ;;  %v21789_v35 = vld [vmem:[#allocation6 + $0x380] ss:$16 sps:$4 sm:$0xff]   ;;  %v21855_v10 = vld [vmem:[#allocation6 + $0x4e4] ss:$16 sps:$4 sm:$0x3f]  }
 0x9e9   :  { %15600 = vmatpush1.bf16.msra.mxu1 %v15551_v8  ;;  %15702 = vmatprep.subr.bf16.mxu0 %v21743_v18  ;;  %v21792_v18 = vld [vmem:[#allocation6 + $0x388] ss:$16 sps:$4 sm:$0xff]   ;;  %v21795_v8 = vld [vmem:[#allocation6 + $0x3a4] ss:$16 sps:$4 sm:$0x3f]  }
 0x9ea   :  { %15743 = vmatprep.subr.bf16.mxu1 %v21746_v51  ;;  %v21799_v51 = vld [vmem:[#allocation6 + $0x3a0] ss:$16 sps:$4 sm:$0x3f]  }
 0x9eb   :  { %v21859_v44 = vld [vmem:[#allocation6 + $0x4e0] ss:$16 sps:$4 sm:$0x3f]  }
 0x9ef   :  { %18920 = vmatmul.mubr.msk.bf16.vlgmr.msra.gmra.mrb[52].mxu0 %vm195_vm2, %v15504_v29 }
 0x9f0   :  { %18922 = vmatmul.mubr.msk.bf16.vlgmr.msra.gmra.mrb[52].mxu1 %vm195_vm2, %v15504_v29  ;;  %15703 = vmatpush1.bf16.msra.mxu0 %v21741_v2  ;;  %v21800_v29 = vld [vmem:[#allocation6 + $0x3a8] ss:$16 sps:$4 sm:$0x3f]   ;;  %v16279_v2 = vsel %vm202_vm0, %v21799_v51, 0 }
 0x9f1   :  { %15744 = vmatpush1.bf16.msra.mxu1 %v21744_v49  ;;  %18931 = vmatprep.subr.msk.bf16.mxu0 %vm202_vm0, %v21747_v42  ;;  %v21803_v49 = vld [vmem:[#allocation6 + $0x3c4] ss:$16 sps:$4 sm:$0xff]   ;;  %v16285_v42 = vsel %vm202_vm0, %v21800_v29, 0  ;;  %v21864_v29 = vld [vmem:[#allocation6 + $0x508] ss:$16 sps:$4 sm:$0xff]  }
 0x9f2   :  { %18933 = vmatprep.subr.msk.bf16.mxu1 %vm202_vm0, %v21749_v54  ;;  %15734 = vmatprep.mubr.bf16.mxu0 %v21960_v0  ;;  %v16238_v54 = vrot.slane %v23117_v40, 3 }
 0x9f3   :  { %15775 = vmatprep.mubr.bf16.mxu1 %v21960_v0 }
 0x9f4   :  { %15705 = vmatpush1.bf16.msra.mxu0 %v15691_v17  ;;  %v21804_v17 = vld [vmem:[#allocation6 + $0x3c8] ss:$16 sps:$4 sm:$0xff]  }
 0x9f5   :  { %15746 = vmatpush1.bf16.msra.mxu1 %v15697_v23  ;;  %15850 = vmatprep.subr.bf16.mxu0 %v21755_v27  ;;  %v21807_v27 = vld [vmem:[#allocation6 + $0x3e4] ss:$16 sps:$4 sm:$0x3f]   ;;  %v21811_v23 = vld [vmem:[#allocation6 + $0x3e0] ss:$16 sps:$4 sm:$0x3f]  }
 0x9f6   :  { %15891 = vmatprep.subr.bf16.mxu1 %v21758_v56  ;;  %v21809_v56 = vld [vmem:[#allocation6 + $0x3ec] ss:$16 sps:$4 sm:$0x3f]  }
 0x9fb   :  { %18932 = vmatmul.mubr.msk.bf16.vlgmr.msra.gmra.mrb[52].mxu0 %vm195_vm2, %v15650_v60 }
 0x9fc   :  { %18934 = vmatmul.mubr.msk.bf16.vlgmr.msra.gmra.mrb[52].mxu1 %vm195_vm2, %v15650_v60  ;;  %15851 = vmatpush1.bf16.msra.mxu0 %v21753_v57  ;;  %v21812_v60 = vld [vmem:[#allocation6 + $0x3e8] ss:$16 sps:$4 sm:$0x3f]   ;;  %v16427_v57 = vsel %vm202_vm0, %v21811_v23, 0 }
 0x9fd   :  { %15892 = vmatpush1.bf16.msra.mxu1 %v21756_v12  ;;  %18943 = vmatprep.subr.msk.bf16.mxu0 %vm202_vm0, %v21759_v28  ;;  %v21815_v12 = vld [vmem:[#allocation6 + $0x404] ss:$16 sps:$4 sm:$0xff]   ;;  %v16433_v40 = vsel %vm202_vm0, %v21812_v60, 0  ;;  %v21818_v28 = vld [vmem:[#allocation6 + $0x40c] ss:$16 sps:$4 sm:$0xff]  }
 0x9fe   :  { %18945 = vmatprep.subr.msk.bf16.mxu1 %vm202_vm0, %v21761_v45  ;;  %15882 = vmatprep.mubr.bf16.mxu0 %v21960_v0  ;;  %v16385_v45 = vrot.slane %v23121_v46, 4 }
 0x9ff   :  { %15923 = vmatprep.mubr.bf16.mxu1 %v21960_v0 }
 0xa00   :  { %15853 = vmatpush1.bf16.msra.mxu0 %v15839_v38  ;;  %v16386_v3 = vor.u32 %v16385_v45, %v16384_v55  ;;  %v21813_v38 = vld [vmem:[#allocation6 + $0x400] ss:$16 sps:$4 sm:$0xff]  }
 0xa01   :  { %15894 = vmatpush1.bf16.msra.mxu1 %v15845_v58  ;;  %15996 = vmatprep.subr.bf16.mxu0 %v21767_v33  ;;  %v21816_v33 = vld [vmem:[#allocation6 + $0x408] ss:$16 sps:$4 sm:$0xff]   ;;  %v21819_v58 = vld [vmem:[#allocation6 + $0x424] ss:$16 sps:$4 sm:$0x3f]  }
 0xa02   :  { %16037 = vmatprep.subr.bf16.mxu1 %v21770_v20  ;;  %v21823_v20 = vld [vmem:[#allocation6 + $0x420] ss:$16 sps:$4 sm:$0x3f]  }
 0xa03   :  { %v16572_v46 = vsel %vm202_vm0, %v21823_v20, 0 }
 0xa07   :  { %18944 = vmatmul.mubr.msk.bf16.vlgmr.msra.gmra.mrb[52].mxu0 %vm195_vm2, %v15798_v41 }
 0xa08   :  { %18946 = vmatmul.mubr.msk.bf16.vlgmr.msra.gmra.mrb[52].mxu1 %vm195_vm2, %v15798_v41  ;;  %15997 = vmatpush1.bf16.msra.mxu0 %v21765_v53  ;;  %v16578_v41 = vsel %vm202_vm0, %v21824_v63, 0  ;;  %v21830_v53 = vld [vmem:[#allocation6 + $0x44c] ss:$16 sps:$4 sm:$0xff]  }
 0xa09   :  { %16038 = vmatpush1.bf16.msra.mxu1 %v21768_v13  ;;  %18955 = vmatprep.subr.msk.bf16.mxu0 %vm202_vm0, %v21771_v11  ;;  %v21825_v13 = vld [vmem:[#allocation6 + $0x440] ss:$16 sps:$4 sm:$0xff]   ;;  %v21828_v11 = vld [vmem:[#allocation6 + $0x448] ss:$16 sps:$4 sm:$0xff]  }
 0xa0a   :  { %18957 = vmatprep.subr.msk.bf16.mxu1 %vm202_vm0, %v21773_v62  ;;  %16028 = vmatprep.mubr.bf16.mxu0 %v21960_v0  ;;  %v21835_v62 = vld [vmem:[#allocation6 + $0x460] ss:$16 sps:$4 sm:$0x3f]  }
 0xa0b   :  { %16069 = vmatprep.mubr.bf16.mxu1 %v21960_v0 }
 0xa0c   :  { %15999 = vmatpush1.bf16.msra.mxu0 %v15985_v47  ;;  %v21836_v47 = vld [vmem:[#allocation6 + $0x468] ss:$16 sps:$4 sm:$0x3f]  }
 0xa0d   :  { %16040 = vmatpush1.bf16.msra.mxu1 %v15991_v22  ;;  %16144 = vmatprep.subr.bf16.mxu0 %v21779_v25  ;;  %v16714_v25 = vsel %vm202_vm0, %v21835_v62, 0  ;;  %v21839_v22 = vld [vmem:[#allocation6 + $0x484] ss:$16 sps:$4 sm:$0xff]  }
 0xa0e   :  { %16185 = vmatprep.subr.bf16.mxu1 %v21782_v34  ;;  %v16720_v34 = vsel %vm202_vm0, %v21836_v47, 0 }
 0xa13   :  { %18956 = vmatmul.mubr.msk.bf16.vlgmr.msra.gmra.mrb[52].mxu0 %vm195_vm2, %v15944_v31 }
 0xa14   :  { %18958 = vmatmul.mubr.msk.bf16.vlgmr.msra.gmra.mrb[52].mxu1 %vm195_vm2, %v15944_v31  ;;  %16145 = vmatpush1.bf16.msra.mxu0 %v21777_v4  ;;  %v21842_v31 = vld [vmem:[#allocation6 + $0x48c] ss:$16 sps:$4 sm:$0xff]   ;;  %v21840_v4 = vld [vmem:[#allocation6 + $0x488] ss:$16 sps:$4 sm:$0xff]  }
 0xa15   :  { %16186 = vmatpush1.bf16.msra.mxu1 %v21780_v6  ;;  %18967 = vmatprep.subr.msk.bf16.mxu0 %vm202_vm0, %v21783_v16  ;;  %v21843_v6 = vld [vmem:[#allocation6 + $0x4a4] ss:$16 sps:$4 sm:$0x3f]   ;;  %v21847_v16 = vld [vmem:[#allocation6 + $0x4a0] ss:$16 sps:$4 sm:$0x3f]  }
 0xa16   :  { %18969 = vmatprep.subr.msk.bf16.mxu1 %vm202_vm0, %v21785_v37  ;;  %16176 = vmatprep.mubr.bf16.mxu0 %v21960_v0  ;;  %v21848_v37 = vld [vmem:[#allocation6 + $0x4a8] ss:$16 sps:$4 sm:$0x3f]   ;;  %v16856_v32 = vsel %vm202_vm0, %v21847_v16, 0 }
 0xa17   :  { %16217 = vmatprep.mubr.bf16.mxu1 %v21960_v0 }
 0xa18   :  { %16147 = vmatpush1.bf16.msra.mxu0 %v16133_v39  ;;  %v21851_v39 = vld [vmem:[#allocation6 + $0x4c4] ss:$16 sps:$4 sm:$0xff]  }
 0xa19   :  { %16188 = vmatpush1.bf16.msra.mxu1 %v16139_v43  ;;  %16290 = vmatprep.subr.bf16.mxu0 %v21791_v36  ;;  %v16862_v36 = vsel %vm202_vm0, %v21848_v37, 0  ;;  %v21854_v43 = vld [vmem:[#allocation6 + $0x4cc] ss:$16 sps:$4 sm:$0xff]  }
 0xa1a   :  { %16331 = vmatprep.subr.bf16.mxu1 %v21794_v19  ;;  %v21852_v19 = vld [vmem:[#allocation6 + $0x4c8] ss:$16 sps:$4 sm:$0xff]  }
 0xa1f   :  { %18968 = vmatmul.mubr.msk.bf16.vlgmr.msra.gmra.mrb[52].mxu0 %vm195_vm2, %v16092_v30 }
 0xa20   :  { %18970 = vmatmul.mubr.msk.bf16.vlgmr.msra.gmra.mrb[52].mxu1 %vm195_vm2, %v16092_v30  ;;  %16291 = vmatpush1.bf16.msra.mxu0 %v21789_v35  ;;  %v21857_v30 = vld [vmem:[#allocation6 + $0x4ec] ss:$16 sps:$4 sm:$0x3f]   ;;  %v21860_v35 = vld [vmem:[#allocation6 + $0x4e8] ss:$16 sps:$4 sm:$0x3f]  }
 0xa21   :  { %16332 = vmatpush1.bf16.msra.mxu1 %v21792_v18  ;;  %18979 = vmatprep.subr.msk.bf16.mxu0 %vm202_vm0, %v21795_v8  ;;  %v16998_v18 = vsel %vm202_vm0, %v21859_v44, 0  ;;  %v21863_v8 = vld [vmem:[#allocation6 + $0x504] ss:$16 sps:$4 sm:$0xff]   ;;  %v17004_v51 = vsel %vm202_vm0, %v21860_v35, 0 }
 0xa22   :  { %18981 = vmatprep.subr.msk.bf16.mxu1 %vm202_vm0, %v21797_v15  ;;  %16322 = vmatprep.mubr.bf16.mxu0 %v21960_v0  ;;  %v21866_v15 = vld [vmem:[#allocation6 + $0x50c] ss:$16 sps:$4 sm:$0xff]  }
 0xa23   :  { %16363 = vmatprep.mubr.bf16.mxu1 %v21960_v0 }
 0xa24   :  { %16293 = vmatpush1.bf16.msra.mxu0 %v16279_v2  ;;  %v21867_v2 = vld [vmem:[#allocation6 + $0x524] ss:$16 sps:$4 sm:$0x3f]  }
 0xa25   :  { %16334 = vmatpush1.bf16.msra.mxu1 %v16285_v42  ;;  %16438 = vmatprep.subr.bf16.mxu0 %v21803_v49  ;;  %v21871_v49 = vld [vmem:[#allocation6 + $0x520] ss:$16 sps:$4 sm:$0x3f]   ;;  %v21869_v42 = vld [vmem:[#allocation6 + $0x52c] ss:$16 sps:$4 sm:$0x3f]  }
 0xa26   :  { %16479 = vmatprep.subr.bf16.mxu1 %v21806_v52  ;;  %v21872_v52 = vld [vmem:[#allocation6 + $0x528] ss:$16 sps:$4 sm:$0x3f]  }
 0xa2b   :  { %18980 = vmatmul.mubr.msk.bf16.vlgmr.msra.gmra.mrb[52].mxu0 %vm195_vm2, %v16238_v54 }
 0xa2c   :  { %18982 = vmatmul.mubr.msk.bf16.vlgmr.msra.gmra.mrb[52].mxu1 %vm195_vm2, %v16238_v54  ;;  %16439 = vmatpush1.bf16.msra.mxu0 %v21801_v5  ;;  %v17140_v54 = vsel %vm202_vm0, %v21871_v49, 0  ;;  %v17146_v5 = vsel %vm202_vm0, %v21872_v52, 0 }
 0xa2d   :  { %16480 = vmatpush1.bf16.msra.mxu1 %v21804_v17  ;;  %18991 = vmatprep.subr.msk.bf16.mxu0 %vm202_vm0, %v21807_v27  ;;  %v21880_v27 = vld [vmem:[%s23313_s5 + $0x10] sm:$0xff] }
 0xa2e   :  { %18993 = vmatprep.subr.msk.bf16.mxu1 %vm202_vm0, %v21809_v56  ;;  %16470 = vmatprep.mubr.bf16.mxu0 %v21960_v0  ;;  %v8717_v23 = vmul.f32 %v21880_v27, %v21880_v27 }
 0xa2f   :  { %16511 = vmatprep.mubr.bf16.mxu1 %v21960_v0 }
 0xa30   :  { %16441 = vmatpush1.bf16.msra.mxu0 %v16427_v57  ;;  %v8699_v57 = vrot.slane %v21880_v27, 4 }
 0xa31   :  { %16482 = vmatpush1.bf16.msra.mxu1 %v16433_v40  ;;  %16583 = vmatprep.subr.bf16.mxu0 %v21815_v12 }
 0xa32   :  { %16624 = vmatprep.subr.bf16.mxu1 %v21818_v28  ;;  %v21882_v28 = vld [vmem:[%s23313_s5 + $0x18] sm:$0xff] }
 0xa33   :  { %v8705_v55 = vrot.slane %v21882_v28, 4  ;;  %v8718_v45 = vmul.f32 %v21882_v28, %v21882_v28 }
 0xa35   :  { %v8706_v63 = vadd.f32 %v21882_v28, %v8705_v55 }
 0xa37   :  { %18992 = vmatmul.mubr.msk.bf16.vlgmr.msra.gmra.mrb[52].mxu0 %vm195_vm2, %v16386_v3  ;;  %v8707_v62 = vrot.slane %v8706_v63, 2 }
 0xa38   :  { %18994 = vmatmul.mubr.msk.bf16.vlgmr.msra.gmra.mrb[52].mxu1 %vm195_vm2, %v16386_v3  ;;  %16584 = vmatpush1.bf16.msra.mxu0 %v21813_v38 }
 0xa39   :  { %16625 = vmatpush1.bf16.msra.mxu1 %v21816_v33  ;;  %19003 = vmatprep.subr.msk.bf16.mxu0 %vm202_vm0, %v21819_v58  ;;  %v8700_v33 = vadd.f32 %v21880_v27, %v8699_v57 }
 0xa3a   :  { %19005 = vmatprep.subr.msk.bf16.mxu1 %vm202_vm0, %v21821_v61  ;;  %16615 = vmatprep.mubr.bf16.mxu0 %v21960_v0 }
 0xa3b   :  { %16656 = vmatprep.mubr.bf16.mxu1 %v21960_v0 }
 0xa3c   :  { %16586 = vmatpush1.bf16.msra.mxu0 %v16572_v46  ;;  %v8737_v46 = vrot.slane %v8718_v45, 4 }
 0xa3d   :  { %16627 = vmatpush1.bf16.msra.mxu1 %v16578_v41  ;;  %16725 = vmatprep.subr.bf16.mxu0 %v21827_v59 }
 0xa3e   :  { %16766 = vmatprep.subr.bf16.mxu1 %v21830_v53  ;;  %v8701_v53 = vrot.slane %v8700_v33, 2 }
 0xa43   :  { %19004 = vmatmul.mubr.msk.bf16.vlgmr.msra.gmra.mrb[52].mxu0 %vm195_vm2, %v23114_v21 }
 0xa44   :  { %19006 = vmatmul.mubr.msk.bf16.vlgmr.msra.gmra.mrb[52].mxu1 %vm195_vm2, %v23114_v21  ;;  %16726 = vmatpush1.bf16.msra.mxu0 %v21825_v13  ;;  %v21837_v21 = vld [vmem:[#allocation6 + $0x480] ss:$16 sps:$4 sm:$0xff]  }
 0xa45   :  { %16767 = vmatpush1.bf16.msra.mxu1 %v21828_v11  ;;  %19015 = vmatprep.subr.msk.bf16.mxu0 %vm202_vm0, %v21831_v7 }
 0xa46   :  { %19017 = vmatprep.subr.msk.bf16.mxu1 %vm202_vm0, %v21833_v24  ;;  %16757 = vmatprep.mubr.bf16.mxu0 %v21960_v0  ;;  %v8738_v24 = vadd.f32 %v8737_v46, %v8718_v45 }
 0xa47   :  { %16798 = vmatprep.mubr.bf16.mxu1 %v21960_v0 }
 0xa48   :  { %16728 = vmatpush1.bf16.msra.mxu0 %v16714_v25 }
 0xa49   :  { %16769 = vmatpush1.bf16.msra.mxu1 %v16720_v34  ;;  %16867 = vmatprep.subr.bf16.mxu0 %v21839_v22  ;;  %v8702_v22 = vadd.f32 %v8701_v53, %v8700_v33 }
 0xa4a   :  { %16908 = vmatprep.subr.bf16.mxu1 %v21842_v31 }
 0xa4b   :  { %v8703_v37 = vrot.slane %v8702_v22, 1 }
 0xa4d   :  { %v23262_v35 = vadd.f32 %v8703_v37, %v8702_v22 }
 0xa4f   :  { %19016 = vmatmul.mubr.msk.bf16.vlgmr.msra.gmra.mrb[52].mxu0 %vm195_vm2, %v22728_v1 }
 0xa50   :  { %19018 = vmatmul.mubr.msk.bf16.vlgmr.msra.gmra.mrb[52].mxu1 %vm195_vm2, %v22728_v1  ;;  %16868 = vmatpush1.bf16.msra.mxu0 %v21837_v21  ;;  %v21849_v1 = vld [vmem:[#allocation6 + $0x4c0] ss:$16 sps:$4 sm:$0xff]  }
 0xa51   :  { %16909 = vmatpush1.bf16.msra.mxu1 %v21840_v4  ;;  %19027 = vmatprep.subr.msk.bf16.mxu0 %vm202_vm0, %v21843_v6  ;;  %v8708_v4 = vadd.f32 %v8707_v62, %v8706_v63  ;;  %v8739_v6 = vrot.slane %v8738_v24, 2 }
 0xa52   :  { %19029 = vmatprep.subr.msk.bf16.mxu1 %vm202_vm0, %v21845_v26  ;;  %16899 = vmatprep.mubr.bf16.mxu0 %v21960_v0 }
 0xa53   :  { %16940 = vmatprep.mubr.bf16.mxu1 %v21960_v0 }
 0xa54   :  { %16870 = vmatpush1.bf16.msra.mxu0 %v16856_v32 }
 0xa55   :  { %16911 = vmatpush1.bf16.msra.mxu1 %v16862_v36  ;;  %17009 = vmatprep.subr.bf16.mxu0 %v21851_v39 }
 0xa56   :  { %17050 = vmatprep.subr.bf16.mxu1 %v21854_v43  ;;  %v8709_v43 = vrot.slane %v8708_v4, 1 }
 0xa5b   :  { %19028 = vmatmul.mubr.msk.bf16.vlgmr.msra.gmra.mrb[52].mxu0 %vm195_vm2, %v22758_v9 }
 0xa5c   :  { %19030 = vmatmul.mubr.msk.bf16.vlgmr.msra.gmra.mrb[52].mxu1 %vm195_vm2, %v22758_v9  ;;  %17010 = vmatpush1.bf16.msra.mxu0 %v21849_v1  ;;  %v21861_v9 = vld [vmem:[#allocation6 + $0x500] ss:$16 sps:$4 sm:$0xff]   ;;  %v23256_v1 = vadd.f32 %v8739_v6, %v8738_v24 }
 0xa5d   :  { %17051 = vmatpush1.bf16.msra.mxu1 %v21852_v19  ;;  %19039 = vmatprep.subr.msk.bf16.mxu0 %vm202_vm0, %v21855_v10  ;;  %v21962_v10 = vmov 1983009808  }
 0xa5e   :  { %19041 = vmatprep.subr.msk.bf16.mxu1 %vm202_vm0, %v21857_v30  ;;  %17041 = vmatprep.mubr.bf16.mxu0 %v21960_v0  ;;  %v23258_v44 = vunpack.c.l.s4 %v21962_v10 }
 0xa5f   :  { %17082 = vmatprep.mubr.bf16.mxu1 %v21960_v0 }
 0xa60   :  { %17012 = vmatpush1.bf16.msra.mxu0 %v16998_v18 }
 0xa61   :  { %17053 = vmatpush1.bf16.msra.mxu1 %v17004_v51  ;;  %17151 = vmatprep.subr.bf16.mxu0 %v21863_v8 }
 0xa62   :  { %17192 = vmatprep.subr.bf16.mxu1 %v21866_v15  ;;  %v23270_v15 = vadd.f32 %v8709_v43, %v8708_v4 }
 0xa67   :  { %19040 = vmatmul.mubr.msk.bf16.vlgmr.msra.gmra.mrb[52].mxu0 %vm195_vm2, %v22785_v50 }
 0xa68   :  { %19042 = vmatmul.mubr.msk.bf16.vlgmr.msra.gmra.mrb[52].mxu1 %vm195_vm2, %v22785_v50  ;;  %17152 = vmatpush1.bf16.msra.mxu0 %v21861_v9  ;;  %v21879_v50 = vld [vmem:[%s23313_s5] sm:$0xff]  ;;  %v8741_v9 = vrot.slane %v23256_v1, 1 }
 0xa69   :  { %17193 = vmatpush1.bf16.msra.mxu1 %v21864_v29  ;;  %19051 = vmatprep.subr.msk.bf16.mxu0 %vm202_vm0, %v21867_v2  ;;  %v8715_v17 = vmul.f32 %v21879_v50, %v21879_v50  ;;  %v8687_v60 = vrot.slane %v21879_v50, 4 }
 0xa6a   :  { %19053 = vmatprep.subr.msk.bf16.mxu1 %vm202_vm0, %v21869_v42  ;;  %17183 = vmatprep.mubr.bf16.mxu0 %v21960_v0 }
 0xa6b   :  { %17224 = vmatprep.mubr.bf16.mxu1 %v21960_v0  ;;  %v21881_v0 = vld [vmem:[%s23313_s5 + $0x8] sm:$0xff]  ;;  %v8719_v40 = vrot.slane %v8715_v17, 4  ;;  %v8688_v38 = vadd.f32 %v21879_v50, %v8687_v60 }
 0xa6c   :  { %17154 = vmatpush1.bf16.msra.mxu0 %v17140_v54  ;;  %v8716_v56 = vmul.f32 %v21881_v0, %v21881_v0  ;;  %v8693_v12 = vrot.slane %v21881_v0, 4 }
 0xa6d   :  { %17195 = vmatpush1.bf16.msra.mxu1 %v17146_v5  ;;  %v8720_v20 = vadd.f32 %v8719_v40, %v8715_v17  ;;  %v8689_v41 = vrot.slane %v8688_v38, 2  ;;  %v17319_v5 = vunpack.c.0.s8 %v23258_v44 }
 0xa6e   :  { %v8725_v3 = vrot.slane %v8716_v56, 4  ;;  %v8694_v58 = vadd.f32 %v21881_v0, %v8693_v12 }
 0xa6f   :  { %v8721_v11 = vrot.slane %v8720_v20, 2  ;;  %v8690_v25 = vadd.f32 %v8689_v41, %v8688_v38 }
 0xa70   :  { %v8726_v59 = vadd.f32 %v8725_v3, %v8716_v56  ;;  %v8695_v13 = vrot.slane %v8694_v58, 2 }
 0xa71   :  { %v8722_v31 = vadd.f32 %v8721_v11, %v8720_v20  ;;  %v8691_v26 = vrot.slane %v8690_v25, 1 }
 0xa72   :  { %v8727_v47 = vrot.slane %v8726_v59, 2  ;;  %v8696_v34 = vadd.f32 %v8695_v13, %v8694_v58 }
 0xa73   :  { %19052 = vmatmul.mubr.msk.bf16.vlgmr.msra.gmra.mrb[52].mxu0 %vm195_vm2, %v22814_v14  ;;  %v8723_v39 = vrot.slane %v8722_v31, 1  ;;  %v23260_v30 = vadd.f32 %v8691_v26, %v8690_v25 }
 0xa74   :  { %19054 = vmatmul.mubr.msk.bf16.vlgmr.msra.gmra.mrb[52].mxu1 %vm195_vm2, %v22814_v14  ;;  %v8731_v14 = vrot.slane %v8717_v23, 4  ;;  %v8728_v16 = vadd.f32 %v8727_v47, %v8726_v59  ;;  %v8697_v32 = vrot.slane %v8696_v34, 1 }
 0xa75   :  { %v23266_v8 = vadd.f32 %v8723_v39, %v8722_v31 }
 0xa76   :  { %v8732_v61 = vadd.f32 %v8731_v14, %v8717_v23  ;;  %v8729_v19 = vrot.slane %v8728_v16, 1  ;;  %v23264_v18 = vadd.f32 %v8697_v32, %v8696_v34 }
 0xa78   :  { %v8733_v7 = vrot.slane %v8732_v61, 2  ;;  %v23273_v2 = vadd.f32 %v8729_v19, %v8728_v16 }
 0xa7a   :  { %v8734_v21 = vadd.f32 %v8733_v7, %v8732_v61 }
 0xa7c   :  { %v8735_v36 = vrot.slane %v8734_v21, 1 }
 0xa7e   :  { %v23268_v51 = vadd.f32 %v8735_v36, %v8734_v21 }
 0xb46   :  { %v17185_v29 = vpop.f32.mrb[52].mxu0 }
 0xb47   :  { %19055 = vst [vmem:[%s23313_s5 + $0x20] sm:$0xff] %v17185_v29  ;;  %v17246_v49 = vrot.slane %v17185_v29, 4  ;;  %v17274_v42 = vmul.f32 %v17185_v29, %v17185_v29  ;;  %v17226_v52 = vpop.f32.mrb[52].mxu1  ;;  %v17187_v54 = vpop.f32.mrb[53].mxu0 }
 0xb48   :  { %19057 = vst [vmem:[%s23313_s5 + $0x30] sm:$0xff] %v17226_v52  ;;  %v17258_v50 = vrot.slane %v17226_v52, 4  ;;  %v17276_v17 = vmul.f32 %v17226_v52, %v17226_v52  ;;  %19056 = vst [vmem:[%s23313_s5 + $0x28] sm:$0xff] %v17187_v54  ;;  %v17252_v27 = vrot.slane %v17187_v54, 4  ;;  %v17275_v23 = vmul.f32 %v17187_v54, %v17187_v54  ;;  %v17228_v0 = vpop.f32.mrb[53].mxu1  ;;  %v17189_v56 = vpop.f32.mrb[54].mxu0 }
 0xb49   :  { %v17247_v60 = vadd.f32 %v17246_v49, %v17185_v29  ;;  %v17278_v57 = vrot.slane %v17274_v42, 4  ;;  %19058 = vst [vmem:[%s23313_s5 + $0x38] sm:$0xff] %v17228_v0  ;;  %v17264_v12 = vrot.slane %v17228_v0, 4  ;;  %v17277_v40 = vmul.f32 %v17228_v0, %v17228_v0  ;;  %v17230_v14 = vpop.f32.mrb[54].mxu1  ;;  %v17190_v28 = vpop.f32.mrb[55].mxu0 }
 0xb4a   :  { %v17259_v55 = vadd.f32 %v17258_v50, %v17226_v52  ;;  %v17290_v45 = vrot.slane %v17276_v17, 4  ;;  %v17253_v3 = vadd.f32 %v17252_v27, %v17187_v54  ;;  %v17284_v38 = vrot.slane %v17275_v23, 4  ;;  %v17231_v33 = vpop.f32.mrb[55].mxu1 }
 0xb4b   :  { %v17248_v58 = vrot.slane %v17247_v60, 2  ;;  %v17279_v20 = vadd.f32 %v17278_v57, %v17274_v42  ;;  %v17265_v61 = vadd.f32 %v17264_v12, %v17228_v0  ;;  %v17296_v63 = vrot.slane %v17277_v40, 4 }
 0xb4c   :  { %v17260_v46 = vrot.slane %v17259_v55, 2  ;;  %v17291_v59 = vadd.f32 %v17290_v45, %v17276_v17  ;;  %v17254_v41 = vrot.slane %v17253_v3, 2  ;;  %v17285_v53 = vadd.f32 %v17284_v38, %v17275_v23 }
 0xb4d   :  { %v17249_v13 = vadd.f32 %v17248_v58, %v17247_v60  ;;  %v17280_v11 = vrot.slane %v17279_v20, 2  ;;  %v17266_v7 = vrot.slane %v17265_v61, 2  ;;  %v17297_v62 = vadd.f32 %v17296_v63, %v17277_v40 }
 0xb4e   :  { %v17261_v24 = vadd.f32 %v17260_v46, %v17259_v55  ;;  %v17292_v47 = vrot.slane %v17291_v59, 2  ;;  %v17255_v25 = vadd.f32 %v17254_v41, %v17253_v3  ;;  %v17286_v22 = vrot.slane %v17285_v53, 2 }
 0xb4f   :  { %v17250_v34 = vrot.slane %v17249_v13, 1  ;;  %v17281_v31 = vadd.f32 %v17280_v11, %v17279_v20  ;;  %v17267_v21 = vadd.f32 %v17266_v7, %v17265_v61  ;;  %v17298_v4 = vrot.slane %v17297_v62, 2 }
 0xb50   :  { %v17262_v6 = vrot.slane %v17261_v24, 1  ;;  %v17293_v16 = vadd.f32 %v17292_v47, %v17291_v59  ;;  %v17256_v26 = vrot.slane %v17255_v25, 1  ;;  %v17287_v37 = vadd.f32 %v17286_v22, %v17285_v53 }
 0xb51   :  { %v17251_v32 = vadd.f32 %v17250_v34, %v17249_v13  ;;  %v17282_v39 = vrot.slane %v17281_v31, 1  ;;  %v17268_v36 = vrot.slane %v17267_v21, 1  ;;  %v17299_v43 = vadd.f32 %v17298_v4, %v17297_v62 }
 0xb52   :  { %v17263_v19 = vadd.f32 %v17262_v6, %v17261_v24  ;;  %v17294_v10 = vrot.slane %v17293_v16, 1  ;;  %v17257_v29 = vadd.f32 %v17256_v26, %v17255_v25  ;;  %v17288_v49 = vrot.slane %v17287_v37, 1 }
 0xb53   :  { %v17270_v42 = vadd.f32 %v17251_v32, %v23260_v30  ;;  %v17283_v52 = vadd.f32 %v17282_v39, %v17281_v31  ;;  %v17269_v54 = vadd.f32 %v17268_v36, %v17267_v21  ;;  %v17300_v50 = vrot.slane %v17299_v43, 1 }
 0xb54   :  { %v17272_v17 = vadd.f32 %v17263_v19, %v23262_v35  ;;  %v17295_v27 = vadd.f32 %v17294_v10, %v17293_v16  ;;  %v17271_v23 = vadd.f32 %v17257_v29, %v23264_v18  ;;  %v17289_v0 = vadd.f32 %v17288_v49, %v17287_v37 }
 0xb55   :  { %v8742_v56 = vadd.f32 %v8741_v9, %v23256_v1  ;;  %v17302_v60 = vadd.f32 %v17283_v52, %v23266_v8  ;;  %v17273_v57 = vadd.f32 %v17269_v54, %v23270_v15  ;;  %v17301_v12 = vadd.f32 %v17300_v50, %v17299_v43 }
 0xb56   :  { %v17304_v30 = vadd.f32 %v17295_v27, %v23268_v51  ;;  %v17303_v40 = vadd.f32 %v17289_v0, %v23273_v2  ;;  %v17322_v35 = vsub.s32 %v17319_v5, %v22239_v48 }
 0xb57   :  { %v17307_v14 = vsel %vm17306_vm11, %v17270_v42, %v17302_v60  ;;  %v17305_v18 = vadd.f32 %v17301_v12, %v8742_v56 }
 0xb58   :  { %v17309_v28 = vsel %vm17306_vm11, %v17272_v17, %v17304_v30  ;;  %v17308_v1 = vsel %vm17306_vm11, %v17271_v23, %v17303_v40 }
 0xb59   :  { %v17315_v9 = vcombine.low %v17307_v14, %v17308_v1  ;;  %v17310_v8 = vsel %vm17306_vm11, %v17273_v57, %v17305_v18 }
 0xb5a   :  { %v17316_v15 = vcombine.low %v17309_v28, %v17310_v8 }
 0xb5b   :  { %v17323_v55 = vrot.slane %v17315_v9, %v17322_v35 }
 0xb5c   :  { %v17330_v45 = vrot.slane %v17316_v15, %v17322_v35 }
 0xb5e   :  { %v17331_v51 = vcombine.low %v17323_v55, %v17330_v45 }
 0xb60   :  { %17333 = vst [vmem:[%s23314_s6] sm:$0xff] %v17331_v51 }
 0xb61   :  { %17342 = vsyncpa [#allocation3], 1 }
 0xb62   :  { %17343 = vsyncpa [#allocation5], 1 }

</bundles_post_ra>
